<compile_context>
chip_gen: v7x
topology: tpu7x:2x2x1
jax: 0.10.0
libtpu: 0.0.40
codegen_flags: <defaults>
</compile_context>

<pallas_src>
import functools

import jax
import jax.numpy as jnp
from jax.experimental import pallas as pl
from jax.experimental.pallas import tpu as pltpu

BN_EPS = 1e-5

IN_FEATURES = 672
HIDDEN_DIMS = (1000, 800, 500, 200, 100)
OUT_FEATURES = 1


def _round_up(n, m):
    return ((n + m - 1) // m) * m


PAD_HIDDEN = tuple(_round_up(d, 128) for d in HIDDEN_DIMS)   # (1024,896,512,256,128)
PAD_OUT = _round_up(OUT_FEATURES, 128)                       # 128
PAD_DIMS = (IN_FEATURES,) + PAD_HIDDEN + (PAD_OUT,)


def _vmem_capacity_bytes():
    """Best-effort VMEM capacity query; conservative 64 MiB fallback (v7x)."""
    try:
        info = pltpu.get_tpu_info()
        for attr in ("vmem_capacity_bytes", "vmem_bytes", "vmem_size_bytes"):
            cap = getattr(info, attr, None)
            if cap:
                return int(cap)
    except Exception:
        pass
    return 64 * 1024 * 1024


_VMEM_CAP = _vmem_capacity_bytes()
_BIG_VMEM = _VMEM_CAP >= 128 * 1024 * 1024           # v5e / v6e (128 MiB)
VMEM_LIMIT = (96 if _BIG_VMEM else 48) * 1024 * 1024  # explicit compiler budget
MAX_TB = 2048 if _BIG_VMEM else 1024                  # batch-tile cap (tiled path)
FUSED_MAX_BATCH = 2048 if _BIG_VMEM else 1024         # whole-batch-in-VMEM cutoff


# ----------------------------------------------------------------------------
# Shared BN helper (traced inside kernels)
# ----------------------------------------------------------------------------
def _fold_bn(sum_, sumsq, gamma, beta, inv_n):
    """Fold training-mode BN into per-feature (1,C) scale/shift, f32."""
    mean = sum_ * inv_n
    var = jnp.maximum(sumsq * inv_n - mean * mean, 0.0)   # clamp cancellation
    scale = gamma * jax.lax.rsqrt(var + BN_EPS)
    shift = beta - mean * scale
    return scale, shift


# ----------------------------------------------------------------------------
# Fused kernel: whole batch resident in VMEM, all 6 layers in one call
# ----------------------------------------------------------------------------
def _fused_kernel(x_ref, w1, gb1, w2, gb2, w3, gb3, w4, gb4, w5, gb5, w6, b6,
                  out_ref, *, inv_n):
    def bn_relu(h, gb_ref):
        gb = gb_ref[...]
        scale, shift = _fold_bn(jnp.sum(h, axis=0, keepdims=True),
                                jnp.sum(h * h, axis=0, keepdims=True),
                                gb[0:1, :], gb[1:2, :], inv_n)
        return jnp.maximum(h * scale + shift, 0.0).astype(jnp.bfloat16)

    h = jnp.dot(x_ref[...].astype(jnp.bfloat16), w1[...],
                preferred_element_type=jnp.float32)
    h = jnp.dot(bn_relu(h, gb1), w2[...], preferred_element_type=jnp.float32)
    h = jnp.dot(bn_relu(h, gb2), w3[...], preferred_element_type=jnp.float32)
    h = jnp.dot(bn_relu(h, gb3), w4[...], preferred_element_type=jnp.float32)
    h = jnp.dot(bn_relu(h, gb4), w5[...], preferred_element_type=jnp.float32)
    out_ref[...] = jnp.dot(bn_relu(h, gb5), w6[...],
                           preferred_element_type=jnp.float32) + b6[...]


def _fused_forward(x, p):
    B = x.shape[0]
    kernel = functools.partial(_fused_kernel, inv_n=1.0 / B)
    w_elems = sum(PAD_DIMS[i] * PAD_DIMS[i + 1] for i in range(6))
    return pl.pallas_call(
        kernel,
        out_shape=jax.ShapeDtypeStruct((B, PAD_OUT), jnp.float32),
        compiler_params=pltpu.CompilerParams(vmem_limit_bytes=VMEM_LIMIT),
        cost_estimate=pl.CostEstimate(
            flops=2 * B * w_elems,
            transcendentals=sum(PAD_HIDDEN),
            bytes_accessed=B * IN_FEATURES * 4 + w_elems * 2 + B * PAD_OUT * 4),
    )(x, p["w1"], p["gb1"], p["w2"], p["gb2"], p["w3"], p["gb3"],
      p["w4"], p["gb4"], p["w5"], p["gb5"], p["w6"], p["b6"])


# ----------------------------------------------------------------------------
# Tiled fallback kernels (large batch): bf16 intermediates, per-tile BN stats
# ----------------------------------------------------------------------------
def _mm_stats_kernel(x_ref, w_ref, h_ref, stats_out_ref):
    """h = x @ w (bf16 out); per-tile [sum; sum_sq] of the stored bf16 h."""
    h = jnp.dot(x_ref[...].astype(jnp.bfloat16), w_ref[...],
                preferred_element_type=jnp.float32)
    h_bf = h.astype(jnp.bfloat16)
    h_ref[...] = h_bf
    hf = h_bf.astype(jnp.float32)          # stats of exactly what downstream reads
    stats_out_ref[...] = jnp.concatenate(
        [jnp.sum(hf, axis=0, keepdims=True),
         jnp.sum(hf * hf, axis=0, keepdims=True)], axis=0)


def _bn_relu_mm_stats_kernel(h_ref, stats_ref, gb_ref, w_ref,
                             h_out_ref, stats_out_ref, *, inv_n):
    """a = relu(BN(h)); h_out = a @ w (bf16 out); per-tile stats of h_out."""
    gb = gb_ref[...]
    scale, shift = _fold_bn(stats_ref[0:1, :], stats_ref[1:2, :],
                            gb[0:1, :], gb[1:2, :], inv_n)
    a = jnp.maximum(h_ref[...].astype(jnp.float32) * scale + shift, 0.0)
    h2 = jnp.dot(a.astype(jnp.bfloat16), w_ref[...],
                 preferred_element_type=jnp.float32)
    h2_bf = h2.astype(jnp.bfloat16)
    h_out_ref[...] = h2_bf
    h2f = h2_bf.astype(jnp.float32)
    stats_out_ref[...] = jnp.concatenate(
        [jnp.sum(h2f, axis=0, keepdims=True),
         jnp.sum(h2f * h2f, axis=0, keepdims=True)], axis=0)


def _bn_relu_mm_bias_kernel(h_ref, stats_ref, gb_ref, w_ref, b_ref, out_ref,
                            *, inv_n):
    """a = relu(BN(h)); out = a @ w + b (final Linear, lane-padded output)."""
    gb = gb_ref[...]
    scale, shift = _fold_bn(stats_ref[0:1, :], stats_ref[1:2, :],
                            gb[0:1, :], gb[1:2, :], inv_n)
    a = jnp.maximum(h_ref[...].astype(jnp.float32) * scale + shift, 0.0)
    out_ref[...] = jnp.dot(a.astype(jnp.bfloat16), w_ref[...],
                           preferred_element_type=jnp.float32) + b_ref[...]


def _first_layer(x, w, tb):
    B, d_in = x.shape
    d_out = w.shape[1]
    nt = B // tb
    return pl.pallas_call(
        _mm_stats_kernel,
        grid=(nt,),
        in_specs=[
            pl.BlockSpec((tb, d_in), lambda i: (i, 0)),
            pl.BlockSpec((d_in, d_out), lambda i: (0, 0)),
        ],
        out_specs=[
            pl.BlockSpec((tb, d_out), lambda i: (i, 0)),
            pl.BlockSpec((None, 2, d_out), lambda i: (i, 0, 0)),  # per-tile stats
        ],
        out_shape=[
            jax.ShapeDtypeStruct((B, d_out), jnp.bfloat16),
            jax.ShapeDtypeStruct((nt, 2, d_out), jnp.float32),
        ],
        compiler_params=pltpu.CompilerParams(
            dimension_semantics=("parallel",),         # no cross-tile state
            vmem_limit_bytes=VMEM_LIMIT),
        cost_estimate=pl.CostEstimate(
            flops=2 * B * d_in * d_out,
            transcendentals=0,
            bytes_accessed=B * d_in * 4 + d_in * d_out * 2 + B * d_out * 2
                           + nt * 2 * d_out * 4),
    )(x, w)


def _middle_layer(h, stats, gb, w, inv_n, tb):
    B, d_in = h.shape
    d_out = w.shape[1]
    nt = B // tb
    kernel = functools.partial(_bn_relu_mm_stats_kernel, inv_n=inv_n)
    return pl.pallas_call(
        kernel,
        grid=(nt,),
        in_specs=[
            pl.BlockSpec((tb, d_in), lambda i: (i, 0)),
            pl.BlockSpec((2, d_in), lambda i: (0, 0)),
            pl.BlockSpec((2, d_in), lambda i: (0, 0)),
            pl.BlockSpec((d_in, d_out), lambda i: (0, 0)),
        ],
        out_specs=[
            pl.BlockSpec((tb, d_out), lambda i: (i, 0)),
            pl.BlockSpec((None, 2, d_out), lambda i: (i, 0, 0)),
        ],
        out_shape=[
            jax.ShapeDtypeStruct((B, d_out), jnp.bfloat16),
            jax.ShapeDtypeStruct((nt, 2, d_out), jnp.float32),
        ],
        compiler_params=pltpu.CompilerParams(
            dimension_semantics=("parallel",),
            vmem_limit_bytes=VMEM_LIMIT),
        cost_estimate=pl.CostEstimate(
            flops=2 * B * d_in * d_out,
            transcendentals=nt * d_in,
            bytes_accessed=B * d_in * 2 + d_in * d_out * 2 + B * d_out * 2
                           + nt * 2 * d_out * 4 + 4 * d_in * 4),
    )(h, stats, gb, w)


def _final_layer(h, stats, gb, w, b, inv_n, tb):
    B, d_in = h.shape
    d_out = w.shape[1]
    nt = B // tb
    kernel = functools.partial(_bn_relu_mm_bias_kernel, inv_n=inv_n)
    return pl.pallas_call(
        kernel,
        grid=(nt,),
        in_specs=[
            pl.BlockSpec((tb, d_in), lambda i: (i, 0)),
            pl.BlockSpec((2, d_in), lambda i: (0, 0)),
            pl.BlockSpec((2, d_in), lambda i: (0, 0)),
            pl.BlockSpec((d_in, d_out), lambda i: (0, 0)),
            pl.BlockSpec((1, d_out), lambda i: (0, 0)),
        ],
        out_specs=pl.BlockSpec((tb, d_out), lambda i: (i, 0)),
        out_shape=jax.ShapeDtypeStruct((B, d_out), jnp.float32),
        compiler_params=pltpu.CompilerParams(
            dimension_semantics=("parallel",),
            vmem_limit_bytes=VMEM_LIMIT),
        cost_estimate=pl.CostEstimate(
            flops=2 * B * d_in * d_out,
            transcendentals=nt * d_in,
            bytes_accessed=B * d_in * 2 + d_in * d_out * 2 + B * d_out * 4),
    )(h, stats, gb, w, b)


def _tiled_forward(x, p, tb):
    B = x.shape[0]
    inv_n = 1.0 / B
    h, pstats = _first_layer(x, p["w1"], tb)
    stats = jnp.sum(pstats, axis=0)                  # tiny XLA reduce over tiles
    for l in range(1, 5):
        h, pstats = _middle_layer(h, stats, p[f"gb{l}"], p[f"w{l+1}"], inv_n, tb)
        stats = jnp.sum(pstats, axis=0)
    return _final_layer(h, stats, p["gb5"], p["w6"], p["b6"], inv_n, tb)


# ----------------------------------------------------------------------------
# Parameter prep (done once, outside the jitted forward)
# ----------------------------------------------------------------------------
def prepare_params(params):
    """Transpose to (in,out), zero-pad features to multiples of 128, cast
    weights to bf16, pack gamma/beta into one (2,C) block per BN layer.
    Biases b1..b5 are dropped (they cancel exactly under training-mode BN)."""
    prepped = {}
    for l in range(5):
        w = params[f"w{l+1}"]                        # torch layout (out, in)
        d_out_real, d_in_real = w.shape
        d_in_pad = IN_FEATURES if l == 0 else PAD_HIDDEN[l - 1]
        d_out_pad = PAD_HIDDEN[l]
        wt = jnp.zeros((d_in_pad, d_out_pad), jnp.float32)
        wt = wt.at[:d_in_real, :d_out_real].set(w.T)
        # Padded channels must be exactly zero (explicit check, not implicit).
        assert int(jnp.count_nonzero(wt[d_in_real:, :])) == 0
        assert int(jnp.count_nonzero(wt[:, d_out_real:])) == 0
        prepped[f"w{l+1}"] = wt.astype(jnp.bfloat16)

        gb = jnp.zeros((2, d_out_pad), jnp.float32)
        gb = gb.at[0, :d_out_real].set(params[f"gamma{l+1}"])
        gb = gb.at[1, :d_out_real].set(params[f"beta{l+1}"])
        assert int(jnp.count_nonzero(gb[:, d_out_real:])) == 0
        prepped[f"gb{l+1}"] = gb

    w6 = params["w6"]                                # (1, 100)
    wt = jnp.zeros((PAD_HIDDEN[-1], PAD_OUT), jnp.float32)
    wt = wt.at[:w6.shape[1], :w6.shape[0]].set(w6.T)
    prepped["w6"] = wt.astype(jnp.bfloat16)
    b6 = jnp.zeros((1, PAD_OUT), jnp.float32)
    b6 = b6.at[0, :w6.shape[0]].set(params["b6"])
    prepped["b6"] = b6
    return prepped


def _choose_tb(batch, max_tb=None):
    if max_tb is None:
        max_tb = MAX_TB
    if batch <= max_tb:
        return batch                     # single whole-batch tile (full-dim block)
    start = max_tb - max_tb % 8
    for tb in range(start, 7, -8):       # largest multiple-of-8 divisor of batch
        if batch % tb == 0:
            return tb
    return None                          # no clean tiling -> fused fallback


# ----------------------------------------------------------------------------
# Forward
# ----------------------------------------------------------------------------
def ann_forward(x, p, tb=None, force_tiled=False):
    """Returns (logits, reg_loss) like the PyTorch module."""
    B = x.shape[0]
    use_fused = (not force_tiled) and (B <= FUSED_MAX_BATCH)
    if not use_fused:
        if tb is None:
            tb = _choose_tb(B)
        if tb is None:                   # e.g. prime batch size: fused fallback
            use_fused = True
    if use_fused:
        out_pad = _fused_forward(x, p)
    else:
        assert B % tb == 0, "batch must be divisible by the batch tile"
        out_pad = _tiled_forward(x, p, tb)

    out = out_pad[:, :OUT_FEATURES]                  # un-pad lane-dense output
    reg_loss = 0.0
    # TODO(synk): BatchNorm running_mean/running_var updates (training side
    # effect only, do not change the returned activations) are not emitted.
    return out, reg_loss


# ----------------------------------------------------------------------------
# Pure-JAX reference (mirrors the kernel's matmul precision) and params
# ----------------------------------------------------------------------------
def reference_forward(x, params):
    h = x
    for l in range(1, 6):
        w, b = params[f"w{l}"], params[f"b{l}"]
        z = jnp.dot(h.astype(jnp.bfloat16), w.T.astype(jnp.bfloat16),
                    preferred_element_type=jnp.float32) + b
        mu = jnp.mean(z, axis=0)
        var = jnp.mean((z - mu) ** 2, axis=0)        # biased batch variance
        z = (z - mu) * jax.lax.rsqrt(var + BN_EPS) * params[f"gamma{l}"] \
            + params[f"beta{l}"]
        h = jnp.maximum(z, 0.0)
    return jnp.dot(h.astype(jnp.bfloat16), params["w6"].T.astype(jnp.bfloat16),
                   preferred_element_type=jnp.float32) + params["b6"]


def init_params(key):
    """Synthetic params with PyTorch nn.Linear / nn.BatchNorm1d shapes."""
    dims = (IN_FEATURES,) + HIDDEN_DIMS + (OUT_FEATURES,)
    keys = iter(jax.random.split(key, 24))
    params = {}
    for l in range(6):
        fan_in, fan_out = dims[l], dims[l + 1]
        bound = 1.0 / float(fan_in) ** 0.5
        params[f"w{l+1}"] = jax.random.uniform(
            next(keys), (fan_out, fan_in), jnp.float32, -bound, bound)
        params[f"b{l+1}"] = jax.random.uniform(
            next(keys), (fan_out,), jnp.float32, -bound, bound)
        if l < 5:
            params[f"gamma{l+1}"] = 1.0 + 0.1 * jax.random.normal(
                next(keys), (fan_out,), jnp.float32)
            params[f"beta{l+1}"] = 0.1 * jax.random.normal(
                next(keys), (fan_out,), jnp.float32)
    return params


if __name__ == "__main__":
    key = jax.random.PRNGKey(0)
    pkey, k1, k2 = jax.random.split(key, 3)
    params = init_params(pkey)
    prepped = prepare_params(params)

    fwd = jax.jit(ann_forward, static_argnames=("tb", "force_tiled"))

    # Path 1: fully fused, whole batch resident in VMEM (default for small B).
    B1 = 64
    x1 = jax.random.normal(k1, (B1, IN_FEATURES), jnp.float32)
    out1, reg1 = fwd(x1, prepped)
    out1 = jax.block_until_ready(out1)
    ref1 = reference_forward(x1, params)
    err1 = float(jnp.max(jnp.abs(out1 - ref1)))
    assert out1.shape == (B1, OUT_FEATURES)
    assert float(reg1) == 0.0
    assert err1 < 5e-2, f"fused path max |err| = {err1}"

    # Path 2: batch-tiled fallback (bf16 intermediates, per-tile BN partial
    # stats, parallel batch grid) -- exercised with 2 tiles of 128.
    B2, TB = 256, 128
    x2 = jax.random.normal(k2, (B2, IN_FEATURES), jnp.float32)
    out2, reg2 = fwd(x2, prepped, tb=TB, force_tiled=True)
    out2 = jax.block_until_ready(out2)
    ref2 = reference_forward(x2, params)
    err2 = float(jnp.max(jnp.abs(out2 - ref2)))
    assert out2.shape == (B2, OUT_FEATURES)
    assert float(reg2) == 0.0
    assert err2 < 5e-2, f"tiled path max |err| = {err2}"

    print("KERNEL_OK")
</pallas_src>

<mosaic_0001>
module attributes {stable_mosaic.version = 11 : i64} {
  func.func @_fused_kernel(%arg0: memref<64x672xf32, #tpu.memory_space<vmem>>, %arg1: memref<672x1024xbf16, #tpu.memory_space<vmem>>, %arg2: memref<2x1024xf32, #tpu.memory_space<vmem>>, %arg3: memref<1024x896xbf16, #tpu.memory_space<vmem>>, %arg4: memref<2x896xf32, #tpu.memory_space<vmem>>, %arg5: memref<896x512xbf16, #tpu.memory_space<vmem>>, %arg6: memref<2x512xf32, #tpu.memory_space<vmem>>, %arg7: memref<512x256xbf16, #tpu.memory_space<vmem>>, %arg8: memref<2x256xf32, #tpu.memory_space<vmem>>, %arg9: memref<256x128xbf16, #tpu.memory_space<vmem>>, %arg10: memref<2x128xf32, #tpu.memory_space<vmem>>, %arg11: memref<128x128xbf16, #tpu.memory_space<vmem>>, %arg12: memref<1x128xf32, #tpu.memory_space<vmem>>, %arg13: memref<64x128xf32, #tpu.memory_space<vmem>>) attributes {dimension_semantics = [], scalar_prefetch = 0 : i64, scratch_operands = 0 : i64, tpu.core_type = #tpu.core_type<tc>} {
    %c0 = arith.constant 0 : index
    %c0_0 = arith.constant 0 : index
    %0 = vector.load %arg0[%c0, %c0_0] : memref<64x672xf32, #tpu.memory_space<vmem>>, vector<64x672xf32>
    %1 = arith.truncf %0 : vector<64x672xf32> to vector<64x672xbf16>
    %c0_1 = arith.constant 0 : index
    %c0_2 = arith.constant 0 : index
    %2 = vector.load %arg1[%c0_1, %c0_2] : memref<672x1024xbf16, #tpu.memory_space<vmem>>, vector<672x1024xbf16>
    %cst = arith.constant dense<0.000000e+00> : vector<64x1024xf32>
    %3 = tpu.matmul %1, %2, %cst {dimension_numbers = #tpu.dot_dimension_numbers<[1], [0], [0], [1], [0, 0, 1, 1], [], []>} : vector<64x672xbf16>, vector<672x1024xbf16>, vector<64x1024xf32> -> vector<64x1024xf32>
    %c0_3 = arith.constant 0 : index
    %c0_4 = arith.constant 0 : index
    %4 = vector.load %arg2[%c0_3, %c0_4] : memref<2x1024xf32, #tpu.memory_space<vmem>>, vector<2x1024xf32>
    %cst_5 = arith.constant dense<0.000000e+00> : vector<1024xf32>
    %5 = vector.multi_reduction <add>, %3, %cst_5 [0] : vector<64x1024xf32> to vector<1024xf32>
    %6 = vector.shape_cast %5 : vector<1024xf32> to vector<1x1024xf32>
    %7 = arith.mulf %3, %3 : vector<64x1024xf32>
    %cst_6 = arith.constant dense<0.000000e+00> : vector<1024xf32>
    %8 = vector.multi_reduction <add>, %7, %cst_6 [0] : vector<64x1024xf32> to vector<1024xf32>
    %9 = vector.shape_cast %8 : vector<1024xf32> to vector<1x1024xf32>
    %10 = vector.extract_strided_slice %4 {offsets = [0, 0], sizes = [1, 1024], strides = [1, 1]} : vector<2x1024xf32> to vector<1x1024xf32>
    %11 = vector.extract_strided_slice %4 {offsets = [1, 0], sizes = [1, 1024], strides = [1, 1]} : vector<2x1024xf32> to vector<1x1024xf32>
    %cst_7 = arith.constant 1.562500e-02 : f32
    %12 = vector.broadcast %cst_7 : f32 to vector<1x1024xf32>
    %13 = arith.mulf %6, %12 : vector<1x1024xf32>
    %cst_8 = arith.constant 1.562500e-02 : f32
    %14 = vector.broadcast %cst_8 : f32 to vector<1x1024xf32>
    %15 = arith.mulf %9, %14 : vector<1x1024xf32>
    %16 = arith.mulf %13, %13 : vector<1x1024xf32>
    %17 = arith.subf %15, %16 : vector<1x1024xf32>
    %cst_9 = arith.constant 0.000000e+00 : f32
    %18 = vector.broadcast %cst_9 : f32 to vector<1x1024xf32>
    %19 = arith.maximumf %17, %18 : vector<1x1024xf32>
    %cst_10 = arith.constant 9.99999974E-6 : f32
    %20 = vector.broadcast %cst_10 : f32 to vector<1x1024xf32>
    %21 = arith.addf %19, %20 : vector<1x1024xf32>
    %22 = math.rsqrt %21 : vector<1x1024xf32>
    %23 = arith.mulf %10, %22 : vector<1x1024xf32>
    %24 = arith.mulf %13, %23 : vector<1x1024xf32>
    %25 = arith.subf %11, %24 : vector<1x1024xf32>
    %26 = vector.broadcast %23 : vector<1x1024xf32> to vector<64x1024xf32>
    %27 = arith.mulf %3, %26 : vector<64x1024xf32>
    %28 = vector.broadcast %25 : vector<1x1024xf32> to vector<64x1024xf32>
    %29 = arith.addf %27, %28 : vector<64x1024xf32>
    %cst_11 = arith.constant 0.000000e+00 : f32
    %30 = vector.broadcast %cst_11 : f32 to vector<64x1024xf32>
    %31 = arith.maximumf %29, %30 : vector<64x1024xf32>
    %32 = arith.truncf %31 : vector<64x1024xf32> to vector<64x1024xbf16>
    %c0_12 = arith.constant 0 : index
    %c0_13 = arith.constant 0 : index
    %33 = vector.load %arg3[%c0_12, %c0_13] : memref<1024x896xbf16, #tpu.memory_space<vmem>>, vector<1024x896xbf16>
    %cst_14 = arith.constant dense<0.000000e+00> : vector<64x896xf32>
    %34 = tpu.matmul %32, %33, %cst_14 {dimension_numbers = #tpu.dot_dimension_numbers<[1], [0], [0], [1], [0, 0, 1, 1], [], []>} : vector<64x1024xbf16>, vector<1024x896xbf16>, vector<64x896xf32> -> vector<64x896xf32>
    %c0_15 = arith.constant 0 : index
    %c0_16 = arith.constant 0 : index
    %35 = vector.load %arg4[%c0_15, %c0_16] : memref<2x896xf32, #tpu.memory_space<vmem>>, vector<2x896xf32>
    %cst_17 = arith.constant dense<0.000000e+00> : vector<896xf32>
    %36 = vector.multi_reduction <add>, %34, %cst_17 [0] : vector<64x896xf32> to vector<896xf32>
    %37 = vector.shape_cast %36 : vector<896xf32> to vector<1x896xf32>
    %38 = arith.mulf %34, %34 : vector<64x896xf32>
    %cst_18 = arith.constant dense<0.000000e+00> : vector<896xf32>
    %39 = vector.multi_reduction <add>, %38, %cst_18 [0] : vector<64x896xf32> to vector<896xf32>
    %40 = vector.shape_cast %39 : vector<896xf32> to vector<1x896xf32>
    %41 = vector.extract_strided_slice %35 {offsets = [0, 0], sizes = [1, 896], strides = [1, 1]} : vector<2x896xf32> to vector<1x896xf32>
    %42 = vector.extract_strided_slice %35 {offsets = [1, 0], sizes = [1, 896], strides = [1, 1]} : vector<2x896xf32> to vector<1x896xf32>
    %cst_19 = arith.constant 1.562500e-02 : f32
    %43 = vector.broadcast %cst_19 : f32 to vector<1x896xf32>
    %44 = arith.mulf %37, %43 : vector<1x896xf32>
    %cst_20 = arith.constant 1.562500e-02 : f32
    %45 = vector.broadcast %cst_20 : f32 to vector<1x896xf32>
    %46 = arith.mulf %40, %45 : vector<1x896xf32>
    %47 = arith.mulf %44, %44 : vector<1x896xf32>
    %48 = arith.subf %46, %47 : vector<1x896xf32>
    %cst_21 = arith.constant 0.000000e+00 : f32
    %49 = vector.broadcast %cst_21 : f32 to vector<1x896xf32>
    %50 = arith.maximumf %48, %49 : vector<1x896xf32>
    %cst_22 = arith.constant 9.99999974E-6 : f32
    %51 = vector.broadcast %cst_22 : f32 to vector<1x896xf32>
    %52 = arith.addf %50, %51 : vector<1x896xf32>
    %53 = math.rsqrt %52 : vector<1x896xf32>
    %54 = arith.mulf %41, %53 : vector<1x896xf32>
    %55 = arith.mulf %44, %54 : vector<1x896xf32>
    %56 = arith.subf %42, %55 : vector<1x896xf32>
    %57 = vector.broadcast %54 : vector<1x896xf32> to vector<64x896xf32>
    %58 = arith.mulf %34, %57 : vector<64x896xf32>
    %59 = vector.broadcast %56 : vector<1x896xf32> to vector<64x896xf32>
    %60 = arith.addf %58, %59 : vector<64x896xf32>
    %cst_23 = arith.constant 0.000000e+00 : f32
    %61 = vector.broadcast %cst_23 : f32 to vector<64x896xf32>
    %62 = arith.maximumf %60, %61 : vector<64x896xf32>
    %63 = arith.truncf %62 : vector<64x896xf32> to vector<64x896xbf16>
    %c0_24 = arith.constant 0 : index
    %c0_25 = arith.constant 0 : index
    %64 = vector.load %arg5[%c0_24, %c0_25] : memref<896x512xbf16, #tpu.memory_space<vmem>>, vector<896x512xbf16>
    %cst_26 = arith.constant dense<0.000000e+00> : vector<64x512xf32>
    %65 = tpu.matmul %63, %64, %cst_26 {dimension_numbers = #tpu.dot_dimension_numbers<[1], [0], [0], [1], [0, 0, 1, 1], [], []>} : vector<64x896xbf16>, vector<896x512xbf16>, vector<64x512xf32> -> vector<64x512xf32>
    %c0_27 = arith.constant 0 : index
    %c0_28 = arith.constant 0 : index
    %66 = vector.load %arg6[%c0_27, %c0_28] : memref<2x512xf32, #tpu.memory_space<vmem>>, vector<2x512xf32>
    %cst_29 = arith.constant dense<0.000000e+00> : vector<512xf32>
    %67 = vector.multi_reduction <add>, %65, %cst_29 [0] : vector<64x512xf32> to vector<512xf32>
    %68 = vector.shape_cast %67 : vector<512xf32> to vector<1x512xf32>
    %69 = arith.mulf %65, %65 : vector<64x512xf32>
    %cst_30 = arith.constant dense<0.000000e+00> : vector<512xf32>
    %70 = vector.multi_reduction <add>, %69, %cst_30 [0] : vector<64x512xf32> to vector<512xf32>
    %71 = vector.shape_cast %70 : vector<512xf32> to vector<1x512xf32>
    %72 = vector.extract_strided_slice %66 {offsets = [0, 0], sizes = [1, 512], strides = [1, 1]} : vector<2x512xf32> to vector<1x512xf32>
    %73 = vector.extract_strided_slice %66 {offsets = [1, 0], sizes = [1, 512], strides = [1, 1]} : vector<2x512xf32> to vector<1x512xf32>
    %cst_31 = arith.constant 1.562500e-02 : f32
    %74 = vector.broadcast %cst_31 : f32 to vector<1x512xf32>
    %75 = arith.mulf %68, %74 : vector<1x512xf32>
    %cst_32 = arith.constant 1.562500e-02 : f32
    %76 = vector.broadcast %cst_32 : f32 to vector<1x512xf32>
    %77 = arith.mulf %71, %76 : vector<1x512xf32>
    %78 = arith.mulf %75, %75 : vector<1x512xf32>
    %79 = arith.subf %77, %78 : vector<1x512xf32>
    %cst_33 = arith.constant 0.000000e+00 : f32
    %80 = vector.broadcast %cst_33 : f32 to vector<1x512xf32>
    %81 = arith.maximumf %79, %80 : vector<1x512xf32>
    %cst_34 = arith.constant 9.99999974E-6 : f32
    %82 = vector.broadcast %cst_34 : f32 to vector<1x512xf32>
    %83 = arith.addf %81, %82 : vector<1x512xf32>
    %84 = math.rsqrt %83 : vector<1x512xf32>
    %85 = arith.mulf %72, %84 : vector<1x512xf32>
    %86 = arith.mulf %75, %85 : vector<1x512xf32>
    %87 = arith.subf %73, %86 : vector<1x512xf32>
    %88 = vector.broadcast %85 : vector<1x512xf32> to vector<64x512xf32>
    %89 = arith.mulf %65, %88 : vector<64x512xf32>
    %90 = vector.broadcast %87 : vector<1x512xf32> to vector<64x512xf32>
    %91 = arith.addf %89, %90 : vector<64x512xf32>
    %cst_35 = arith.constant 0.000000e+00 : f32
    %92 = vector.broadcast %cst_35 : f32 to vector<64x512xf32>
    %93 = arith.maximumf %91, %92 : vector<64x512xf32>
    %94 = arith.truncf %93 : vector<64x512xf32> to vector<64x512xbf16>
    %c0_36 = arith.constant 0 : index
    %c0_37 = arith.constant 0 : index
    %95 = vector.load %arg7[%c0_36, %c0_37] : memref<512x256xbf16, #tpu.memory_space<vmem>>, vector<512x256xbf16>
    %cst_38 = arith.constant dense<0.000000e+00> : vector<64x256xf32>
    %96 = tpu.matmul %94, %95, %cst_38 {dimension_numbers = #tpu.dot_dimension_numbers<[1], [0], [0], [1], [0, 0, 1, 1], [], []>} : vector<64x512xbf16>, vector<512x256xbf16>, vector<64x256xf32> -> vector<64x256xf32>
    %c0_39 = arith.constant 0 : index
    %c0_40 = arith.constant 0 : index
    %97 = vector.load %arg8[%c0_39, %c0_40] : memref<2x256xf32, #tpu.memory_space<vmem>>, vector<2x256xf32>
    %cst_41 = arith.constant dense<0.000000e+00> : vector<256xf32>
    %98 = vector.multi_reduction <add>, %96, %cst_41 [0] : vector<64x256xf32> to vector<256xf32>
    %99 = vector.shape_cast %98 : vector<256xf32> to vector<1x256xf32>
    %100 = arith.mulf %96, %96 : vector<64x256xf32>
    %cst_42 = arith.constant dense<0.000000e+00> : vector<256xf32>
    %101 = vector.multi_reduction <add>, %100, %cst_42 [0] : vector<64x256xf32> to vector<256xf32>
    %102 = vector.shape_cast %101 : vector<256xf32> to vector<1x256xf32>
    %103 = vector.extract_strided_slice %97 {offsets = [0, 0], sizes = [1, 256], strides = [1, 1]} : vector<2x256xf32> to vector<1x256xf32>
    %104 = vector.extract_strided_slice %97 {offsets = [1, 0], sizes = [1, 256], strides = [1, 1]} : vector<2x256xf32> to vector<1x256xf32>
    %cst_43 = arith.constant 1.562500e-02 : f32
    %105 = vector.broadcast %cst_43 : f32 to vector<1x256xf32>
    %106 = arith.mulf %99, %105 : vector<1x256xf32>
    %cst_44 = arith.constant 1.562500e-02 : f32
    %107 = vector.broadcast %cst_44 : f32 to vector<1x256xf32>
    %108 = arith.mulf %102, %107 : vector<1x256xf32>
    %109 = arith.mulf %106, %106 : vector<1x256xf32>
    %110 = arith.subf %108, %109 : vector<1x256xf32>
    %cst_45 = arith.constant 0.000000e+00 : f32
    %111 = vector.broadcast %cst_45 : f32 to vector<1x256xf32>
    %112 = arith.maximumf %110, %111 : vector<1x256xf32>
    %cst_46 = arith.constant 9.99999974E-6 : f32
    %113 = vector.broadcast %cst_46 : f32 to vector<1x256xf32>
    %114 = arith.addf %112, %113 : vector<1x256xf32>
    %115 = math.rsqrt %114 : vector<1x256xf32>
    %116 = arith.mulf %103, %115 : vector<1x256xf32>
    %117 = arith.mulf %106, %116 : vector<1x256xf32>
    %118 = arith.subf %104, %117 : vector<1x256xf32>
    %119 = vector.broadcast %116 : vector<1x256xf32> to vector<64x256xf32>
    %120 = arith.mulf %96, %119 : vector<64x256xf32>
    %121 = vector.broadcast %118 : vector<1x256xf32> to vector<64x256xf32>
    %122 = arith.addf %120, %121 : vector<64x256xf32>
    %cst_47 = arith.constant 0.000000e+00 : f32
    %123 = vector.broadcast %cst_47 : f32 to vector<64x256xf32>
    %124 = arith.maximumf %122, %123 : vector<64x256xf32>
    %125 = arith.truncf %124 : vector<64x256xf32> to vector<64x256xbf16>
    %c0_48 = arith.constant 0 : index
    %c0_49 = arith.constant 0 : index
    %126 = vector.load %arg9[%c0_48, %c0_49] : memref<256x128xbf16, #tpu.memory_space<vmem>>, vector<256x128xbf16>
    %cst_50 = arith.constant dense<0.000000e+00> : vector<64x128xf32>
    %127 = tpu.matmul %125, %126, %cst_50 {dimension_numbers = #tpu.dot_dimension_numbers<[1], [0], [0], [1], [0, 0, 1, 1], [], []>} : vector<64x256xbf16>, vector<256x128xbf16>, vector<64x128xf32> -> vector<64x128xf32>
    %c0_51 = arith.constant 0 : index
    %c0_52 = arith.constant 0 : index
    %128 = vector.load %arg10[%c0_51, %c0_52] : memref<2x128xf32, #tpu.memory_space<vmem>>, vector<2x128xf32>
    %cst_53 = arith.constant dense<0.000000e+00> : vector<128xf32>
    %129 = vector.multi_reduction <add>, %127, %cst_53 [0] : vector<64x128xf32> to vector<128xf32>
    %130 = vector.shape_cast %129 : vector<128xf32> to vector<1x128xf32>
    %131 = arith.mulf %127, %127 : vector<64x128xf32>
    %cst_54 = arith.constant dense<0.000000e+00> : vector<128xf32>
    %132 = vector.multi_reduction <add>, %131, %cst_54 [0] : vector<64x128xf32> to vector<128xf32>
    %133 = vector.shape_cast %132 : vector<128xf32> to vector<1x128xf32>
    %134 = vector.extract_strided_slice %128 {offsets = [0, 0], sizes = [1, 128], strides = [1, 1]} : vector<2x128xf32> to vector<1x128xf32>
    %135 = vector.extract_strided_slice %128 {offsets = [1, 0], sizes = [1, 128], strides = [1, 1]} : vector<2x128xf32> to vector<1x128xf32>
    %cst_55 = arith.constant 1.562500e-02 : f32
    %136 = vector.broadcast %cst_55 : f32 to vector<1x128xf32>
    %137 = arith.mulf %130, %136 : vector<1x128xf32>
    %cst_56 = arith.constant 1.562500e-02 : f32
    %138 = vector.broadcast %cst_56 : f32 to vector<1x128xf32>
    %139 = arith.mulf %133, %138 : vector<1x128xf32>
    %140 = arith.mulf %137, %137 : vector<1x128xf32>
    %141 = arith.subf %139, %140 : vector<1x128xf32>
    %cst_57 = arith.constant 0.000000e+00 : f32
    %142 = vector.broadcast %cst_57 : f32 to vector<1x128xf32>
    %143 = arith.maximumf %141, %142 : vector<1x128xf32>
    %cst_58 = arith.constant 9.99999974E-6 : f32
    %144 = vector.broadcast %cst_58 : f32 to vector<1x128xf32>
    %145 = arith.addf %143, %144 : vector<1x128xf32>
    %146 = math.rsqrt %145 : vector<1x128xf32>
    %147 = arith.mulf %134, %146 : vector<1x128xf32>
    %148 = arith.mulf %137, %147 : vector<1x128xf32>
    %149 = arith.subf %135, %148 : vector<1x128xf32>
    %150 = vector.broadcast %147 : vector<1x128xf32> to vector<64x128xf32>
    %151 = arith.mulf %127, %150 : vector<64x128xf32>
    %152 = vector.broadcast %149 : vector<1x128xf32> to vector<64x128xf32>
    %153 = arith.addf %151, %152 : vector<64x128xf32>
    %cst_59 = arith.constant 0.000000e+00 : f32
    %154 = vector.broadcast %cst_59 : f32 to vector<64x128xf32>
    %155 = arith.maximumf %153, %154 : vector<64x128xf32>
    %156 = arith.truncf %155 : vector<64x128xf32> to vector<64x128xbf16>
    %c0_60 = arith.constant 0 : index
    %c0_61 = arith.constant 0 : index
    %157 = vector.load %arg11[%c0_60, %c0_61] : memref<128x128xbf16, #tpu.memory_space<vmem>>, vector<128x128xbf16>
    %cst_62 = arith.constant dense<0.000000e+00> : vector<64x128xf32>
    %158 = tpu.matmul %156, %157, %cst_62 {dimension_numbers = #tpu.dot_dimension_numbers<[1], [0], [0], [1], [0, 0, 1, 1], [], []>} : vector<64x128xbf16>, vector<128x128xbf16>, vector<64x128xf32> -> vector<64x128xf32>
    %c0_63 = arith.constant 0 : index
    %c0_64 = arith.constant 0 : index
    %159 = vector.load %arg12[%c0_63, %c0_64] : memref<1x128xf32, #tpu.memory_space<vmem>>, vector<1x128xf32>
    %160 = vector.broadcast %159 : vector<1x128xf32> to vector<64x128xf32>
    %161 = arith.addf %158, %160 : vector<64x128xf32>
    %c0_65 = arith.constant 0 : index
    %c0_66 = arith.constant 0 : index
    %162 = vector.load %arg13[%c0_65, %c0_66] : memref<64x128xf32, #tpu.memory_space<vmem>>, vector<64x128xf32>
    tpu.vector_store %arg13[%c0_65, %c0_66], %161 {strides = array<i32>} : memref<64x128xf32, #tpu.memory_space<vmem>>, vector<64x128xf32>,
    return
  }
}

</mosaic_0001>

<bundles_post_ra>
// kernel: ann_forward.1
= control target key start
LH: loop header
LB: loop body
LE: loop exit
PB: predicated region body
PF: predicated region fallthrough
CT: control target
= control target key end

     0   :  { %18 = vsyncpa [#allocation3], 0  ;;  %s17728_s0 = inlined_call_operand.hbm [shape: f32[64,672], index: 0, kind: input, shape index: {}]   ;;  %s17729_s1 = inlined_call_operand.hbm [shape: bf16[672,1024], index: 1, kind: input, shape index: {}]   ;;  %s17730_s2 = inlined_call_operand.hbm [shape: f32[2,1024], index: 2, kind: input, shape index: {}]   ;;  %s17731_s3 = inlined_call_operand.hbm [shape: bf16[1024,896], index: 3, kind: input, shape index: {}]   ;;  %s17732_s4 = inlined_call_operand.hbm [shape: f32[2,896], index: 4, kind: input, shape index: {}]   ;;  %s17733_s5 = inlined_call_operand.hbm [shape: bf16[896,512], index: 5, kind: input, shape index: {}]   ;;  %s17734_s6 = inlined_call_operand.hbm [shape: f32[2,512], index: 6, kind: input, shape index: {}]   ;;  %s17735_s7 = inlined_call_operand.hbm [shape: bf16[512,256], index: 7, kind: input, shape index: {}]   ;;  %s17736_s8 = inlined_call_operand.hbm [shape: f32[2,256], index: 8, kind: input, shape index: {}]   ;;  %s17737_s9 = inlined_call_operand.hbm [shape: bf16[256,128], index: 9, kind: input, shape index: {}]   ;;  %s17738_s10 = inlined_call_operand.hbm [shape: f32[2,128], index: 10, kind: input, shape index: {}]   ;;  %s17739_s11 = inlined_call_operand.hbm [shape: bf16[128,128], index: 11, kind: input, shape index: {}]   ;;  %s17740_s12 = inlined_call_operand.hbm [shape: f32[1,128], index: 12, kind: input, shape index: {}]   ;;  %s17741_s13 = inlined_call_operand.vmem [shape: f32[64,128], index: 13, kind: output, shape index: {}]  }
   0x1   :  { %19 = vsyncpa [#allocation5], 0 }
   0x2   :  { %20 = vsyncpa [#allocation8], 0 }
   0x3   :  { %21 = vsyncpa [#allocation11], 0 }
   0x4   :  { %22 = vsyncpa [#allocation14], 0 }
   0x5   :  { %23 = vsyncpa [#allocation17], 0 }
   0x6   :  { %24 = vsyncpa [#allocation20], 0  ;;  %s15350_s25 = smov [#allocation4]   ;;  %s15050_s29 = scalar_lea.hbm %s17729_s1, 43008 }
   0x7   :  { %s42_s26 = sshll.u32 %s15350_s25, 4  ;;  %p15051_p0 = scmp.ne.s32.totalorder %s17729_s1, %s15050_s29  ;;  %s43_s26 = int_to_ptr.vmem [resolvable:$true] %s42_s26 }
   0x8   :  { %p15054_p1 = scmp.lt.u32.totalorder %s15050_s29, %s17729_s1 }
   0xa   :  { %p15056_p2 = pnand %p15054_p1, %p15051_p0 }
   0xc   :  { %15059 = shalt.err (!%p15056_p2)
}
   0xd   :  { %s15060_s17 = scalar_lea.vmem %s43_s26, 43008  ;;  %p15065_p4 = scmp.lt.s32.totalorder %s43_s26, %s43_s26 }
   0xe   :  { %p15061_p3 = scmp.ne.s32.totalorder %s43_s26, %s15060_s17  ;;  %p15066_p5 = scmp.lt.s32.totalorder %s15060_s17, %s15060_s17 }
  0x10   :  { %p15067_p6 = por %p15066_p5, %p15065_p4 }
  0x12   :  { %p15068_p7 = pnand %p15067_p6, %p15061_p3 }
  0x14   :  { %15071 = shalt.err (!%p15068_p7)
}
  0x15   :  { %s15351_s18 = smov 512   ;;  %s15352_s19 = smov 32  }
  0x16   :  { %48 = dma.hbm_to_vmem [thread:$0]  %s17729_s1, 43008, %s43_s26, [#allocation5], %s15351_s18, %s15351_s18, %s15352_s19  }
  0x17   :  { %s15353_s22 = smov [#allocation7]   ;;  %s15072_s27 = scalar_lea.hbm %s17731_s3, 57344 }
  0x18   :  { %s64_s23 = sshll.u32 %s15353_s22, 4  ;;  %p15073_p8 = scmp.ne.s32.totalorder %s17731_s3, %s15072_s27  ;;  %s65_s23 = int_to_ptr.vmem [resolvable:$true] %s64_s23 }
  0x19   :  { %p15076_p9 = scmp.lt.u32.totalorder %s15072_s27, %s17731_s3 }
  0x1b   :  { %p15078_p10 = pnand %p15076_p9, %p15073_p8 }
  0x1d   :  { %15081 = shalt.err (!%p15078_p10)
}
  0x1e   :  { %s15082_s15 = scalar_lea.vmem %s65_s23, 57344  ;;  %p15087_p12 = scmp.lt.s32.totalorder %s65_s23, %s65_s23 }
  0x1f   :  { %p15083_p11 = scmp.ne.s32.totalorder %s65_s23, %s15082_s15  ;;  %p15088_p13 = scmp.lt.s32.totalorder %s15082_s15, %s15082_s15 }
  0x21   :  { %p15089_p0 = por %p15088_p13, %p15087_p12 }
  0x23   :  { %p15090_p1 = pnand %p15089_p0, %p15083_p11 }
  0x25   :  { %15093 = shalt.err (!%p15090_p1)
}
  0x26   :  { %s15354_s1 = smov 448   ;;  %s15355_s26 = smov 28  }
  0x27   :  { %70 = dma.hbm_to_vmem [thread:$0]  %s17731_s3, 57344, %s65_s23, [#allocation8], %s15354_s1, %s15354_s1, %s15355_s26  }
  0x28   :  { %s15356_s18 = smov [#allocation10]   ;;  %s15094_s22 = scalar_lea.hbm %s17733_s5, 28672 }
  0x29   :  { %s86_s19 = sshll.u32 %s15356_s18, 4  ;;  %p15095_p2 = scmp.ne.s32.totalorder %s17733_s5, %s15094_s22  ;;  %s87_s19 = int_to_ptr.vmem [resolvable:$true] %s86_s19 }
  0x2a   :  { %p15098_p3 = scmp.lt.u32.totalorder %s15094_s22, %s17733_s5 }
  0x2c   :  { %p15100_p4 = pnand %p15098_p3, %p15095_p2 }
  0x2e   :  { %15103 = shalt.err (!%p15100_p4)
}
  0x2f   :  { %s15104_s29 = scalar_lea.vmem %s87_s19, 28672  ;;  %p15109_p6 = scmp.lt.s32.totalorder %s87_s19, %s87_s19 }
  0x30   :  { %p15105_p5 = scmp.ne.s32.totalorder %s87_s19, %s15104_s29  ;;  %p15110_p7 = scmp.lt.s32.totalorder %s15104_s29, %s15104_s29 }
  0x32   :  { %p15111_p8 = por %p15110_p7, %p15109_p6 }
  0x34   :  { %p15112_p9 = pnand %p15111_p8, %p15105_p5 }
  0x36   :  { %15115 = shalt.err (!%p15112_p9)
}
  0x37   :  { %s15357_s3 = smov 256   ;;  %s15358_s23 = smov 16  }
  0x38   :  { %92 = dma.hbm_to_vmem [thread:$0]  %s17733_s5, 28672, %s87_s19, [#allocation11], %s15357_s3, %s15357_s3, %s15358_s23  }
  0x39   :  { %s15359_s15 = smov [#allocation13]   ;;  %s15116_s17 = scalar_lea.hbm %s17735_s7, 8192 }
  0x3a   :  { %s108_s1 = sshll.u32 %s15359_s15, 4  ;;  %p15117_p10 = scmp.ne.s32.totalorder %s17735_s7, %s15116_s17  ;;  %s109_s1 = int_to_ptr.vmem [resolvable:$true] %s108_s1 }
  0x3b   :  { %p15120_p11 = scmp.lt.u32.totalorder %s15116_s17, %s17735_s7 }
  0x3d   :  { %p15122_p12 = pnand %p15120_p11, %p15117_p10 }
  0x3f   :  { %15125 = shalt.err (!%p15122_p12)
}
  0x40   :  { %s15126_s24 = scalar_lea.vmem %s109_s1, 8192  ;;  %p15131_p0 = scmp.lt.s32.totalorder %s109_s1, %s109_s1 }
  0x41   :  { %p15127_p13 = scmp.ne.s32.totalorder %s109_s1, %s15126_s24  ;;  %p15132_p1 = scmp.lt.s32.totalorder %s15126_s24, %s15126_s24 }
  0x43   :  { %p15133_p2 = por %p15132_p1, %p15131_p0 }
  0x45   :  { %p15134_p3 = pnand %p15133_p2, %p15127_p13 }
  0x47   :  { %15137 = shalt.err (!%p15134_p3)
}
  0x48   :  { %s15360_s5 = smov 128   ;;  %s15361_s19 = smov 8  }
  0x49   :  { %114 = dma.hbm_to_vmem [thread:$0]  %s17735_s7, 8192, %s109_s1, [#allocation14], %s15360_s5, %s15360_s5, %s15361_s19  }
  0x4a   :  { %s15362_s28 = smov [#allocation16]   ;;  %s15138_s30 = scalar_lea.hbm %s17737_s9, 2048 }
  0x4b   :  { %s130_s29 = sshll.u32 %s15362_s28, 4  ;;  %p15139_p4 = scmp.ne.s32.totalorder %s17737_s9, %s15138_s30  ;;  %s131_s29 = int_to_ptr.vmem [resolvable:$true] %s130_s29 }
  0x4c   :  { %p15142_p5 = scmp.lt.u32.totalorder %s15138_s30, %s17737_s9 }
  0x4e   :  { %p15144_p6 = pnand %p15142_p5, %p15139_p4 }
  0x50   :  { %15147 = shalt.err (!%p15144_p6)
}
  0x51   :  { %s15148_s17 = scalar_lea.vmem %s131_s29, 2048  ;;  %p15153_p8 = scmp.lt.s32.totalorder %s131_s29, %s131_s29 }
  0x52   :  { %p15149_p7 = scmp.ne.s32.totalorder %s131_s29, %s15148_s17  ;;  %p15154_p9 = scmp.lt.s32.totalorder %s15148_s17, %s15148_s17 }
  0x54   :  { %p15155_p10 = por %p15154_p9, %p15153_p8 }
  0x56   :  { %p15156_p11 = pnand %p15155_p10, %p15149_p7 }
  0x58   :  { %15159 = shalt.err (!%p15156_p11)
}
  0x59   :  { %s15363_s7 = smov 64   ;;  %s15364_s1 = smov 4  }
  0x5a   :  { %136 = dma.hbm_to_vmem [thread:$0]  %s17737_s9, 2048, %s131_s29, [#allocation17], %s15363_s7, %s15363_s7, %s15364_s1  }
  0x5b   :  { %s15365_s21 = smov [#allocation19]   ;;  %s15366_s24 = smov [#allocation2]  }
  0x5c   :  { %s152_s22 = sshll.u32 %s15365_s21, 4  ;;  %s30_s5 = sshll.u32 %s15366_s24, 4  ;;  %s153_s22 = int_to_ptr.vmem [resolvable:$true] %s152_s22  ;;  %s31_s5 = int_to_ptr.vmem [resolvable:$true] %s30_s5 }
  0x5d   :  { %s15160_s27 = scalar_lea.hbm %s17739_s11, 1024 }
  0x5e   :  { %p15161_p12 = scmp.ne.s32.totalorder %s17739_s11, %s15160_s27  ;;  %p15164_p13 = scmp.lt.u32.totalorder %s15160_s27, %s17739_s11 }
  0x60   :  { %p15166_p0 = pnand %p15164_p13, %p15161_p12 }
  0x62   :  { %15169 = shalt.err (!%p15166_p0)
}
  0x63   :  { %s15170_s9 = scalar_lea.vmem %s153_s22, 1024  ;;  %p15175_p2 = scmp.lt.s32.totalorder %s153_s22, %s153_s22 }
  0x64   :  { %p15171_p1 = scmp.ne.s32.totalorder %s153_s22, %s15170_s9  ;;  %p15176_p3 = scmp.lt.s32.totalorder %s15170_s9, %s15170_s9 }
  0x66   :  { %p15177_p4 = por %p15176_p3, %p15175_p2 }
  0x68   :  { %p15178_p5 = pnand %p15177_p4, %p15171_p1 }
  0x6a   :  { %15181 = shalt.err (!%p15178_p5)
}
  0x6b   :  { %158 = dma.hbm_to_vmem [thread:$0]  %s17739_s11, 1024, %s153_s22, [#allocation20], %s15363_s7, %s15363_s7, %s15364_s1  }
  0x6c   :  { %s15182_s16 = scalar_lea.hbm %s17728_s0, 6144 }
  0x6d   :  { %p15183_p6 = scmp.ne.s32.totalorder %s17728_s0, %s15182_s16  ;;  %p15186_p7 = scmp.lt.u32.totalorder %s15182_s16, %s17728_s0 }
  0x6f   :  { %p15188_p8 = pnand %p15186_p7, %p15183_p6 }
  0x71   :  { %15191 = shalt.err (!%p15188_p8)
}
  0x72   :  { %s15192_s24 = scalar_lea.vmem %s31_s5, 6144  ;;  %p15197_p10 = scmp.lt.s32.totalorder %s31_s5, %s31_s5 }
  0x73   :  { %p15193_p9 = scmp.ne.s32.totalorder %s31_s5, %s15192_s24  ;;  %p15198_p11 = scmp.lt.s32.totalorder %s15192_s24, %s15192_s24 }
  0x75   :  { %p15199_p12 = por %p15198_p11, %p15197_p10 }
  0x77   :  { %p15200_p13 = pnand %p15199_p12, %p15193_p9 }
  0x79   :  { %15203 = shalt.err (!%p15200_p13)
}
  0x7a   :  { %s15367_s11 = smov 768   ;;  %s15368_s7 = smov 48  }
  0x7b   :  { %36 = dma.hbm_to_vmem [thread:$0]  %s17728_s0, 6144, %s31_s5, [#allocation3], %s15367_s11, %s15367_s11, %s15368_s7  }
  0x7c   :  { %s15369_s19 = smov [#allocation6]   ;;  %s15370_s27 = smov [#allocation9]  }
  0x7d   :  { %s55_s25 = sshll.u32 %s15369_s19, 4  ;;  %s77_s28 = sshll.u32 %s15370_s27, 4  ;;  %s56_s25 = int_to_ptr.vmem [resolvable:$true] %s55_s25  ;;  %s78_s28 = int_to_ptr.vmem [resolvable:$true] %s77_s28 }
  0x7e   :  { %s15204_s30 = scalar_lea.hbm %s17730_s2, 256 }
  0x7f   :  { %p15205_p0 = scmp.ne.s32.totalorder %s17730_s2, %s15204_s30  ;;  %p15208_p1 = scmp.lt.u32.totalorder %s15204_s30, %s17730_s2 }
  0x81   :  { %p15210_p2 = pnand %p15208_p1, %p15205_p0 }
  0x83   :  { %15213 = shalt.err (!%p15210_p2)
}
  0x84   :  { %s15214_s0 = scalar_lea.vmem %s56_s25, 256  ;;  %p15219_p4 = scmp.lt.s32.totalorder %s56_s25, %s56_s25 }
  0x85   :  { %p15215_p3 = scmp.ne.s32.totalorder %s56_s25, %s15214_s0  ;;  %p15220_p5 = scmp.lt.s32.totalorder %s15214_s0, %s15214_s0 }
  0x87   :  { %p15221_p6 = por %p15220_p5, %p15219_p4 }
  0x89   :  { %p15222_p7 = pnand %p15221_p6, %p15215_p3 }
  0x8b   :  { %15225 = shalt.err (!%p15222_p7)
}
  0x8c   :  { %58 = dma.hbm_to_vmem [thread:$0]  %s17730_s2, 256, %s56_s25, [#allocation5]  }
  0x8d   :  { %s15226_s18 = scalar_lea.hbm %s17732_s4, 224 }
  0x8e   :  { %p15227_p8 = scmp.ne.s32.totalorder %s17732_s4, %s15226_s18  ;;  %p15230_p9 = scmp.lt.u32.totalorder %s15226_s18, %s17732_s4 }
  0x90   :  { %p15232_p10 = pnand %p15230_p9, %p15227_p8 }
  0x92   :  { %15235 = shalt.err (!%p15232_p10)
}
  0x93   :  { %s15236_s7 = scalar_lea.vmem %s78_s28, 224  ;;  %p15241_p12 = scmp.lt.s32.totalorder %s78_s28, %s78_s28 }
  0x94   :  { %p15237_p11 = scmp.ne.s32.totalorder %s78_s28, %s15236_s7  ;;  %p15242_p13 = scmp.lt.s32.totalorder %s15236_s7, %s15236_s7 }
  0x96   :  { %p15243_p0 = por %p15242_p13, %p15241_p12 }
  0x98   :  { %p15244_p1 = pnand %p15243_p0, %p15237_p11 }
  0x9a   :  { %15247 = shalt.err (!%p15244_p1)
}
  0x9b   :  { %80 = dma.hbm_to_vmem [thread:$0]  %s17732_s4, 224, %s78_s28, [#allocation8]  }
  0x9c   :  { %s15371_s22 = smov [#allocation12]   ;;  %s15372_s25 = smov [#allocation15]  }
  0x9d   :  { %s99_s19 = sshll.u32 %s15371_s22, 4  ;;  %s121_s27 = sshll.u32 %s15372_s25, 4  ;;  %s100_s19 = int_to_ptr.vmem [resolvable:$true] %s99_s19  ;;  %s122_s27 = int_to_ptr.vmem [resolvable:$true] %s121_s27 }
  0x9e   :  { %s15248_s30 = scalar_lea.hbm %s17734_s6, 128 }
  0x9f   :  { %p15249_p2 = scmp.ne.s32.totalorder %s17734_s6, %s15248_s30  ;;  %p15252_p3 = scmp.lt.u32.totalorder %s15248_s30, %s17734_s6 }
  0xa1   :  { %p15254_p4 = pnand %p15252_p3, %p15249_p2 }
  0xa3   :  { %15257 = shalt.err (!%p15254_p4)
}
  0xa4   :  { %s15258_s4 = scalar_lea.vmem %s100_s19, 128  ;;  %p15263_p6 = scmp.lt.s32.totalorder %s100_s19, %s100_s19 }
  0xa5   :  { %p15259_p5 = scmp.ne.s32.totalorder %s100_s19, %s15258_s4  ;;  %p15264_p7 = scmp.lt.s32.totalorder %s15258_s4, %s15258_s4 }
  0xa7   :  { %p15265_p8 = por %p15264_p7, %p15263_p6 }
  0xa9   :  { %p15266_p9 = pnand %p15265_p8, %p15259_p5 }
  0xab   :  { %15269 = shalt.err (!%p15266_p9)
}
  0xac   :  { %102 = dma.hbm_to_vmem [thread:$0]  %s17734_s6, 128, %s100_s19, [#allocation11]  }
  0xad   :  { %s15270_s16 = scalar_lea.hbm %s17736_s8, 64 }
  0xae   :  { %p15271_p10 = scmp.ne.s32.totalorder %s17736_s8, %s15270_s16  ;;  %p15274_p11 = scmp.lt.u32.totalorder %s15270_s16, %s17736_s8 }
  0xb0   :  { %p15276_p12 = pnand %p15274_p11, %p15271_p10 }
  0xb2   :  { %15279 = shalt.err (!%p15276_p12)
}
  0xb3   :  { %s15280_s24 = scalar_lea.vmem %s122_s27, 64  ;;  %p15285_p0 = scmp.lt.s32.totalorder %s122_s27, %s122_s27 }
  0xb4   :  { %p15281_p13 = scmp.ne.s32.totalorder %s122_s27, %s15280_s24  ;;  %p15286_p1 = scmp.lt.s32.totalorder %s15280_s24, %s15280_s24 }
  0xb6   :  { %p15287_p2 = por %p15286_p1, %p15285_p0 }
  0xb8   :  { %p15288_p3 = pnand %p15287_p2, %p15281_p13 }
  0xba   :  { %15291 = shalt.err (!%p15288_p3)
}
  0xbb   :  { %124 = dma.hbm_to_vmem [thread:$0]  %s17736_s8, 64, %s122_s27, [#allocation14]  }
  0xbc   :  { %s15373_s7 = smov [#allocation18]   ;;  %s15374_s1 = smov [#allocation21]  }
  0xbd   :  { %s143_s2 = sshll.u32 %s15373_s7, 4  ;;  %s165_s22 = sshll.u32 %s15374_s1, 4  ;;  %s144_s2 = int_to_ptr.vmem [resolvable:$true] %s143_s2  ;;  %s166_s22 = int_to_ptr.vmem [resolvable:$true] %s165_s22 }
  0xbe   :  { %s15292_s3 = scalar_lea.hbm %s17738_s10, 32 }
  0xbf   :  { %p15293_p4 = scmp.ne.s32.totalorder %s17738_s10, %s15292_s3  ;;  %p15296_p5 = scmp.lt.u32.totalorder %s15292_s3, %s17738_s10 }
  0xc1   :  { %p15298_p6 = pnand %p15296_p5, %p15293_p4 }
  0xc3   :  { %15301 = shalt.err (!%p15298_p6)
}
  0xc4   :  { %s15302_s8 = scalar_lea.vmem %s144_s2, 32  ;;  %p15307_p8 = scmp.lt.s32.totalorder %s144_s2, %s144_s2 }
  0xc5   :  { %p15303_p7 = scmp.ne.s32.totalorder %s144_s2, %s15302_s8  ;;  %p15308_p9 = scmp.lt.s32.totalorder %s15302_s8, %s15302_s8 }
  0xc7   :  { %p15309_p10 = por %p15308_p9, %p15307_p8 }
  0xc9   :  { %p15310_p11 = pnand %p15309_p10, %p15303_p7 }
  0xcb   :  { %15313 = shalt.err (!%p15310_p11)
}
  0xcc   :  { %146 = dma.hbm_to_vmem [thread:$0]  %s17738_s10, 32, %s144_s2, [#allocation17]  }
  0xcd   :  { %s15314_s28 = scalar_lea.hbm %s17740_s12, 16 }
  0xce   :  { %p15315_p12 = scmp.ne.s32.totalorder %s17740_s12, %s15314_s28  ;;  %p15318_p13 = scmp.lt.u32.totalorder %s15314_s28, %s17740_s12 }
  0xd0   :  { %p15320_p0 = pnand %p15318_p13, %p15315_p12 }
  0xd2   :  { %15323 = shalt.err (!%p15320_p0)
}
  0xd3   :  { %s15324_s17 = scalar_lea.vmem %s166_s22, 16  ;;  %s15328_s18 = scalar_lea.vmem %s166_s22, 32 }
  0xd4   :  { %p15325_p1 = scmp.ne.s32.totalorder %s166_s22, %s15324_s17  ;;  %p15329_p2 = scmp.lt.s32.totalorder %s166_s22, %s166_s22 }
  0xd5   :  { %p15330_p3 = scmp.lt.s32.totalorder %s15328_s18, %s15324_s17 }
  0xd7   :  { %p15331_p4 = por %p15330_p3, %p15329_p2 }
  0xd9   :  { %p15332_p5 = pnand %p15331_p4, %p15325_p1 }
  0xdb   :  { %15335 = shalt.err (!%p15332_p5)
}
  0xdc   :  { %168 = dma.hbm_to_vmem [thread:$0]  %s17740_s12, 16, %s166_s22, [#allocation20]  }
  0xdd   :  { %15336 = dma.done.wait [#allocation3], 6144  }
  0xde   :  { %15337 = vsyncadd [#allocation3], 4294961152 }
  0xdf   :  { %15338 = dma.done.wait [#allocation5], 43264  }
  0xe0   :  { %15339 = vsyncadd [#allocation5], 4294924032 }
  0xe1   :  { %15340 = dma.done.wait [#allocation8], 57568  }
  0xe2   :  { %15341 = vsyncadd [#allocation8], 4294909728 }
  0xe3   :  { %15342 = dma.done.wait [#allocation11], 28800  }
  0xe4   :  { %15343 = vsyncadd [#allocation11], 4294938496 }
  0xe5   :  { %15344 = dma.done.wait [#allocation14], 8256  }
  0xe6   :  { %15345 = vsyncadd [#allocation14], 4294959040 }
  0xe7   :  { %15346 = dma.done.wait [#allocation17], 2080  }
  0xe8   :  { %15347 = vsyncadd [#allocation17], 4294965216 }
  0xe9   :  { %15348 = dma.done.wait [#allocation20], 1040  }
  0xea   :  { %15349 = vsyncadd [#allocation20], 4294966256  ;;  %v281_v0 = vld [vmem:[#allocation4] sm:$0xff]  ;;  %v282_v2 = vld [vmem:[#allocation4 + $0x8] sm:$0xff]  ;;  %vm2297_vm0 = vcmask 261120  }
  0xeb   :  { %v285_v1 = vld [vmem:[#allocation4 + $0x20] sm:$0xff]  ;;  %v286_v4 = vld [vmem:[#allocation4 + $0x28] sm:$0xff]  ;;  %v216_v54 = vld [vmem:[#allocation2 + $0x38] sm:$0xff] }
  0xec   :  { %v12151_v3 = vcombine.high %v281_v0, %v285_v1  ;;  %v12150_v5 = vcombine.low %v281_v0, %v285_v1  ;;  %v289_v6 = vld [vmem:[#allocation4 + $0x40] sm:$0xff]  ;;  %v12153_v8 = vcombine.high %v282_v2, %v286_v4  ;;  %v12152_v9 = vcombine.low %v282_v2, %v286_v4  ;;  %v290_v11 = vld [vmem:[#allocation4 + $0x48] sm:$0xff] }
  0xed   :  { %v293_v7 = vld [vmem:[#allocation4 + $0x60] sm:$0xff]  ;;  %v294_v12 = vld [vmem:[#allocation4 + $0x68] sm:$0xff] }
  0xee   :  { %v12159_v10 = vcombine.high %v289_v6, %v293_v7  ;;  %v297_v13 = vld [vmem:[#allocation4 + $0x80] sm:$0xff]  ;;  %2310 = vmatprep.subr.bf16.mxu0 %v12151_v3  ;;  %v12161_v14 = vcombine.high %v290_v11, %v294_v12  ;;  %v298_v16 = vld [vmem:[#allocation4 + $0x88] sm:$0xff]  ;;  %2529 = vmatprep.subr.bf16.mxu1 %v12153_v8  ;;  %v12158_v18 = vcombine.low %v289_v6, %v293_v7 }
  0xef   :  { %v301_v15 = vld [vmem:[#allocation4 + $0xa0] sm:$0xff]  ;;  %v302_v17 = vld [vmem:[#allocation4 + $0xa8] sm:$0xff]  ;;  %2311 = vmatpush1.bf16.msra.mxu0 %v12150_v5  ;;  %2530 = vmatpush1.bf16.msra.mxu1 %v12152_v9  ;;  %v12160_v19 = vcombine.low %v290_v11, %v294_v12 }
  0xf0   :  { %2312 = vmatprep.subr.bf16.mxu0 %v12159_v10  ;;  %v12167_v20 = vcombine.high %v297_v13, %v301_v15  ;;  %2531 = vmatprep.subr.bf16.mxu1 %v12161_v14  ;;  %v12169_v21 = vcombine.high %v298_v16, %v302_v17  ;;  %v305_v22 = vld [vmem:[#allocation4 + $0xc0] sm:$0xff]  ;;  %v306_v24 = vld [vmem:[#allocation4 + $0xc8] sm:$0xff]  ;;  %v12166_v26 = vcombine.low %v297_v13, %v301_v15 }
  0xf1   :  { %v309_v23 = vld [vmem:[#allocation4 + $0xe0] sm:$0xff]  ;;  %v310_v25 = vld [vmem:[#allocation4 + $0xe8] sm:$0xff]  ;;  %v12168_v27 = vcombine.low %v298_v16, %v302_v17 }
  0xf2   :  { %v12175_v28 = vcombine.high %v305_v22, %v309_v23  ;;  %v12177_v29 = vcombine.high %v306_v24, %v310_v25  ;;  %v313_v30 = vld [vmem:[#allocation4 + $0x100] sm:$0xff]  ;;  %v314_v32 = vld [vmem:[#allocation4 + $0x108] sm:$0xff]  ;;  %v12174_v34 = vcombine.low %v305_v22, %v309_v23  ;;  %v12176_v35 = vcombine.low %v306_v24, %v310_v25 }
  0xf3   :  { %2313 = vmatpush1.bf16.msra.mxu0 %v12158_v18  ;;  %2532 = vmatpush1.bf16.msra.mxu1 %v12160_v19  ;;  %v317_v31 = vld [vmem:[#allocation4 + $0x120] sm:$0xff]  ;;  %v318_v33 = vld [vmem:[#allocation4 + $0x128] sm:$0xff] }
  0xf4   :  { %2314 = vmatprep.subr.bf16.mxu0 %v12167_v20  ;;  %2533 = vmatprep.subr.bf16.mxu1 %v12169_v21  ;;  %v12183_v36 = vcombine.high %v313_v30, %v317_v31  ;;  %v12185_v37 = vcombine.high %v314_v32, %v318_v33  ;;  %v321_v38 = vld [vmem:[#allocation4 + $0x140] sm:$0xff]  ;;  %v322_v40 = vld [vmem:[#allocation4 + $0x148] sm:$0xff]  ;;  %v12182_v42 = vcombine.low %v313_v30, %v317_v31 }
  0xf5   :  { %v325_v39 = vld [vmem:[#allocation4 + $0x160] sm:$0xff]  ;;  %v326_v41 = vld [vmem:[#allocation4 + $0x168] sm:$0xff]  ;;  %v12184_v43 = vcombine.low %v314_v32, %v318_v33 }
  0xf6   :  { %v12191_v44 = vcombine.high %v321_v38, %v325_v39  ;;  %v12193_v45 = vcombine.high %v322_v40, %v326_v41  ;;  %v329_v46 = vld [vmem:[#allocation4 + $0x180] sm:$0xff]  ;;  %v330_v48 = vld [vmem:[#allocation4 + $0x188] sm:$0xff]  ;;  %v12190_v50 = vcombine.low %v321_v38, %v325_v39  ;;  %v12192_v51 = vcombine.low %v322_v40, %v326_v41 }
  0xf7   :  { %2315 = vmatpush1.bf16.msra.mxu0 %v12166_v26  ;;  %2534 = vmatpush1.bf16.msra.mxu1 %v12168_v27  ;;  %v333_v47 = vld [vmem:[#allocation4 + $0x1a0] sm:$0xff]  ;;  %v334_v49 = vld [vmem:[#allocation4 + $0x1a8] sm:$0xff] }
  0xf8   :  { %2316 = vmatprep.subr.bf16.mxu0 %v12175_v28  ;;  %2535 = vmatprep.subr.bf16.mxu1 %v12177_v29  ;;  %v12199_v52 = vcombine.high %v329_v46, %v333_v47  ;;  %v210_v53 = vld [vmem:[#allocation2 + $0x8] sm:$0xff]  ;;  %v12201_v55 = vcombine.high %v330_v48, %v334_v49  ;;  %v337_v56 = vld [vmem:[#allocation4 + $0x1c0] sm:$0xff]  ;;  %v12198_v61 = vcombine.low %v329_v46, %v333_v47 }
  0xf9   :  { %v341_v57 = vld [vmem:[#allocation4 + $0x1e0] sm:$0xff]  ;;  %v15603_v58 = vpack.c.bf16 %v216_v54, %v210_v53  ;;  %v338_v59 = vld [vmem:[#allocation4 + $0x1c8] sm:$0xff]  ;;  %v12200_v62 = vcombine.low %v330_v48, %v334_v49 }
  0xfa   :  { %v342_v60 = vld [vmem:[#allocation4 + $0x1e8] sm:$0xff]  ;;  %v12207_v63 = vcombine.high %v337_v56, %v341_v57  ;;  %v345_v1 = vld [vmem:[#allocation4 + $0x200] sm:$0xff]  ;;  %v12206_v5 = vcombine.low %v337_v56, %v341_v57 }
  0xfb   :  { %2317 = vmatpush1.bf16.msra.mxu0 %v12174_v34  ;;  %2536 = vmatpush1.bf16.msra.mxu1 %v12176_v35  ;;  %v12209_v0 = vcombine.high %v338_v59, %v342_v60  ;;  %v349_v2 = vld [vmem:[#allocation4 + $0x220] sm:$0xff]  ;;  %v346_v3 = vld [vmem:[#allocation4 + $0x208] sm:$0xff]  ;;  %v12208_v6 = vcombine.low %v338_v59, %v342_v60 }
  0xfc   :  { %2318 = vmatprep.subr.bf16.mxu0 %v12183_v36  ;;  %2537 = vmatprep.subr.bf16.mxu1 %v12185_v37  ;;  %v350_v4 = vld [vmem:[#allocation4 + $0x228] sm:$0xff]  ;;  %v12215_v7 = vcombine.high %v345_v1, %v349_v2  ;;  %v353_v9 = vld [vmem:[#allocation4 + $0x240] sm:$0xff]  ;;  %v12214_v13 = vcombine.low %v345_v1, %v349_v2 }
  0xfd   :  { %2342 = vmatprep.mubr.bf16.mxu0 %v15603_v58  ;;  %2561 = vmatprep.mubr.bf16.mxu1 %v15603_v58  ;;  %v12217_v8 = vcombine.high %v346_v3, %v350_v4  ;;  %v357_v10 = vld [vmem:[#allocation4 + $0x260] sm:$0xff]  ;;  %v354_v11 = vld [vmem:[#allocation4 + $0x248] sm:$0xff]  ;;  %v12216_v14 = vcombine.low %v346_v3, %v350_v4 }
  0xfe   :  { %v358_v12 = vld [vmem:[#allocation4 + $0x268] sm:$0xff]  ;;  %v12223_v15 = vcombine.high %v353_v9, %v357_v10  ;;  %v361_v17 = vld [vmem:[#allocation4 + $0x280] sm:$0xff]  ;;  %v12222_v21 = vcombine.low %v353_v9, %v357_v10 }
  0xff   :  { %2319 = vmatpush1.bf16.msra.mxu0 %v12182_v42  ;;  %2538 = vmatpush1.bf16.msra.mxu1 %v12184_v43  ;;  %v12225_v16 = vcombine.high %v354_v11, %v358_v12  ;;  %v365_v18 = vld [vmem:[#allocation4 + $0x2a0] sm:$0xff]  ;;  %v362_v19 = vld [vmem:[#allocation4 + $0x288] sm:$0xff]  ;;  %v12224_v22 = vcombine.low %v354_v11, %v358_v12 }
 0x100   :  { %2320 = vmatprep.subr.bf16.mxu0 %v12191_v44  ;;  %2539 = vmatprep.subr.bf16.mxu1 %v12193_v45  ;;  %v366_v20 = vld [vmem:[#allocation4 + $0x2a8] sm:$0xff]  ;;  %v12231_v23 = vcombine.high %v361_v17, %v365_v18  ;;  %v369_v25 = vld [vmem:[#allocation4 + $0x2c0] sm:$0xff]  ;;  %v12230_v29 = vcombine.low %v361_v17, %v365_v18  ;;  %v228_v18 = vld [vmem:[#allocation2 + $0x98] sm:$0xff] }
 0x101   :  { %v12233_v24 = vcombine.high %v362_v19, %v366_v20  ;;  %v373_v26 = vld [vmem:[#allocation4 + $0x2e0] sm:$0xff]  ;;  %v370_v27 = vld [vmem:[#allocation4 + $0x2c8] sm:$0xff]  ;;  %v12232_v30 = vcombine.low %v362_v19, %v366_v20 }
 0x102   :  { %v374_v28 = vld [vmem:[#allocation4 + $0x2e8] sm:$0xff]  ;;  %v12239_v31 = vcombine.high %v369_v25, %v373_v26  ;;  %v377_v33 = vld [vmem:[#allocation4 + $0x300] sm:$0xff]  ;;  %v12238_v37 = vcombine.low %v369_v25, %v373_v26 }
 0x103   :  { %2321 = vmatpush1.bf16.msra.mxu0 %v12190_v50  ;;  %2540 = vmatpush1.bf16.msra.mxu1 %v12192_v51  ;;  %v12241_v32 = vcombine.high %v370_v27, %v374_v28  ;;  %v381_v34 = vld [vmem:[#allocation4 + $0x320] sm:$0xff]  ;;  %v378_v35 = vld [vmem:[#allocation4 + $0x308] sm:$0xff]  ;;  %v12240_v38 = vcombine.low %v370_v27, %v374_v28 }
 0x104   :  { %2322 = vmatprep.subr.bf16.mxu0 %v12199_v52  ;;  %2541 = vmatprep.subr.bf16.mxu1 %v12201_v55  ;;  %v382_v36 = vld [vmem:[#allocation4 + $0x328] sm:$0xff]  ;;  %v12247_v39 = vcombine.high %v377_v33, %v381_v34  ;;  %v385_v41 = vld [vmem:[#allocation4 + $0x340] sm:$0xff]  ;;  %v12246_v45 = vcombine.low %v377_v33, %v381_v34 }
 0x105   :  { %v12249_v40 = vcombine.high %v378_v35, %v382_v36  ;;  %v389_v42 = vld [vmem:[#allocation4 + $0x360] sm:$0xff]  ;;  %v386_v43 = vld [vmem:[#allocation4 + $0x348] sm:$0xff]  ;;  %v12248_v46 = vcombine.low %v378_v35, %v382_v36 }
 0x106   :  { %v390_v44 = vld [vmem:[#allocation4 + $0x368] sm:$0xff]  ;;  %v12255_v47 = vcombine.high %v385_v41, %v389_v42  ;;  %v393_v49 = vld [vmem:[#allocation4 + $0x380] sm:$0xff]  ;;  %v12254_v53 = vcombine.low %v385_v41, %v389_v42 }
 0x107   :  { %2323 = vmatpush1.bf16.msra.mxu0 %v12198_v61  ;;  %2542 = vmatpush1.bf16.msra.mxu1 %v12200_v62  ;;  %v12257_v48 = vcombine.high %v386_v43, %v390_v44  ;;  %v397_v50 = vld [vmem:[#allocation4 + $0x3a0] sm:$0xff]  ;;  %v394_v51 = vld [vmem:[#allocation4 + $0x388] sm:$0xff]  ;;  %v12256_v54 = vcombine.low %v386_v43, %v390_v44 }
 0x108   :  { %2324 = vmatprep.subr.bf16.mxu0 %v12207_v63  ;;  %2543 = vmatprep.subr.bf16.mxu1 %v12209_v0  ;;  %v398_v52 = vld [vmem:[#allocation4 + $0x3a8] sm:$0xff]  ;;  %v12263_v55 = vcombine.high %v393_v49, %v397_v50  ;;  %v401_v57 = vld [vmem:[#allocation4 + $0x3c0] sm:$0xff]  ;;  %v12262_v62 = vcombine.low %v393_v49, %v397_v50 }
 0x109   :  { %v12265_v56 = vcombine.high %v394_v51, %v398_v52  ;;  %v405_v59 = vld [vmem:[#allocation4 + $0x3e0] sm:$0xff]  ;;  %v402_v60 = vld [vmem:[#allocation4 + $0x3c8] sm:$0xff]  ;;  %v12264_v63 = vcombine.low %v394_v51, %v398_v52  ;;  %v239_v52 = vld [vmem:[#allocation2 + $0xf0] sm:$0xff] }
 0x10a   :  { %v406_v61 = vld [vmem:[#allocation4 + $0x3e8] sm:$0xff]  ;;  %v12271_v0 = vcombine.high %v401_v57, %v405_v59  ;;  %v409_v2 = vld [vmem:[#allocation4 + $0x400] sm:$0xff] }
 0x10b   :  { %2325 = vmatpush1.bf16.msra.mxu0 %v12206_v5  ;;  %2544 = vmatpush1.bf16.msra.mxu1 %v12208_v6  ;;  %v12273_v1 = vcombine.high %v402_v60, %v406_v61  ;;  %v413_v3 = vld [vmem:[#allocation4 + $0x420] sm:$0xff]  ;;  %v410_v4 = vld [vmem:[#allocation4 + $0x408] sm:$0xff]  ;;  %v12270_v6 = vcombine.low %v401_v57, %v405_v59  ;;  %v12272_v9 = vcombine.low %v402_v60, %v406_v61 }
 0x10c   :  { %2326 = vmatprep.subr.bf16.mxu0 %v12215_v7  ;;  %2545 = vmatprep.subr.bf16.mxu1 %v12217_v8  ;;  %v414_v5 = vld [vmem:[#allocation4 + $0x428] sm:$0xff]  ;;  %v209_v7 = vld [vmem:[#allocation2] sm:$0xff]  ;;  %v215_v8 = vld [vmem:[#allocation2 + $0x30] sm:$0xff]  ;;  %v12279_v10 = vcombine.high %v409_v2, %v413_v3  ;;  %v12278_v19 = vcombine.low %v409_v2, %v413_v3 }
 0x10d   :  { %v12281_v11 = vcombine.high %v410_v4, %v414_v5  ;;  %v417_v12 = vld [vmem:[#allocation4 + $0x440] sm:$0xff]  ;;  %v222_v17 = vld [vmem:[#allocation2 + $0x68] sm:$0xff]  ;;  %v12280_v20 = vcombine.low %v410_v4, %v414_v5 }
 0x10e   :  { %v15609_v25 = vpack.c.bf16 %v228_v18, %v222_v17  ;;  %v426_v26 = vld [vmem:[#allocation4 + $0x488] sm:$0xff]  ;;  %v433_v34 = vld [vmem:[#allocation4 + $0x4c0] sm:$0xff] }
 0x10f   :  { %2327 = vmatpush1.bf16.msra.mxu0 %v12214_v13  ;;  %2546 = vmatpush1.bf16.msra.mxu1 %v12216_v14  ;;  %v421_v13 = vld [vmem:[#allocation4 + $0x460] sm:$0xff]  ;;  %v418_v14 = vld [vmem:[#allocation4 + $0x448] sm:$0xff] }
 0x110   :  { %2328 = vmatprep.subr.bf16.mxu0 %v12223_v15  ;;  %2547 = vmatprep.subr.bf16.mxu1 %v12225_v16  ;;  %v15607_v15 = vpack.c.bf16 %v215_v8, %v209_v7  ;;  %v422_v16 = vld [vmem:[#allocation4 + $0x468] sm:$0xff]  ;;  %v12286_v28 = vcombine.low %v417_v12, %v421_v13  ;;  %v437_v35 = vld [vmem:[#allocation4 + $0x4e0] sm:$0xff] }
 0x111   :  { %v430_v27 = vld [vmem:[#allocation4 + $0x4a8] sm:$0xff]  ;;  %v12303_v43 = vcombine.high %v433_v34, %v437_v35  ;;  %v12302_v50 = vcombine.low %v433_v34, %v437_v35  ;;  %v233_v51 = vld [vmem:[#allocation2 + $0xc0] sm:$0xff] }
 0x112   :  { %v12297_v33 = vcombine.high %v426_v26, %v430_v27  ;;  %v434_v36 = vld [vmem:[#allocation4 + $0x4c8] sm:$0xff]  ;;  %v12296_v42 = vcombine.low %v426_v26, %v430_v27  ;;  %v453_v57 = vld [vmem:[#allocation4 + $0x560] sm:$0xff]  ;;  %v15623_v61 = vpack.c.bf16 %v239_v52, %v233_v51 }
 0x113   :  { %2329 = vmatpush1.bf16.msra.mxu0 %v12222_v21  ;;  %2548 = vmatpush1.bf16.msra.mxu1 %v12224_v22  ;;  %v12287_v21 = vcombine.high %v417_v12, %v421_v13  ;;  %v12289_v22 = vcombine.high %v418_v14, %v422_v16  ;;  %v446_v49 = vld [vmem:[#allocation4 + $0x528] sm:$0xff]  ;;  %v457_v4 = vld [vmem:[#allocation4 + $0x580] sm:$0xff] }
 0x114   :  { %2330 = vmatprep.subr.bf16.mxu0 %v12231_v23  ;;  %2549 = vmatprep.subr.bf16.mxu1 %v12233_v24  ;;  %v425_v23 = vld [vmem:[#allocation4 + $0x480] sm:$0xff]  ;;  %v450_v59 = vld [vmem:[#allocation4 + $0x548] sm:$0xff] }
 0x115   :  { %v429_v24 = vld [vmem:[#allocation4 + $0x4a0] sm:$0xff]  ;;  %v454_v60 = vld [vmem:[#allocation4 + $0x568] sm:$0xff] }
 0x116   :  { %v12294_v41 = vcombine.low %v425_v23, %v429_v24  ;;  %v12321_v3 = vcombine.high %v450_v59, %v454_v60  ;;  %v461_v5 = vld [vmem:[#allocation4 + $0x5a0] sm:$0xff]  ;;  %v458_v7 = vld [vmem:[#allocation4 + $0x588] sm:$0xff]  ;;  %v12320_v12 = vcombine.low %v450_v59, %v454_v60 }
 0x117   :  { %2331 = vmatpush1.bf16.msra.mxu0 %v12230_v29  ;;  %2550 = vmatpush1.bf16.msra.mxu1 %v12232_v30  ;;  %v221_v29 = vld [vmem:[#allocation2 + $0x60] sm:$0xff]  ;;  %v227_v30 = vld [vmem:[#allocation2 + $0x90] sm:$0xff]  ;;  %v462_v8 = vld [vmem:[#allocation4 + $0x5a8] sm:$0xff]  ;;  %v12327_v13 = vcombine.high %v457_v4, %v461_v5 }
 0x118   :  { %2332 = vmatprep.subr.bf16.mxu0 %v12239_v31  ;;  %2551 = vmatprep.subr.bf16.mxu1 %v12241_v32  ;;  %v12288_v31 = vcombine.low %v418_v14, %v422_v16  ;;  %v12295_v32 = vcombine.high %v425_v23, %v429_v24  ;;  %v12329_v14 = vcombine.high %v458_v7, %v462_v8  ;;  %v465_v16 = vld [vmem:[#allocation4 + $0x5c0] sm:$0xff]  ;;  %v466_v18 = vld [vmem:[#allocation4 + $0x5c8] sm:$0xff] }
 0x119   :  { %v469_v17 = vld [vmem:[#allocation4 + $0x5e0] sm:$0xff]  ;;  %v12326_v23 = vcombine.low %v457_v4, %v461_v5  ;;  %v12328_v24 = vcombine.low %v458_v7, %v462_v8  ;;  %v502_v59 = vld [vmem:[#allocation4 + $0x6e8] sm:$0xff] }
 0x11a   :  { %v12335_v26 = vcombine.high %v465_v16, %v469_v17  ;;  %v473_v27 = vld [vmem:[#allocation4 + $0x600] sm:$0xff]  ;;  %v510_v4 = vld [vmem:[#allocation4 + $0x728] sm:$0xff] }
 0x11b   :  { %2333 = vmatpush1.bf16.msra.mxu0 %v12238_v37  ;;  %2552 = vmatpush1.bf16.msra.mxu1 %v12240_v38  ;;  %v438_v37 = vld [vmem:[#allocation4 + $0x4e8] sm:$0xff]  ;;  %v15615_v38 = vpack.c.bf16 %v227_v30, %v221_v29 }
 0x11c   :  { %2334 = vmatprep.subr.bf16.mxu0 %v12247_v39  ;;  %2553 = vmatprep.subr.bf16.mxu1 %v12249_v40  ;;  %v234_v39 = vld [vmem:[#allocation2 + $0xc8] sm:$0xff]  ;;  %v240_v40 = vld [vmem:[#allocation2 + $0xf8] sm:$0xff]  ;;  %v12305_v44 = vcombine.high %v434_v36, %v438_v37 }
 0x11d   :  { %v474_v29 = vld [vmem:[#allocation4 + $0x608] sm:$0xff] }
 0x11f   :  { %2335 = vmatpush1.bf16.msra.mxu0 %v12246_v45  ;;  %2554 = vmatpush1.bf16.msra.mxu1 %v12248_v46  ;;  %v441_v45 = vld [vmem:[#allocation4 + $0x500] sm:$0xff] }
 0x120   :  { %2336 = vmatprep.subr.bf16.mxu0 %v12255_v47  ;;  %2555 = vmatprep.subr.bf16.mxu1 %v12257_v48  ;;  %v445_v46 = vld [vmem:[#allocation4 + $0x520] sm:$0xff]  ;;  %v15617_v47 = vpack.c.bf16 %v240_v40, %v234_v39  ;;  %v442_v48 = vld [vmem:[#allocation4 + $0x508] sm:$0xff] }
 0x121   :  { %v482_v39 = vld [vmem:[#allocation4 + $0x648] sm:$0xff] }
 0x123   :  { %2337 = vmatpush1.bf16.msra.mxu0 %v12254_v53  ;;  %2556 = vmatpush1.bf16.msra.mxu1 %v12256_v54  ;;  %v12304_v53 = vcombine.low %v434_v36, %v438_v37  ;;  %v12311_v54 = vcombine.high %v441_v45, %v445_v46  ;;  %v481_v36 = vld [vmem:[#allocation4 + $0x640] sm:$0xff] }
 0x124   :  { %2338 = vmatprep.subr.bf16.mxu0 %v12263_v55  ;;  %2557 = vmatprep.subr.bf16.mxu1 %v12265_v56  ;;  %v12313_v55 = vcombine.high %v442_v48, %v446_v49  ;;  %v449_v56 = vld [vmem:[#allocation4 + $0x540] sm:$0xff] }
 0x125   :  { %v12319_v2 = vcombine.high %v449_v56, %v453_v57  ;;  %v485_v37 = vld [vmem:[#allocation4 + $0x660] sm:$0xff] }
 0x126   :  { %v12350_v51 = vcombine.low %v481_v36, %v485_v37 }
 0x127   :  { %2339 = vmatpush1.bf16.msra.mxu0 %v12262_v62  ;;  %2558 = vmatpush1.bf16.msra.mxu1 %v12264_v63  ;;  %v246_v62 = vld [vmem:[#allocation2 + $0x128] sm:$0xff]  ;;  %v252_v63 = vld [vmem:[#allocation2 + $0x158] sm:$0xff] }
 0x128   :  { %2340 = vmatprep.subr.bf16.mxu0 %v12271_v0  ;;  %2559 = vmatprep.subr.bf16.mxu1 %v12273_v1  ;;  %v12310_v0 = vcombine.low %v441_v45, %v445_v46  ;;  %v12312_v1 = vcombine.low %v442_v48, %v446_v49  ;;  %v489_v45 = vld [vmem:[#allocation4 + $0x680] sm:$0xff]  ;;  %v490_v48 = vld [vmem:[#allocation4 + $0x688] sm:$0xff] }
 0x129   :  { %v493_v46 = vld [vmem:[#allocation4 + $0x6a0] sm:$0xff] }
 0x12a   :  { %v12358_v60 = vcombine.low %v489_v45, %v493_v46 }
 0x12b   :  { %2341 = vmatpush1.bf16.msra.mxu0 %v12270_v6  ;;  %2560 = vmatpush1.bf16.msra.mxu1 %v12272_v9  ;;  %v15625_v6 = vpack.c.bf16 %v252_v63, %v246_v62  ;;  %v12318_v9 = vcombine.low %v449_v56, %v453_v57  ;;  %v498_v56 = vld [vmem:[#allocation4 + $0x6c8] sm:$0xff] }
 0x12c   :  { %2383 = vmatprep.subr.bf16.mxu0 %v12279_v10  ;;  %2602 = vmatprep.subr.bf16.mxu1 %v12281_v11  ;;  %v245_v10 = vld [vmem:[#allocation2 + $0x120] sm:$0xff]  ;;  %v251_v11 = vld [vmem:[#allocation2 + $0x150] sm:$0xff]  ;;  %v12368_v7 = vcombine.low %v498_v56, %v502_v59 }
 0x12e   :  { %2343 = vmatmul.mubr.bf16.vlgmr.msra.gmra.mrb[0].mxu0 %v15607_v15  ;;  %2562 = vmatmul.mubr.bf16.vlgmr.msra.gmra.mrb[0].mxu1 %v15607_v15 }
 0x12f   :  { %2384 = vmatpush1.bf16.msra.mxu0 %v12278_v19  ;;  %2603 = vmatpush1.bf16.msra.mxu1 %v12280_v20  ;;  %v470_v19 = vld [vmem:[#allocation4 + $0x5e8] sm:$0xff]  ;;  %v15631_v20 = vpack.c.bf16 %v251_v11, %v245_v10  ;;  %v517_v10 = vld [vmem:[#allocation4 + $0x760] sm:$0xff] }
 0x130   :  { %2385 = vmatprep.subr.bf16.mxu0 %v12287_v21  ;;  %2604 = vmatprep.subr.bf16.mxu1 %v12289_v22  ;;  %v212_v21 = vld [vmem:[#allocation2 + $0x18] sm:$0xff]  ;;  %v218_v22 = vld [vmem:[#allocation2 + $0x48] sm:$0xff]  ;;  %v12337_v30 = vcombine.high %v466_v18, %v470_v19  ;;  %v12336_v34 = vcombine.low %v466_v18, %v470_v19  ;;  %v521_v18 = vld [vmem:[#allocation4 + $0x780] sm:$0xff] }
 0x131   :  { %2352 = vmatprep.mubr.bf16.mxu0 %v15609_v25  ;;  %2571 = vmatprep.mubr.bf16.mxu1 %v15609_v25  ;;  %v514_v11 = vld [vmem:[#allocation4 + $0x748] sm:$0xff]  ;;  %v525_v19 = vld [vmem:[#allocation4 + $0x7a0] sm:$0xff] }
 0x133   :  { %2386 = vmatpush1.bf16.msra.mxu0 %v12286_v28  ;;  %2605 = vmatpush1.bf16.msra.mxu1 %v12288_v31  ;;  %v477_v28 = vld [vmem:[#allocation4 + $0x620] sm:$0xff]  ;;  %v478_v31 = vld [vmem:[#allocation4 + $0x628] sm:$0xff] }
 0x134   :  { %2387 = vmatprep.subr.bf16.mxu0 %v12295_v32  ;;  %2606 = vmatprep.subr.bf16.mxu1 %v12297_v33  ;;  %v15633_v32 = vpack.c.bf16 %v218_v22, %v212_v21  ;;  %v12334_v33 = vcombine.low %v465_v16, %v469_v17  ;;  %v12343_v35 = vcombine.high %v473_v27, %v477_v28  ;;  %v522_v21 = vld [vmem:[#allocation4 + $0x788] sm:$0xff] }
 0x135   :  { %v12345_v40 = vcombine.high %v474_v29, %v478_v31 }
 0x136   :  { %2353 = vmatmul.mubr.bf16.gmra.mrb[4].mxu0 %v15615_v38  ;;  %2572 = vmatmul.mubr.bf16.gmra.mrb[4].mxu1 %v15615_v38 }
 0x137   :  { %2388 = vmatpush1.bf16.msra.mxu0 %v12294_v41  ;;  %2607 = vmatpush1.bf16.msra.mxu1 %v12296_v42  ;;  %v486_v41 = vld [vmem:[#allocation4 + $0x668] sm:$0xff]  ;;  %v12342_v42 = vcombine.low %v473_v27, %v477_v28  ;;  %v12391_v27 = vcombine.high %v521_v18, %v525_v19  ;;  %v529_v28 = vld [vmem:[#allocation4 + $0x7c0] sm:$0xff] }
 0x138   :  { %2389 = vmatprep.subr.bf16.mxu0 %v12303_v43  ;;  %2608 = vmatprep.subr.bf16.mxu1 %v12305_v44  ;;  %v12344_v43 = vcombine.low %v474_v29, %v478_v31  ;;  %v12351_v44 = vcombine.high %v481_v36, %v485_v37  ;;  %v12353_v49 = vcombine.high %v482_v39, %v486_v41  ;;  %v533_v29 = vld [vmem:[#allocation4 + $0x7e0] sm:$0xff] }
 0x139   :  { %2362 = vmatprep.mubr.bf16.mxu0 %v15617_v47  ;;  %2581 = vmatprep.mubr.bf16.mxu1 %v15617_v47  ;;  %v12352_v52 = vcombine.low %v482_v39, %v486_v41  ;;  %v12399_v37 = vcombine.high %v529_v28, %v533_v29  ;;  %v541_v39 = vld [vmem:[#allocation4 + $0x820] sm:$0xff]  ;;  %v542_v41 = vld [vmem:[#allocation4 + $0x828] sm:$0xff] }
 0x13b   :  { %2390 = vmatpush1.bf16.msra.mxu0 %v12302_v50  ;;  %2609 = vmatpush1.bf16.msra.mxu1 %v12304_v53  ;;  %v494_v50 = vld [vmem:[#allocation4 + $0x6a8] sm:$0xff]  ;;  %v12359_v53 = vcombine.high %v489_v45, %v493_v46  ;;  %v12398_v45 = vcombine.low %v529_v28, %v533_v29  ;;  %v545_v46 = vld [vmem:[#allocation4 + $0x840] sm:$0xff] }
 0x13c   :  { %2391 = vmatprep.subr.bf16.mxu0 %v12311_v54  ;;  %2610 = vmatprep.subr.bf16.mxu1 %v12313_v55  ;;  %v497_v54 = vld [vmem:[#allocation4 + $0x6c0] sm:$0xff]  ;;  %v12361_v57 = vcombine.high %v490_v48, %v494_v50  ;;  %v12360_v62 = vcombine.low %v490_v48, %v494_v50 }
 0x13d   :  { %v501_v55 = vld [vmem:[#allocation4 + $0x6e0] sm:$0xff] }
 0x13e   :  { %2363 = vmatmul.mubr.bf16.gmra.mrb[8].mxu0 %v15623_v61  ;;  %2582 = vmatmul.mubr.bf16.gmra.mrb[8].mxu1 %v15623_v61  ;;  %v12367_v63 = vcombine.high %v497_v54, %v501_v55  ;;  %v12366_v5 = vcombine.low %v497_v54, %v501_v55  ;;  %v549_v48 = vld [vmem:[#allocation4 + $0x860] sm:$0xff]  ;;  %v230_v55 = vld [vmem:[#allocation2 + $0xa8] sm:$0xff] }
 0x13f   :  { %2392 = vmatpush1.bf16.msra.mxu0 %v12310_v0  ;;  %2611 = vmatpush1.bf16.msra.mxu1 %v12312_v1  ;;  %v505_v0 = vld [vmem:[#allocation4 + $0x700] sm:$0xff] }
 0x140   :  { %2393 = vmatprep.subr.bf16.mxu0 %v12319_v2  ;;  %2612 = vmatprep.subr.bf16.mxu1 %v12321_v3  ;;  %v509_v1 = vld [vmem:[#allocation4 + $0x720] sm:$0xff]  ;;  %v506_v2 = vld [vmem:[#allocation4 + $0x708] sm:$0xff]  ;;  %v12369_v3 = vcombine.high %v498_v56, %v502_v59 }
 0x141   :  { %2372 = vmatprep.mubr.bf16.mxu0 %v15625_v6  ;;  %2591 = vmatprep.mubr.bf16.mxu1 %v15625_v6  ;;  %v12375_v8 = vcombine.high %v505_v0, %v509_v1  ;;  %v12376_v16 = vcombine.low %v506_v2, %v510_v4  ;;  %v553_v59 = vld [vmem:[#allocation4 + $0x880] sm:$0xff] }
 0x143   :  { %2394 = vmatpush1.bf16.msra.mxu0 %v12318_v9  ;;  %2613 = vmatpush1.bf16.msra.mxu1 %v12320_v12  ;;  %v513_v9 = vld [vmem:[#allocation4 + $0x740] sm:$0xff]  ;;  %v12377_v12 = vcombine.high %v506_v2, %v510_v4  ;;  %v223_v4 = vld [vmem:[#allocation2 + $0x70] sm:$0xff] }
 0x144   :  { %2395 = vmatprep.subr.bf16.mxu0 %v12327_v13  ;;  %2614 = vmatprep.subr.bf16.mxu1 %v12329_v14  ;;  %v518_v13 = vld [vmem:[#allocation4 + $0x768] sm:$0xff]  ;;  %v12374_v14 = vcombine.low %v505_v0, %v509_v1  ;;  %v12383_v17 = vcombine.high %v513_v9, %v517_v10 }
 0x145   :  { %v12385_v22 = vcombine.high %v514_v11, %v518_v13  ;;  %v554_v0 = vld [vmem:[#allocation4 + $0x888] sm:$0xff] }
 0x146   :  { %2373 = vmatmul.mubr.bf16.gmra.mrb[12].mxu0 %v15631_v20  ;;  %2592 = vmatmul.mubr.bf16.gmra.mrb[12].mxu1 %v15631_v20  ;;  %v558_v1 = vld [vmem:[#allocation4 + $0x8a8] sm:$0xff] }
 0x147   :  { %2396 = vmatpush1.bf16.msra.mxu0 %v12326_v23  ;;  %2615 = vmatpush1.bf16.msra.mxu1 %v12328_v24  ;;  %v526_v23 = vld [vmem:[#allocation4 + $0x7a8] sm:$0xff]  ;;  %v12382_v24 = vcombine.low %v513_v9, %v517_v10  ;;  %v565_v9 = vld [vmem:[#allocation4 + $0x8e0] sm:$0xff] }
 0x148   :  { %2397 = vmatprep.subr.bf16.mxu0 %v12335_v26  ;;  %2616 = vmatprep.subr.bf16.mxu1 %v12337_v30  ;;  %v12384_v26 = vcombine.low %v514_v11, %v518_v13  ;;  %v530_v30 = vld [vmem:[#allocation4 + $0x7c8] sm:$0xff]  ;;  %v12393_v31 = vcombine.high %v522_v21, %v526_v23  ;;  %v12392_v36 = vcombine.low %v522_v21, %v526_v23  ;;  %v569_v21 = vld [vmem:[#allocation4 + $0x900] sm:$0xff] }
 0x149   :  { %2415 = vmatprep.mubr.bf16.mxu0 %v15633_v32  ;;  %2634 = vmatprep.mubr.bf16.mxu1 %v15633_v32  ;;  %v566_v13 = vld [vmem:[#allocation4 + $0x8e8] sm:$0xff] }
 0x14b   :  { %2398 = vmatpush1.bf16.msra.mxu0 %v12334_v33  ;;  %2617 = vmatpush1.bf16.msra.mxu1 %v12336_v34  ;;  %v534_v33 = vld [vmem:[#allocation4 + $0x7e8] sm:$0xff]  ;;  %v12390_v34 = vcombine.low %v521_v18, %v525_v19 }
 0x14c   :  { %2399 = vmatprep.subr.bf16.mxu0 %v12343_v35  ;;  %2618 = vmatprep.subr.bf16.mxu1 %v12345_v40  ;;  %v537_v35 = vld [vmem:[#allocation4 + $0x800] sm:$0xff]  ;;  %v538_v40 = vld [vmem:[#allocation4 + $0x808] sm:$0xff] }
 0x14d   :  { %v12407_v50 = vcombine.high %v537_v35, %v541_v39  ;;  %v12409_v54 = vcombine.high %v538_v40, %v542_v41 }
 0x14f   :  { %2400 = vmatpush1.bf16.msra.mxu0 %v12342_v42  ;;  %2619 = vmatpush1.bf16.msra.mxu1 %v12344_v43  ;;  %v12401_v42 = vcombine.high %v530_v30, %v534_v33  ;;  %v211_v43 = vld [vmem:[#allocation2 + $0x10] sm:$0xff] }
 0x150   :  { %2401 = vmatprep.subr.bf16.mxu0 %v12351_v44  ;;  %2620 = vmatprep.subr.bf16.mxu1 %v12353_v49  ;;  %v217_v44 = vld [vmem:[#allocation2 + $0x40] sm:$0xff]  ;;  %v12400_v49 = vcombine.low %v530_v30, %v534_v33  ;;  %v235_v30 = vld [vmem:[#allocation2 + $0xd0] sm:$0xff] }
 0x151   :  { %v15639_v56 = vpack.c.bf16 %v217_v44, %v211_v43  ;;  %v254_v43 = vld [vmem:[#allocation2 + $0x168] sm:$0xff] }
 0x153   :  { %2402 = vmatpush1.bf16.msra.mxu0 %v12350_v51  ;;  %2621 = vmatpush1.bf16.msra.mxu1 %v12352_v52  ;;  %v546_v51 = vld [vmem:[#allocation4 + $0x848] sm:$0xff] }
 0x154   :  { %2403 = vmatprep.subr.bf16.mxu0 %v12359_v53  ;;  %2622 = vmatprep.subr.bf16.mxu1 %v12361_v57  ;;  %v550_v52 = vld [vmem:[#allocation4 + $0x868] sm:$0xff]  ;;  %v224_v53 = vld [vmem:[#allocation2 + $0x78] sm:$0xff]  ;;  %v12406_v57 = vcombine.low %v537_v35, %v541_v39  ;;  %v581_v35 = vld [vmem:[#allocation4 + $0x960] sm:$0xff] }
 0x155   :  { %v12417_v2 = vcombine.high %v546_v51, %v550_v52  ;;  %v12416_v10 = vcombine.low %v546_v51, %v550_v52  ;;  %v578_v39 = vld [vmem:[#allocation4 + $0x948] sm:$0xff] }
 0x156   :  { %v586_v51 = vld [vmem:[#allocation4 + $0x988] sm:$0xff] }
 0x157   :  { %2404 = vmatpush1.bf16.msra.mxu0 %v12358_v60  ;;  %2623 = vmatpush1.bf16.msra.mxu1 %v12360_v62  ;;  %v12408_v60 = vcombine.low %v538_v40, %v542_v41  ;;  %v12415_v62 = vcombine.high %v545_v46, %v549_v48  ;;  %v582_v40 = vld [vmem:[#allocation4 + $0x968] sm:$0xff]  ;;  %v248_v41 = vld [vmem:[#allocation2 + $0x138] sm:$0xff] }
 0x158   :  { %2405 = vmatprep.subr.bf16.mxu0 %v12367_v63  ;;  %2624 = vmatprep.subr.bf16.mxu1 %v12369_v3  ;;  %v557_v63 = vld [vmem:[#allocation4 + $0x8a0] sm:$0xff]  ;;  %v15641_v3 = vpack.c.bf16 %v230_v55, %v224_v53  ;;  %v590_v52 = vld [vmem:[#allocation4 + $0x9a8] sm:$0xff]  ;;  %v12449_v53 = vcombine.high %v578_v39, %v582_v40  ;;  %v247_v55 = vld [vmem:[#allocation2 + $0x130] sm:$0xff] }
 0x159   :  { %v12423_v11 = vcombine.high %v553_v59, %v557_v63  ;;  %v12422_v19 = vcombine.low %v553_v59, %v557_v63  ;;  %v12448_v63 = vcombine.low %v578_v39, %v582_v40  ;;  %v213_v40 = vld [vmem:[#allocation2 + $0x20] sm:$0xff] }
 0x15b   :  { %2406 = vmatpush1.bf16.msra.mxu0 %v12366_v5  ;;  %2625 = vmatpush1.bf16.msra.mxu1 %v12368_v7  ;;  %v229_v5 = vld [vmem:[#allocation2 + $0xa0] sm:$0xff]  ;;  %v12414_v7 = vcombine.low %v545_v46, %v549_v48 }
 0x15c   :  { %2407 = vmatprep.subr.bf16.mxu0 %v12375_v8  ;;  %2626 = vmatprep.subr.bf16.mxu1 %v12377_v12  ;;  %v561_v8 = vld [vmem:[#allocation4 + $0x8c0] sm:$0xff]  ;;  %v562_v12 = vld [vmem:[#allocation4 + $0x8c8] sm:$0xff]  ;;  %v15647_v18 = vpack.c.bf16 %v229_v5, %v223_v4  ;;  %v12457_v5 = vcombine.high %v586_v51, %v590_v52 }
 0x15d   :  { %v12431_v23 = vcombine.high %v561_v8, %v565_v9  ;;  %v12433_v28 = vcombine.high %v562_v12, %v566_v13  ;;  %v12430_v33 = vcombine.low %v561_v8, %v565_v9  ;;  %v585_v46 = vld [vmem:[#allocation4 + $0x980] sm:$0xff]  ;;  %v214_v4 = vld [vmem:[#allocation2 + $0x28] sm:$0xff] }
 0x15f   :  { %2408 = vmatpush1.bf16.msra.mxu0 %v12374_v14  ;;  %2627 = vmatpush1.bf16.msra.mxu1 %v12376_v16  ;;  %v236_v14 = vld [vmem:[#allocation2 + $0xd8] sm:$0xff]  ;;  %v12425_v16 = vcombine.high %v554_v0, %v558_v1 }
 0x160   :  { %2409 = vmatprep.subr.bf16.mxu0 %v12383_v17  ;;  %2628 = vmatprep.subr.bf16.mxu1 %v12385_v22  ;;  %v242_v17 = vld [vmem:[#allocation2 + $0x108] sm:$0xff]  ;;  %v12424_v22 = vcombine.low %v554_v0, %v558_v1 }
 0x161   :  { %v15649_v29 = vpack.c.bf16 %v242_v17, %v236_v14  ;;  %v594_v1 = vld [vmem:[#allocation4 + $0x9c8] sm:$0xff] }
 0x162   :  { %v602_v14 = vld [vmem:[#allocation4 + $0xa08] sm:$0xff] }
 0x163   :  { %2410 = vmatpush1.bf16.msra.mxu0 %v12382_v24  ;;  %2629 = vmatpush1.bf16.msra.mxu1 %v12384_v26  ;;  %v573_v24 = vld [vmem:[#allocation4 + $0x920] sm:$0xff]  ;;  %v570_v26 = vld [vmem:[#allocation4 + $0x908] sm:$0xff] }
 0x164   :  { %2411 = vmatprep.subr.bf16.mxu0 %v12391_v27  ;;  %2630 = vmatprep.subr.bf16.mxu1 %v12393_v31  ;;  %v574_v27 = vld [vmem:[#allocation4 + $0x928] sm:$0xff]  ;;  %v241_v31 = vld [vmem:[#allocation2 + $0x100] sm:$0xff] }
 0x165   :  { %v15655_v44 = vpack.c.bf16 %v241_v31, %v235_v30  ;;  %v12440_v48 = vcombine.low %v570_v26, %v574_v27  ;;  %v606_v17 = vld [vmem:[#allocation4 + $0xa28] sm:$0xff] }
 0x166   :  { %v614_v30 = vld [vmem:[#allocation4 + $0xa68] sm:$0xff] }
 0x167   :  { %2412 = vmatpush1.bf16.msra.mxu0 %v12390_v34  ;;  %2631 = vmatpush1.bf16.msra.mxu1 %v12392_v36  ;;  %v577_v34 = vld [vmem:[#allocation4 + $0x940] sm:$0xff]  ;;  %v12432_v36 = vcombine.low %v562_v12, %v566_v13 }
 0x168   :  { %2413 = vmatprep.subr.bf16.mxu0 %v12399_v37  ;;  %2632 = vmatprep.subr.bf16.mxu1 %v12401_v42  ;;  %v12439_v37 = vcombine.high %v569_v21, %v573_v24  ;;  %v12441_v42 = vcombine.high %v570_v26, %v574_v27  ;;  %v12446_v59 = vcombine.low %v577_v34, %v581_v35  ;;  %v601_v12 = vld [vmem:[#allocation4 + $0xa00] sm:$0xff]  ;;  %v610_v27 = vld [vmem:[#allocation4 + $0xa48] sm:$0xff] }
 0x169   :  { %v605_v13 = vld [vmem:[#allocation4 + $0xa20] sm:$0xff]  ;;  %v12481_v39 = vcombine.high %v610_v27, %v614_v30 }
 0x16a   :  { %v613_v26 = vld [vmem:[#allocation4 + $0xa60] sm:$0xff]  ;;  %v12470_v31 = vcombine.low %v601_v12, %v605_v13 }
 0x16b   :  { %2414 = vmatpush1.bf16.msra.mxu0 %v12398_v45  ;;  %2633 = vmatpush1.bf16.msra.mxu1 %v12400_v49  ;;  %v12438_v45 = vcombine.low %v569_v21, %v573_v24  ;;  %v12447_v49 = vcombine.high %v577_v34, %v581_v35  ;;  %v609_v24 = vld [vmem:[#allocation4 + $0xa40] sm:$0xff]  ;;  %v283_v35 = vld [vmem:[#allocation4 + $0x10] sm:$0xff] }
 0x16c   :  { %2456 = vmatprep.subr.bf16.mxu0 %v12407_v50  ;;  %2675 = vmatprep.subr.bf16.mxu1 %v12409_v54  ;;  %v589_v50 = vld [vmem:[#allocation4 + $0x9a0] sm:$0xff]  ;;  %v15657_v54 = vpack.c.bf16 %v254_v43, %v248_v41  ;;  %v12479_v34 = vcombine.high %v609_v24, %v613_v26  ;;  %v219_v41 = vld [vmem:[#allocation2 + $0x50] sm:$0xff]  ;;  %v12478_v43 = vcombine.low %v609_v24, %v613_v26 }
 0x16d   :  { %v12455_v0 = vcombine.high %v585_v46, %v589_v50  ;;  %v12454_v9 = vcombine.low %v585_v46, %v589_v50  ;;  %v295_v46 = vld [vmem:[#allocation4 + $0x70] sm:$0xff]  ;;  %v292_v50 = vld [vmem:[#allocation4 + $0x58] sm:$0xff] }
 0x16e   :  { %2416 = vmatmul.mubr.bf16.vlgmr.msra.gmra.mrb[0].mxu0 %v15639_v56  ;;  %2635 = vmatmul.mubr.bf16.vlgmr.msra.gmra.mrb[0].mxu1 %v15639_v56 }
 0x16f   :  { %2457 = vmatpush1.bf16.msra.mxu0 %v12406_v57  ;;  %2676 = vmatpush1.bf16.msra.mxu1 %v12408_v60  ;;  %v253_v57 = vld [vmem:[#allocation2 + $0x160] sm:$0xff] }
 0x170   :  { %2458 = vmatprep.subr.bf16.mxu0 %v12415_v62  ;;  %2677 = vmatprep.subr.bf16.mxu1 %v12417_v2  ;;  %v593_v60 = vld [vmem:[#allocation4 + $0x9c0] sm:$0xff]  ;;  %v598_v2 = vld [vmem:[#allocation4 + $0x9e8] sm:$0xff]  ;;  %v15663_v8 = vpack.c.bf16 %v253_v57, %v247_v55  ;;  %v232_v55 = vld [vmem:[#allocation2 + $0xb8] sm:$0xff]  ;;  %v15673_v57 = vpack.c.bf16 %v219_v41, %v213_v40 }
 0x171   :  { %2425 = vmatprep.mubr.bf16.mxu0 %v15641_v3  ;;  %2644 = vmatprep.mubr.bf16.mxu1 %v15641_v3  ;;  %v597_v62 = vld [vmem:[#allocation4 + $0x9e0] sm:$0xff]  ;;  %v323_v41 = vld [vmem:[#allocation4 + $0x150] sm:$0xff] }
 0x172   :  { %v12462_v21 = vcombine.low %v593_v60, %v597_v62 }
 0x173   :  { %2459 = vmatpush1.bf16.msra.mxu0 %v12414_v7  ;;  %2678 = vmatpush1.bf16.msra.mxu1 %v12416_v10  ;;  %v220_v7 = vld [vmem:[#allocation2 + $0x58] sm:$0xff]  ;;  %v12456_v10 = vcombine.low %v586_v51, %v590_v52  ;;  %v226_v52 = vld [vmem:[#allocation2 + $0x88] sm:$0xff] }
 0x174   :  { %2460 = vmatprep.subr.bf16.mxu0 %v12423_v11  ;;  %2679 = vmatprep.subr.bf16.mxu1 %v12425_v16  ;;  %v12463_v11 = vcombine.high %v593_v60, %v597_v62  ;;  %v12465_v16 = vcombine.high %v594_v1, %v598_v2  ;;  %v296_v51 = vld [vmem:[#allocation4 + $0x78] sm:$0xff] }
 0x176   :  { %2426 = vmatmul.mubr.bf16.gmra.mrb[4].mxu0 %v15647_v18  ;;  %2645 = vmatmul.mubr.bf16.gmra.mrb[4].mxu1 %v15647_v18 }
 0x177   :  { %2461 = vmatpush1.bf16.msra.mxu0 %v12422_v19  ;;  %2680 = vmatpush1.bf16.msra.mxu1 %v12424_v22  ;;  %v15665_v19 = vpack.c.bf16 %v220_v7, %v214_v4  ;;  %v12464_v22 = vcombine.low %v594_v1, %v598_v2  ;;  %v300_v1 = vld [vmem:[#allocation4 + $0x98] sm:$0xff]  ;;  %v12165_v2 = vcombine.high %v292_v50, %v296_v51  ;;  %v231_v7 = vld [vmem:[#allocation2 + $0xb0] sm:$0xff] }
 0x178   :  { %2462 = vmatprep.subr.bf16.mxu0 %v12431_v23  ;;  %2681 = vmatprep.subr.bf16.mxu1 %v12433_v28  ;;  %v12471_v23 = vcombine.high %v601_v12, %v605_v13  ;;  %v12473_v28 = vcombine.high %v602_v14, %v606_v17  ;;  %v15675_v4 = vpack.c.bf16 %v232_v55, %v226_v52  ;;  %v311_v12 = vld [vmem:[#allocation4 + $0xf0] sm:$0xff] }
 0x179   :  { %2435 = vmatprep.mubr.bf16.mxu0 %v15649_v29  ;;  %2654 = vmatprep.mubr.bf16.mxu1 %v15649_v29  ;;  %v12164_v13 = vcombine.low %v292_v50, %v296_v51  ;;  %v256_v51 = vld [vmem:[#allocation2 + $0x178] sm:$0xff] }
 0x17b   :  { %2463 = vmatpush1.bf16.msra.mxu0 %v12430_v33  ;;  %2682 = vmatpush1.bf16.msra.mxu1 %v12432_v36  ;;  %v12472_v33 = vcombine.low %v602_v14, %v606_v17  ;;  %v287_v36 = vld [vmem:[#allocation4 + $0x30] sm:$0xff]  ;;  %v312_v17 = vld [vmem:[#allocation4 + $0xf8] sm:$0xff] }
 0x17c   :  { %2464 = vmatprep.subr.bf16.mxu0 %v12439_v37  ;;  %2683 = vmatprep.subr.bf16.mxu1 %v12441_v42  ;;  %v284_v37 = vld [vmem:[#allocation4 + $0x18] sm:$0xff] }
 0x17d   :  { %v288_v42 = vld [vmem:[#allocation4 + $0x38] sm:$0xff] }
 0x17e   :  { %2436 = vmatmul.mubr.bf16.gmra.mrb[8].mxu0 %v15655_v44  ;;  %2655 = vmatmul.mubr.bf16.gmra.mrb[8].mxu1 %v15655_v44  ;;  %v12156_v60 = vcombine.low %v284_v37, %v288_v42 }
 0x17f   :  { %2465 = vmatpush1.bf16.msra.mxu0 %v12438_v45  ;;  %2684 = vmatpush1.bf16.msra.mxu1 %v12440_v48  ;;  %v291_v45 = vld [vmem:[#allocation4 + $0x50] sm:$0xff]  ;;  %v12480_v48 = vcombine.low %v610_v27, %v614_v30 }
 0x180   :  { %2466 = vmatprep.subr.bf16.mxu0 %v12447_v49  ;;  %2685 = vmatprep.subr.bf16.mxu1 %v12449_v53  ;;  %v12155_v49 = vcombine.high %v283_v35, %v287_v36  ;;  %v12157_v53 = vcombine.high %v284_v37, %v288_v42  ;;  %v12163_v62 = vcombine.high %v291_v45, %v295_v46  ;;  %v315_v30 = vld [vmem:[#allocation4 + $0x110] sm:$0xff] }
 0x181   :  { %2445 = vmatprep.mubr.bf16.mxu0 %v15657_v54  ;;  %2664 = vmatprep.mubr.bf16.mxu1 %v15657_v54  ;;  %v243_v37 = vld [vmem:[#allocation2 + $0x110] sm:$0xff] }
 0x182   :  { %v327_v42 = vld [vmem:[#allocation4 + $0x170] sm:$0xff] }
 0x183   :  { %2467 = vmatpush1.bf16.msra.mxu0 %v12446_v59  ;;  %2686 = vmatpush1.bf16.msra.mxu1 %v12448_v63  ;;  %v12154_v59 = vcombine.low %v283_v35, %v287_v36  ;;  %v299_v63 = vld [vmem:[#allocation4 + $0x90] sm:$0xff]  ;;  %v237_v36 = vld [vmem:[#allocation2 + $0xe0] sm:$0xff] }
 0x184   :  { %2468 = vmatprep.subr.bf16.mxu0 %v12455_v0  ;;  %2687 = vmatprep.subr.bf16.mxu1 %v12457_v5  ;;  %v303_v0 = vld [vmem:[#allocation4 + $0xb0] sm:$0xff]  ;;  %v225_v5 = vld [vmem:[#allocation2 + $0x80] sm:$0xff]  ;;  %v15693_v52 = vpack.c.bf16 %v243_v37, %v237_v36 }
 0x185   :  { %v12171_v14 = vcombine.high %v299_v63, %v303_v0  ;;  %v15683_v24 = vpack.c.bf16 %v231_v7, %v225_v5  ;;  %v12170_v26 = vcombine.low %v299_v63, %v303_v0  ;;  %v332_v63 = vld [vmem:[#allocation4 + $0x198] sm:$0xff]  ;;  %v255_v5 = vld [vmem:[#allocation2 + $0x170] sm:$0xff] }
 0x186   :  { %2446 = vmatmul.mubr.bf16.gmra.mrb[12].mxu0 %v15663_v8  ;;  %2665 = vmatmul.mubr.bf16.gmra.mrb[12].mxu1 %v15663_v8  ;;  %v336_v7 = vld [vmem:[#allocation4 + $0x1b8] sm:$0xff] }
 0x187   :  { %2469 = vmatpush1.bf16.msra.mxu0 %v12454_v9  ;;  %2688 = vmatpush1.bf16.msra.mxu1 %v12456_v10  ;;  %v304_v9 = vld [vmem:[#allocation4 + $0xb8] sm:$0xff]  ;;  %v12162_v10 = vcombine.low %v291_v45, %v295_v46 }
 0x188   :  { %2470 = vmatprep.subr.bf16.mxu0 %v12463_v11  ;;  %2689 = vmatprep.subr.bf16.mxu1 %v12465_v16  ;;  %v307_v11 = vld [vmem:[#allocation4 + $0xd0] sm:$0xff]  ;;  %v308_v16 = vld [vmem:[#allocation4 + $0xd8] sm:$0xff]  ;;  %v12172_v27 = vcombine.low %v300_v1, %v304_v9 }
 0x189   :  { %12486 = vmatprep.mubr.msk.bf16.mxu0 %vm2297_vm0, %v15665_v19  ;;  %12490 = vmatprep.mubr.msk.bf16.mxu1 %vm2297_vm0, %v15665_v19  ;;  %v12178_v40 = vcombine.low %v307_v11, %v311_v12  ;;  %v324_v46 = vld [vmem:[#allocation4 + $0x158] sm:$0xff] }
 0x18b   :  { %2471 = vmatpush1.bf16.msra.mxu0 %v12462_v21  ;;  %2690 = vmatpush1.bf16.msra.mxu1 %v12464_v22  ;;  %v238_v21 = vld [vmem:[#allocation2 + $0xe8] sm:$0xff]  ;;  %v12173_v22 = vcombine.high %v300_v1, %v304_v9  ;;  %v12194_v9 = vcombine.low %v323_v41, %v327_v42 }
 0x18c   :  { %2472 = vmatprep.subr.bf16.mxu0 %v12471_v23  ;;  %2691 = vmatprep.subr.bf16.mxu1 %v12473_v28  ;;  %v244_v23 = vld [vmem:[#allocation2 + $0x118] sm:$0xff]  ;;  %v12179_v28 = vcombine.high %v307_v11, %v311_v12  ;;  %v339_v12 = vld [vmem:[#allocation4 + $0x1d0] sm:$0xff] }
 0x18d   :  { %v15685_v35 = vpack.c.bf16 %v244_v23, %v238_v21  ;;  %v12204_v23 = vcombine.low %v332_v63, %v336_v7 }
 0x18f   :  { %2473 = vmatpush1.bf16.msra.mxu0 %v12470_v31  ;;  %2692 = vmatpush1.bf16.msra.mxu1 %v12472_v33  ;;  %v319_v31 = vld [vmem:[#allocation4 + $0x130] sm:$0xff]  ;;  %v316_v33 = vld [vmem:[#allocation4 + $0x118] sm:$0xff] }
 0x190   :  { %2474 = vmatprep.subr.bf16.mxu0 %v12479_v34  ;;  %2693 = vmatprep.subr.bf16.mxu1 %v12481_v39  ;;  %v12181_v34 = vcombine.high %v308_v16, %v312_v17  ;;  %v320_v39 = vld [vmem:[#allocation4 + $0x138] sm:$0xff]  ;;  %v12187_v45 = vcombine.high %v315_v30, %v319_v31 }
 0x191   :  { %v12189_v50 = vcombine.high %v316_v33, %v320_v39  ;;  %v12188_v55 = vcombine.low %v316_v33, %v320_v39  ;;  %v352_v33 = vld [vmem:[#allocation4 + $0x238] sm:$0xff]  ;;  %v355_v39 = vld [vmem:[#allocation4 + $0x250] sm:$0xff] }
 0x193   :  { %2475 = vmatpush1.bf16.msra.mxu0 %v12478_v43  ;;  %2694 = vmatpush1.bf16.msra.mxu1 %v12480_v48  ;;  %v12180_v43 = vcombine.low %v308_v16, %v312_v17  ;;  %v328_v48 = vld [vmem:[#allocation4 + $0x178] sm:$0xff]  ;;  %v12205_v16 = vcombine.high %v332_v63, %v336_v7  ;;  %v371_v63 = vld [vmem:[#allocation4 + $0x2d0] sm:$0xff] }
 0x194   :  { %2748 = vmatprep.subr.bf16.mxu0 %v12155_v49  ;;  %2967 = vmatprep.subr.bf16.mxu1 %v12157_v53  ;;  %v250_v49 = vld [vmem:[#allocation2 + $0x148] sm:$0xff]  ;;  %v12186_v53 = vcombine.low %v315_v30, %v319_v31  ;;  %v12197_v0 = vcombine.high %v324_v46, %v328_v48  ;;  %v344_v17 = vld [vmem:[#allocation4 + $0x1f8] sm:$0xff] }
 0x195   :  { %v15695_v1 = vpack.c.bf16 %v256_v51, %v250_v49  ;;  %v348_v30 = vld [vmem:[#allocation4 + $0x218] sm:$0xff]  ;;  %v363_v49 = vld [vmem:[#allocation4 + $0x290] sm:$0xff] }
 0x196   :  { %2489 = vmatmul.mubr.bf16.vlgmr.msra.gmra.mrb[0].mxu0 %v15673_v57  ;;  %2708 = vmatmul.mubr.bf16.vlgmr.msra.gmra.mrb[0].mxu1 %v15673_v57  ;;  %v364_v51 = vld [vmem:[#allocation4 + $0x298] sm:$0xff] }
 0x197   :  { %2749 = vmatpush1.bf16.msra.mxu0 %v12154_v59  ;;  %2968 = vmatpush1.bf16.msra.mxu1 %v12156_v60  ;;  %v12195_v59 = vcombine.high %v323_v41, %v327_v42  ;;  %v331_v60 = vld [vmem:[#allocation4 + $0x190] sm:$0xff]  ;;  %v356_v41 = vld [vmem:[#allocation4 + $0x258] sm:$0xff]  ;;  %v12221_v42 = vcombine.high %v348_v30, %v352_v33 }
 0x198   :  { %2750 = vmatprep.subr.bf16.mxu0 %v12163_v62  ;;  %2969 = vmatprep.subr.bf16.mxu1 %v12165_v2  ;;  %v335_v62 = vld [vmem:[#allocation4 + $0x1b0] sm:$0xff]  ;;  %v249_v2 = vld [vmem:[#allocation2 + $0x140] sm:$0xff] }
 0x199   :  { %12487 = vmatprep.mubr.msk.bf16.mxu0 %vm2297_vm0, %v15675_v4  ;;  %12491 = vmatprep.mubr.msk.bf16.mxu1 %vm2297_vm0, %v15675_v4  ;;  %v12203_v11 = vcombine.high %v331_v60, %v335_v62  ;;  %v15703_v21 = vpack.c.bf16 %v255_v5, %v249_v2  ;;  %v376_v5 = vld [vmem:[#allocation4 + $0x2f8] sm:$0xff] }
 0x19b   :  { %2751 = vmatpush1.bf16.msra.mxu0 %v12162_v10  ;;  %2970 = vmatpush1.bf16.msra.mxu1 %v12164_v13  ;;  %v12196_v10 = vcombine.low %v324_v46, %v328_v48  ;;  %v343_v13 = vld [vmem:[#allocation4 + $0x1f0] sm:$0xff]  ;;  %v12220_v46 = vcombine.low %v348_v30, %v352_v33  ;;  %v392_v30 = vld [vmem:[#allocation4 + $0x378] sm:$0xff] }
 0x19c   :  { %2752 = vmatprep.subr.bf16.mxu0 %v12171_v14  ;;  %2971 = vmatprep.subr.bf16.mxu1 %v12173_v22  ;;  %v340_v14 = vld [vmem:[#allocation4 + $0x1d8] sm:$0xff]  ;;  %v12202_v22 = vcombine.low %v331_v60, %v335_v62 }
 0x19d   :  { %v12213_v31 = vcombine.high %v340_v14, %v344_v17  ;;  %v12212_v36 = vcombine.low %v340_v14, %v344_v17  ;;  %v384_v14 = vld [vmem:[#allocation4 + $0x338] sm:$0xff] }
 0x19e   :  { %2499 = vmatmul.mubr.bf16.gmra.mrb[4].mxu0 %v15683_v24  ;;  %2718 = vmatmul.mubr.bf16.gmra.mrb[4].mxu1 %v15683_v24 }
 0x19f   :  { %2753 = vmatpush1.bf16.msra.mxu0 %v12170_v26  ;;  %2972 = vmatpush1.bf16.msra.mxu1 %v12172_v27  ;;  %v12211_v26 = vcombine.high %v339_v12, %v343_v13  ;;  %v347_v27 = vld [vmem:[#allocation4 + $0x210] sm:$0xff] }
 0x1a0   :  { %2754 = vmatprep.subr.bf16.mxu0 %v12179_v28  ;;  %2973 = vmatprep.subr.bf16.mxu1 %v12181_v34  ;;  %v351_v28 = vld [vmem:[#allocation4 + $0x230] sm:$0xff]  ;;  %v12210_v34 = vcombine.low %v339_v12, %v343_v13  ;;  %v380_v13 = vld [vmem:[#allocation4 + $0x318] sm:$0xff] }
 0x1a1   :  { %12488 = vmatprep.mubr.msk.bf16.mxu0 %vm2297_vm0, %v15685_v35  ;;  %12492 = vmatprep.mubr.msk.bf16.mxu1 %vm2297_vm0, %v15685_v35  ;;  %v12219_v37 = vcombine.high %v347_v27, %v351_v28 }
 0x1a3   :  { %2755 = vmatpush1.bf16.msra.mxu0 %v12178_v40  ;;  %2974 = vmatpush1.bf16.msra.mxu1 %v12180_v43  ;;  %v359_v40 = vld [vmem:[#allocation4 + $0x270] sm:$0xff]  ;;  %v360_v43 = vld [vmem:[#allocation4 + $0x278] sm:$0xff] }
 0x1a4   :  { %2756 = vmatprep.subr.bf16.mxu0 %v12187_v45  ;;  %2975 = vmatprep.subr.bf16.mxu1 %v12189_v50  ;;  %v12218_v45 = vcombine.low %v347_v27, %v351_v28  ;;  %v12227_v48 = vcombine.high %v355_v39, %v359_v40  ;;  %v367_v50 = vld [vmem:[#allocation4 + $0x2b0] sm:$0xff]  ;;  %v12228_v60 = vcombine.low %v356_v41, %v360_v43  ;;  %v388_v28 = vld [vmem:[#allocation4 + $0x358] sm:$0xff] }
 0x1a5   :  { %v12235_v62 = vcombine.high %v363_v49, %v367_v50  ;;  %v12234_v7 = vcombine.low %v363_v49, %v367_v50  ;;  %v404_v50 = vld [vmem:[#allocation4 + $0x3d8] sm:$0xff] }
 0x1a6   :  { %2509 = vmatmul.mubr.bf16.gmra.mrb[8].mxu0 %v15693_v52  ;;  %2728 = vmatmul.mubr.bf16.gmra.mrb[8].mxu1 %v15693_v52 }
 0x1a7   :  { %2757 = vmatpush1.bf16.msra.mxu0 %v12186_v53  ;;  %2976 = vmatpush1.bf16.msra.mxu1 %v12188_v55  ;;  %v12229_v53 = vcombine.high %v356_v41, %v360_v43  ;;  %v368_v55 = vld [vmem:[#allocation4 + $0x2b8] sm:$0xff] }
 0x1a8   :  { %2758 = vmatprep.subr.bf16.mxu0 %v12195_v59  ;;  %2977 = vmatprep.subr.bf16.mxu1 %v12197_v0  ;;  %v12226_v59 = vcombine.low %v355_v39, %v359_v40  ;;  %v372_v0 = vld [vmem:[#allocation4 + $0x2d8] sm:$0xff]  ;;  %v12237_v2 = vcombine.high %v364_v51, %v368_v55 }
 0x1a9   :  { %12489 = vmatprep.mubr.msk.bf16.mxu0 %vm2297_vm0, %v15695_v1  ;;  %12493 = vmatprep.mubr.msk.bf16.mxu1 %vm2297_vm0, %v15695_v1  ;;  %v396_v40 = vld [vmem:[#allocation4 + $0x398] sm:$0xff] }
 0x1aa   :  { %v400_v41 = vld [vmem:[#allocation4 + $0x3b8] sm:$0xff] }
 0x1ab   :  { %2759 = vmatpush1.bf16.msra.mxu0 %v12194_v9  ;;  %2978 = vmatpush1.bf16.msra.mxu1 %v12196_v10  ;;  %v379_v9 = vld [vmem:[#allocation4 + $0x310] sm:$0xff] }
 0x1ac   :  { %2760 = vmatprep.subr.bf16.mxu0 %v12203_v11  ;;  %2979 = vmatprep.subr.bf16.mxu1 %v12205_v16  ;;  %v383_v10 = vld [vmem:[#allocation4 + $0x330] sm:$0xff]  ;;  %v12236_v11 = vcombine.low %v364_v51, %v368_v55  ;;  %v12245_v16 = vcombine.high %v372_v0, %v376_v5  ;;  %v408_v51 = vld [vmem:[#allocation4 + $0x3f8] sm:$0xff] }
 0x1ad   :  { %v12251_v27 = vcombine.high %v379_v9, %v383_v10  ;;  %v12250_v33 = vcombine.low %v379_v9, %v383_v10  ;;  %v423_v9 = vld [vmem:[#allocation4 + $0x470] sm:$0xff]  ;;  %v12276_v10 = vcombine.low %v404_v50, %v408_v51 }
 0x1ae   :  { %2519 = vmatmul.mubr.bf16.gmra.mrb[12].mxu0 %v15703_v21  ;;  %2738 = vmatmul.mubr.bf16.gmra.mrb[12].mxu1 %v15703_v21 }
 0x1af   :  { %2761 = vmatpush1.bf16.msra.mxu0 %v12202_v22  ;;  %2980 = vmatpush1.bf16.msra.mxu1 %v12204_v23  ;;  %v387_v22 = vld [vmem:[#allocation4 + $0x350] sm:$0xff] }
 0x1b0   :  { %2762 = vmatprep.subr.bf16.mxu0 %v12211_v26  ;;  %2981 = vmatprep.subr.bf16.mxu1 %v12213_v31  ;;  %v391_v23 = vld [vmem:[#allocation4 + $0x370] sm:$0xff]  ;;  %v12244_v26 = vcombine.low %v372_v0, %v376_v5  ;;  %v12253_v31 = vcombine.high %v380_v13, %v384_v14  ;;  %v416_v0 = vld [vmem:[#allocation4 + $0x438] sm:$0xff] }
 0x1b1   :  { %2780 = vmatprep.mubr.bf16.mxu0 %v15603_v58  ;;  %2999 = vmatprep.mubr.bf16.mxu1 %v15603_v58  ;;  %v375_v58 = vld [vmem:[#allocation4 + $0x2f0] sm:$0xff]  ;;  %v12259_v39 = vcombine.high %v387_v22, %v391_v23  ;;  %v12258_v43 = vcombine.low %v387_v22, %v391_v23 }
 0x1b2   :  { %v12243_v12 = vcombine.high %v371_v63, %v375_v58  ;;  %v12242_v17 = vcombine.low %v371_v63, %v375_v58  ;;  %v412_v58 = vld [vmem:[#allocation4 + $0x418] sm:$0xff]  ;;  %v431_v22 = vld [vmem:[#allocation4 + $0x4b0] sm:$0xff] }
 0x1b3   :  { %2763 = vmatpush1.bf16.msra.mxu0 %v12210_v34  ;;  %2982 = vmatpush1.bf16.msra.mxu1 %v12212_v36  ;;  %v395_v34 = vld [vmem:[#allocation4 + $0x390] sm:$0xff]  ;;  %v12284_v23 = vcombine.low %v412_v58, %v416_v0 }
 0x1b4   :  { %2764 = vmatprep.subr.bf16.mxu0 %v12219_v37  ;;  %2983 = vmatprep.subr.bf16.mxu1 %v12221_v42  ;;  %v399_v36 = vld [vmem:[#allocation4 + $0x3b0] sm:$0xff]  ;;  %v12252_v37 = vcombine.low %v380_v13, %v384_v14  ;;  %v12261_v42 = vcombine.high %v388_v28, %v392_v30  ;;  %v424_v13 = vld [vmem:[#allocation4 + $0x478] sm:$0xff]  ;;  %v12285_v14 = vcombine.high %v412_v58, %v416_v0 }
 0x1b5   :  { %v12267_v49 = vcombine.high %v395_v34, %v399_v36  ;;  %v12266_v55 = vcombine.low %v395_v34, %v399_v36  ;;  %v439_v34 = vld [vmem:[#allocation4 + $0x4f0] sm:$0xff] }
 0x1b6   :  { %v459_v0 = vld [vmem:[#allocation4 + $0x590] sm:$0xff] }
 0x1b7   :  { %2765 = vmatpush1.bf16.msra.mxu0 %v12218_v45  ;;  %2984 = vmatpush1.bf16.msra.mxu1 %v12220_v46  ;;  %v403_v45 = vld [vmem:[#allocation4 + $0x3d0] sm:$0xff] }
 0x1b8   :  { %2766 = vmatprep.subr.bf16.mxu0 %v12227_v48  ;;  %2985 = vmatprep.subr.bf16.mxu1 %v12229_v53  ;;  %v407_v46 = vld [vmem:[#allocation4 + $0x3f0] sm:$0xff]  ;;  %v12260_v48 = vcombine.low %v388_v28, %v392_v30  ;;  %v12269_v53 = vcombine.high %v396_v40, %v400_v41  ;;  %v432_v28 = vld [vmem:[#allocation4 + $0x4b8] sm:$0xff] }
 0x1b9   :  { %v12275_v63 = vcombine.high %v403_v45, %v407_v46  ;;  %v12274_v5 = vcombine.low %v403_v45, %v407_v46  ;;  %v447_v45 = vld [vmem:[#allocation4 + $0x530] sm:$0xff] }
 0x1bb   :  { %2767 = vmatpush1.bf16.msra.mxu0 %v12226_v59  ;;  %2986 = vmatpush1.bf16.msra.mxu1 %v12228_v60  ;;  %v411_v59 = vld [vmem:[#allocation4 + $0x410] sm:$0xff] }
 0x1bc   :  { %2768 = vmatprep.subr.bf16.mxu0 %v12235_v62  ;;  %2987 = vmatprep.subr.bf16.mxu1 %v12237_v2  ;;  %v415_v60 = vld [vmem:[#allocation4 + $0x430] sm:$0xff]  ;;  %v12268_v62 = vcombine.low %v396_v40, %v400_v41  ;;  %v12277_v2 = vcombine.high %v404_v50, %v408_v51  ;;  %v440_v40 = vld [vmem:[#allocation4 + $0x4f8] sm:$0xff] }
 0x1bf   :  { %2769 = vmatpush1.bf16.msra.mxu0 %v12234_v7  ;;  %2988 = vmatpush1.bf16.msra.mxu1 %v12236_v11  ;;  %v419_v7 = vld [vmem:[#allocation4 + $0x450] sm:$0xff]  ;;  %v12283_v11 = vcombine.high %v411_v59, %v415_v60 }
 0x1c0   :  { %2770 = vmatprep.subr.bf16.mxu0 %v12243_v12  ;;  %2989 = vmatprep.subr.bf16.mxu1 %v12245_v16  ;;  %v420_v12 = vld [vmem:[#allocation4 + $0x458] sm:$0xff]  ;;  %v12282_v16 = vcombine.low %v411_v59, %v415_v60 }
 0x1c1   :  { %v12293_v30 = vcombine.high %v420_v12, %v424_v13  ;;  %v12292_v36 = vcombine.low %v420_v12, %v424_v13  ;;  %v452_v60 = vld [vmem:[#allocation4 + $0x558] sm:$0xff]  ;;  %v467_v12 = vld [vmem:[#allocation4 + $0x5d0] sm:$0xff] }
 0x1c2   :  { %v471_v13 = vld [vmem:[#allocation4 + $0x5f0] sm:$0xff] }
 0x1c3   :  { %2771 = vmatpush1.bf16.msra.mxu0 %v12242_v17  ;;  %2990 = vmatpush1.bf16.msra.mxu1 %v12244_v26  ;;  %v427_v17 = vld [vmem:[#allocation4 + $0x490] sm:$0xff]  ;;  %v12291_v26 = vcombine.high %v419_v7, %v423_v9 }
 0x1c4   :  { %2772 = vmatprep.subr.bf16.mxu0 %v12251_v27  ;;  %2991 = vmatprep.subr.bf16.mxu1 %v12253_v31  ;;  %v428_v27 = vld [vmem:[#allocation4 + $0x498] sm:$0xff]  ;;  %v12290_v31 = vcombine.low %v419_v7, %v423_v9 }
 0x1c5   :  { %v12301_v41 = vcombine.high %v428_v27, %v432_v28  ;;  %v460_v7 = vld [vmem:[#allocation4 + $0x598] sm:$0xff] }
 0x1c6   :  { %v464_v9 = vld [vmem:[#allocation4 + $0x5b8] sm:$0xff] }
 0x1c7   :  { %2773 = vmatpush1.bf16.msra.mxu0 %v12250_v33  ;;  %2992 = vmatpush1.bf16.msra.mxu1 %v12252_v37  ;;  %v435_v33 = vld [vmem:[#allocation4 + $0x4d0] sm:$0xff]  ;;  %v12299_v37 = vcombine.high %v427_v17, %v431_v22 }
 0x1c8   :  { %2774 = vmatprep.subr.bf16.mxu0 %v12259_v39  ;;  %2993 = vmatprep.subr.bf16.mxu1 %v12261_v42  ;;  %v436_v39 = vld [vmem:[#allocation4 + $0x4d8] sm:$0xff]  ;;  %v12298_v42 = vcombine.low %v427_v17, %v431_v22  ;;  %v12307_v46 = vcombine.high %v435_v33, %v439_v34  ;;  %v12306_v51 = vcombine.low %v435_v33, %v439_v34 }
 0x1c9   :  { %v12309_v50 = vcombine.high %v436_v39, %v440_v40  ;;  %v472_v17 = vld [vmem:[#allocation4 + $0x5f8] sm:$0xff]  ;;  %v12333_v22 = vcombine.high %v460_v7, %v464_v9  ;;  %v12338_v34 = vcombine.low %v467_v12, %v471_v13 }
 0x1cb   :  { %2775 = vmatpush1.bf16.msra.mxu0 %v12258_v43  ;;  %2994 = vmatpush1.bf16.msra.mxu1 %v12260_v48  ;;  %v443_v43 = vld [vmem:[#allocation4 + $0x510] sm:$0xff]  ;;  %v444_v48 = vld [vmem:[#allocation4 + $0x518] sm:$0xff] }
 0x1cc   :  { %2776 = vmatprep.subr.bf16.mxu0 %v12267_v49  ;;  %2995 = vmatprep.subr.bf16.mxu1 %v12269_v53  ;;  %v448_v49 = vld [vmem:[#allocation4 + $0x538] sm:$0xff]  ;;  %v451_v53 = vld [vmem:[#allocation4 + $0x550] sm:$0xff]  ;;  %v12315_v59 = vcombine.high %v443_v43, %v447_v45  ;;  %v12314_v58 = vcombine.low %v443_v43, %v447_v45 }
 0x1cd   :  { %v491_v45 = vld [vmem:[#allocation4 + $0x690] sm:$0xff] }
 0x1cf   :  { %2777 = vmatpush1.bf16.msra.mxu0 %v12266_v55  ;;  %2996 = vmatpush1.bf16.msra.mxu1 %v12268_v62  ;;  %v455_v55 = vld [vmem:[#allocation4 + $0x570] sm:$0xff]  ;;  %v456_v62 = vld [vmem:[#allocation4 + $0x578] sm:$0xff] }
 0x1d0   :  { %2778 = vmatprep.subr.bf16.mxu0 %v12275_v63  ;;  %2997 = vmatprep.subr.bf16.mxu1 %v12277_v2  ;;  %v12317_v63 = vcombine.high %v444_v48, %v448_v49  ;;  %v463_v2 = vld [vmem:[#allocation4 + $0x5b0] sm:$0xff] }
 0x1d3   :  { %2779 = vmatpush1.bf16.msra.mxu0 %v12274_v5  ;;  %2998 = vmatpush1.bf16.msra.mxu1 %v12276_v10  ;;  %v12316_v5 = vcombine.low %v444_v48, %v448_v49  ;;  %v12325_v10 = vcombine.high %v452_v60, %v456_v62  ;;  %v492_v48 = vld [vmem:[#allocation4 + $0x698] sm:$0xff] }
 0x1d4   :  { %2821 = vmatprep.subr.bf16.mxu0 %v12283_v11  ;;  %3040 = vmatprep.subr.bf16.mxu1 %v12285_v14  ;;  %v12322_v11 = vcombine.low %v451_v53, %v455_v55  ;;  %v12331_v14 = vcombine.high %v459_v0, %v463_v2  ;;  %v496_v49 = vld [vmem:[#allocation4 + $0x6b8] sm:$0xff] }
 0x1d6   :  { %2781 = vmatmul.mubr.bf16.vlgmr.msra.gmra.mrb[16].mxu0 %v15607_v15  ;;  %3000 = vmatmul.mubr.bf16.vlgmr.msra.gmra.mrb[16].mxu1 %v15607_v15  ;;  %v12300_v15 = vcombine.low %v428_v27, %v432_v28  ;;  %v479_v27 = vld [vmem:[#allocation4 + $0x630] sm:$0xff]  ;;  %v12332_v28 = vcombine.low %v460_v7, %v464_v9  ;;  %v512_v7 = vld [vmem:[#allocation4 + $0x738] sm:$0xff] }
 0x1d7   :  { %2822 = vmatpush1.bf16.msra.mxu0 %v12282_v16  ;;  %3041 = vmatpush1.bf16.msra.mxu1 %v12284_v23  ;;  %v468_v16 = vld [vmem:[#allocation4 + $0x5d8] sm:$0xff]  ;;  %v12330_v23 = vcombine.low %v459_v0, %v463_v2  ;;  %v511_v0 = vld [vmem:[#allocation4 + $0x730] sm:$0xff]  ;;  %v12364_v2 = vcombine.low %v492_v48, %v496_v49 }
 0x1d8   :  { %2823 = vmatprep.subr.bf16.mxu0 %v12291_v26  ;;  %3042 = vmatprep.subr.bf16.mxu1 %v12293_v30  ;;  %v475_v26 = vld [vmem:[#allocation4 + $0x610] sm:$0xff]  ;;  %v476_v30 = vld [vmem:[#allocation4 + $0x618] sm:$0xff]  ;;  %v12341_v33 = vcombine.high %v468_v16, %v472_v17 }
 0x1d9   :  { %2790 = vmatprep.mubr.bf16.mxu0 %v15609_v25  ;;  %3009 = vmatprep.mubr.bf16.mxu1 %v15609_v25  ;;  %v12308_v25 = vcombine.low %v436_v39, %v440_v40  ;;  %v12347_v39 = vcombine.high %v475_v26, %v479_v27  ;;  %v484_v40 = vld [vmem:[#allocation4 + $0x658] sm:$0xff]  ;;  %v12346_v43 = vcombine.low %v475_v26, %v479_v27  ;;  %v527_v26 = vld [vmem:[#allocation4 + $0x7b0] sm:$0xff] }
 0x1db   :  { %2824 = vmatpush1.bf16.msra.mxu0 %v12290_v31  ;;  %3043 = vmatpush1.bf16.msra.mxu1 %v12292_v36  ;;  %v480_v31 = vld [vmem:[#allocation4 + $0x638] sm:$0xff]  ;;  %v483_v36 = vld [vmem:[#allocation4 + $0x650] sm:$0xff] }
 0x1dc   :  { %2825 = vmatprep.subr.bf16.mxu0 %v12299_v37  ;;  %3044 = vmatprep.subr.bf16.mxu1 %v12301_v41  ;;  %v487_v37 = vld [vmem:[#allocation4 + $0x670] sm:$0xff]  ;;  %v488_v41 = vld [vmem:[#allocation4 + $0x678] sm:$0xff] }
 0x1de   :  { %2791 = vmatmul.mubr.bf16.gmra.mrb[20].mxu0 %v15615_v38  ;;  %3010 = vmatmul.mubr.bf16.gmra.mrb[20].mxu1 %v15615_v38  ;;  %v12323_v38 = vcombine.high %v451_v53, %v455_v55  ;;  %v499_v53 = vld [vmem:[#allocation4 + $0x6d0] sm:$0xff] }
 0x1df   :  { %2826 = vmatpush1.bf16.msra.mxu0 %v12298_v42  ;;  %3045 = vmatpush1.bf16.msra.mxu1 %v12300_v15  ;;  %v12349_v42 = vcombine.high %v476_v30, %v480_v31  ;;  %v495_v15 = vld [vmem:[#allocation4 + $0x6b0] sm:$0xff] }
 0x1e0   :  { %2827 = vmatprep.subr.bf16.mxu0 %v12307_v46  ;;  %3046 = vmatprep.subr.bf16.mxu1 %v12309_v50  ;;  %v12348_v46 = vcombine.low %v476_v30, %v480_v31  ;;  %v12357_v50 = vcombine.high %v484_v40, %v488_v41  ;;  %v503_v55 = vld [vmem:[#allocation4 + $0x6f0] sm:$0xff]  ;;  %v528_v30 = vld [vmem:[#allocation4 + $0x7b8] sm:$0xff] }
 0x1e1   :  { %2800 = vmatprep.mubr.bf16.mxu0 %v15617_v47  ;;  %3019 = vmatprep.mubr.bf16.mxu1 %v15617_v47  ;;  %v12324_v47 = vcombine.low %v452_v60, %v456_v62  ;;  %v504_v60 = vld [vmem:[#allocation4 + $0x6f8] sm:$0xff]  ;;  %v12365_v62 = vcombine.high %v492_v48, %v496_v49 }
 0x1e2   :  { %v540_v48 = vld [vmem:[#allocation4 + $0x818] sm:$0xff] }
 0x1e3   :  { %2828 = vmatpush1.bf16.msra.mxu0 %v12306_v51  ;;  %3047 = vmatpush1.bf16.msra.mxu1 %v12308_v25  ;;  %v12354_v51 = vcombine.low %v483_v36, %v487_v37  ;;  %v12356_v25 = vcombine.low %v484_v40, %v488_v41  ;;  %v532_v40 = vld [vmem:[#allocation4 + $0x7d8] sm:$0xff] }
 0x1e4   :  { %2829 = vmatprep.subr.bf16.mxu0 %v12315_v59  ;;  %3048 = vmatprep.subr.bf16.mxu1 %v12317_v63  ;;  %v500_v59 = vld [vmem:[#allocation4 + $0x6d8] sm:$0xff]  ;;  %v12362_v63 = vcombine.low %v491_v45, %v495_v15 }
 0x1e5   :  { %v12373_v9 = vcombine.high %v500_v59, %v504_v60  ;;  %v536_v41 = vld [vmem:[#allocation4 + $0x7f8] sm:$0xff] }
 0x1e6   :  { %2801 = vmatmul.mubr.bf16.gmra.mrb[24].mxu0 %v15623_v61  ;;  %3020 = vmatmul.mubr.bf16.gmra.mrb[24].mxu1 %v15623_v61  ;;  %v12339_v61 = vcombine.high %v467_v12, %v471_v13  ;;  %v519_v12 = vld [vmem:[#allocation4 + $0x770] sm:$0xff]  ;;  %v12372_v13 = vcombine.low %v500_v59, %v504_v60  ;;  %v544_v49 = vld [vmem:[#allocation4 + $0x838] sm:$0xff] }
 0x1e7   :  { %2830 = vmatpush1.bf16.msra.mxu0 %v12314_v58  ;;  %3049 = vmatpush1.bf16.msra.mxu1 %v12316_v5  ;;  %v507_v58 = vld [vmem:[#allocation4 + $0x710] sm:$0xff]  ;;  %v12371_v5 = vcombine.high %v499_v53, %v503_v55  ;;  %v548_v59 = vld [vmem:[#allocation4 + $0x858] sm:$0xff] }
 0x1e8   :  { %2831 = vmatprep.subr.bf16.mxu0 %v12323_v38  ;;  %3050 = vmatprep.subr.bf16.mxu1 %v12325_v10  ;;  %v508_v38 = vld [vmem:[#allocation4 + $0x718] sm:$0xff]  ;;  %v12370_v10 = vcombine.low %v499_v53, %v503_v55  ;;  %v551_v53 = vld [vmem:[#allocation4 + $0x870] sm:$0xff]  ;;  %v12404_v55 = vcombine.low %v532_v40, %v536_v41 }
 0x1e9   :  { %2810 = vmatprep.mubr.bf16.mxu0 %v15625_v6  ;;  %3029 = vmatprep.mubr.bf16.mxu1 %v15625_v6  ;;  %v12340_v6 = vcombine.low %v468_v16, %v472_v17  ;;  %v520_v16 = vld [vmem:[#allocation4 + $0x778] sm:$0xff]  ;;  %v12381_v17 = vcombine.high %v508_v38, %v512_v7  ;;  %v12380_v27 = vcombine.low %v508_v38, %v512_v7 }
 0x1ea   :  { %v552_v60 = vld [vmem:[#allocation4 + $0x878] sm:$0xff] }
 0x1eb   :  { %2832 = vmatpush1.bf16.msra.mxu0 %v12322_v11  ;;  %3051 = vmatpush1.bf16.msra.mxu1 %v12324_v47  ;;  %v515_v11 = vld [vmem:[#allocation4 + $0x750] sm:$0xff]  ;;  %v12379_v47 = vcombine.high %v507_v58, %v511_v0  ;;  %v556_v38 = vld [vmem:[#allocation4 + $0x898] sm:$0xff] }
 0x1ec   :  { %2833 = vmatprep.subr.bf16.mxu0 %v12331_v14  ;;  %3052 = vmatprep.subr.bf16.mxu1 %v12333_v22  ;;  %v516_v14 = vld [vmem:[#allocation4 + $0x758] sm:$0xff]  ;;  %v12378_v22 = vcombine.low %v507_v58, %v511_v0  ;;  %v559_v58 = vld [vmem:[#allocation4 + $0x8b0] sm:$0xff]  ;;  %v12412_v0 = vcombine.low %v540_v48, %v544_v49 }
 0x1ed   :  { %v12389_v31 = vcombine.high %v516_v14, %v520_v16  ;;  %v560_v7 = vld [vmem:[#allocation4 + $0x8b8] sm:$0xff] }
 0x1ee   :  { %2811 = vmatmul.mubr.bf16.gmra.mrb[28].mxu0 %v15631_v20  ;;  %3030 = vmatmul.mubr.bf16.gmra.mrb[28].mxu1 %v15631_v20  ;;  %v12355_v20 = vcombine.high %v483_v36, %v487_v37  ;;  %v535_v36 = vld [vmem:[#allocation4 + $0x7f0] sm:$0xff]  ;;  %v12388_v37 = vcombine.low %v516_v14, %v520_v16  ;;  %v564_v14 = vld [vmem:[#allocation4 + $0x8d8] sm:$0xff] }
 0x1ef   :  { %2834 = vmatpush1.bf16.msra.mxu0 %v12330_v23  ;;  %3053 = vmatpush1.bf16.msra.mxu1 %v12332_v28  ;;  %v523_v23 = vld [vmem:[#allocation4 + $0x790] sm:$0xff]  ;;  %v12387_v28 = vcombine.high %v515_v11, %v519_v12  ;;  %v568_v16 = vld [vmem:[#allocation4 + $0x8f8] sm:$0xff] }
 0x1f0   :  { %2835 = vmatprep.subr.bf16.mxu0 %v12339_v61  ;;  %3054 = vmatprep.subr.bf16.mxu1 %v12341_v33  ;;  %v524_v61 = vld [vmem:[#allocation4 + $0x798] sm:$0xff]  ;;  %v12386_v33 = vcombine.low %v515_v11, %v519_v12  ;;  %v567_v11 = vld [vmem:[#allocation4 + $0x8f0] sm:$0xff]  ;;  %v12420_v12 = vcombine.low %v548_v59, %v552_v60 }
 0x1f1   :  { %2853 = vmatprep.mubr.bf16.mxu0 %v15633_v32  ;;  %3072 = vmatprep.mubr.bf16.mxu1 %v15633_v32  ;;  %v12363_v32 = vcombine.high %v491_v45, %v495_v15  ;;  %v543_v45 = vld [vmem:[#allocation4 + $0x830] sm:$0xff]  ;;  %v12396_v15 = vcombine.low %v524_v61, %v528_v30 }
 0x1f3   :  { %2836 = vmatpush1.bf16.msra.mxu0 %v12338_v34  ;;  %3055 = vmatpush1.bf16.msra.mxu1 %v12340_v6  ;;  %v531_v34 = vld [vmem:[#allocation4 + $0x7d0] sm:$0xff]  ;;  %v12395_v6 = vcombine.high %v523_v23, %v527_v26 }
 0x1f4   :  { %2837 = vmatprep.subr.bf16.mxu0 %v12347_v39  ;;  %3056 = vmatprep.subr.bf16.mxu1 %v12349_v42  ;;  %v12397_v39 = vcombine.high %v524_v61, %v528_v30  ;;  %v12394_v42 = vcombine.low %v523_v23, %v527_v26  ;;  %v575_v23 = vld [vmem:[#allocation4 + $0x930] sm:$0xff]  ;;  %v576_v61 = vld [vmem:[#allocation4 + $0x938] sm:$0xff] }
 0x1f7   :  { %2838 = vmatpush1.bf16.msra.mxu0 %v12346_v43  ;;  %3057 = vmatpush1.bf16.msra.mxu1 %v12348_v46  ;;  %v539_v43 = vld [vmem:[#allocation4 + $0x810] sm:$0xff]  ;;  %v12403_v46 = vcombine.high %v531_v34, %v535_v36 }
 0x1f8   :  { %2839 = vmatprep.subr.bf16.mxu0 %v12355_v20  ;;  %3058 = vmatprep.subr.bf16.mxu1 %v12357_v50  ;;  %v12405_v20 = vcombine.high %v532_v40, %v536_v41  ;;  %v12402_v50 = vcombine.low %v531_v34, %v535_v36  ;;  %v587_v40 = vld [vmem:[#allocation4 + $0x990] sm:$0xff] }
 0x1f9   :  { %v591_v41 = vld [vmem:[#allocation4 + $0x9b0] sm:$0xff] }
 0x1fb   :  { %2840 = vmatpush1.bf16.msra.mxu0 %v12354_v51  ;;  %3059 = vmatpush1.bf16.msra.mxu1 %v12356_v25  ;;  %v547_v51 = vld [vmem:[#allocation4 + $0x850] sm:$0xff]  ;;  %v12411_v25 = vcombine.high %v539_v43, %v543_v45 }
 0x1fc   :  { %2841 = vmatprep.subr.bf16.mxu0 %v12363_v32  ;;  %3060 = vmatprep.subr.bf16.mxu1 %v12365_v62  ;;  %v12413_v32 = vcombine.high %v540_v48, %v544_v49  ;;  %v12410_v62 = vcombine.low %v539_v43, %v543_v45  ;;  %v588_v45 = vld [vmem:[#allocation4 + $0x998] sm:$0xff]  ;;  %v12459_v49 = vcombine.high %v587_v40, %v591_v41 }
 0x1ff   :  { %2842 = vmatpush1.bf16.msra.mxu0 %v12362_v63  ;;  %3061 = vmatpush1.bf16.msra.mxu1 %v12364_v2  ;;  %v555_v63 = vld [vmem:[#allocation4 + $0x890] sm:$0xff]  ;;  %v12419_v2 = vcombine.high %v547_v51, %v551_v53 }
 0x200   :  { %2843 = vmatprep.subr.bf16.mxu0 %v12371_v5  ;;  %3062 = vmatprep.subr.bf16.mxu1 %v12373_v9  ;;  %v12421_v5 = vcombine.high %v548_v59, %v552_v60  ;;  %v12418_v9 = vcombine.low %v547_v51, %v551_v53  ;;  %v596_v51 = vld [vmem:[#allocation4 + $0x9d8] sm:$0xff] }
 0x201   :  { %v600_v53 = vld [vmem:[#allocation4 + $0x9f8] sm:$0xff] }
 0x202   :  { %v12469_v60 = vcombine.high %v596_v51, %v600_v53 }
 0x203   :  { %2844 = vmatpush1.bf16.msra.mxu0 %v12370_v10  ;;  %3063 = vmatpush1.bf16.msra.mxu1 %v12372_v13  ;;  %v563_v10 = vld [vmem:[#allocation4 + $0x8d0] sm:$0xff]  ;;  %v12427_v13 = vcombine.high %v555_v63, %v559_v58 }
 0x204   :  { %2845 = vmatprep.subr.bf16.mxu0 %v12379_v47  ;;  %3064 = vmatprep.subr.bf16.mxu1 %v12381_v17  ;;  %v12429_v47 = vcombine.high %v556_v38, %v560_v7  ;;  %v12426_v17 = vcombine.low %v555_v63, %v559_v58  ;;  %v12435_v26 = vcombine.high %v563_v10, %v567_v11  ;;  %v608_v63 = vld [vmem:[#allocation4 + $0xa38] sm:$0xff] }
 0x205   :  { %v12434_v30 = vcombine.low %v563_v10, %v567_v11 }
 0x207   :  { %2846 = vmatpush1.bf16.msra.mxu0 %v12378_v22  ;;  %3065 = vmatpush1.bf16.msra.mxu1 %v12380_v27  ;;  %v571_v22 = vld [vmem:[#allocation4 + $0x910] sm:$0xff]  ;;  %v12437_v27 = vcombine.high %v564_v14, %v568_v16 }
 0x208   :  { %2847 = vmatprep.subr.bf16.mxu0 %v12387_v28  ;;  %3066 = vmatprep.subr.bf16.mxu1 %v12389_v31  ;;  %v572_v28 = vld [vmem:[#allocation4 + $0x918] sm:$0xff]  ;;  %v579_v31 = vld [vmem:[#allocation4 + $0x950] sm:$0xff]  ;;  %v12443_v34 = vcombine.high %v571_v22, %v575_v23 }
 0x209   :  { %v12445_v36 = vcombine.high %v572_v28, %v576_v61 }
 0x20b   :  { %2848 = vmatpush1.bf16.msra.mxu0 %v12386_v33  ;;  %3067 = vmatpush1.bf16.msra.mxu1 %v12388_v37  ;;  %v12436_v33 = vcombine.low %v564_v14, %v568_v16  ;;  %v580_v37 = vld [vmem:[#allocation4 + $0x958] sm:$0xff] }
 0x20c   :  { %2849 = vmatprep.subr.bf16.mxu0 %v12395_v6  ;;  %3068 = vmatprep.subr.bf16.mxu1 %v12397_v39  ;;  %v584_v6 = vld [vmem:[#allocation4 + $0x978] sm:$0xff]  ;;  %v12442_v39 = vcombine.low %v571_v22, %v575_v23  ;;  %v13916_v23 = vld [vmem:[#allocation7 + $0x38] ss:$28 sps:$4 sm:$0xff]  }
 0x20d   :  { %v12453_v43 = vcombine.high %v580_v37, %v584_v6  ;;  %v12452_v48 = vcombine.low %v580_v37, %v584_v6  ;;  %v13915_v14 = vld [vmem:[#allocation7 + $0xc] ss:$28 sps:$4 sm:$0xff]   ;;  %v13942_v6 = vld [vmem:[#allocation7 + $0x11c] ss:$28 sps:$4 sm:$0xff]  }
 0x20e   :  { %v13913_v22 = vld [vmem:[#allocation7 + $0x8] ss:$28 sps:$4 sm:$0xff]  }
 0x20f   :  { %2850 = vmatpush1.bf16.msra.mxu0 %v12394_v42  ;;  %3069 = vmatpush1.bf16.msra.mxu1 %v12396_v15  ;;  %v592_v15 = vld [vmem:[#allocation4 + $0x9b8] sm:$0xff] }
 0x210   :  { %2851 = vmatprep.subr.bf16.mxu0 %v12403_v46  ;;  %3070 = vmatprep.subr.bf16.mxu1 %v12405_v20  ;;  %v595_v20 = vld [vmem:[#allocation4 + $0x9d0] sm:$0xff] }
 0x211   :  { %v13937_v37 = vld [vmem:[#allocation7 + $0xe8] ss:$28 sps:$4 sm:$0xff]  }
 0x213   :  { %2852 = vmatpush1.bf16.msra.mxu0 %v12402_v50  ;;  %3071 = vmatpush1.bf16.msra.mxu1 %v12404_v55  ;;  %v12461_v50 = vcombine.high %v588_v45, %v592_v15  ;;  %v12458_v55 = vcombine.low %v587_v40, %v591_v41  ;;  %v13948_v40 = vld [vmem:[#allocation7 + $0x154] ss:$28 sps:$4 sm:$0xff]  }
 0x214   :  { %2894 = vmatprep.subr.bf16.mxu0 %v12411_v25  ;;  %3113 = vmatprep.subr.bf16.mxu1 %v12413_v32  ;;  %v603_v25 = vld [vmem:[#allocation4 + $0xa10] sm:$0xff]  ;;  %v13946_v41 = vld [vmem:[#allocation7 + $0x150] ss:$28 sps:$4 sm:$0xff]  }
 0x215   :  { %v607_v32 = vld [vmem:[#allocation4 + $0xa30] sm:$0xff] }
 0x216   :  { %2854 = vmatmul.mubr.bf16.vlgmr.msra.gmra.mrb[16].mxu0 %v15639_v56  ;;  %3073 = vmatmul.mubr.bf16.vlgmr.msra.gmra.mrb[16].mxu1 %v15639_v56  ;;  %v12428_v56 = vcombine.low %v556_v38, %v560_v7  ;;  %v615_v38 = vld [vmem:[#allocation4 + $0xa70] sm:$0xff]  ;;  %v612_v7 = vld [vmem:[#allocation4 + $0xa58] sm:$0xff]  ;;  %v12474_v10 = vcombine.low %v603_v25, %v607_v32 }
 0x217   :  { %2895 = vmatpush1.bf16.msra.mxu0 %v12410_v62  ;;  %3114 = vmatpush1.bf16.msra.mxu1 %v12412_v0  ;;  %v604_v62 = vld [vmem:[#allocation4 + $0xa18] sm:$0xff]  ;;  %v611_v0 = vld [vmem:[#allocation4 + $0xa50] sm:$0xff] }
 0x218   :  { %2896 = vmatprep.subr.bf16.mxu0 %v12419_v2  ;;  %3115 = vmatprep.subr.bf16.mxu1 %v12421_v5  ;;  %v12475_v2 = vcombine.high %v603_v25, %v607_v32  ;;  %v12477_v5 = vcombine.high %v604_v62, %v608_v63  ;;  %v12483_v11 = vcombine.high %v611_v0, %v615_v38  ;;  %v13973_v25 = vld [vmem:[#allocation7 + $0x238] ss:$28 sps:$4 sm:$0xff]   ;;  %v13978_v32 = vld [vmem:[#allocation7 + $0x26c] ss:$28 sps:$4 sm:$0xff]  }
 0x219   :  { %2863 = vmatprep.mubr.bf16.mxu0 %v15641_v3  ;;  %3082 = vmatprep.mubr.bf16.mxu1 %v15641_v3  ;;  %v583_v3 = vld [vmem:[#allocation4 + $0x970] sm:$0xff] }
 0x21a   :  { %v12451_v42 = vcombine.high %v579_v31, %v583_v3  ;;  %v12450_v46 = vcombine.low %v579_v31, %v583_v3  ;;  %v13930_v31 = vld [vmem:[#allocation7 + $0xac] ss:$28 sps:$4 sm:$0xff]   ;;  %v13933_v3 = vld [vmem:[#allocation7 + $0xb4] ss:$28 sps:$4 sm:$0xff]  }
 0x21b   :  { %2897 = vmatpush1.bf16.msra.mxu0 %v12418_v9  ;;  %3116 = vmatpush1.bf16.msra.mxu1 %v12420_v12  ;;  %v616_v9 = vld [vmem:[#allocation4 + $0xa78] sm:$0xff] }
 0x21c   :  { %2898 = vmatprep.subr.bf16.mxu0 %v12427_v13  ;;  %3117 = vmatprep.subr.bf16.mxu1 %v12429_v47  ;;  %v12485_v12 = vcombine.high %v612_v7, %v616_v9  ;;  %v12482_v13 = vcombine.low %v611_v0, %v615_v38  ;;  %v13912_v47 = vld [vmem:[#allocation7 + $0x4] ss:$28 sps:$4 sm:$0xff]   ;;  %v12484_v16 = vcombine.low %v612_v7, %v616_v9 }
 0x21e   :  { %2864 = vmatmul.mubr.bf16.gmra.mrb[20].mxu0 %v15647_v18  ;;  %3083 = vmatmul.mubr.bf16.gmra.mrb[20].mxu1 %v15647_v18  ;;  %v12444_v18 = vcombine.low %v572_v28, %v576_v61  ;;  %v13922_v28 = vld [vmem:[#allocation7 + $0x70] ss:$28 sps:$4 sm:$0xff]   ;;  %v13927_v61 = vld [vmem:[#allocation7 + $0x7c] ss:$28 sps:$4 sm:$0xff]  }
 0x21f   :  { %2899 = vmatpush1.bf16.msra.mxu0 %v12426_v17  ;;  %3118 = vmatpush1.bf16.msra.mxu1 %v12428_v56  ;;  %v13910_v17 = vld [vmem:[#allocation7] ss:$28 sps:$4 sm:$0xff]  }
 0x220   :  { %2900 = vmatprep.subr.bf16.mxu0 %v12435_v26  ;;  %3119 = vmatprep.subr.bf16.mxu1 %v12437_v27  ;;  %v13921_v56 = vld [vmem:[#allocation7 + $0x44] ss:$28 sps:$4 sm:$0xff]   ;;  %v13924_v27 = vld [vmem:[#allocation7 + $0x74] ss:$28 sps:$4 sm:$0xff]  }
 0x221   :  { %2873 = vmatprep.mubr.bf16.mxu0 %v15649_v29  ;;  %3092 = vmatprep.mubr.bf16.mxu1 %v15649_v29  ;;  %v599_v29 = vld [vmem:[#allocation4 + $0x9f0] sm:$0xff] }
 0x222   :  { %v12467_v59 = vcombine.high %v595_v20, %v599_v29  ;;  %v12466_v58 = vcombine.low %v595_v20, %v599_v29  ;;  %v13919_v26 = vld [vmem:[#allocation7 + $0x40] ss:$28 sps:$4 sm:$0xff]   ;;  %v13963_v20 = vld [vmem:[#allocation7 + $0x1cc] ss:$28 sps:$4 sm:$0xff]  }
 0x223   :  { %2901 = vmatpush1.bf16.msra.mxu0 %v12434_v30  ;;  %3120 = vmatpush1.bf16.msra.mxu1 %v12436_v33  ;;  %v13925_v30 = vld [vmem:[#allocation7 + $0x78] ss:$28 sps:$4 sm:$0xff]   ;;  %v13936_v33 = vld [vmem:[#allocation7 + $0xe4] ss:$28 sps:$4 sm:$0xff]  }
 0x224   :  { %2902 = vmatprep.subr.bf16.mxu0 %v12443_v34  ;;  %3121 = vmatprep.subr.bf16.mxu1 %v12445_v36  ;;  %v13934_v34 = vld [vmem:[#allocation7 + $0xe0] ss:$28 sps:$4 sm:$0xff]   ;;  %v13939_v36 = vld [vmem:[#allocation7 + $0xec] ss:$28 sps:$4 sm:$0xff]  }
 0x225   :  { %v13961_v29 = vld [vmem:[#allocation7 + $0x1c8] ss:$28 sps:$4 sm:$0xff]  }
 0x226   :  { %2874 = vmatmul.mubr.bf16.gmra.mrb[24].mxu0 %v15655_v44  ;;  %3093 = vmatmul.mubr.bf16.gmra.mrb[24].mxu1 %v15655_v44  ;;  %v12460_v44 = vcombine.low %v588_v45, %v592_v15  ;;  %v13955_v45 = vld [vmem:[#allocation7 + $0x190] ss:$28 sps:$4 sm:$0xff]   ;;  %v13960_v15 = vld [vmem:[#allocation7 + $0x1c4] ss:$28 sps:$4 sm:$0xff]  }
 0x227   :  { %2903 = vmatpush1.bf16.msra.mxu0 %v12442_v39  ;;  %3122 = vmatpush1.bf16.msra.mxu1 %v12444_v18  ;;  %v13943_v39 = vld [vmem:[#allocation7 + $0x120] ss:$28 sps:$4 sm:$0xff]  }
 0x228   :  { %2904 = vmatprep.subr.bf16.mxu0 %v12451_v42  ;;  %3123 = vmatprep.subr.bf16.mxu1 %v12453_v43  ;;  %v13951_v18 = vld [vmem:[#allocation7 + $0x15c] ss:$28 sps:$4 sm:$0xff]   ;;  %v13954_v43 = vld [vmem:[#allocation7 + $0x18c] ss:$28 sps:$4 sm:$0xff]  }
 0x229   :  { %2883 = vmatprep.mubr.bf16.mxu0 %v15657_v54  ;;  %3102 = vmatprep.mubr.bf16.mxu1 %v15657_v54  ;;  %v12468_v54 = vcombine.low %v596_v51, %v600_v53  ;;  %v13949_v42 = vld [vmem:[#allocation7 + $0x158] ss:$28 sps:$4 sm:$0xff]   ;;  %v13970_v53 = vld [vmem:[#allocation7 + $0x230] ss:$28 sps:$4 sm:$0xff]  }
 0x22a   :  { %v13972_v51 = vld [vmem:[#allocation7 + $0x234] ss:$28 sps:$4 sm:$0xff]  }
 0x22b   :  { %2905 = vmatpush1.bf16.msra.mxu0 %v12450_v46  ;;  %3124 = vmatpush1.bf16.msra.mxu1 %v12452_v48  ;;  %v13958_v46 = vld [vmem:[#allocation7 + $0x1c0] ss:$28 sps:$4 sm:$0xff]  }
 0x22c   :  { %2906 = vmatprep.subr.bf16.mxu0 %v12459_v49  ;;  %3125 = vmatprep.subr.bf16.mxu1 %v12461_v50  ;;  %v13966_v48 = vld [vmem:[#allocation7 + $0x1fc] ss:$28 sps:$4 sm:$0xff]   ;;  %v13969_v49 = vld [vmem:[#allocation7 + $0x204] ss:$28 sps:$4 sm:$0xff]  }
 0x22d   :  { %v13964_v50 = vld [vmem:[#allocation7 + $0x1f8] ss:$28 sps:$4 sm:$0xff]  }
 0x22e   :  { %2884 = vmatmul.mubr.bf16.gmra.mrb[28].mxu0 %v15663_v8  ;;  %3103 = vmatmul.mubr.bf16.gmra.mrb[28].mxu1 %v15663_v8  ;;  %v12476_v8 = vcombine.low %v604_v62, %v608_v63  ;;  %v13979_v62 = vld [vmem:[#allocation7 + $0x270] ss:$28 sps:$4 sm:$0xff]   ;;  %v13984_v63 = vld [vmem:[#allocation7 + $0x2a4] ss:$28 sps:$4 sm:$0xff]  }
 0x22f   :  { %2907 = vmatpush1.bf16.msra.mxu0 %v12458_v55  ;;  %3126 = vmatpush1.bf16.msra.mxu1 %v12460_v44  ;;  %v13975_v55 = vld [vmem:[#allocation7 + $0x23c] ss:$28 sps:$4 sm:$0xff]   ;;  %v13981_v44 = vld [vmem:[#allocation7 + $0x274] ss:$28 sps:$4 sm:$0xff]  }
 0x230   :  { %2908 = vmatprep.subr.bf16.mxu0 %v12467_v59  ;;  %3127 = vmatprep.subr.bf16.mxu1 %v12469_v60  ;;  %v13976_v59 = vld [vmem:[#allocation7 + $0x268] ss:$28 sps:$4 sm:$0xff]  }
 0x231   :  { %12494 = vmatprep.mubr.msk.bf16.mxu0 %vm2297_vm0, %v15665_v19  ;;  %12498 = vmatprep.mubr.msk.bf16.mxu1 %vm2297_vm0, %v15665_v19  ;;  %v13918_v19 = vld [vmem:[#allocation7 + $0x3c] ss:$28 sps:$4 sm:$0xff]  }
 0x233   :  { %2909 = vmatpush1.bf16.msra.mxu0 %v12466_v58  ;;  %3128 = vmatpush1.bf16.msra.mxu1 %v12468_v54  ;;  %v13982_v54 = vld [vmem:[#allocation7 + $0x2a0] ss:$28 sps:$4 sm:$0xff]  }
 0x234   :  { %2910 = vmatprep.subr.bf16.mxu0 %v12475_v2  ;;  %3129 = vmatprep.subr.bf16.mxu1 %v12477_v5  ;;  %v13987_v2 = vld [vmem:[#allocation7 + $0x2ac] ss:$28 sps:$4 sm:$0xff]  }
 0x237   :  { %2911 = vmatpush1.bf16.msra.mxu0 %v12474_v10  ;;  %3130 = vmatpush1.bf16.msra.mxu1 %v12476_v8 }
 0x238   :  { %2912 = vmatprep.subr.bf16.mxu0 %v12483_v11  ;;  %3131 = vmatprep.subr.bf16.mxu1 %v12485_v12 }
 0x23b   :  { %2913 = vmatpush1.bf16.msra.mxu0 %v12482_v13  ;;  %3132 = vmatpush1.bf16.msra.mxu1 %v12484_v16 }
 0x23c   :  { %6806 = vmatprep.subr.bf16.mxu0 %v13912_v47  ;;  %7098 = vmatprep.subr.bf16.mxu1 %v13915_v14 }
 0x23e   :  { %2927 = vmatmul.mubr.bf16.vlgmr.msra.gmra.mrb[16].mxu0 %v15673_v57  ;;  %3146 = vmatmul.mubr.bf16.vlgmr.msra.gmra.mrb[16].mxu1 %v15673_v57  ;;  %v13928_v57 = vld [vmem:[#allocation7 + $0xa8] ss:$28 sps:$4 sm:$0xff]  }
 0x23f   :  { %12495 = vmatprep.mubr.msk.bf16.mxu0 %vm2297_vm0, %v15675_v4  ;;  %12499 = vmatprep.mubr.msk.bf16.mxu1 %vm2297_vm0, %v15675_v4  ;;  %v13931_v4 = vld [vmem:[#allocation7 + $0xb0] ss:$28 sps:$4 sm:$0xff]  }
 0x240   :  { %6807 = vmatpush1.bf16.msra.mxu0 %v13910_v17  ;;  %7099 = vmatpush1.bf16.msra.mxu1 %v13913_v22 }
 0x241   :  { %6808 = vmatprep.subr.bf16.mxu0 %v13918_v19  ;;  %7100 = vmatprep.subr.bf16.mxu1 %v13921_v56  ;;  %v13990_v56 = vld [vmem:[#allocation7 + $0x2dc] ss:$28 sps:$4 sm:$0xff]  }
 0x244   :  { %6809 = vmatpush1.bf16.msra.mxu0 %v13916_v23  ;;  %7101 = vmatpush1.bf16.msra.mxu1 %v13919_v26  ;;  %v13985_v23 = vld [vmem:[#allocation7 + $0x2a8] ss:$28 sps:$4 sm:$0xff]  }
 0x245   :  { %6810 = vmatprep.subr.bf16.mxu0 %v13924_v27  ;;  %7102 = vmatprep.subr.bf16.mxu1 %v13927_v61  ;;  %v13988_v61 = vld [vmem:[#allocation7 + $0x2d8] ss:$28 sps:$4 sm:$0xff]  }
 0x246   :  { %2937 = vmatmul.mubr.bf16.gmra.mrb[20].mxu0 %v15683_v24  ;;  %3156 = vmatmul.mubr.bf16.gmra.mrb[20].mxu1 %v15683_v24  ;;  %v13945_v24 = vld [vmem:[#allocation7 + $0x124] ss:$28 sps:$4 sm:$0xff]  }
 0x247   :  { %12496 = vmatprep.mubr.msk.bf16.mxu0 %vm2297_vm0, %v15685_v35  ;;  %12500 = vmatprep.mubr.msk.bf16.mxu1 %vm2297_vm0, %v15685_v35  ;;  %v13940_v35 = vld [vmem:[#allocation7 + $0x118] ss:$28 sps:$4 sm:$0xff]  }
 0x248   :  { %6811 = vmatpush1.bf16.msra.mxu0 %v13922_v28  ;;  %7103 = vmatpush1.bf16.msra.mxu1 %v13925_v30  ;;  %v13993_v30 = vld [vmem:[#allocation7 + $0x2e4] ss:$28 sps:$4 sm:$0xff]  }
 0x249   :  { %6812 = vmatprep.subr.bf16.mxu0 %v13930_v31  ;;  %7104 = vmatprep.subr.bf16.mxu1 %v13933_v3 }
 0x24c   :  { %6813 = vmatpush1.bf16.msra.mxu0 %v13928_v57  ;;  %7105 = vmatpush1.bf16.msra.mxu1 %v13931_v4 }
 0x24d   :  { %6814 = vmatprep.subr.bf16.mxu0 %v13936_v33  ;;  %7106 = vmatprep.subr.bf16.mxu1 %v13939_v36  ;;  %v13991_v33 = vld [vmem:[#allocation7 + $0x2e0] ss:$28 sps:$4 sm:$0xff]  }
 0x24e   :  { %2947 = vmatmul.mubr.bf16.gmra.mrb[24].mxu0 %v15693_v52  ;;  %3166 = vmatmul.mubr.bf16.gmra.mrb[24].mxu1 %v15693_v52  ;;  %v13957_v52 = vld [vmem:[#allocation7 + $0x194] ss:$28 sps:$4 sm:$0xff]  }
 0x24f   :  { %12497 = vmatprep.mubr.msk.bf16.mxu0 %vm2297_vm0, %v15695_v1  ;;  %12501 = vmatprep.mubr.msk.bf16.mxu1 %vm2297_vm0, %v15695_v1  ;;  %v13952_v1 = vld [vmem:[#allocation7 + $0x188] ss:$28 sps:$4 sm:$0xff]  }
 0x250   :  { %6815 = vmatpush1.bf16.msra.mxu0 %v13934_v34  ;;  %7107 = vmatpush1.bf16.msra.mxu1 %v13937_v37  ;;  %v13996_v34 = vld [vmem:[#allocation7 + $0x314] ss:$28 sps:$4 sm:$0xff]  }
 0x251   :  { %6816 = vmatprep.subr.bf16.mxu0 %v13942_v6  ;;  %7108 = vmatprep.subr.bf16.mxu1 %v13945_v24 }
 0x254   :  { %6817 = vmatpush1.bf16.msra.mxu0 %v13940_v35  ;;  %7109 = vmatpush1.bf16.msra.mxu1 %v13943_v39  ;;  %v13994_v35 = vld [vmem:[#allocation7 + $0x310] ss:$28 sps:$4 sm:$0xff]   ;;  %v13999_v39 = vld [vmem:[#allocation7 + $0x31c] ss:$28 sps:$4 sm:$0xff]  }
 0x255   :  { %6818 = vmatprep.subr.bf16.mxu0 %v13948_v40  ;;  %7110 = vmatprep.subr.bf16.mxu1 %v13951_v18 }
 0x256   :  { %2957 = vmatmul.mubr.bf16.gmra.mrb[28].mxu0 %v15703_v21  ;;  %3176 = vmatmul.mubr.bf16.gmra.mrb[28].mxu1 %v15703_v21  ;;  %v13967_v21 = vld [vmem:[#allocation7 + $0x200] ss:$28 sps:$4 sm:$0xff]  }
 0x258   :  { %6819 = vmatpush1.bf16.msra.mxu0 %v13946_v41  ;;  %7111 = vmatpush1.bf16.msra.mxu1 %v13949_v42 }
 0x259   :  { %6820 = vmatprep.subr.bf16.mxu0 %v13954_v43  ;;  %7112 = vmatprep.subr.bf16.mxu1 %v13957_v52 }
 0x25c   :  { %6821 = vmatpush1.bf16.msra.mxu0 %v13952_v1  ;;  %7113 = vmatpush1.bf16.msra.mxu1 %v13955_v45 }
 0x25d   :  { %6822 = vmatprep.subr.bf16.mxu0 %v13960_v15  ;;  %7114 = vmatprep.subr.bf16.mxu1 %v13963_v20 }
 0x260   :  { %6823 = vmatpush1.bf16.msra.mxu0 %v13958_v46  ;;  %7115 = vmatpush1.bf16.msra.mxu1 %v13961_v29 }
 0x261   :  { %6824 = vmatprep.subr.bf16.mxu0 %v13966_v48  ;;  %7116 = vmatprep.subr.bf16.mxu1 %v13969_v49 }
 0x264   :  { %6825 = vmatpush1.bf16.msra.mxu0 %v13964_v50  ;;  %7117 = vmatpush1.bf16.msra.mxu1 %v13967_v21 }
 0x265   :  { %6826 = vmatprep.subr.bf16.mxu0 %v13972_v51  ;;  %7118 = vmatprep.subr.bf16.mxu1 %v13975_v55  ;;  %v14002_v55 = vld [vmem:[#allocation7 + $0x34c] ss:$28 sps:$4 sm:$0xff]  }
 0x268   :  { %6827 = vmatpush1.bf16.msra.mxu0 %v13970_v53  ;;  %7119 = vmatpush1.bf16.msra.mxu1 %v13973_v25  ;;  %v13997_v53 = vld [vmem:[#allocation7 + $0x318] ss:$28 sps:$4 sm:$0xff]  }
 0x269   :  { %v15763_v60 = vpop.f32.mrb[0].mxu0  ;;  %6828 = vmatprep.subr.bf16.mxu0 %v13978_v32  ;;  %v15765_v58 = vpop.f32.mrb[0].mxu1  ;;  %7120 = vmatprep.subr.bf16.mxu1 %v13981_v44 }
 0x26a   :  { %v15767_v0 = vpop.f32.mrb[1].mxu0  ;;  %v3292_v5 = vmul.f32 %v15763_v60, %v15763_v60  ;;  %v3294_v38 = vmul.f32 %v15765_v58, %v15765_v58  ;;  %v15773_v7 = vpop.f32.mrb[1].mxu1 }
 0x26b   :  { %v15775_v9 = vpop.f32.mrb[2].mxu0  ;;  %v3293_v10 = vmul.f32 %v15767_v0, %v15767_v0  ;;  %v3295_v8 = vmul.f32 %v15773_v7, %v15773_v7  ;;  %v15785_v13 = vpop.f32.mrb[2].mxu1 }
 0x26c   :  { %v3188_v11 = vadd.f32 %v15775_v9, %v15763_v60  ;;  %v3300_v12 = vmul.f32 %v15775_v9, %v15775_v9  ;;  %v15787_v47 = vpop.f32.mrb[3].mxu0  ;;  %6829 = vmatpush1.bf16.msra.mxu0 %v13976_v59  ;;  %v3214_v14 = vadd.f32 %v15785_v13, %v15765_v58  ;;  %v3302_v16 = vmul.f32 %v15785_v13, %v15785_v13  ;;  %v15797_v19 = vpop.f32.mrb[3].mxu1 }
 0x26d   :  { %v3201_v17 = vadd.f32 %v15787_v47, %v15767_v0  ;;  %v3301_v22 = vmul.f32 %v15787_v47, %v15787_v47  ;;  %7121 = vmatpush1.bf16.msra.mxu1 %v13979_v62  ;;  %v3227_v27 = vadd.f32 %v15797_v19, %v15773_v7  ;;  %v3303_v28 = vmul.f32 %v15797_v19, %v15797_v19  ;;  %v14000_v62 = vld [vmem:[#allocation7 + $0x348] ss:$28 sps:$4 sm:$0xff]  }
 0x26e   :  { %v3356_v26 = vadd.f32 %v3300_v12, %v3292_v5  ;;  %6830 = vmatprep.subr.bf16.mxu0 %v13984_v63  ;;  %7122 = vmatprep.subr.bf16.mxu1 %v13987_v2  ;;  %v3382_v31 = vadd.f32 %v3302_v16, %v3294_v38  ;;  %v14005_v63 = vld [vmem:[#allocation7 + $0x354] ss:$28 sps:$4 sm:$0xff]  }
 0x26f   :  { %v3369_v57 = vadd.f32 %v3301_v22, %v3293_v10  ;;  %v3395_v3 = vadd.f32 %v3303_v28, %v3295_v8  ;;  %v14003_v12 = vld [vmem:[#allocation7 + $0x350] ss:$28 sps:$4 sm:$0xff]  }
 0x270   :  { %6831 = vmatpush1.bf16.msra.mxu0 %v13982_v54 }
 0x271   :  { %v15803_v4 = vpop.f32.mrb[4].mxu0  ;;  %7123 = vmatpush1.bf16.msra.mxu1 %v13985_v23  ;;  %6832 = vmatprep.subr.bf16.mxu0 %v13990_v56  ;;  %v15808_v6 = vpop.f32.mrb[4].mxu1  ;;  %v14008_v23 = vld [vmem:[#allocation7 + $0x384] ss:$28 sps:$4 sm:$0xff]   ;;  %v14011_v56 = vld [vmem:[#allocation7 + $0x38c] ss:$28 sps:$4 sm:$0xff]  }
 0x272   :  { %v3189_v36 = vadd.f32 %v3188_v11, %v15803_v4  ;;  %v3308_v37 = vmul.f32 %v15803_v4, %v15803_v4  ;;  %v15810_v24 = vpop.f32.mrb[5].mxu0  ;;  %7124 = vmatprep.subr.bf16.mxu1 %v13993_v30  ;;  %v3215_v40 = vadd.f32 %v3214_v14, %v15808_v6  ;;  %v3310_v41 = vmul.f32 %v15808_v6, %v15808_v6  ;;  %v15818_v43 = vpop.f32.mrb[5].mxu1 }
 0x273   :  { %v3202_v18 = vadd.f32 %v3201_v17, %v15810_v24  ;;  %v3309_v42 = vmul.f32 %v15810_v24, %v15810_v24  ;;  %v15820_v52 = vpop.f32.mrb[6].mxu0  ;;  %v3228_v45 = vadd.f32 %v3227_v27, %v15818_v43  ;;  %v3311_v15 = vmul.f32 %v15818_v43, %v15818_v43  ;;  %v15826_v20 = vpop.f32.mrb[6].mxu1 }
 0x274   :  { %v3357_v1 = vadd.f32 %v3356_v26, %v3308_v37  ;;  %v3190_v46 = vadd.f32 %v3189_v36, %v15820_v52  ;;  %v15828_v29 = vpop.f32.mrb[7].mxu0  ;;  %6833 = vmatpush1.bf16.msra.mxu0 %v13988_v61  ;;  %v3383_v48 = vadd.f32 %v3382_v31, %v3310_v41  ;;  %v3316_v50 = vmul.f32 %v15820_v52, %v15820_v52  ;;  %v15833_v51 = vpop.f32.mrb[7].mxu1 }
 0x275   :  { %v3370_v49 = vadd.f32 %v3369_v57, %v3309_v42  ;;  %v3216_v21 = vadd.f32 %v3215_v40, %v15826_v20  ;;  %7125 = vmatpush1.bf16.msra.mxu1 %v13991_v33  ;;  %v3396_v25 = vadd.f32 %v3395_v3, %v3311_v15  ;;  %v3318_v32 = vmul.f32 %v15826_v20, %v15826_v20 }
 0x276   :  { %v3203_v44 = vadd.f32 %v3202_v18, %v15828_v29  ;;  %v3317_v59 = vmul.f32 %v15828_v29, %v15828_v29  ;;  %6834 = vmatprep.subr.bf16.mxu0 %v13996_v34  ;;  %v3358_v54 = vadd.f32 %v3357_v1, %v3316_v50  ;;  %v3229_v2 = vadd.f32 %v3228_v45, %v15833_v51 }
 0x277   :  { %v3319_v5 = vmul.f32 %v15833_v51, %v15833_v51  ;;  %7126 = vmatprep.subr.bf16.mxu1 %v13999_v39  ;;  %v3384_v38 = vadd.f32 %v3383_v48, %v3318_v32 }
 0x278   :  { %v3371_v10 = vadd.f32 %v3370_v49, %v3317_v59  ;;  %6835 = vmatpush1.bf16.msra.mxu0 %v13994_v35 }
 0x279   :  { %v3397_v8 = vadd.f32 %v3396_v25, %v3319_v5  ;;  %v15843_v11 = vpop.f32.mrb[8].mxu0  ;;  %7127 = vmatpush1.bf16.msra.mxu1 %v13997_v53  ;;  %6836 = vmatprep.subr.bf16.mxu0 %v14002_v55  ;;  %v15848_v17 = vpop.f32.mrb[8].mxu1 }
 0x27a   :  { %v3191_v14 = vadd.f32 %v3190_v46, %v15843_v11  ;;  %v3324_v16 = vmul.f32 %v15843_v11, %v15843_v11  ;;  %v15850_v22 = vpop.f32.mrb[9].mxu0  ;;  %7128 = vmatprep.subr.bf16.mxu1 %v14005_v63  ;;  %v3217_v26 = vadd.f32 %v3216_v21, %v15848_v17  ;;  %v3326_v27 = vmul.f32 %v15848_v17, %v15848_v17  ;;  %v15858_v30 = vpop.f32.mrb[9].mxu1 }
 0x27b   :  { %v3204_v28 = vadd.f32 %v3203_v44, %v15850_v22  ;;  %v3325_v61 = vmul.f32 %v15850_v22, %v15850_v22  ;;  %v15860_v31 = vpop.f32.mrb[10].mxu0  ;;  %v3230_v3 = vadd.f32 %v3229_v2, %v15858_v30  ;;  %v3327_v33 = vmul.f32 %v15858_v30, %v15858_v30  ;;  %v15866_v36 = vpop.f32.mrb[10].mxu1 }
 0x27c   :  { %v3359_v57 = vadd.f32 %v3358_v54, %v3324_v16  ;;  %v3192_v34 = vadd.f32 %v3191_v14, %v15860_v31  ;;  %v15868_v37 = vpop.f32.mrb[11].mxu0  ;;  %6837 = vmatpush1.bf16.msra.mxu0 %v14000_v62  ;;  %v3385_v35 = vadd.f32 %v3384_v38, %v3326_v27  ;;  %v3332_v40 = vmul.f32 %v15860_v31, %v15860_v31  ;;  %v15873_v18 = vpop.f32.mrb[11].mxu1 }
 0x27d   :  { %v3372_v39 = vadd.f32 %v3371_v10, %v3325_v61  ;;  %v3218_v41 = vadd.f32 %v3217_v26, %v15866_v36  ;;  %7129 = vmatpush1.bf16.msra.mxu1 %v14003_v12  ;;  %v3398_v42 = vadd.f32 %v3397_v8, %v3327_v33  ;;  %v3334_v1 = vmul.f32 %v15866_v36, %v15866_v36 }
 0x27e   :  { %v3205_v45 = vadd.f32 %v3204_v28, %v15868_v37  ;;  %v3333_v15 = vmul.f32 %v15868_v37, %v15868_v37  ;;  %6879 = vmatprep.subr.bf16.mxu0 %v14008_v23  ;;  %v3360_v46 = vadd.f32 %v3359_v57, %v3332_v40  ;;  %v3231_v48 = vadd.f32 %v3230_v3, %v15873_v18 }
 0x27f   :  { %v3335_v49 = vmul.f32 %v15873_v18, %v15873_v18  ;;  %7171 = vmatprep.subr.bf16.mxu1 %v14011_v56  ;;  %v3386_v50 = vadd.f32 %v3385_v35, %v3334_v1 }
 0x280   :  { %v3373_v21 = vadd.f32 %v3372_v39, %v3333_v15 }
 0x281   :  { %v3399_v53 = vadd.f32 %v3398_v42, %v3335_v49  ;;  %v15883_v55 = vpop.f32.mrb[12].mxu0  ;;  %v15888_v44 = vpop.f32.mrb[12].mxu1 }
 0x282   :  { %v3193_v25 = vadd.f32 %v3192_v34, %v15883_v55  ;;  %v3340_v32 = vmul.f32 %v15883_v55, %v15883_v55  ;;  %17822 = vst [vmem:[#allocation29_spill] sm:$0xff] %v15888_v44  ;;  %v15890_v59 = vpop.f32.mrb[13].mxu0  ;;  %v3219_v62 = vadd.f32 %v3218_v41, %v15888_v44  ;;  %v3342_v63 = vmul.f32 %v15888_v44, %v15888_v44  ;;  %v15898_v5 = vpop.f32.mrb[13].mxu1 }
 0x283   :  { %v3206_v54 = vadd.f32 %v3205_v45, %v15890_v59  ;;  %v3341_v2 = vmul.f32 %v15890_v59, %v15890_v59  ;;  %v15900_v38 = vpop.f32.mrb[14].mxu0  ;;  %v3232_v8 = vadd.f32 %v3231_v48, %v15898_v5  ;;  %v3343_v12 = vmul.f32 %v15898_v5, %v15898_v5  ;;  %v15906_v16 = vpop.f32.mrb[14].mxu1 }
 0x284   :  { %v3361_v10 = vadd.f32 %v3360_v46, %v3340_v32  ;;  %v3194_v14 = vadd.f32 %v3193_v25, %v15900_v38  ;;  %17823 = vst [vmem:[#allocation30_spill] sm:$0xff] %v15906_v16  ;;  %v15908_v23 = vpop.f32.mrb[15].mxu0  ;;  %v3387_v56 = vadd.f32 %v3386_v50, %v3342_v63  ;;  %v3348_v27 = vmul.f32 %v15900_v38, %v15900_v38  ;;  %v15913_v61 = vpop.f32.mrb[15].mxu1 }
 0x285   :  { %v3374_v26 = vadd.f32 %v3373_v21, %v3341_v2  ;;  %v3220_v28 = vadd.f32 %v3219_v62, %v15906_v16  ;;  %v3400_v57 = vadd.f32 %v3399_v53, %v3343_v12  ;;  %v3350_v33 = vmul.f32 %v15906_v16, %v15906_v16 }
 0x286   :  { %v3195_v3 = vrot.slane %v3194_v14, 4  ;;  %v3207_v34 = vadd.f32 %v3206_v54, %v15908_v23  ;;  %v3362_v35 = vadd.f32 %v3361_v10, %v3348_v27  ;;  %v3349_v40 = vmul.f32 %v15908_v23, %v15908_v23 }
 0x287   :  { %v3221_v39 = vrot.slane %v3220_v28, 4  ;;  %v3233_v41 = vadd.f32 %v3232_v8, %v15913_v61  ;;  %v3388_v1 = vadd.f32 %v3387_v56, %v3350_v33  ;;  %v3351_v15 = vmul.f32 %v15913_v61, %v15913_v61 }
 0x288   :  { %v3196_v42 = vadd.f32 %v3195_v3, %v3194_v14  ;;  %v3208_v45 = vrot.slane %v3207_v34, 4  ;;  %v3363_v46 = vrot.slane %v3362_v35, 4  ;;  %v3375_v49 = vadd.f32 %v3374_v26, %v3349_v40 }
 0x289   :  { %v3222_v48 = vadd.f32 %v3221_v39, %v3220_v28  ;;  %v3234_v50 = vrot.slane %v3233_v41, 4  ;;  %v3389_v53 = vrot.slane %v3388_v1, 4  ;;  %v3401_v32 = vadd.f32 %v3400_v57, %v3351_v15 }
 0x28a   :  { %v3197_v21 = vrot.slane %v3196_v42, 2  ;;  %v3209_v25 = vadd.f32 %v3208_v45, %v3207_v34  ;;  %v3364_v62 = vadd.f32 %v3363_v46, %v3362_v35  ;;  %v3376_v54 = vrot.slane %v3375_v49, 4 }
 0x28b   :  { %v3223_v63 = vrot.slane %v3222_v48, 2  ;;  %v3235_v2 = vadd.f32 %v3234_v50, %v3233_v41  ;;  %v3390_v8 = vadd.f32 %v3389_v53, %v3388_v1  ;;  %v3402_v14 = vrot.slane %v3401_v32, 4 }
 0x28c   :  { %v3198_v10 = vadd.f32 %v3197_v21, %v3196_v42  ;;  %v3210_v12 = vrot.slane %v3209_v25, 2  ;;  %v3365_v56 = vrot.slane %v3364_v62, 2  ;;  %v3377_v3 = vadd.f32 %v3376_v54, %v3375_v49 }
 0x28d   :  { %v3224_v27 = vadd.f32 %v3223_v63, %v3222_v48  ;;  %v3236_v33 = vrot.slane %v3235_v2, 2  ;;  %v3391_v28 = vrot.slane %v3390_v8, 2  ;;  %v3403_v39 = vadd.f32 %v3402_v14, %v3401_v32 }
 0x28e   :  { %v3199_v16 = vrot.slane %v3198_v10, 1  ;;  %v3211_v26 = vadd.f32 %v3210_v12, %v3209_v25  ;;  %v3366_v40 = vadd.f32 %v3365_v56, %v3364_v62  ;;  %v3378_v34 = vrot.slane %v3377_v3, 2 }
 0x28f   :  { %v3225_v44 = vrot.slane %v3224_v27, 1  ;;  %v3237_v57 = vadd.f32 %v3236_v33, %v3235_v2  ;;  %v3392_v45 = vadd.f32 %v3391_v28, %v3390_v8  ;;  %v3404_v41 = vrot.slane %v3403_v39, 2 }
 0x290   :  { %v3200_v35 = vadd.f32 %v3199_v16, %v3198_v10  ;;  %v3212_v15 = vrot.slane %v3211_v26, 1  ;;  %v3367_v42 = vrot.slane %v3366_v40, 1  ;;  %v3379_v46 = vadd.f32 %v3378_v34, %v3377_v3 }
 0x291   :  { %v3226_v1 = vadd.f32 %v3225_v44, %v3224_v27  ;;  %v3238_v50 = vrot.slane %v3237_v57, 1  ;;  %v3393_v48 = vrot.slane %v3392_v45, 1  ;;  %v3405_v53 = vadd.f32 %v3404_v41, %v3403_v39 }
 0x292   :  { %v15923_v21 = vmul.f32 0.015625, %v3200_v35  ;;  %v3213_v49 = vadd.f32 %v3212_v15, %v3211_v26  ;;  %v3368_v63 = vadd.f32 %v3367_v42, %v3366_v40  ;;  %v3380_v32 = vrot.slane %v3379_v46, 1 }
 0x293   :  { %v3462_v25 = vmul.f32 0.015625, %v3226_v1  ;;  %v3239_v62 = vadd.f32 %v3238_v50, %v3237_v57  ;;  %v3394_v16 = vadd.f32 %v3393_v48, %v3392_v45  ;;  %v3406_v10 = vrot.slane %v3405_v53, 1 }
 0x294   :  { %v3476_v54 = vmul.f32 %v15923_v21, %v15923_v21  ;;  %v3461_v2 = vmul.f32 0.015625, %v3213_v49  ;;  %v3468_v8 = vmul.f32 0.015625, %v3368_v63  ;;  %v3381_v44 = vadd.f32 %v3380_v32, %v3379_v46 }
 0x295   :  { %v3478_v12 = vmul.f32 %v3462_v25, %v3462_v25  ;;  %v3463_v14 = vmul.f32 0.015625, %v3239_v62  ;;  %v3470_v56 = vmul.f32 0.015625, %v3394_v16  ;;  %v3407_v3 = vadd.f32 %v3406_v10, %v3405_v53 }
 0x296   :  { %v3477_v27 = vmul.f32 %v3461_v2, %v3461_v2  ;;  %v3484_v33 = vsub.f32 %v3468_v8, %v3476_v54  ;;  %v3469_v28 = vmul.f32 0.015625, %v3381_v44  ;;  %v3529_v42 = vlaneseq }
 0x297   :  { %v3479_v26 = vmul.f32 %v3463_v14, %v3463_v14  ;;  %v3486_v39 = vsub.f32 %v3470_v56, %v3478_v12  ;;  %v3471_v40 = vmul.f32 0.015625, %v3407_v3  ;;  %v15375_v53 = vmov 1983009808  }
 0x298   :  { %v3492_v34 = vmax.f32 %v3484_v33, 0.0  ;;  %v3485_v57 = vsub.f32 %v3469_v28, %v3477_v27  ;;  %v3530_v49 = vshrl.u32 %v3529_v42, 7  ;;  %v3527_v63 = vunpack.c.l.s4 %v15375_v53  ;;  %v3186_v28 = vld [vmem:[#allocation6] sm:$0xff] }
 0x299   :  { %v3494_v35 = vmax.f32 %v3486_v39, 0.0  ;;  %v3487_v15 = vsub.f32 %v3471_v40, %v3479_v26 }
 0x29a   :  { %v3500_v41 = vadd.f32 1e-05, %v3492_v34  ;;  %v3493_v45 = vmax.f32 %v3485_v57, 0.0  ;;  %v15927_v32 = vsub.s32 0, %v3530_v49  ;;  %v15929_v62 = vsub.s32 2, %v3530_v49 }
 0x29b   :  { %v3502_v1 = vadd.f32 1e-05, %v3494_v35  ;;  %v3495_v50 = vmax.f32 %v3487_v15, 0.0  ;;  %v15931_v54 = vsub.s32 4, %v3530_v49  ;;  %v15933_v16 = vsub.s32 6, %v3530_v49 }
 0x29c   :  { %15006 = vrsqrt.f32 %v3500_v41  ;;  %v3501_v46 = vadd.f32 1e-05, %v3493_v45  ;;  %17824 = vst [vmem:[#allocation31_spill] sm:$0xff] %v15929_v62  ;;  %v3528_v10 = vunpack.c.0.s8 %v3527_v63  ;;  %v15943_v45 = vsub.s32 1, %v3530_v49 }
 0x29d   :  { %15008 = vrsqrt.f32 %v3502_v1  ;;  %v3503_v48 = vadd.f32 1e-05, %v3495_v50  ;;  %17825 = vst [vmem:[#allocation32_spill] sm:$0xff] %v15931_v54  ;;  %17826 = vst [vmem:[#allocation33_spill] sm:$0xff] %v15933_v16  ;;  %v15945_v42 = vsub.s32 3, %v3530_v49 }
 0x29e   :  { %15010 = vrsqrt.f32 %v3501_v46  ;;  %v15935_v44 = vsub.s32 %v3528_v10, %v3530_v49  ;;  %17827 = vst [vmem:[#allocation34_spill] sm:$0xff] %v15943_v45 }
 0x29f   :  { %15012 = vrsqrt.f32 %v3503_v48  ;;  %17828 = vst [vmem:[#allocation35_spill] sm:$0xff] %v15945_v42 }
 0x2a6   :  { %v15007_v8 = vpop.eup %15006 }
 0x2a7   :  { %v15009_v12 = vpop.eup %15008 }
 0x2a8   :  { %v15011_v56 = vpop.eup %15010 }
 0x2a9   :  { %v15013_v27 = vpop.eup %15012  ;;  %v3524_v3 = vcombine.low %v15007_v8, %v15011_v56  ;;  %v15951_v8 = vsub.s32 5, %v3530_v49 }
 0x2aa   :  { %v3525_v33 = vcombine.low %v15009_v12, %v15013_v27 }
 0x2ab   :  { %v3532_v26 = vrot.slane %v3524_v3, %v15935_v44  ;;  %17829 = vst [vmem:[#allocation36_spill] sm:$0xff] %v15951_v8  ;;  %v15954_v3 = vsub.s32 7, %v3530_v49 }
 0x2ac   :  { %v3539_v39 = vrot.slane %v3525_v33, %v15935_v44 }
 0x2ad   :  { %17830 = vst [vmem:[#allocation37_spill] sm:$0xff] %v15954_v3 }
 0x2ae   :  { %v3540_v40 = vcombine.low %v3532_v26, %v3539_v39 }
 0x2b0   :  { %v3560_v34 = vmul.f32 %v3540_v40, %v3186_v28 }
 0x2b2   :  { %v3567_v57 = vrot.slane %v3560_v34, %v15927_v32  ;;  %v3571_v35 = vrot.slane %v3560_v34, %v15929_v62  ;;  %v3575_v15 = vrot.slane %v3560_v34, %v15931_v54  ;;  %v3579_v41 = vrot.slane %v3560_v34, %v15933_v16 }
 0x2b4   :  { %v3604_v1 = vmul.f32 %v3567_v57, %v15923_v21  ;;  %v3605_v50 = vmul.f32 %v3571_v35, %v3461_v2  ;;  %v3606_v46 = vmul.f32 %v3575_v15, %v3462_v25  ;;  %v3607_v48 = vmul.f32 %v3579_v41, %v3463_v14 }
 0x2b5   :  { %v3663_v53 = vrot.slane %v3567_v57, %v15927_v32  ;;  %v3667_v63 = vrot.slane %v3571_v35, %v15927_v32  ;;  %v3675_v10 = vrot.slane %v3579_v41, %v15927_v32  ;;  %v3671_v27 = vrot.slane %v3575_v15, %v15927_v32  ;;  %v17832_v41 = vld [vmem:[#allocation30_spill] sm:$0xff] }
 0x2b6   :  { %v3620_v12 = vcombine.low %v3604_v1, %v3605_v50  ;;  %v3621_v56 = vcombine.low %v3606_v46, %v3607_v48 }
 0x2b7   :  { %v3751_v33 = vmul.f32 %v3675_v10, %v15913_v61  ;;  %v3693_v21 = vmul.f32 %v3667_v63, %v15767_v0  ;;  %v3701_v25 = vmul.f32 %v3667_v63, %v15787_v47  ;;  %v3692_v2 = vmul.f32 %v3663_v53, %v15763_v60 }
 0x2b8   :  { %v3628_v14 = vrot.slane %v3620_v12, %v15935_v44  ;;  %v3635_v26 = vrot.slane %v3621_v56, %v15935_v44  ;;  %v3700_v39 = vmul.f32 %v3663_v53, %v15775_v9  ;;  %v3709_v40 = vmul.f32 %v3667_v63, %v15810_v24 }
 0x2b9   :  { %v3717_v34 = vmul.f32 %v3667_v63, %v15828_v29  ;;  %v3708_v49 = vmul.f32 %v3663_v53, %v15803_v4  ;;  %v3716_v61 = vmul.f32 %v3663_v53, %v15820_v52  ;;  %v3725_v0 = vmul.f32 %v3667_v63, %v15850_v22 }
 0x2ba   :  { %v3636_v57 = vcombine.low %v3628_v14, %v3635_v26  ;;  %v3733_v47 = vmul.f32 %v3667_v63, %v15868_v37  ;;  %v3724_v60 = vmul.f32 %v3663_v53, %v15843_v11  ;;  %v3732_v35 = vmul.f32 %v3663_v53, %v15860_v31 }
 0x2bb   :  { %v3741_v15 = vmul.f32 %v3667_v63, %v15890_v59  ;;  %v15973_v9 = vmul.f32 %v3667_v63, %v15908_v23  ;;  %v15976_v24 = vmul.f32 %v3663_v53, %v15883_v55  ;;  %v15979_v4 = vmul.f32 %v3663_v53, %v15900_v38 }
 0x2bc   :  { %v3654_v52 = vrot.slane %v3636_v57, 7  ;;  %v15982_v29 = vmul.f32 %v3675_v10, %v15773_v7  ;;  %v15985_v22 = vmul.f32 %v3675_v10, %v15797_v19  ;;  %v15988_v11 = vmul.f32 %v3671_v27, %v15765_v58 }
 0x2bd   :  { %v15991_v31 = vmul.f32 %v3671_v27, %v15785_v13  ;;  %v15994_v37 = vmul.f32 %v3675_v10, %v15818_v43  ;;  %v15997_v55 = vmul.f32 %v3675_v10, %v15833_v51  ;;  %v16000_v59 = vmul.f32 %v3671_v27, %v15808_v6  ;;  %v17831_v6 = vld [vmem:[#allocation29_spill] sm:$0xff] }
 0x2be   :  { %v3658_v7 = vsub.f32 %v3186_v28, %v3654_v52  ;;  %v16003_v38 = vmul.f32 %v3671_v27, %v15826_v20  ;;  %v16006_v19 = vmul.f32 %v3675_v10, %v15858_v30  ;;  %v16009_v58 = vmul.f32 %v3675_v10, %v15873_v18 }
 0x2bf   :  { %v16012_v13 = vmul.f32 %v3671_v27, %v15848_v17  ;;  %v16015_v43 = vmul.f32 %v3671_v27, %v15866_v36  ;;  %v16018_v51 = vmul.f32 %v3675_v10, %v15898_v5  ;;  %v16021_v23 = vmul.f32 %v3671_v27, %v17831_v6 }
 0x2c0   :  { %v3761_v20 = vrot.slane %v3658_v7, %v15943_v45  ;;  %v3765_v30 = vrot.slane %v3658_v7, %v15945_v42  ;;  %v3769_v28 = vrot.slane %v3658_v7, %v15951_v8  ;;  %v3773_v18 = vrot.slane %v3658_v7, %v15954_v3 }
 0x2c1   :  { %v16028_v17 = vmul.f32 %v3671_v27, %v17832_v41  ;;  %v14014_v41 = vld [vmem:[#allocation7 + $0x3bc] ss:$28 sps:$4 sm:$0xff]  }
 0x2c2   :  { %v3801_v36 = vrot.slane %v3761_v20, %v15943_v45  ;;  %v3805_v1 = vrot.slane %v3765_v30, %v15943_v45  ;;  %v16033_v5 = vrot.slane %v3773_v18, %v15943_v45  ;;  %v16036_v50 = vrot.slane %v3769_v28, %v15943_v45  ;;  %v14009_v18 = vld [vmem:[#allocation7 + $0x388] ss:$28 sps:$4 sm:$0xff]  }
 0x2c4   :  { %v16039_v46 = vadd.f32 %v16033_v5, %v3751_v33  ;;  %v3831_v48 = vadd.f32 %v3805_v1, %v3693_v21  ;;  %v3839_v53 = vadd.f32 %v3805_v1, %v3701_v25  ;;  %v3830_v63 = vadd.f32 %v3801_v36, %v3692_v2  ;;  %v14006_v33 = vld [vmem:[#allocation7 + $0x380] ss:$28 sps:$4 sm:$0xff]  }
 0x2c5   :  { %v3838_v10 = vadd.f32 %v3801_v36, %v3700_v39  ;;  %v3847_v12 = vadd.f32 %v3805_v1, %v3709_v40  ;;  %v3855_v56 = vadd.f32 %v3805_v1, %v3717_v34  ;;  %v3846_v27 = vadd.f32 %v3801_v36, %v3708_v49 }
 0x2c6   :  { %v3953_v14 = vmax.f32 %v16039_v46, 0.0  ;;  %v3895_v26 = vmax.f32 %v3831_v48, 0.0  ;;  %v3903_v57 = vmax.f32 %v3839_v53, 0.0  ;;  %v3894_v52 = vmax.f32 %v3830_v63, 0.0  ;;  %v14017_v48 = vld [vmem:[#allocation7 + $0x3c4] ss:$28 sps:$4 sm:$0xff]  }
 0x2c7   :  { %v3902_v7 = vmax.f32 %v3838_v10, 0.0  ;;  %v3911_v6 = vmax.f32 %v3847_v12, 0.0  ;;  %v3919_v20 = vmax.f32 %v3855_v56, 0.0  ;;  %v3854_v30 = vadd.f32 %v3801_v36, %v3716_v61  ;;  %v14012_v56 = vld [vmem:[#allocation7 + $0x3b8] ss:$28 sps:$4 sm:$0xff]  }
 0x2c8   :  { %v16042_v28 = vpack.c.bf16 %v3903_v57, %v3895_v26  ;;  %v3910_v21 = vmax.f32 %v3846_v27, 0.0  ;;  %v3863_v25 = vadd.f32 %v3805_v1, %v3725_v0  ;;  %v3871_v2 = vadd.f32 %v3805_v1, %v3733_v47  ;;  %v14015_v27 = vld [vmem:[#allocation7 + $0x3c0] ss:$28 sps:$4 sm:$0xff]   ;;  %v14044_v46 = vld [vmem:[#allocation7 + $0x4d4] ss:$28 sps:$4 sm:$0xff]  }
 0x2c9   :  { %v16044_v39 = vpack.c.bf16 %v3902_v7, %v3894_v52  ;;  %v16046_v40 = vpack.c.bf16 %v3919_v20, %v3911_v6  ;;  %v3918_v34 = vmax.f32 %v3854_v30, 0.0  ;;  %v3862_v49 = vadd.f32 %v3801_v36, %v3724_v60  ;;  %v14020_v52 = vld [vmem:[#allocation7 + $0x3f4] ss:$28 sps:$4 sm:$0xff]   ;;  %v14023_v7 = vld [vmem:[#allocation7 + $0x3fc] ss:$28 sps:$4 sm:$0xff]  }
 0x2ca   :  { %17833 = vst [vmem:[#allocation29_spill] sm:$0xff] %v16042_v28  ;;  %6838 = vmatprep.mubr.bf16.mxu0 %v16042_v28  ;;  %7130 = vmatprep.mubr.bf16.mxu1 %v16042_v28  ;;  %v3927_v61 = vmax.f32 %v3863_v25, 0.0  ;;  %v3935_v53 = vmax.f32 %v3871_v2, 0.0  ;;  %v3870_v63 = vadd.f32 %v3801_v36, %v3732_v35  ;;  %v3879_v10 = vadd.f32 %v3805_v1, %v3741_v15  ;;  %v14021_v25 = vld [vmem:[#allocation7 + $0x3f8] ss:$28 sps:$4 sm:$0xff]  }
 0x2cb   :  { %17834 = vst [vmem:[#allocation30_spill] sm:$0xff] %v16044_v39  ;;  %17835 = vst [vmem:[#allocation38_spill] sm:$0xff] %v16046_v40  ;;  %6839 = vmatmul.mubr.bf16.vlgmr.msra.gmra.mrb[32].mxu0 %v16044_v39  ;;  %7131 = vmatmul.mubr.bf16.vlgmr.msra.gmra.mrb[32].mxu1 %v16044_v39  ;;  %v16052_v0 = vpack.c.bf16 %v3918_v34, %v3910_v21  ;;  %v3926_v47 = vmax.f32 %v3862_v49, 0.0  ;;  %v3887_v12 = vadd.f32 %v3805_v1, %v15973_v9 }
 0x2cc   :  { %v3878_v60 = vadd.f32 %v3801_v36, %v15976_v24  ;;  %6880 = vmatpush1.bf16.msra.mxu0 %v14006_v33  ;;  %7172 = vmatpush1.bf16.msra.mxu1 %v14009_v18  ;;  %v16056_v26 = vpack.c.bf16 %v3935_v53, %v3927_v61  ;;  %v3934_v57 = vmax.f32 %v3870_v63, 0.0  ;;  %v3943_v35 = vmax.f32 %v3879_v10, 0.0  ;;  %v14026_v61 = vld [vmem:[#allocation7 + $0x42c] ss:$28 sps:$4 sm:$0xff]   ;;  %v14029_v53 = vld [vmem:[#allocation7 + $0x434] ss:$28 sps:$4 sm:$0xff]  }
 0x2cd   :  { %17836 = vst [vmem:[#allocation39_spill] sm:$0xff] %v16052_v0  ;;  %v3886_v15 = vadd.f32 %v3801_v36, %v15979_v4  ;;  %6848 = vmatprep.mubr.bf16.mxu0 %v16046_v40  ;;  %7140 = vmatprep.mubr.bf16.mxu1 %v16046_v40  ;;  %v3951_v6 = vmax.f32 %v3887_v12, 0.0  ;;  %v3833_v24 = vadd.f32 %v16033_v5, %v15982_v29 }
 0x2ce   :  { %17837 = vst [vmem:[#allocation40_spill] sm:$0xff] %v16056_v26  ;;  %v3942_v9 = vmax.f32 %v3878_v60, 0.0  ;;  %v3841_v1 = vadd.f32 %v16033_v5, %v15985_v22  ;;  %6881 = vmatprep.subr.bf16.mxu0 %v14014_v41  ;;  %7173 = vmatprep.subr.bf16.mxu1 %v14017_v48  ;;  %v16065_v20 = vpack.c.bf16 %v3934_v57, %v3926_v47  ;;  %v14018_v22 = vld [vmem:[#allocation7 + $0x3f0] ss:$28 sps:$4 sm:$0xff]  }
 0x2cf   :  { %v3950_v30 = vmax.f32 %v3886_v15, 0.0  ;;  %v3832_v4 = vadd.f32 %v16036_v50, %v15988_v11  ;;  %v3840_v36 = vadd.f32 %v16036_v50, %v15991_v31  ;;  %v16071_v33 = vpack.c.bf16 %v3951_v6, %v3943_v35  ;;  %v14032_v15 = vld [vmem:[#allocation7 + $0x464] ss:$28 sps:$4 sm:$0xff]  }
 0x2d0   :  { %17838 = vst [vmem:[#allocation41_spill] sm:$0xff] %v16065_v20  ;;  %v3897_v18 = vmax.f32 %v3833_v24, 0.0  ;;  %v3905_v21 = vmax.f32 %v3841_v1, 0.0  ;;  %v3849_v29 = vadd.f32 %v16033_v5, %v15994_v37  ;;  %6882 = vmatpush1.bf16.msra.mxu0 %v14012_v56  ;;  %7174 = vmatpush1.bf16.msra.mxu1 %v14015_v27  ;;  %v3857_v11 = vadd.f32 %v16033_v5, %v15997_v55  ;;  %v14024_v56 = vld [vmem:[#allocation7 + $0x428] ss:$28 sps:$4 sm:$0xff]  }
 0x2d1   :  { %17839 = vst [vmem:[#allocation42_spill] sm:$0xff] %v16071_v33  ;;  %v16075_v2 = vpack.c.bf16 %v3950_v30, %v3942_v9  ;;  %v3896_v34 = vmax.f32 %v3832_v4, 0.0  ;;  %v3904_v49 = vmax.f32 %v3840_v36, 0.0  ;;  %6883 = vmatprep.subr.bf16.mxu0 %v14020_v52  ;;  %7175 = vmatprep.subr.bf16.mxu1 %v14023_v7  ;;  %v3848_v48 = vadd.f32 %v16036_v50, %v16000_v59  ;;  %v14027_v27 = vld [vmem:[#allocation7 + $0x430] ss:$28 sps:$4 sm:$0xff]  }
 0x2d2   :  { %v16079_v31 = vpack.c.bf16 %v3905_v21, %v3897_v18  ;;  %v3913_v41 = vmax.f32 %v3849_v29, 0.0  ;;  %v3856_v37 = vadd.f32 %v16036_v50, %v16003_v38  ;;  %v3921_v10 = vmax.f32 %v3857_v11, 0.0  ;;  %v14030_v30 = vld [vmem:[#allocation7 + $0x460] ss:$28 sps:$4 sm:$0xff]   ;;  %v14033_v4 = vld [vmem:[#allocation7 + $0x468] ss:$28 sps:$4 sm:$0xff]  }
 0x2d3   :  { %17840 = vst [vmem:[#allocation43_spill] sm:$0xff] %v16075_v2  ;;  %v16085_v63 = vpack.c.bf16 %v3904_v49, %v3896_v34  ;;  %v3865_v47 = vadd.f32 %v16033_v5, %v16006_v19  ;;  %v3873_v55 = vadd.f32 %v16033_v5, %v16009_v58  ;;  %6849 = vmatmul.mubr.bf16.gmra.mrb[36].mxu0 %v16052_v0  ;;  %v3912_v12 = vmax.f32 %v3848_v48, 0.0  ;;  %v14038_v18 = vld [vmem:[#allocation7 + $0x49c] ss:$28 sps:$4 sm:$0xff]   ;;  %v14041_v21 = vld [vmem:[#allocation7 + $0x4a4] ss:$28 sps:$4 sm:$0xff]  }
 0x2d4   :  { %17841 = vst [vmem:[#allocation44_spill] sm:$0xff] %v16079_v31  ;;  %7141 = vmatmul.mubr.bf16.gmra.mrb[36].mxu1 %v16052_v0  ;;  %v3920_v59 = vmax.f32 %v3856_v37, 0.0  ;;  %v3864_v38 = vadd.f32 %v16036_v50, %v16012_v13  ;;  %v3872_v60 = vadd.f32 %v16036_v50, %v16015_v43  ;;  %6884 = vmatpush1.bf16.msra.mxu0 %v14018_v22  ;;  %v14035_v13 = vld [vmem:[#allocation7 + $0x46c] ss:$28 sps:$4 sm:$0xff]   ;;  %v14053_v49 = vld [vmem:[#allocation7 + $0x514] ss:$28 sps:$4 sm:$0xff]  }
 0x2d5   :  { %17842 = vst [vmem:[#allocation45_spill] sm:$0xff] %v16085_v63  ;;  %7176 = vmatpush1.bf16.msra.mxu1 %v14021_v25  ;;  %v16097_v19 = vpack.c.bf16 %v3921_v10, %v3913_v41  ;;  %v3929_v57 = vmax.f32 %v3865_v47, 0.0  ;;  %v3937_v58 = vmax.f32 %v3873_v55, 0.0  ;;  %v3881_v35 = vadd.f32 %v16033_v5, %v16018_v51  ;;  %6858 = vmatprep.mubr.bf16.mxu0 %v16056_v26  ;;  %v14042_v22 = vld [vmem:[#allocation7 + $0x4d0] ss:$28 sps:$4 sm:$0xff]  }
 0x2d6   :  { %7150 = vmatprep.mubr.bf16.mxu1 %v16056_v26  ;;  %v16103_v52 = vpack.c.bf16 %v3920_v59, %v3912_v12  ;;  %v3928_v43 = vmax.f32 %v3864_v38, 0.0  ;;  %v3936_v7 = vmax.f32 %v3872_v60, 0.0  ;;  %v3880_v6 = vadd.f32 %v16036_v50, %v16021_v23  ;;  %6885 = vmatprep.subr.bf16.mxu0 %v14026_v61  ;;  %v14045_v25 = vld [vmem:[#allocation7 + $0x4d8] ss:$28 sps:$4 sm:$0xff]   ;;  %v14050_v34 = vld [vmem:[#allocation7 + $0x50c] ss:$28 sps:$4 sm:$0xff]  }
 0x2d7   :  { %17843 = vst [vmem:[#allocation46_spill] sm:$0xff] %v16097_v19  ;;  %7177 = vmatprep.subr.bf16.mxu1 %v14029_v53  ;;  %v16107_v9 = vpack.c.bf16 %v3937_v58, %v3929_v57  ;;  %v3945_v24 = vmax.f32 %v3881_v35, 0.0  ;;  %v3888_v51 = vadd.f32 %v16036_v50, %v16028_v17  ;;  %v14036_v17 = vld [vmem:[#allocation7 + $0x498] ss:$28 sps:$4 sm:$0xff]   ;;  %v14039_v50 = vld [vmem:[#allocation7 + $0x4a0] ss:$28 sps:$4 sm:$0xff]  }
 0x2d8   :  { %17844 = vst [vmem:[#allocation47_spill] sm:$0xff] %v16103_v52  ;;  %v16111_v5 = vpack.c.bf16 %v3936_v7, %v3928_v43  ;;  %v3944_v1 = vmax.f32 %v3880_v6, 0.0  ;;  %6886 = vmatpush1.bf16.msra.mxu0 %v14024_v56  ;;  %v14048_v11 = vld [vmem:[#allocation7 + $0x508] ss:$28 sps:$4 sm:$0xff]   ;;  %v14051_v41 = vld [vmem:[#allocation7 + $0x510] ss:$28 sps:$4 sm:$0xff]  }
 0x2d9   :  { %17845 = vst [vmem:[#allocation48_spill] sm:$0xff] %v16107_v9  ;;  %7178 = vmatpush1.bf16.msra.mxu1 %v14027_v27  ;;  %v16115_v36 = vpack.c.bf16 %v3953_v14, %v3945_v24  ;;  %v3952_v23 = vmax.f32 %v3888_v51, 0.0  ;;  %6887 = vmatprep.subr.bf16.mxu0 %v14032_v15  ;;  %v14047_v14 = vld [vmem:[#allocation7 + $0x4dc] ss:$28 sps:$4 sm:$0xff]   ;;  %v14056_v48 = vld [vmem:[#allocation7 + $0x544] ss:$28 sps:$4 sm:$0xff]  }
 0x2da   :  { %17846 = vst [vmem:[#allocation49_spill] sm:$0xff] %v16111_v5  ;;  %7179 = vmatprep.subr.bf16.mxu1 %v14035_v13  ;;  %v14059_v37 = vld [vmem:[#allocation7 + $0x54c] ss:$28 sps:$4 sm:$0xff]   ;;  %v14054_v61 = vld [vmem:[#allocation7 + $0x540] ss:$28 sps:$4 sm:$0xff]  }
 0x2db   :  { %17847 = vst [vmem:[#allocation50_spill] sm:$0xff] %v16115_v36  ;;  %v16117_v29 = vpack.c.bf16 %v3952_v23, %v3944_v1  ;;  %6859 = vmatmul.mubr.bf16.gmra.mrb[40].mxu0 %v16065_v20  ;;  %v14057_v53 = vld [vmem:[#allocation7 + $0x548] ss:$28 sps:$4 sm:$0xff]   ;;  %v14062_v10 = vld [vmem:[#allocation7 + $0x57c] ss:$28 sps:$4 sm:$0xff]  }
 0x2dc   :  { %7151 = vmatmul.mubr.bf16.gmra.mrb[40].mxu1 %v16065_v20  ;;  %6888 = vmatpush1.bf16.msra.mxu0 %v14030_v30  ;;  %v14065_v47 = vld [vmem:[#allocation7 + $0x584] ss:$28 sps:$4 sm:$0xff]   ;;  %v14060_v55 = vld [vmem:[#allocation7 + $0x578] ss:$28 sps:$4 sm:$0xff]   ;;  %v14066_v60 = vld [vmem:[#allocation7 + $0x5b0] ss:$28 sps:$4 sm:$0xff]  }
 0x2dd   :  { %17848 = vst [vmem:[#allocation51_spill] sm:$0xff] %v16117_v29  ;;  %7180 = vmatpush1.bf16.msra.mxu1 %v14033_v4  ;;  %6868 = vmatprep.mubr.bf16.mxu0 %v16071_v33  ;;  %v14063_v12 = vld [vmem:[#allocation7 + $0x580] ss:$28 sps:$4 sm:$0xff]   ;;  %v14068_v59 = vld [vmem:[#allocation7 + $0x5b4] ss:$28 sps:$4 sm:$0xff]  }
 0x2de   :  { %7160 = vmatprep.mubr.bf16.mxu1 %v16071_v33  ;;  %6889 = vmatprep.subr.bf16.mxu0 %v14038_v18  ;;  %v14071_v38 = vld [vmem:[#allocation7 + $0x5bc] ss:$28 sps:$4 sm:$0xff]   ;;  %v14074_v27 = vld [vmem:[#allocation7 + $0x5ec] ss:$28 sps:$4 sm:$0xff]   ;;  %v14077_v57 = vld [vmem:[#allocation7 + $0x5f4] ss:$28 sps:$4 sm:$0xff]  }
 0x2df   :  { %7181 = vmatprep.subr.bf16.mxu1 %v14041_v21  ;;  %v14069_v56 = vld [vmem:[#allocation7 + $0x5b8] ss:$28 sps:$4 sm:$0xff]   ;;  %v14072_v58 = vld [vmem:[#allocation7 + $0x5e8] ss:$28 sps:$4 sm:$0xff]   ;;  %v14075_v35 = vld [vmem:[#allocation7 + $0x5f0] ss:$28 sps:$4 sm:$0xff]  }
 0x2e0   :  { %6890 = vmatpush1.bf16.msra.mxu0 %v14036_v17  ;;  %v14080_v15 = vld [vmem:[#allocation7 + $0x624] ss:$28 sps:$4 sm:$0xff]   ;;  %v14083_v13 = vld [vmem:[#allocation7 + $0x62c] ss:$28 sps:$4 sm:$0xff]   ;;  %v14086_v6 = vld [vmem:[#allocation7 + $0x65c] ss:$28 sps:$4 sm:$0xff]  }
 0x2e1   :  { %7182 = vmatpush1.bf16.msra.mxu1 %v14039_v50  ;;  %6891 = vmatprep.subr.bf16.mxu0 %v14044_v46  ;;  %v14078_v43 = vld [vmem:[#allocation7 + $0x620] ss:$28 sps:$4 sm:$0xff]   ;;  %v14081_v7 = vld [vmem:[#allocation7 + $0x628] ss:$28 sps:$4 sm:$0xff]   ;;  %v14084_v51 = vld [vmem:[#allocation7 + $0x658] ss:$28 sps:$4 sm:$0xff]  }
 0x2e2   :  { %7183 = vmatprep.subr.bf16.mxu1 %v14047_v14  ;;  %v14089_v24 = vld [vmem:[#allocation7 + $0x664] ss:$28 sps:$4 sm:$0xff]   ;;  %v14092_v30 = vld [vmem:[#allocation7 + $0x694] ss:$28 sps:$4 sm:$0xff]   ;;  %v14095_v4 = vld [vmem:[#allocation7 + $0x69c] ss:$28 sps:$4 sm:$0xff]  }
 0x2e3   :  { %6869 = vmatmul.mubr.bf16.gmra.mrb[44].mxu0 %v16075_v2  ;;  %v14087_v1 = vld [vmem:[#allocation7 + $0x660] ss:$28 sps:$4 sm:$0xff]   ;;  %v14090_v23 = vld [vmem:[#allocation7 + $0x690] ss:$28 sps:$4 sm:$0xff]   ;;  %v14093_v18 = vld [vmem:[#allocation7 + $0x698] ss:$28 sps:$4 sm:$0xff]  }
 0x2e4   :  { %7161 = vmatmul.mubr.bf16.gmra.mrb[44].mxu1 %v16075_v2  ;;  %6892 = vmatpush1.bf16.msra.mxu0 %v14042_v22  ;;  %v14098_v21 = vld [vmem:[#allocation7 + $0x6cc] ss:$28 sps:$4 sm:$0xff]   ;;  %v14101_v17 = vld [vmem:[#allocation7 + $0x6d4] ss:$28 sps:$4 sm:$0xff]   ;;  %v14104_v14 = vld [vmem:[#allocation7 + $0x704] ss:$28 sps:$4 sm:$0xff]  }
 0x2e5   :  { %7184 = vmatpush1.bf16.msra.mxu1 %v14045_v25  ;;  %6911 = vmatprep.mubr.bf16.mxu0 %v16079_v31  ;;  %v14096_v50 = vld [vmem:[#allocation7 + $0x6c8] ss:$28 sps:$4 sm:$0xff]   ;;  %v14099_v46 = vld [vmem:[#allocation7 + $0x6d0] ss:$28 sps:$4 sm:$0xff]   ;;  %v14102_v25 = vld [vmem:[#allocation7 + $0x700] ss:$28 sps:$4 sm:$0xff]  }
 0x2e6   :  { %7203 = vmatprep.mubr.bf16.mxu1 %v16079_v31  ;;  %6893 = vmatprep.subr.bf16.mxu0 %v14050_v34  ;;  %v14107_v22 = vld [vmem:[#allocation7 + $0x70c] ss:$28 sps:$4 sm:$0xff]  }
 0x2e7   :  { %7185 = vmatprep.subr.bf16.mxu1 %v14053_v49  ;;  %v14105_v34 = vld [vmem:[#allocation7 + $0x708] ss:$28 sps:$4 sm:$0xff]   ;;  %v14110_v49 = vld [vmem:[#allocation7 + $0x73c] ss:$28 sps:$4 sm:$0xff]  }
 0x2e8   :  { %6894 = vmatpush1.bf16.msra.mxu0 %v14048_v11  ;;  %v14113_v11 = vld [vmem:[#allocation7 + $0x744] ss:$28 sps:$4 sm:$0xff]  }
 0x2e9   :  { %7186 = vmatpush1.bf16.msra.mxu1 %v14051_v41  ;;  %6895 = vmatprep.subr.bf16.mxu0 %v14056_v48  ;;  %v14108_v41 = vld [vmem:[#allocation7 + $0x738] ss:$28 sps:$4 sm:$0xff]   ;;  %v14111_v48 = vld [vmem:[#allocation7 + $0x740] ss:$28 sps:$4 sm:$0xff]  }
 0x2ea   :  { %7187 = vmatprep.subr.bf16.mxu1 %v14059_v37  ;;  %v14116_v37 = vld [vmem:[#allocation7 + $0x774] ss:$28 sps:$4 sm:$0xff]  }
 0x2ec   :  { %6896 = vmatpush1.bf16.msra.mxu0 %v14054_v61  ;;  %v14119_v61 = vld [vmem:[#allocation7 + $0x77c] ss:$28 sps:$4 sm:$0xff]  }
 0x2ed   :  { %7188 = vmatpush1.bf16.msra.mxu1 %v14057_v53  ;;  %6897 = vmatprep.subr.bf16.mxu0 %v14062_v10 }
 0x2ee   :  { %7189 = vmatprep.subr.bf16.mxu1 %v14065_v47 }
 0x2f0   :  { %6898 = vmatpush1.bf16.msra.mxu0 %v14060_v55  ;;  %v14114_v55 = vld [vmem:[#allocation7 + $0x770] ss:$28 sps:$4 sm:$0xff]  }
 0x2f1   :  { %7190 = vmatpush1.bf16.msra.mxu1 %v14063_v12  ;;  %6899 = vmatprep.subr.bf16.mxu0 %v14068_v59 }
 0x2f2   :  { %7191 = vmatprep.subr.bf16.mxu1 %v14071_v38 }
 0x2f4   :  { %6900 = vmatpush1.bf16.msra.mxu0 %v14066_v60 }
 0x2f5   :  { %7192 = vmatpush1.bf16.msra.mxu1 %v14069_v56  ;;  %6901 = vmatprep.subr.bf16.mxu0 %v14074_v27  ;;  %v14117_v27 = vld [vmem:[#allocation7 + $0x778] ss:$28 sps:$4 sm:$0xff]  }
 0x2f6   :  { %7193 = vmatprep.subr.bf16.mxu1 %v14077_v57  ;;  %v14122_v57 = vld [vmem:[#allocation7 + $0x7ac] ss:$28 sps:$4 sm:$0xff]  }
 0x2f8   :  { %6902 = vmatpush1.bf16.msra.mxu0 %v14072_v58 }
 0x2f9   :  { %7194 = vmatpush1.bf16.msra.mxu1 %v14075_v35  ;;  %6903 = vmatprep.subr.bf16.mxu0 %v14080_v15 }
 0x2fa   :  { %7195 = vmatprep.subr.bf16.mxu1 %v14083_v13 }
 0x2fc   :  { %6904 = vmatpush1.bf16.msra.mxu0 %v14078_v43 }
 0x2fd   :  { %7196 = vmatpush1.bf16.msra.mxu1 %v14081_v7  ;;  %6905 = vmatprep.subr.bf16.mxu0 %v14086_v6  ;;  %v14125_v7 = vld [vmem:[#allocation7 + $0x7b4] ss:$28 sps:$4 sm:$0xff]  }
 0x2fe   :  { %7197 = vmatprep.subr.bf16.mxu1 %v14089_v24 }
 0x300   :  { %6906 = vmatpush1.bf16.msra.mxu0 %v14084_v51 }
 0x301   :  { %7198 = vmatpush1.bf16.msra.mxu1 %v14087_v1  ;;  %6907 = vmatprep.subr.bf16.mxu0 %v14092_v30 }
 0x302   :  { %7199 = vmatprep.subr.bf16.mxu1 %v14095_v4 }
 0x304   :  { %6908 = vmatpush1.bf16.msra.mxu0 %v14090_v23 }
 0x305   :  { %7200 = vmatpush1.bf16.msra.mxu1 %v14093_v18  ;;  %6909 = vmatprep.subr.bf16.mxu0 %v14098_v21  ;;  %v14120_v21 = vld [vmem:[#allocation7 + $0x7a8] ss:$28 sps:$4 sm:$0xff]  }
 0x306   :  { %7201 = vmatprep.subr.bf16.mxu1 %v14101_v17 }
 0x308   :  { %6910 = vmatpush1.bf16.msra.mxu0 %v14096_v50  ;;  %v14123_v50 = vld [vmem:[#allocation7 + $0x7b0] ss:$28 sps:$4 sm:$0xff]  }
 0x309   :  { %7202 = vmatpush1.bf16.msra.mxu1 %v14099_v46  ;;  %6952 = vmatprep.subr.bf16.mxu0 %v14104_v14 }
 0x30a   :  { %7244 = vmatprep.subr.bf16.mxu1 %v14107_v22 }
 0x30b   :  { %6912 = vmatmul.mubr.bf16.vlgmr.msra.gmra.mrb[32].mxu0 %v16085_v63 }
 0x30c   :  { %7204 = vmatmul.mubr.bf16.vlgmr.msra.gmra.mrb[32].mxu1 %v16085_v63  ;;  %6921 = vmatprep.mubr.bf16.mxu0 %v16097_v19 }
 0x30d   :  { %7213 = vmatprep.mubr.bf16.mxu1 %v16097_v19  ;;  %6953 = vmatpush1.bf16.msra.mxu0 %v14102_v25 }
 0x30e   :  { %7245 = vmatpush1.bf16.msra.mxu1 %v14105_v34  ;;  %6954 = vmatprep.subr.bf16.mxu0 %v14110_v49 }
 0x30f   :  { %7246 = vmatprep.subr.bf16.mxu1 %v14113_v11 }
 0x311   :  { %v16131_v53 = vpop.f32.mrb[16].mxu0  ;;  %v16133_v10 = vpop.f32.mrb[16].mxu1  ;;  %6955 = vmatpush1.bf16.msra.mxu0 %v14108_v41  ;;  %v14128_v41 = vld [vmem:[#allocation7 + $0x7e4] ss:$28 sps:$4 sm:$0xff]  }
 0x312   :  { %v16135_v47 = vpop.f32.mrb[17].mxu0  ;;  %7247 = vmatpush1.bf16.msra.mxu1 %v14111_v48  ;;  %v3296_v12 = vmul.f32 %v16131_v53, %v16131_v53  ;;  %v3298_v59 = vmul.f32 %v16133_v10, %v16133_v10  ;;  %v16143_v60 = vpop.f32.mrb[17].mxu1  ;;  %6956 = vmatprep.subr.bf16.mxu0 %v14116_v37 }
 0x313   :  { %v3297_v38 = vmul.f32 %v16135_v47, %v16135_v47  ;;  %v16145_v56 = vpop.f32.mrb[18].mxu0  ;;  %7248 = vmatprep.subr.bf16.mxu1 %v14119_v61  ;;  %6922 = vmatmul.mubr.bf16.gmra.mrb[36].mxu0 %v16103_v52  ;;  %v3299_v58 = vmul.f32 %v16143_v60, %v16143_v60  ;;  %v16155_v13 = vpop.f32.mrb[18].mxu1 }
 0x314   :  { %7214 = vmatmul.mubr.bf16.gmra.mrb[36].mxu1 %v16103_v52  ;;  %v3240_v35 = vadd.f32 %v16145_v56, %v16131_v53  ;;  %v3304_v15 = vmul.f32 %v16145_v56, %v16145_v56  ;;  %v16157_v43 = vpop.f32.mrb[19].mxu0  ;;  %6931 = vmatprep.mubr.bf16.mxu0 %v16107_v9  ;;  %v3266_v6 = vadd.f32 %v16155_v13, %v16133_v10  ;;  %v16167_v1 = vpop.f32.mrb[19].mxu1 }
 0x315   :  { %7223 = vmatprep.mubr.bf16.mxu1 %v16107_v9  ;;  %v3306_v24 = vmul.f32 %v16155_v13, %v16155_v13  ;;  %v3253_v51 = vadd.f32 %v16157_v43, %v16135_v47  ;;  %v3305_v4 = vmul.f32 %v16157_v43, %v16157_v43  ;;  %v3279_v23 = vadd.f32 %v16167_v1, %v16143_v60 }
 0x316   :  { %v3408_v30 = vadd.f32 %v3304_v15, %v3296_v12  ;;  %v3307_v18 = vmul.f32 %v16167_v1, %v16167_v1  ;;  %6957 = vmatpush1.bf16.msra.mxu0 %v14114_v55  ;;  %7249 = vmatpush1.bf16.msra.mxu1 %v14117_v27 }
 0x317   :  { %v3434_v17 = vadd.f32 %v3306_v24, %v3298_v59  ;;  %6958 = vmatprep.subr.bf16.mxu0 %v14122_v57  ;;  %v3421_v46 = vadd.f32 %v3305_v4, %v3297_v38  ;;  %7250 = vmatprep.subr.bf16.mxu1 %v14125_v7  ;;  %v14131_v38 = vld [vmem:[#allocation7 + $0x7ec] ss:$28 sps:$4 sm:$0xff]   ;;  %v14126_v7 = vld [vmem:[#allocation7 + $0x7e0] ss:$28 sps:$4 sm:$0xff]  }
 0x318   :  { %v3447_v14 = vadd.f32 %v3307_v18, %v3299_v58  ;;  %v14137_v18 = vld [vmem:[#allocation7 + $0x824] ss:$28 sps:$4 sm:$0xff]  }
 0x319   :  { %v16175_v22 = vpop.f32.mrb[20].mxu0  ;;  %v16180_v49 = vpop.f32.mrb[20].mxu1 }
 0x31a   :  { %v3241_v25 = vadd.f32 %v3240_v35, %v16175_v22  ;;  %v3312_v34 = vmul.f32 %v16175_v22, %v16175_v22  ;;  %v16182_v11 = vpop.f32.mrb[21].mxu0  ;;  %6959 = vmatpush1.bf16.msra.mxu0 %v14120_v21  ;;  %v3267_v48 = vadd.f32 %v3266_v6, %v16180_v49  ;;  %v3314_v37 = vmul.f32 %v16180_v49, %v16180_v49  ;;  %v16190_v12 = vpop.f32.mrb[21].mxu1  ;;  %v14129_v6 = vld [vmem:[#allocation7 + $0x7e8] ss:$28 sps:$4 sm:$0xff]  }
 0x31b   :  { %v3254_v61 = vadd.f32 %v3253_v51, %v16182_v11  ;;  %v3313_v55 = vmul.f32 %v16182_v11, %v16182_v11  ;;  %v16192_v59 = vpop.f32.mrb[22].mxu0  ;;  %7251 = vmatpush1.bf16.msra.mxu1 %v14123_v50  ;;  %6932 = vmatmul.mubr.bf16.gmra.mrb[40].mxu0 %v16111_v5  ;;  %v3280_v57 = vadd.f32 %v3279_v23, %v16190_v12  ;;  %v16199_v35 = vpop.f32.mrb[22].mxu1  ;;  %v14134_v23 = vld [vmem:[#allocation7 + $0x81c] ss:$28 sps:$4 sm:$0xff]  }
 0x31c   :  { %7224 = vmatmul.mubr.bf16.gmra.mrb[40].mxu1 %v16111_v5  ;;  %v3409_v27 = vadd.f32 %v3408_v30, %v3312_v34  ;;  %v3315_v58 = vmul.f32 %v16190_v12, %v16190_v12  ;;  %17849 = vst [vmem:[#allocation52_spill] sm:$0xff] %v16199_v35  ;;  %v16201_v15 = vpop.f32.mrb[23].mxu0  ;;  %v3435_v24 = vadd.f32 %v3434_v17, %v3314_v37  ;;  %v16206_v30 = vpop.f32.mrb[23].mxu1 }
 0x31d   :  { %6941 = vmatprep.mubr.bf16.mxu0 %v16115_v36  ;;  %7233 = vmatprep.mubr.bf16.mxu1 %v16115_v36  ;;  %v3422_v51 = vadd.f32 %v3421_v46, %v3313_v55  ;;  %v3242_v4 = vadd.f32 %v3241_v25, %v16192_v59  ;;  %v3320_v50 = vmul.f32 %v16192_v59, %v16192_v59 }
 0x31e   :  { %v3448_v21 = vadd.f32 %v3447_v14, %v3315_v58  ;;  %v3268_v34 = vadd.f32 %v3267_v48, %v16199_v35  ;;  %v3322_v17 = vmul.f32 %v16199_v35, %v16199_v35  ;;  %6960 = vmatprep.subr.bf16.mxu0 %v14128_v41  ;;  %v3255_v37 = vadd.f32 %v3254_v61, %v16201_v15  ;;  %v14132_v41 = vld [vmem:[#allocation7 + $0x818] ss:$28 sps:$4 sm:$0xff]  }
 0x31f   :  { %v3321_v46 = vmul.f32 %v16201_v15, %v16201_v15  ;;  %v3281_v25 = vadd.f32 %v3280_v57, %v16206_v30  ;;  %v3323_v55 = vmul.f32 %v16206_v30, %v16206_v30  ;;  %7252 = vmatprep.subr.bf16.mxu1 %v14131_v38  ;;  %v3410_v14 = vadd.f32 %v3409_v27, %v3320_v50  ;;  %v14135_v38 = vld [vmem:[#allocation7 + $0x820] ss:$28 sps:$4 sm:$0xff]  }
 0x320   :  { %v3436_v58 = vadd.f32 %v3435_v24, %v3322_v17  ;;  %6961 = vmatpush1.bf16.msra.mxu0 %v14126_v7  ;;  %7253 = vmatpush1.bf16.msra.mxu1 %v14129_v6 }
 0x321   :  { %v3423_v48 = vadd.f32 %v3422_v51, %v3321_v46  ;;  %v3449_v36 = vadd.f32 %v3448_v21, %v3323_v55  ;;  %v16219_v5 = vpop.f32.mrb[24].mxu0  ;;  %6962 = vmatprep.subr.bf16.mxu0 %v14134_v23  ;;  %7254 = vmatprep.subr.bf16.mxu1 %v14137_v18  ;;  %v16224_v9 = vpop.f32.mrb[24].mxu1  ;;  %v14140_v23 = vld [vmem:[#allocation7 + $0x854] ss:$28 sps:$4 sm:$0xff]  }
 0x322   :  { %v3243_v61 = vadd.f32 %v3242_v4, %v16219_v5  ;;  %v3328_v57 = vmul.f32 %v16219_v5, %v16219_v5  ;;  %17850 = vst [vmem:[#allocation53_spill] sm:$0xff] %v16224_v9  ;;  %v16226_v52 = vpop.f32.mrb[25].mxu0  ;;  %v3269_v27 = vadd.f32 %v3268_v34, %v16224_v9  ;;  %v3330_v7 = vmul.f32 %v16224_v9, %v16224_v9  ;;  %v16234_v51 = vpop.f32.mrb[25].mxu1  ;;  %v14167_v9 = vld [vmem:[#allocation7 + $0x93c] ss:$28 sps:$4 sm:$0xff]  }
 0x323   :  { %v3256_v6 = vadd.f32 %v3255_v37, %v16226_v52  ;;  %v3329_v24 = vmul.f32 %v16226_v52, %v16226_v52  ;;  %17851 = vst [vmem:[#allocation54_spill] sm:$0xff] %v16234_v51  ;;  %v16236_v4 = vpop.f32.mrb[26].mxu0  ;;  %6942 = vmatmul.mubr.bf16.gmra.mrb[44].mxu0 %v16117_v29  ;;  %v3282_v21 = vadd.f32 %v3281_v25, %v16234_v51  ;;  %v16243_v34 = vpop.f32.mrb[26].mxu1  ;;  %v14143_v37 = vld [vmem:[#allocation7 + $0x85c] ss:$28 sps:$4 sm:$0xff]  }
 0x324   :  { %7234 = vmatmul.mubr.bf16.gmra.mrb[44].mxu1 %v16117_v29  ;;  %v3411_v18 = vadd.f32 %v3410_v14, %v3328_v57  ;;  %v3331_v50 = vmul.f32 %v16234_v51, %v16234_v51  ;;  %17852 = vst [vmem:[#allocation55_spill] sm:$0xff] %v16243_v34  ;;  %v16245_v17 = vpop.f32.mrb[27].mxu0  ;;  %v3437_v46 = vadd.f32 %v3436_v58, %v3330_v7  ;;  %v16250_v31 = vpop.f32.mrb[27].mxu1  ;;  %v14138_v14 = vld [vmem:[#allocation7 + $0x850] ss:$28 sps:$4 sm:$0xff]  }
 0x325   :  { %v3424_v55 = vadd.f32 %v3423_v48, %v3329_v24  ;;  %v3244_v19 = vadd.f32 %v3243_v61, %v16236_v4  ;;  %v3336_v63 = vmul.f32 %v16236_v4, %v16236_v4  ;;  %17853 = vst [vmem:[#allocation56_spill] sm:$0xff] %v16250_v31  ;;  %6963 = vmatpush1.bf16.msra.mxu0 %v14132_v41  ;;  %v14141_v58 = vld [vmem:[#allocation7 + $0x858] ss:$28 sps:$4 sm:$0xff]   ;;  %v14146_v48 = vld [vmem:[#allocation7 + $0x88c] ss:$28 sps:$4 sm:$0xff]  }
 0x326   :  { %v3450_v25 = vadd.f32 %v3449_v36, %v3331_v50  ;;  %v3270_v57 = vadd.f32 %v3269_v27, %v16243_v34  ;;  %v3338_v29 = vmul.f32 %v16243_v34, %v16243_v34  ;;  %v3257_v2 = vadd.f32 %v3256_v6, %v16245_v17  ;;  %7255 = vmatpush1.bf16.msra.mxu1 %v14135_v38  ;;  %v14149_v36 = vld [vmem:[#allocation7 + $0x894] ss:$28 sps:$4 sm:$0xff]   ;;  %v14144_v38 = vld [vmem:[#allocation7 + $0x888] ss:$28 sps:$4 sm:$0xff]  }
 0x327   :  { %v3412_v7 = vadd.f32 %v3411_v18, %v3336_v63  ;;  %v3337_v61 = vmul.f32 %v16245_v17, %v16245_v17  ;;  %v3283_v24 = vadd.f32 %v3282_v21, %v16250_v31  ;;  %v3339_v41 = vmul.f32 %v16250_v31, %v16250_v31  ;;  %6964 = vmatprep.subr.bf16.mxu0 %v14140_v23  ;;  %v14147_v23 = vld [vmem:[#allocation7 + $0x890] ss:$28 sps:$4 sm:$0xff]  }
 0x328   :  { %v3438_v27 = vadd.f32 %v3437_v46, %v3338_v29  ;;  %7256 = vmatprep.subr.bf16.mxu1 %v14143_v37  ;;  %v14152_v29 = vld [vmem:[#allocation7 + $0x8c4] ss:$28 sps:$4 sm:$0xff]  }
 0x329   :  { %v3425_v50 = vadd.f32 %v3424_v55, %v3337_v61  ;;  %v3451_v33 = vadd.f32 %v3450_v25, %v3339_v41  ;;  %v16261_v20 = vpop.f32.mrb[28].mxu0  ;;  %6965 = vmatpush1.bf16.msra.mxu0 %v14138_v14  ;;  %v16266_v18 = vpop.f32.mrb[28].mxu1  ;;  %v14155_v61 = vld [vmem:[#allocation7 + $0x8cc] ss:$28 sps:$4 sm:$0xff]  }
 0x32a   :  { %v3245_v63 = vadd.f32 %v3244_v19, %v16261_v20  ;;  %v3344_v6 = vmul.f32 %v16261_v20, %v16261_v20  ;;  %17854 = vst [vmem:[#allocation57_spill] sm:$0xff] %v16266_v18  ;;  %v16268_v21 = vpop.f32.mrb[29].mxu0  ;;  %7257 = vmatpush1.bf16.msra.mxu1 %v14141_v58  ;;  %6966 = vmatprep.subr.bf16.mxu0 %v14146_v48  ;;  %v16276_v14 = vpop.f32.mrb[29].mxu1 }
 0x32b   :  { %v3271_v37 = vadd.f32 %v3270_v57, %v16266_v18  ;;  %v3346_v46 = vmul.f32 %v16266_v18, %v16266_v18  ;;  %v3258_v55 = vadd.f32 %v3257_v2, %v16268_v21  ;;  %v3345_v19 = vmul.f32 %v16268_v21, %v16268_v21  ;;  %17855 = vst [vmem:[#allocation58_spill] sm:$0xff] %v16276_v14  ;;  %v16278_v25 = vpop.f32.mrb[30].mxu0  ;;  %v16284_v26 = vpop.f32.mrb[30].mxu1 }
 0x32c   :  { %7258 = vmatprep.subr.bf16.mxu1 %v14149_v36  ;;  %v3413_v58 = vadd.f32 %v3412_v7, %v3344_v6  ;;  %v3284_v48 = vadd.f32 %v3283_v24, %v16276_v14  ;;  %v3347_v57 = vmul.f32 %v16276_v14, %v16276_v14  ;;  %v3246_v41 = vadd.f32 %v3245_v63, %v16278_v25  ;;  %v16286_v2 = vpop.f32.mrb[31].mxu0  ;;  %v16291_v28 = vpop.f32.mrb[31].mxu1  ;;  %v14150_v7 = vld [vmem:[#allocation7 + $0x8c0] ss:$28 sps:$4 sm:$0xff]  }
 0x32d   :  { %17856 = vst [vmem:[#allocation59_spill] sm:$0xff] %v16284_v26  ;;  %v3439_v0 = vadd.f32 %v3438_v27, %v3346_v46  ;;  %v3426_v40 = vadd.f32 %v3425_v50, %v3345_v19  ;;  %v3352_v39 = vmul.f32 %v16278_v25, %v16278_v25  ;;  %v3272_v36 = vadd.f32 %v3271_v37, %v16284_v26  ;;  %v14153_v27 = vld [vmem:[#allocation7 + $0x8c8] ss:$28 sps:$4 sm:$0xff]   ;;  %v14158_v50 = vld [vmem:[#allocation7 + $0x8fc] ss:$28 sps:$4 sm:$0xff]  }
 0x32e   :  { %6967 = vmatpush1.bf16.msra.mxu0 %v14144_v38  ;;  %v3452_v24 = vadd.f32 %v3451_v33, %v3347_v57  ;;  %v3247_v6 = vrot.slane %v3246_v41, 4  ;;  %v3354_v63 = vmul.f32 %v16284_v26, %v16284_v26  ;;  %v3259_v3 = vadd.f32 %v3258_v55, %v16286_v2  ;;  %7259 = vmatpush1.bf16.msra.mxu1 %v14147_v23  ;;  %v14161_v38 = vld [vmem:[#allocation7 + $0x904] ss:$28 sps:$4 sm:$0xff]  }
 0x32f   :  { %6968 = vmatprep.subr.bf16.mxu0 %v14152_v29  ;;  %v3414_v46 = vadd.f32 %v3413_v58, %v3352_v39  ;;  %v3273_v19 = vrot.slane %v3272_v36, 4  ;;  %v3353_v37 = vmul.f32 %v16286_v2, %v16286_v2  ;;  %v3285_v8 = vadd.f32 %v3284_v48, %v16291_v28  ;;  %7260 = vmatprep.subr.bf16.mxu1 %v14155_v61  ;;  %v14156_v39 = vld [vmem:[#allocation7 + $0x8f8] ss:$28 sps:$4 sm:$0xff]   ;;  %v14159_v61 = vld [vmem:[#allocation7 + $0x900] ss:$28 sps:$4 sm:$0xff]  }
 0x330   :  { %v3248_v33 = vadd.f32 %v3247_v6, %v3246_v41  ;;  %v3440_v57 = vadd.f32 %v3439_v0, %v3354_v63  ;;  %v3260_v42 = vrot.slane %v3259_v3, 4  ;;  %v3355_v26 = vmul.f32 %v16291_v28, %v16291_v28  ;;  %v14164_v48 = vld [vmem:[#allocation7 + $0x934] ss:$28 sps:$4 sm:$0xff]  }
 0x331   :  { %v3415_v55 = vrot.slane %v3414_v46, 4  ;;  %v3274_v23 = vadd.f32 %v3273_v19, %v3272_v36  ;;  %v3427_v29 = vadd.f32 %v3426_v40, %v3353_v37  ;;  %v3286_v45 = vrot.slane %v3285_v8, 4 }
 0x332   :  { %6969 = vmatpush1.bf16.msra.mxu0 %v14150_v7  ;;  %v3249_v58 = vrot.slane %v3248_v33, 2  ;;  %v3441_v18 = vrot.slane %v3440_v57, 4  ;;  %v3261_v14 = vadd.f32 %v3260_v42, %v3259_v3  ;;  %v3453_v34 = vadd.f32 %v3452_v24, %v3355_v26  ;;  %7261 = vmatpush1.bf16.msra.mxu1 %v14153_v27  ;;  %v14162_v42 = vld [vmem:[#allocation7 + $0x930] ss:$28 sps:$4 sm:$0xff]  }
 0x333   :  { %6970 = vmatprep.subr.bf16.mxu0 %v14158_v50  ;;  %v3416_v41 = vadd.f32 %v3415_v55, %v3414_v46  ;;  %v3275_v0 = vrot.slane %v3274_v23, 2  ;;  %v3428_v6 = vrot.slane %v3427_v29, 4  ;;  %v3287_v63 = vadd.f32 %v3286_v45, %v3285_v8  ;;  %7262 = vmatprep.subr.bf16.mxu1 %v14161_v38  ;;  %v14165_v50 = vld [vmem:[#allocation7 + $0x938] ss:$28 sps:$4 sm:$0xff]   ;;  %v14170_v45 = vld [vmem:[#allocation7 + $0x96c] ss:$28 sps:$4 sm:$0xff]  }
 0x334   :  { %v3250_v31 = vadd.f32 %v3249_v58, %v3248_v33  ;;  %v3442_v36 = vadd.f32 %v3441_v18, %v3440_v57  ;;  %v3262_v40 = vrot.slane %v3261_v14, 2  ;;  %v3454_v19 = vrot.slane %v3453_v34, 4  ;;  %v14173_v33 = vld [vmem:[#allocation7 + $0x974] ss:$28 sps:$4 sm:$0xff]  }
 0x335   :  { %v3417_v7 = vrot.slane %v3416_v41, 2  ;;  %v3276_v37 = vadd.f32 %v3275_v0, %v3274_v23  ;;  %v3429_v51 = vadd.f32 %v3428_v6, %v3427_v29  ;;  %v3288_v35 = vrot.slane %v3287_v63, 2 }
 0x336   :  { %6971 = vmatpush1.bf16.msra.mxu0 %v14156_v39  ;;  %v3251_v3 = vrot.slane %v3250_v31, 1  ;;  %v3443_v26 = vrot.slane %v3442_v36, 2  ;;  %v3263_v24 = vadd.f32 %v3262_v40, %v3261_v14  ;;  %v3455_v27 = vadd.f32 %v3454_v19, %v3453_v34  ;;  %7263 = vmatpush1.bf16.msra.mxu1 %v14159_v61  ;;  %v14168_v34 = vld [vmem:[#allocation7 + $0x968] ss:$28 sps:$4 sm:$0xff]  }
 0x337   :  { %6972 = vmatprep.subr.bf16.mxu0 %v14164_v48  ;;  %v3418_v8 = vadd.f32 %v3417_v7, %v3416_v41  ;;  %v3277_v46 = vrot.slane %v3276_v37, 1  ;;  %v3430_v38 = vrot.slane %v3429_v51, 2  ;;  %v3289_v18 = vadd.f32 %v3288_v35, %v3287_v63  ;;  %7264 = vmatprep.subr.bf16.mxu1 %v14167_v9  ;;  %v14171_v35 = vld [vmem:[#allocation7 + $0x970] ss:$28 sps:$4 sm:$0xff]   ;;  %v14176_v9 = vld [vmem:[#allocation7 + $0x9a4] ss:$28 sps:$4 sm:$0xff]  }
 0x338   :  { %v3252_v57 = vadd.f32 %v3251_v3, %v3250_v31  ;;  %v3444_v55 = vadd.f32 %v3443_v26, %v3442_v36  ;;  %v3264_v23 = vrot.slane %v3263_v24, 1  ;;  %v3456_v29 = vrot.slane %v3455_v27, 2  ;;  %v14179_v19 = vld [vmem:[#allocation7 + $0x9ac] ss:$28 sps:$4 sm:$0xff]  }
 0x339   :  { %v3419_v39 = vrot.slane %v3418_v8, 1  ;;  %v3278_v58 = vadd.f32 %v3277_v46, %v3276_v37  ;;  %v3431_v0 = vadd.f32 %v3430_v38, %v3429_v51  ;;  %v3290_v6 = vrot.slane %v3289_v18, 1  ;;  %v14177_v38 = vld [vmem:[#allocation7 + $0x9a8] ss:$28 sps:$4 sm:$0xff]  }
 0x33a   :  { %6973 = vmatpush1.bf16.msra.mxu0 %v14162_v42  ;;  %v16301_v14 = vmul.f32 0.015625, %v3252_v57  ;;  %v3445_v61 = vrot.slane %v3444_v55, 1  ;;  %v3265_v48 = vadd.f32 %v3264_v23, %v3263_v24  ;;  %v3457_v41 = vadd.f32 %v3456_v29, %v3455_v27  ;;  %7265 = vmatpush1.bf16.msra.mxu1 %v14165_v50  ;;  %v14174_v50 = vld [vmem:[#allocation7 + $0x9a0] ss:$28 sps:$4 sm:$0xff]  }
 0x33b   :  { %6974 = vmatprep.subr.bf16.mxu0 %v14170_v45  ;;  %v3420_v63 = vadd.f32 %v3419_v39, %v3418_v8  ;;  %v16303_v31 = vmul.f32 0.015625, %v3278_v58  ;;  %v3432_v36 = vrot.slane %v3431_v0, 1  ;;  %v3291_v40 = vadd.f32 %v3290_v6, %v3289_v18  ;;  %7266 = vmatprep.subr.bf16.mxu1 %v14173_v33  ;;  %v14182_v18 = vld [vmem:[#allocation7 + $0x9dc] ss:$28 sps:$4 sm:$0xff]   ;;  %v14185_v23 = vld [vmem:[#allocation7 + $0x9e4] ss:$28 sps:$4 sm:$0xff]  }
 0x33c   :  { %v3480_v51 = vmul.f32 %v16301_v14, %v16301_v14  ;;  %v3446_v7 = vadd.f32 %v3445_v61, %v3444_v55  ;;  %v16307_v37 = vmul.f32 0.015625, %v3265_v48  ;;  %v3458_v42 = vrot.slane %v3457_v41, 1  ;;  %v14180_v6 = vld [vmem:[#allocation7 + $0x9d8] ss:$28 sps:$4 sm:$0xff]   ;;  %v14183_v48 = vld [vmem:[#allocation7 + $0x9e0] ss:$28 sps:$4 sm:$0xff]  }
 0x33d   :  { %v3472_v3 = vmul.f32 0.015625, %v3420_v63  ;;  %v3482_v26 = vmul.f32 %v16303_v31, %v16303_v31  ;;  %v3433_v24 = vadd.f32 %v3432_v36, %v3431_v0  ;;  %v16311_v27 = vmul.f32 0.015625, %v3291_v40  ;;  %v14191_v63 = vld [vmem:[#allocation7 + $0xa1c] ss:$28 sps:$4 sm:$0xff]  }
 0x33e   :  { %6975 = vmatpush1.bf16.msra.mxu0 %v14168_v34  ;;  %v3474_v45 = vmul.f32 0.015625, %v3446_v7  ;;  %v3481_v8 = vmul.f32 %v16307_v37, %v16307_v37  ;;  %v3459_v46 = vadd.f32 %v3458_v42, %v3457_v41  ;;  %7267 = vmatpush1.bf16.msra.mxu1 %v14171_v35  ;;  %v14188_v41 = vld [vmem:[#allocation7 + $0xa14] ss:$28 sps:$4 sm:$0xff]  }
 0x33f   :  { %6976 = vmatprep.subr.bf16.mxu0 %v14176_v9  ;;  %v3488_v33 = vsub.f32 %v3472_v3, %v3480_v51  ;;  %v3473_v57 = vmul.f32 0.015625, %v3433_v24  ;;  %v3483_v55 = vmul.f32 %v16311_v27, %v16311_v27  ;;  %7268 = vmatprep.subr.bf16.mxu1 %v14179_v19  ;;  %v14186_v51 = vld [vmem:[#allocation7 + $0xa10] ss:$28 sps:$4 sm:$0xff]   ;;  %v14189_v42 = vld [vmem:[#allocation7 + $0xa18] ss:$28 sps:$4 sm:$0xff]  }
 0x340   :  { %v3490_v29 = vsub.f32 %v3474_v45, %v3482_v26  ;;  %v3475_v39 = vmul.f32 0.015625, %v3459_v46  ;;  %v14194_v3 = vld [vmem:[#allocation7 + $0xa4c] ss:$28 sps:$4 sm:$0xff]   ;;  %v14197_v26 = vld [vmem:[#allocation7 + $0xa54] ss:$28 sps:$4 sm:$0xff]  }
 0x341   :  { %v3496_v58 = vmax.f32 %v3488_v33, 0.0  ;;  %v3489_v0 = vsub.f32 %v3473_v57, %v3481_v8  ;;  %v14192_v24 = vld [vmem:[#allocation7 + $0xa48] ss:$28 sps:$4 sm:$0xff]  }
 0x342   :  { %6977 = vmatpush1.bf16.msra.mxu0 %v14174_v50  ;;  %v3498_v34 = vmax.f32 %v3490_v29, 0.0  ;;  %v3491_v61 = vsub.f32 %v3475_v39, %v3483_v55  ;;  %7269 = vmatpush1.bf16.msra.mxu1 %v14177_v38  ;;  %v14195_v50 = vld [vmem:[#allocation7 + $0xa50] ss:$28 sps:$4 sm:$0xff]   ;;  %v14200_v45 = vld [vmem:[#allocation7 + $0xa84] ss:$28 sps:$4 sm:$0xff]   ;;  %v3187_v39 = vld [vmem:[#allocation6 + $0x8] sm:$0xff] }
 0x343   :  { %6978 = vmatprep.subr.bf16.mxu0 %v14182_v18  ;;  %v3504_v35 = vadd.f32 1e-05, %v3496_v58  ;;  %v3497_v9 = vmax.f32 %v3489_v0, 0.0  ;;  %7270 = vmatprep.subr.bf16.mxu1 %v14185_v23  ;;  %v14203_v8 = vld [vmem:[#allocation7 + $0xa8c] ss:$28 sps:$4 sm:$0xff]  }
 0x344   :  { %v3506_v36 = vadd.f32 1e-05, %v3498_v34  ;;  %v3499_v40 = vmax.f32 %v3491_v61, 0.0 }
 0x345   :  { %15014 = vrsqrt.f32 %v3504_v35  ;;  %v3505_v19 = vadd.f32 1e-05, %v3497_v9 }
 0x346   :  { %6979 = vmatpush1.bf16.msra.mxu0 %v14180_v6  ;;  %15016 = vrsqrt.f32 %v3506_v36  ;;  %v3507_v7 = vadd.f32 1e-05, %v3499_v40  ;;  %7271 = vmatpush1.bf16.msra.mxu1 %v14183_v48 }
 0x347   :  { %6980 = vmatprep.subr.bf16.mxu0 %v14188_v41  ;;  %15018 = vrsqrt.f32 %v3505_v19  ;;  %7272 = vmatprep.subr.bf16.mxu1 %v14191_v63 }
 0x348   :  { %15020 = vrsqrt.f32 %v3507_v7 }
 0x34a   :  { %6981 = vmatpush1.bf16.msra.mxu0 %v14186_v51  ;;  %7273 = vmatpush1.bf16.msra.mxu1 %v14189_v42 }
 0x34b   :  { %6982 = vmatprep.subr.bf16.mxu0 %v14194_v3  ;;  %7274 = vmatprep.subr.bf16.mxu1 %v14197_v26 }
 0x34e   :  { %6983 = vmatpush1.bf16.msra.mxu0 %v14192_v24  ;;  %7275 = vmatpush1.bf16.msra.mxu1 %v14195_v50 }
 0x34f   :  { %7025 = vmatprep.subr.bf16.mxu0 %v14200_v45  ;;  %v15015_v46 = vpop.eup %15014  ;;  %7317 = vmatprep.subr.bf16.mxu1 %v14203_v8 }
 0x350   :  { %v15017_v38 = vpop.eup %15016 }
 0x351   :  { %v15019_v18 = vpop.eup %15018 }
 0x352   :  { %v15021_v33 = vpop.eup %15020  ;;  %v3541_v57 = vcombine.low %v15015_v46, %v15019_v18 }
 0x353   :  { %v3542_v55 = vcombine.low %v15017_v38, %v15021_v33 }
 0x354   :  { %v3549_v23 = vrot.slane %v3541_v57, %v15935_v44 }
 0x355   :  { %v3556_v29 = vrot.slane %v3542_v55, %v15935_v44 }
 0x357   :  { %v3557_v58 = vcombine.low %v3549_v23, %v3556_v29 }
 0x359   :  { %v3561_v0 = vmul.f32 %v3557_v58, %v3187_v39  ;;  %v17864_v58 = vld [vmem:[#allocation34_spill] sm:$0xff] }
 0x35b   :  { %v3583_v6 = vrot.slane %v3561_v0, %v15927_v32  ;;  %v3587_v34 = vrot.slane %v3561_v0, %v15929_v62  ;;  %v3591_v61 = vrot.slane %v3561_v0, %v15931_v54  ;;  %v3595_v48 = vrot.slane %v3561_v0, %v15933_v16 }
 0x35d   :  { %v3608_v41 = vmul.f32 %v3583_v6, %v16301_v14  ;;  %v3609_v35 = vmul.f32 %v3587_v34, %v16307_v37  ;;  %v3610_v9 = vmul.f32 %v3591_v61, %v16303_v31  ;;  %v3611_v63 = vmul.f32 %v3595_v48, %v16311_v27 }
 0x35e   :  { %v3679_v36 = vrot.slane %v3583_v6, %v15927_v32  ;;  %v3683_v40 = vrot.slane %v3587_v34, %v15927_v32  ;;  %v3691_v19 = vrot.slane %v3595_v48, %v15927_v32  ;;  %v3687_v42 = vrot.slane %v3591_v61, %v15927_v32  ;;  %v17865_v6 = vld [vmem:[#allocation35_spill] sm:$0xff]  ;;  %v17866_v61 = vld [vmem:[#allocation36_spill] sm:$0xff] }
 0x35f   :  { %v3637_v51 = vcombine.low %v3608_v41, %v3609_v35  ;;  %v3638_v7 = vcombine.low %v3610_v9, %v3611_v63  ;;  %v17867_v41 = vld [vmem:[#allocation37_spill] sm:$0xff]  ;;  %v17868_v9 = vld [vmem:[#allocation59_spill] sm:$0xff] }
 0x360   :  { %v3755_v3 = vmul.f32 %v3691_v19, %v16291_v28  ;;  %v3697_v14 = vmul.f32 %v3683_v40, %v16135_v47  ;;  %v3705_v37 = vmul.f32 %v3683_v40, %v16157_v43  ;;  %v3696_v31 = vmul.f32 %v3679_v36, %v16131_v53 }
 0x361   :  { %v3645_v27 = vrot.slane %v3637_v51, %v15935_v44  ;;  %v3652_v26 = vrot.slane %v3638_v7, %v15935_v44  ;;  %v3704_v24 = vmul.f32 %v3679_v36, %v16145_v56  ;;  %v3713_v50 = vmul.f32 %v3683_v40, %v16182_v11 }
 0x362   :  { %v3721_v45 = vmul.f32 %v3683_v40, %v16201_v15  ;;  %v3712_v8 = vmul.f32 %v3679_v36, %v16175_v22  ;;  %v3720_v28 = vmul.f32 %v3679_v36, %v16192_v59  ;;  %v3729_v47 = vmul.f32 %v3683_v40, %v16226_v52 }
 0x363   :  { %v3653_v46 = vcombine.low %v3645_v27, %v3652_v26  ;;  %v3737_v43 = vmul.f32 %v3683_v40, %v16245_v17  ;;  %v3728_v53 = vmul.f32 %v3679_v36, %v16219_v5  ;;  %v3736_v38 = vmul.f32 %v3679_v36, %v16236_v4 }
 0x364   :  { %v3745_v18 = vmul.f32 %v3683_v40, %v16268_v21  ;;  %v16348_v56 = vmul.f32 %v3683_v40, %v16286_v2  ;;  %v16351_v11 = vmul.f32 %v3679_v36, %v16261_v20  ;;  %v16354_v22 = vmul.f32 %v3679_v36, %v16278_v25  ;;  %v17857_v25 = vld [vmem:[#allocation52_spill] sm:$0xff] }
 0x365   :  { %v3655_v59 = vrot.slane %v3653_v46, 7  ;;  %v16357_v52 = vmul.f32 %v3691_v19, %v16143_v60  ;;  %v16360_v15 = vmul.f32 %v3691_v19, %v16167_v1  ;;  %v16363_v5 = vmul.f32 %v3687_v42, %v16133_v10  ;;  %v17858_v1 = vld [vmem:[#allocation54_spill] sm:$0xff]  ;;  %v17859_v10 = vld [vmem:[#allocation56_spill] sm:$0xff] }
 0x366   :  { %v16366_v4 = vmul.f32 %v3687_v42, %v16155_v13  ;;  %v16369_v17 = vmul.f32 %v3691_v19, %v16190_v12  ;;  %v16372_v20 = vmul.f32 %v3691_v19, %v16206_v30  ;;  %v16375_v21 = vmul.f32 %v3687_v42, %v16180_v49  ;;  %v17860_v13 = vld [vmem:[#allocation53_spill] sm:$0xff]  ;;  %v17861_v12 = vld [vmem:[#allocation55_spill] sm:$0xff]  ;;  %v17862_v30 = vld [vmem:[#allocation58_spill] sm:$0xff] }
 0x367   :  { %v3659_v60 = vsub.f32 %v3187_v39, %v3655_v59  ;;  %v16378_v2 = vmul.f32 %v3687_v42, %v17857_v25  ;;  %v16381_v33 = vmul.f32 %v3691_v19, %v17858_v1  ;;  %v16384_v57 = vmul.f32 %v3691_v19, %v17859_v10  ;;  %v17863_v49 = vld [vmem:[#allocation57_spill] sm:$0xff] }
 0x368   :  { %v16387_v55 = vmul.f32 %v3687_v42, %v17860_v13  ;;  %v16390_v23 = vmul.f32 %v3687_v42, %v17861_v12  ;;  %v16393_v29 = vmul.f32 %v3691_v19, %v17862_v30  ;;  %v16396_v39 = vmul.f32 %v3687_v42, %v17863_v49 }
 0x369   :  { %v3777_v0 = vrot.slane %v3659_v60, %v17864_v58  ;;  %v3781_v34 = vrot.slane %v3659_v60, %v17865_v6  ;;  %v3785_v48 = vrot.slane %v3659_v60, %v17866_v61  ;;  %v3789_v35 = vrot.slane %v3659_v60, %v17867_v41 }
 0x36a   :  { %v16403_v63 = vmul.f32 %v3687_v42, %v17868_v9  ;;  %v14206_v9 = vld [vmem:[#allocation7 + $0xabc] ss:$28 sps:$4 sm:$0xff]  }
 0x36b   :  { %v3817_v36 = vrot.slane %v3777_v0, %v17864_v58  ;;  %v3821_v40 = vrot.slane %v3781_v34, %v17864_v58  ;;  %v16408_v19 = vrot.slane %v3789_v35, %v17864_v58  ;;  %v16411_v51 = vrot.slane %v3785_v48, %v17864_v58  ;;  %v14201_v35 = vld [vmem:[#allocation7 + $0xa88] ss:$28 sps:$4 sm:$0xff]  }
 0x36d   :  { %v16414_v7 = vadd.f32 %v16408_v19, %v3755_v3  ;;  %v3835_v27 = vadd.f32 %v3821_v40, %v3697_v14  ;;  %v3843_v26 = vadd.f32 %v3821_v40, %v3705_v37  ;;  %v3834_v46 = vadd.f32 %v3817_v36, %v3696_v31  ;;  %v14198_v3 = vld [vmem:[#allocation7 + $0xa80] ss:$28 sps:$4 sm:$0xff]  }
 0x36e   :  { %v3842_v59 = vadd.f32 %v3817_v36, %v3704_v24  ;;  %v3851_v60 = vadd.f32 %v3821_v40, %v3713_v50  ;;  %v3859_v42 = vadd.f32 %v3821_v40, %v3721_v45  ;;  %v3850_v25 = vadd.f32 %v3817_v36, %v3712_v8 }
 0x36f   :  { %v3957_v1 = vmax.f32 %v16414_v7, 0.0  ;;  %v3899_v10 = vmax.f32 %v3835_v27, 0.0  ;;  %v3907_v13 = vmax.f32 %v3843_v26, 0.0  ;;  %v3898_v12 = vmax.f32 %v3834_v46, 0.0  ;;  %v14209_v27 = vld [vmem:[#allocation7 + $0xac4] ss:$28 sps:$4 sm:$0xff]  }
 0x370   :  { %v3906_v30 = vmax.f32 %v3842_v59, 0.0  ;;  %v3915_v49 = vmax.f32 %v3851_v60, 0.0  ;;  %v3923_v0 = vmax.f32 %v3859_v42, 0.0  ;;  %v3858_v34 = vadd.f32 %v3817_v36, %v3720_v28  ;;  %v14204_v42 = vld [vmem:[#allocation7 + $0xab8] ss:$28 sps:$4 sm:$0xff]  }
 0x371   :  { %v16417_v48 = vpack.c.bf16 %v3907_v13, %v3899_v10  ;;  %v3914_v14 = vmax.f32 %v3850_v25, 0.0  ;;  %v3867_v37 = vadd.f32 %v3821_v40, %v3729_v47  ;;  %v3875_v31 = vadd.f32 %v3821_v40, %v3737_v43  ;;  %v14207_v25 = vld [vmem:[#allocation7 + $0xac0] ss:$28 sps:$4 sm:$0xff]   ;;  %v14236_v7 = vld [vmem:[#allocation7 + $0xbd4] ss:$28 sps:$4 sm:$0xff]  }
 0x372   :  { %v16419_v24 = vpack.c.bf16 %v3906_v30, %v3898_v12  ;;  %v16421_v50 = vpack.c.bf16 %v3923_v0, %v3915_v49  ;;  %v3922_v45 = vmax.f32 %v3858_v34, 0.0  ;;  %v3866_v8 = vadd.f32 %v3817_v36, %v3728_v53  ;;  %v14212_v12 = vld [vmem:[#allocation7 + $0xaf4] ss:$28 sps:$4 sm:$0xff]   ;;  %v14215_v30 = vld [vmem:[#allocation7 + $0xafc] ss:$28 sps:$4 sm:$0xff]  }
 0x373   :  { %6984 = vmatprep.mubr.bf16.mxu0 %v16417_v48  ;;  %7276 = vmatprep.mubr.bf16.mxu1 %v16417_v48  ;;  %v3931_v28 = vmax.f32 %v3867_v37, 0.0  ;;  %v3939_v26 = vmax.f32 %v3875_v31, 0.0  ;;  %v3874_v46 = vadd.f32 %v3817_v36, %v3736_v38  ;;  %v3883_v59 = vadd.f32 %v3821_v40, %v3745_v18  ;;  %v14213_v37 = vld [vmem:[#allocation7 + $0xaf8] ss:$28 sps:$4 sm:$0xff]  }
 0x374   :  { %6985 = vmatmul.mubr.bf16.vlgmr.msra.gmra.mrb[32].mxu0 %v16419_v24  ;;  %7277 = vmatmul.mubr.bf16.vlgmr.msra.gmra.mrb[32].mxu1 %v16419_v24  ;;  %v16427_v47 = vpack.c.bf16 %v3922_v45, %v3914_v14  ;;  %v3930_v43 = vmax.f32 %v3866_v8, 0.0  ;;  %v3891_v60 = vadd.f32 %v3821_v40, %v16348_v56  ;;  %v3882_v53 = vadd.f32 %v3817_v36, %v16351_v11 }
 0x375   :  { %7026 = vmatpush1.bf16.msra.mxu0 %v14198_v3  ;;  %7318 = vmatpush1.bf16.msra.mxu1 %v14201_v35  ;;  %v16431_v10 = vpack.c.bf16 %v3939_v26, %v3931_v28  ;;  %v3938_v13 = vmax.f32 %v3874_v46, 0.0  ;;  %v3947_v38 = vmax.f32 %v3883_v59, 0.0  ;;  %v3890_v18 = vadd.f32 %v3817_v36, %v16354_v22  ;;  %v14218_v28 = vld [vmem:[#allocation7 + $0xb2c] ss:$28 sps:$4 sm:$0xff]   ;;  %v14221_v26 = vld [vmem:[#allocation7 + $0xb34] ss:$28 sps:$4 sm:$0xff]  }
 0x376   :  { %6994 = vmatprep.mubr.bf16.mxu0 %v16421_v50  ;;  %7286 = vmatprep.mubr.bf16.mxu1 %v16421_v50  ;;  %v3955_v49 = vmax.f32 %v3891_v60, 0.0  ;;  %v3946_v56 = vmax.f32 %v3882_v53, 0.0  ;;  %v3837_v11 = vadd.f32 %v16408_v19, %v16357_v52  ;;  %v3845_v40 = vadd.f32 %v16408_v19, %v16360_v15  ;;  %v14210_v15 = vld [vmem:[#allocation7 + $0xaf0] ss:$28 sps:$4 sm:$0xff]  }
 0x377   :  { %7027 = vmatprep.subr.bf16.mxu0 %v14206_v9  ;;  %7319 = vmatprep.subr.bf16.mxu1 %v14209_v27  ;;  %v16440_v0 = vpack.c.bf16 %v3938_v13, %v3930_v43  ;;  %v3954_v34 = vmax.f32 %v3890_v18, 0.0  ;;  %v3836_v22 = vadd.f32 %v16411_v51, %v16363_v5  ;;  %v3844_v36 = vadd.f32 %v16411_v51, %v16366_v4  ;;  %v14224_v18 = vld [vmem:[#allocation7 + $0xb64] ss:$28 sps:$4 sm:$0xff]  }
 0x378   :  { %v16446_v3 = vpack.c.bf16 %v3955_v49, %v3947_v38  ;;  %v3901_v35 = vmax.f32 %v3837_v11, 0.0  ;;  %v3909_v14 = vmax.f32 %v3845_v40, 0.0  ;;  %v3853_v52 = vadd.f32 %v16408_v19, %v16369_v17 }
 0x379   :  { %7028 = vmatpush1.bf16.msra.mxu0 %v14204_v42  ;;  %7320 = vmatpush1.bf16.msra.mxu1 %v14207_v25  ;;  %v16450_v31 = vpack.c.bf16 %v3954_v34, %v3946_v56  ;;  %v3900_v45 = vmax.f32 %v3836_v22, 0.0  ;;  %v3908_v8 = vmax.f32 %v3844_v36, 0.0  ;;  %v3861_v5 = vadd.f32 %v16408_v19, %v16372_v20  ;;  %v14216_v42 = vld [vmem:[#allocation7 + $0xb28] ss:$28 sps:$4 sm:$0xff]   ;;  %v14219_v25 = vld [vmem:[#allocation7 + $0xb30] ss:$28 sps:$4 sm:$0xff]  }
 0x37a   :  { %7029 = vmatprep.subr.bf16.mxu0 %v14212_v12  ;;  %7321 = vmatprep.subr.bf16.mxu1 %v14215_v30  ;;  %v16454_v4 = vpack.c.bf16 %v3909_v14, %v3901_v35  ;;  %v3917_v9 = vmax.f32 %v3853_v52, 0.0  ;;  %v3852_v27 = vadd.f32 %v16411_v51, %v16375_v21  ;;  %v3860_v17 = vadd.f32 %v16411_v51, %v16378_v2  ;;  %v14222_v34 = vld [vmem:[#allocation7 + $0xb60] ss:$28 sps:$4 sm:$0xff]   ;;  %v14225_v22 = vld [vmem:[#allocation7 + $0xb68] ss:$28 sps:$4 sm:$0xff]  }
 0x37b   :  { %v16460_v46 = vpack.c.bf16 %v3908_v8, %v3900_v45  ;;  %v3925_v59 = vmax.f32 %v3861_v5, 0.0  ;;  %v3869_v43 = vadd.f32 %v16408_v19, %v16381_v33  ;;  %v3877_v20 = vadd.f32 %v16408_v19, %v16384_v57  ;;  %v14230_v35 = vld [vmem:[#allocation7 + $0xb9c] ss:$28 sps:$4 sm:$0xff]   ;;  %v14233_v14 = vld [vmem:[#allocation7 + $0xba4] ss:$28 sps:$4 sm:$0xff]  }
 0x37c   :  { %6995 = vmatmul.mubr.bf16.gmra.mrb[36].mxu0 %v16427_v47  ;;  %7287 = vmatmul.mubr.bf16.gmra.mrb[36].mxu1 %v16427_v47  ;;  %v3916_v60 = vmax.f32 %v3852_v27, 0.0  ;;  %v3924_v21 = vmax.f32 %v3860_v17, 0.0  ;;  %v3868_v2 = vadd.f32 %v16411_v51, %v16387_v55  ;;  %v3876_v53 = vadd.f32 %v16411_v51, %v16390_v23  ;;  %v14227_v55 = vld [vmem:[#allocation7 + $0xb6c] ss:$28 sps:$4 sm:$0xff]   ;;  %v14245_v8 = vld [vmem:[#allocation7 + $0xc14] ss:$28 sps:$4 sm:$0xff]  }
 0x37d   :  { %7030 = vmatpush1.bf16.msra.mxu0 %v14210_v15  ;;  %7322 = vmatpush1.bf16.msra.mxu1 %v14213_v37  ;;  %v16472_v33 = vpack.c.bf16 %v3925_v59, %v3917_v9  ;;  %v3933_v13 = vmax.f32 %v3869_v43, 0.0  ;;  %v3941_v57 = vmax.f32 %v3877_v20, 0.0  ;;  %v3885_v38 = vadd.f32 %v16408_v19, %v16393_v29  ;;  %v14234_v15 = vld [vmem:[#allocation7 + $0xbd0] ss:$28 sps:$4 sm:$0xff]   ;;  %v14237_v37 = vld [vmem:[#allocation7 + $0xbd8] ss:$28 sps:$4 sm:$0xff]  }
 0x37e   :  { %7004 = vmatprep.mubr.bf16.mxu0 %v16431_v10  ;;  %7296 = vmatprep.mubr.bf16.mxu1 %v16431_v10  ;;  %v16478_v12 = vpack.c.bf16 %v3924_v21, %v3916_v60  ;;  %v3932_v23 = vmax.f32 %v3868_v2, 0.0  ;;  %v3940_v30 = vmax.f32 %v3876_v53, 0.0  ;;  %v3884_v49 = vadd.f32 %v16411_v51, %v16396_v39  ;;  %v14242_v45 = vld [vmem:[#allocation7 + $0xc0c] ss:$28 sps:$4 sm:$0xff]   ;;  %v14248_v27 = vld [vmem:[#allocation7 + $0xc44] ss:$28 sps:$4 sm:$0xff]  }
 0x37f   :  { %7031 = vmatprep.subr.bf16.mxu0 %v14218_v28  ;;  %7323 = vmatprep.subr.bf16.mxu1 %v14221_v26  ;;  %v16482_v56 = vpack.c.bf16 %v3941_v57, %v3933_v13  ;;  %v3949_v11 = vmax.f32 %v3885_v38, 0.0  ;;  %v3892_v29 = vadd.f32 %v16411_v51, %v16403_v63  ;;  %v14228_v63 = vld [vmem:[#allocation7 + $0xb98] ss:$28 sps:$4 sm:$0xff]   ;;  %v14231_v51 = vld [vmem:[#allocation7 + $0xba0] ss:$28 sps:$4 sm:$0xff]  }
 0x380   :  { %v16486_v19 = vpack.c.bf16 %v3940_v30, %v3932_v23  ;;  %v3948_v40 = vmax.f32 %v3884_v49, 0.0  ;;  %v14240_v5 = vld [vmem:[#allocation7 + $0xc08] ss:$28 sps:$4 sm:$0xff]   ;;  %v14243_v9 = vld [vmem:[#allocation7 + $0xc10] ss:$28 sps:$4 sm:$0xff]  }
 0x381   :  { %7032 = vmatpush1.bf16.msra.mxu0 %v14216_v42  ;;  %7324 = vmatpush1.bf16.msra.mxu1 %v14219_v25  ;;  %v16490_v36 = vpack.c.bf16 %v3957_v1, %v3949_v11  ;;  %v3956_v39 = vmax.f32 %v3892_v29, 0.0  ;;  %v14239_v1 = vld [vmem:[#allocation7 + $0xbdc] ss:$28 sps:$4 sm:$0xff]   ;;  %v14251_v17 = vld [vmem:[#allocation7 + $0xc4c] ss:$28 sps:$4 sm:$0xff]  }
 0x382   :  { %7033 = vmatprep.subr.bf16.mxu0 %v14224_v18  ;;  %7325 = vmatprep.subr.bf16.mxu1 %v14227_v55  ;;  %v14246_v28 = vld [vmem:[#allocation7 + $0xc40] ss:$28 sps:$4 sm:$0xff]   ;;  %v14249_v26 = vld [vmem:[#allocation7 + $0xc48] ss:$28 sps:$4 sm:$0xff]   ;;  %v14252_v20 = vld [vmem:[#allocation7 + $0xc78] ss:$28 sps:$4 sm:$0xff]  }
 0x383   :  { %v16492_v52 = vpack.c.bf16 %v3956_v39, %v3948_v40  ;;  %v14254_v59 = vld [vmem:[#allocation7 + $0xc7c] ss:$28 sps:$4 sm:$0xff]   ;;  %v14257_v43 = vld [vmem:[#allocation7 + $0xc84] ss:$28 sps:$4 sm:$0xff]   ;;  %v14260_v21 = vld [vmem:[#allocation7 + $0xcb4] ss:$28 sps:$4 sm:$0xff]  }
 0x384   :  { %7005 = vmatmul.mubr.bf16.gmra.mrb[40].mxu0 %v16440_v0  ;;  %7297 = vmatmul.mubr.bf16.gmra.mrb[40].mxu1 %v16440_v0  ;;  %v14255_v60 = vld [vmem:[#allocation7 + $0xc80] ss:$28 sps:$4 sm:$0xff]   ;;  %v14258_v53 = vld [vmem:[#allocation7 + $0xcb0] ss:$28 sps:$4 sm:$0xff]   ;;  %v14261_v42 = vld [vmem:[#allocation7 + $0xcb8] ss:$28 sps:$4 sm:$0xff]  }
 0x385   :  { %7034 = vmatpush1.bf16.msra.mxu0 %v14222_v34  ;;  %7326 = vmatpush1.bf16.msra.mxu1 %v14225_v22  ;;  %v14263_v2 = vld [vmem:[#allocation7 + $0xcbc] ss:$28 sps:$4 sm:$0xff]   ;;  %v14266_v25 = vld [vmem:[#allocation7 + $0xcec] ss:$28 sps:$4 sm:$0xff]   ;;  %v14269_v13 = vld [vmem:[#allocation7 + $0xcf4] ss:$28 sps:$4 sm:$0xff]  }
 0x386   :  { %7014 = vmatprep.mubr.bf16.mxu0 %v16446_v3  ;;  %7306 = vmatprep.mubr.bf16.mxu1 %v16446_v3  ;;  %v14264_v57 = vld [vmem:[#allocation7 + $0xce8] ss:$28 sps:$4 sm:$0xff]   ;;  %v14267_v38 = vld [vmem:[#allocation7 + $0xcf0] ss:$28 sps:$4 sm:$0xff]   ;;  %v14270_v23 = vld [vmem:[#allocation7 + $0xd20] ss:$28 sps:$4 sm:$0xff]  }
 0x387   :  { %7035 = vmatprep.subr.bf16.mxu0 %v14230_v35  ;;  %7327 = vmatprep.subr.bf16.mxu1 %v14233_v14  ;;  %v14272_v18 = vld [vmem:[#allocation7 + $0xd24] ss:$28 sps:$4 sm:$0xff]   ;;  %v14275_v55 = vld [vmem:[#allocation7 + $0xd2c] ss:$28 sps:$4 sm:$0xff]   ;;  %v14278_v49 = vld [vmem:[#allocation7 + $0xd5c] ss:$28 sps:$4 sm:$0xff]  }
 0x388   :  { %v14273_v30 = vld [vmem:[#allocation7 + $0xd28] ss:$28 sps:$4 sm:$0xff]   ;;  %v14276_v29 = vld [vmem:[#allocation7 + $0xd58] ss:$28 sps:$4 sm:$0xff]   ;;  %v14279_v40 = vld [vmem:[#allocation7 + $0xd60] ss:$28 sps:$4 sm:$0xff]  }
 0x389   :  { %7036 = vmatpush1.bf16.msra.mxu0 %v14228_v63  ;;  %7328 = vmatpush1.bf16.msra.mxu1 %v14231_v51  ;;  %v14281_v11 = vld [vmem:[#allocation7 + $0xd64] ss:$28 sps:$4 sm:$0xff]   ;;  %v14284_v34 = vld [vmem:[#allocation7 + $0xd94] ss:$28 sps:$4 sm:$0xff]   ;;  %v14287_v22 = vld [vmem:[#allocation7 + $0xd9c] ss:$28 sps:$4 sm:$0xff]  }
 0x38a   :  { %7037 = vmatprep.subr.bf16.mxu0 %v14236_v7  ;;  %7329 = vmatprep.subr.bf16.mxu1 %v14239_v1  ;;  %v14282_v39 = vld [vmem:[#allocation7 + $0xd90] ss:$28 sps:$4 sm:$0xff]   ;;  %v14285_v35 = vld [vmem:[#allocation7 + $0xd98] ss:$28 sps:$4 sm:$0xff]   ;;  %v14288_v51 = vld [vmem:[#allocation7 + $0xdc8] ss:$28 sps:$4 sm:$0xff]  }
 0x38b   :  { %v14290_v14 = vld [vmem:[#allocation7 + $0xdcc] ss:$28 sps:$4 sm:$0xff]   ;;  %v14293_v63 = vld [vmem:[#allocation7 + $0xdd4] ss:$28 sps:$4 sm:$0xff]  }
 0x38c   :  { %7015 = vmatmul.mubr.bf16.gmra.mrb[44].mxu0 %v16450_v31  ;;  %7307 = vmatmul.mubr.bf16.gmra.mrb[44].mxu1 %v16450_v31  ;;  %v14291_v7 = vld [vmem:[#allocation7 + $0xdd0] ss:$28 sps:$4 sm:$0xff]  }
 0x38d   :  { %7038 = vmatpush1.bf16.msra.mxu0 %v14234_v15  ;;  %7330 = vmatpush1.bf16.msra.mxu1 %v14237_v37  ;;  %v14296_v1 = vld [vmem:[#allocation7 + $0x14] ss:$28 sps:$4 sm:$0xff]  }
 0x38e   :  { %7057 = vmatprep.mubr.bf16.mxu0 %v16454_v4  ;;  %7349 = vmatprep.mubr.bf16.mxu1 %v16454_v4  ;;  %v14297_v15 = vld [vmem:[#allocation7 + $0x1d8] ss:$28 sps:$4 sm:$0xff]   ;;  %v14294_v37 = vld [vmem:[#allocation7 + $0x10] ss:$28 sps:$4 sm:$0xff]  }
 0x38f   :  { %7039 = vmatprep.subr.bf16.mxu0 %v14242_v45  ;;  %7331 = vmatprep.subr.bf16.mxu1 %v14245_v8  ;;  %v14298_v45 = vld [vmem:[#allocation7 + $0x18] ss:$28 sps:$4 sm:$0xff]   ;;  %v14301_v8 = vld [vmem:[#allocation7 + $0x4c] ss:$28 sps:$4 sm:$0xff]  }
 0x391   :  { %7040 = vmatpush1.bf16.msra.mxu0 %v14240_v5  ;;  %7332 = vmatpush1.bf16.msra.mxu1 %v14243_v9  ;;  %v14302_v5 = vld [vmem:[#allocation7 + $0x210] ss:$28 sps:$4 sm:$0xff]   ;;  %v14299_v9 = vld [vmem:[#allocation7 + $0x48] ss:$28 sps:$4 sm:$0xff]  }
 0x392   :  { %7041 = vmatprep.subr.bf16.mxu0 %v14248_v27  ;;  %7333 = vmatprep.subr.bf16.mxu1 %v14251_v17  ;;  %v14303_v27 = vld [vmem:[#allocation7 + $0x50] ss:$28 sps:$4 sm:$0xff]   ;;  %v14306_v17 = vld [vmem:[#allocation7 + $0x84] ss:$28 sps:$4 sm:$0xff]  }
 0x395   :  { %7042 = vmatpush1.bf16.msra.mxu0 %v14246_v28  ;;  %7334 = vmatpush1.bf16.msra.mxu1 %v14249_v26  ;;  %v14307_v28 = vld [vmem:[#allocation7 + $0x248] ss:$28 sps:$4 sm:$0xff]   ;;  %v14304_v26 = vld [vmem:[#allocation7 + $0x80] ss:$28 sps:$4 sm:$0xff]  }
 0x396   :  { %7043 = vmatprep.subr.bf16.mxu0 %v14254_v59  ;;  %7335 = vmatprep.subr.bf16.mxu1 %v14257_v43  ;;  %v14308_v59 = vld [vmem:[#allocation7 + $0x88] ss:$28 sps:$4 sm:$0xff]   ;;  %v14311_v43 = vld [vmem:[#allocation7 + $0xbc] ss:$28 sps:$4 sm:$0xff]  }
 0x399   :  { %7044 = vmatpush1.bf16.msra.mxu0 %v14252_v20  ;;  %7336 = vmatpush1.bf16.msra.mxu1 %v14255_v60  ;;  %v14312_v20 = vld [vmem:[#allocation7 + $0x280] ss:$28 sps:$4 sm:$0xff]   ;;  %v14309_v60 = vld [vmem:[#allocation7 + $0xb8] ss:$28 sps:$4 sm:$0xff]  }
 0x39a   :  { %7045 = vmatprep.subr.bf16.mxu0 %v14260_v21  ;;  %7337 = vmatprep.subr.bf16.mxu1 %v14263_v2  ;;  %v14313_v21 = vld [vmem:[#allocation7 + $0xc0] ss:$28 sps:$4 sm:$0xff]   ;;  %v14316_v2 = vld [vmem:[#allocation7 + $0xf4] ss:$28 sps:$4 sm:$0xff]  }
 0x39d   :  { %7046 = vmatpush1.bf16.msra.mxu0 %v14258_v53  ;;  %7338 = vmatpush1.bf16.msra.mxu1 %v14261_v42  ;;  %v14317_v53 = vld [vmem:[#allocation7 + $0x2b8] ss:$28 sps:$4 sm:$0xff]   ;;  %v14314_v42 = vld [vmem:[#allocation7 + $0xf0] ss:$28 sps:$4 sm:$0xff]  }
 0x39e   :  { %7047 = vmatprep.subr.bf16.mxu0 %v14266_v25  ;;  %7339 = vmatprep.subr.bf16.mxu1 %v14269_v13  ;;  %v14318_v25 = vld [vmem:[#allocation7 + $0xf8] ss:$28 sps:$4 sm:$0xff]   ;;  %v14321_v13 = vld [vmem:[#allocation7 + $0x12c] ss:$28 sps:$4 sm:$0xff]  }
 0x3a1   :  { %7048 = vmatpush1.bf16.msra.mxu0 %v14264_v57  ;;  %7340 = vmatpush1.bf16.msra.mxu1 %v14267_v38  ;;  %v14322_v57 = vld [vmem:[#allocation7 + $0x2f0] ss:$28 sps:$4 sm:$0xff]   ;;  %v14319_v38 = vld [vmem:[#allocation7 + $0x128] ss:$28 sps:$4 sm:$0xff]  }
 0x3a2   :  { %7049 = vmatprep.subr.bf16.mxu0 %v14272_v18  ;;  %7341 = vmatprep.subr.bf16.mxu1 %v14275_v55  ;;  %v14323_v18 = vld [vmem:[#allocation7 + $0x130] ss:$28 sps:$4 sm:$0xff]   ;;  %v14326_v55 = vld [vmem:[#allocation7 + $0x164] ss:$28 sps:$4 sm:$0xff]  }
 0x3a5   :  { %7050 = vmatpush1.bf16.msra.mxu0 %v14270_v23  ;;  %7342 = vmatpush1.bf16.msra.mxu1 %v14273_v30  ;;  %v14327_v23 = vld [vmem:[#allocation7 + $0x328] ss:$28 sps:$4 sm:$0xff]   ;;  %v14324_v30 = vld [vmem:[#allocation7 + $0x160] ss:$28 sps:$4 sm:$0xff]  }
 0x3a6   :  { %7051 = vmatprep.subr.bf16.mxu0 %v14278_v49  ;;  %7343 = vmatprep.subr.bf16.mxu1 %v14281_v11  ;;  %v14328_v49 = vld [vmem:[#allocation7 + $0x168] ss:$28 sps:$4 sm:$0xff]   ;;  %v14331_v11 = vld [vmem:[#allocation7 + $0x19c] ss:$28 sps:$4 sm:$0xff]  }
 0x3a9   :  { %7052 = vmatpush1.bf16.msra.mxu0 %v14276_v29  ;;  %7344 = vmatpush1.bf16.msra.mxu1 %v14279_v40  ;;  %v14332_v29 = vld [vmem:[#allocation7 + $0x360] ss:$28 sps:$4 sm:$0xff]  }
 0x3aa   :  { %7053 = vmatprep.subr.bf16.mxu0 %v14284_v34  ;;  %7345 = vmatprep.subr.bf16.mxu1 %v14287_v22  ;;  %v17869_v40 = vld [vmem:[#allocation29_spill] sm:$0xff]  ;;  %v14329_v34 = vld [vmem:[#allocation7 + $0x198] ss:$28 sps:$4 sm:$0xff]  }
 0x3ab   :  { %v14333_v22 = vld [vmem:[#allocation7 + $0x1a0] ss:$28 sps:$4 sm:$0xff]  }
 0x3ad   :  { %7054 = vmatpush1.bf16.msra.mxu0 %v14282_v39  ;;  %7346 = vmatpush1.bf16.msra.mxu1 %v14285_v35  ;;  %v14336_v39 = vld [vmem:[#allocation7 + $0x1d4] ss:$28 sps:$4 sm:$0xff]  }
 0x3ae   :  { %7055 = vmatprep.subr.bf16.mxu0 %v14290_v14  ;;  %7347 = vmatprep.subr.bf16.mxu1 %v14293_v63  ;;  %v14337_v35 = vld [vmem:[#allocation7 + $0x558] ss:$28 sps:$4 sm:$0xff]   ;;  %v14334_v14 = vld [vmem:[#allocation7 + $0x1d0] ss:$28 sps:$4 sm:$0xff]  }
 0x3af   :  { %v14338_v63 = vld [vmem:[#allocation7 + $0x398] ss:$28 sps:$4 sm:$0xff]  }
 0x3b1   :  { %7056 = vmatpush1.bf16.msra.mxu0 %v14288_v51  ;;  %7348 = vmatpush1.bf16.msra.mxu1 %v14291_v7  ;;  %v14341_v51 = vld [vmem:[#allocation7 + $0x20c] ss:$28 sps:$4 sm:$0xff]  }
 0x3b2   :  { %7390 = vmatprep.subr.bf16.mxu0 %v14296_v1  ;;  %13263 = vmatprep.subr.bf16.mxu1 %v14297_v15  ;;  %v14342_v7 = vld [vmem:[#allocation7 + $0x590] ss:$28 sps:$4 sm:$0xff]  }
 0x3b3   :  { %v17870_v1 = vld [vmem:[#allocation30_spill] sm:$0xff] }
 0x3b4   :  { %7058 = vmatmul.mubr.bf16.vlgmr.msra.gmra.mrb[32].mxu0 %v16460_v46  ;;  %7350 = vmatmul.mubr.bf16.vlgmr.msra.gmra.mrb[32].mxu1 %v16460_v46  ;;  %v17871_v15 = vld [vmem:[#allocation38_spill] sm:$0xff] }
 0x3b5   :  { %7067 = vmatprep.mubr.bf16.mxu0 %v16472_v33  ;;  %7359 = vmatprep.mubr.bf16.mxu1 %v16472_v33 }
 0x3b6   :  { %7391 = vmatpush1.bf16.msra.mxu0 %v14294_v37  ;;  %13264 = vmatpush3.bf16.msra.mxu1 %v14298_v45  ;;  %v14339_v37 = vld [vmem:[#allocation7 + $0x208] ss:$28 sps:$4 sm:$0xff]   ;;  %v14343_v45 = vld [vmem:[#allocation7 + $0x3d0] ss:$28 sps:$4 sm:$0xff]  }
 0x3b7   :  { %7392 = vmatprep.subr.bf16.mxu0 %v14301_v8  ;;  %13265 = vmatprep.subr.bf16.mxu1 %v14302_v5  ;;  %v14346_v8 = vld [vmem:[#allocation7 + $0x244] ss:$28 sps:$4 sm:$0xff]  }
 0x3b8   :  { %v14347_v5 = vld [vmem:[#allocation7 + $0x5c8] ss:$28 sps:$4 sm:$0xff]  }
 0x3ba   :  { %7393 = vmatpush1.bf16.msra.mxu0 %v14299_v9  ;;  %13266 = vmatpush3.bf16.msra.mxu1 %v14303_v27  ;;  %v14344_v9 = vld [vmem:[#allocation7 + $0x240] ss:$28 sps:$4 sm:$0xff]   ;;  %v14348_v27 = vld [vmem:[#allocation7 + $0x408] ss:$28 sps:$4 sm:$0xff]  }
 0x3bb   :  { %7394 = vmatprep.subr.bf16.mxu0 %v14306_v17  ;;  %13267 = vmatprep.subr.bf16.mxu1 %v14307_v28  ;;  %v14351_v17 = vld [vmem:[#allocation7 + $0x27c] ss:$28 sps:$4 sm:$0xff]  }
 0x3bc   :  { %7068 = vmatmul.mubr.bf16.gmra.mrb[36].mxu0 %v16478_v12  ;;  %7360 = vmatmul.mubr.bf16.gmra.mrb[36].mxu1 %v16478_v12  ;;  %v14352_v28 = vld [vmem:[#allocation7 + $0x600] ss:$28 sps:$4 sm:$0xff]  }
 0x3bd   :  { %7077 = vmatprep.mubr.bf16.mxu0 %v16482_v56  ;;  %7369 = vmatprep.mubr.bf16.mxu1 %v16482_v56 }
 0x3be   :  { %7395 = vmatpush1.bf16.msra.mxu0 %v14304_v26  ;;  %13268 = vmatpush3.bf16.msra.mxu1 %v14308_v59  ;;  %v17872_v26 = vld [vmem:[#allocation39_spill] sm:$0xff]  ;;  %v17873_v59 = vld [vmem:[#allocation40_spill] sm:$0xff] }
 0x3bf   :  { %7396 = vmatprep.subr.bf16.mxu0 %v14311_v43  ;;  %13269 = vmatprep.subr.bf16.mxu1 %v14312_v20  ;;  %v14349_v43 = vld [vmem:[#allocation7 + $0x278] ss:$28 sps:$4 sm:$0xff]   ;;  %v14353_v20 = vld [vmem:[#allocation7 + $0x440] ss:$28 sps:$4 sm:$0xff]  }
 0x3c2   :  { %7397 = vmatpush1.bf16.msra.mxu0 %v14309_v60  ;;  %13270 = vmatpush3.bf16.msra.mxu1 %v14313_v21  ;;  %v14356_v60 = vld [vmem:[#allocation7 + $0x2b4] ss:$28 sps:$4 sm:$0xff]  }
 0x3c3   :  { %7398 = vmatprep.subr.bf16.mxu0 %v14316_v2  ;;  %13271 = vmatprep.subr.bf16.mxu1 %v14317_v53  ;;  %v14357_v21 = vld [vmem:[#allocation7 + $0x638] ss:$28 sps:$4 sm:$0xff]   ;;  %v14354_v2 = vld [vmem:[#allocation7 + $0x2b0] ss:$28 sps:$4 sm:$0xff]  }
 0x3c4   :  { %7078 = vmatmul.mubr.bf16.gmra.mrb[40].mxu0 %v16486_v19  ;;  %7370 = vmatmul.mubr.bf16.gmra.mrb[40].mxu1 %v16486_v19  ;;  %v14358_v53 = vld [vmem:[#allocation7 + $0x478] ss:$28 sps:$4 sm:$0xff]  }
 0x3c5   :  { %7087 = vmatprep.mubr.bf16.mxu0 %v16490_v36  ;;  %7379 = vmatprep.mubr.bf16.mxu1 %v16490_v36 }
 0x3c6   :  { %7399 = vmatpush1.bf16.msra.mxu0 %v14314_v42  ;;  %13272 = vmatpush3.bf16.msra.mxu1 %v14318_v25  ;;  %v14361_v42 = vld [vmem:[#allocation7 + $0x2ec] ss:$28 sps:$4 sm:$0xff]  }
 0x3c7   :  { %7400 = vmatprep.subr.bf16.mxu0 %v14321_v13  ;;  %13273 = vmatprep.subr.bf16.mxu1 %v14322_v57  ;;  %v14362_v25 = vld [vmem:[#allocation7 + $0x670] ss:$28 sps:$4 sm:$0xff]   ;;  %v17874_v13 = vld [vmem:[#allocation41_spill] sm:$0xff] }
 0x3c8   :  { %v17875_v57 = vld [vmem:[#allocation42_spill] sm:$0xff] }
 0x3ca   :  { %7401 = vmatpush1.bf16.msra.mxu0 %v14319_v38  ;;  %13274 = vmatpush3.bf16.msra.mxu1 %v14323_v18  ;;  %v14359_v38 = vld [vmem:[#allocation7 + $0x2e8] ss:$28 sps:$4 sm:$0xff]   ;;  %v14363_v18 = vld [vmem:[#allocation7 + $0x4b0] ss:$28 sps:$4 sm:$0xff]  }
 0x3cb   :  { %7402 = vmatprep.subr.bf16.mxu0 %v14326_v55  ;;  %13275 = vmatprep.subr.bf16.mxu1 %v14327_v23  ;;  %v14366_v55 = vld [vmem:[#allocation7 + $0x324] ss:$28 sps:$4 sm:$0xff]  }
 0x3cc   :  { %7088 = vmatmul.mubr.bf16.gmra.mrb[44].mxu0 %v16492_v52  ;;  %7380 = vmatmul.mubr.bf16.gmra.mrb[44].mxu1 %v16492_v52  ;;  %v14367_v23 = vld [vmem:[#allocation7 + $0x6a8] ss:$28 sps:$4 sm:$0xff]  }
 0x3cd   :  { %7422 = vmatprep.mubr.bf16.mxu0 %v17869_v40  ;;  %7714 = vmatprep.mubr.bf16.mxu1 %v17869_v40  ;;  %v17876_v40 = vld [vmem:[#allocation43_spill] sm:$0xff] }
 0x3ce   :  { %7403 = vmatpush1.bf16.msra.mxu0 %v14324_v30  ;;  %13276 = vmatpush3.bf16.msra.mxu1 %v14328_v49  ;;  %v14364_v30 = vld [vmem:[#allocation7 + $0x320] ss:$28 sps:$4 sm:$0xff]   ;;  %v14368_v49 = vld [vmem:[#allocation7 + $0x4e8] ss:$28 sps:$4 sm:$0xff]  }
 0x3cf   :  { %7404 = vmatprep.subr.bf16.mxu0 %v14331_v11  ;;  %13277 = vmatprep.subr.bf16.mxu1 %v14332_v29  ;;  %v14371_v11 = vld [vmem:[#allocation7 + $0x35c] ss:$28 sps:$4 sm:$0xff]  }
 0x3d0   :  { %v14372_v29 = vld [vmem:[#allocation7 + $0x6e0] ss:$28 sps:$4 sm:$0xff]  }
 0x3d2   :  { %7405 = vmatpush1.bf16.msra.mxu0 %v14329_v34  ;;  %13278 = vmatpush3.bf16.msra.mxu1 %v14333_v22  ;;  %v17877_v34 = vld [vmem:[#allocation44_spill] sm:$0xff] }
 0x3d3   :  { %7406 = vmatprep.subr.bf16.mxu0 %v14336_v39  ;;  %13303 = vmatprep.subr.bf16.mxu1 %v14337_v35  ;;  %v14369_v22 = vld [vmem:[#allocation7 + $0x358] ss:$28 sps:$4 sm:$0xff]   ;;  %v14373_v39 = vld [vmem:[#allocation7 + $0x520] ss:$28 sps:$4 sm:$0xff]  }
 0x3d4   :  { %v14376_v35 = vld [vmem:[#allocation7 + $0x394] ss:$28 sps:$4 sm:$0xff]  }
 0x3d5   :  { %7715 = vmatmul.mubr.bf16.vlgmr.msra.gmra.mrb[48].mxu1 %v17870_v1 }
 0x3d6   :  { %7407 = vmatpush1.bf16.msra.mxu0 %v14334_v14  ;;  %7722 = vmatprep.mubr.bf16.mxu1 %v17871_v15  ;;  %v14377_v14 = vld [vmem:[#allocation7 + $0x8d8] ss:$28 sps:$4 sm:$0xff]  }
 0x3d7   :  { %13304 = vmatpush3.bf16.msra.mxu1 %v14338_v63  ;;  %7408 = vmatprep.subr.bf16.mxu0 %v14341_v51  ;;  %v14374_v63 = vld [vmem:[#allocation7 + $0x390] ss:$28 sps:$4 sm:$0xff]   ;;  %v14378_v51 = vld [vmem:[#allocation7 + $0x718] ss:$28 sps:$4 sm:$0xff]  }
 0x3d8   :  { %13305 = vmatprep.subr.bf16.mxu1 %v14342_v7  ;;  %v14381_v7 = vld [vmem:[#allocation7 + $0x3cc] ss:$28 sps:$4 sm:$0xff]  }
 0x3da   :  { %7409 = vmatpush1.bf16.msra.mxu0 %v14339_v37  ;;  %v14382_v37 = vld [vmem:[#allocation7 + $0x910] ss:$28 sps:$4 sm:$0xff]  }
 0x3db   :  { %13306 = vmatpush3.bf16.msra.mxu1 %v14343_v45  ;;  %7410 = vmatprep.subr.bf16.mxu0 %v14346_v8  ;;  %v17878_v45 = vld [vmem:[#allocation45_spill] sm:$0xff]  ;;  %v17879_v8 = vld [vmem:[#allocation46_spill] sm:$0xff] }
 0x3dc   :  { %13307 = vmatprep.subr.bf16.mxu1 %v14347_v5  ;;  %v14379_v5 = vld [vmem:[#allocation7 + $0x3c8] ss:$28 sps:$4 sm:$0xff]  }
 0x3dd   :  { %7723 = vmatmul.mubr.bf16.gmra.mrb[52].mxu1 %v17872_v26 }
 0x3de   :  { %7411 = vmatpush1.bf16.msra.mxu0 %v14344_v9  ;;  %7730 = vmatprep.mubr.bf16.mxu1 %v17873_v59  ;;  %v14383_v9 = vld [vmem:[#allocation7 + $0x750] ss:$28 sps:$4 sm:$0xff]  }
 0x3df   :  { %13308 = vmatpush3.bf16.msra.mxu1 %v14348_v27  ;;  %7412 = vmatprep.subr.bf16.mxu0 %v14351_v17  ;;  %v14386_v27 = vld [vmem:[#allocation7 + $0x404] ss:$28 sps:$4 sm:$0xff]  }
 0x3e0   :  { %13309 = vmatprep.subr.bf16.mxu1 %v14352_v28  ;;  %v14387_v17 = vld [vmem:[#allocation7 + $0x948] ss:$28 sps:$4 sm:$0xff]   ;;  %v14384_v28 = vld [vmem:[#allocation7 + $0x400] ss:$28 sps:$4 sm:$0xff]  }
 0x3e2   :  { %7413 = vmatpush1.bf16.msra.mxu0 %v14349_v43  ;;  %v14391_v43 = vld [vmem:[#allocation7 + $0x43c] ss:$28 sps:$4 sm:$0xff]  }
 0x3e3   :  { %13310 = vmatpush3.bf16.msra.mxu1 %v14353_v20  ;;  %7414 = vmatprep.subr.bf16.mxu0 %v14356_v60  ;;  %v17880_v20 = vld [vmem:[#allocation47_spill] sm:$0xff]  ;;  %v17881_v60 = vld [vmem:[#allocation48_spill] sm:$0xff] }
 0x3e4   :  { %13311 = vmatprep.subr.bf16.mxu1 %v14357_v21  ;;  %v14389_v21 = vld [vmem:[#allocation7 + $0x438] ss:$28 sps:$4 sm:$0xff]  }
 0x3e5   :  { %7731 = vmatmul.mubr.bf16.gmra.mrb[56].mxu1 %v17874_v13 }
 0x3e6   :  { %7415 = vmatpush1.bf16.msra.mxu0 %v14354_v2  ;;  %7738 = vmatprep.mubr.bf16.mxu1 %v17875_v57  ;;  %v14393_v2 = vld [vmem:[#allocation7 + $0x7c0] ss:$28 sps:$4 sm:$0xff]  }
 0x3e7   :  { %13312 = vmatpush3.bf16.msra.mxu1 %v14358_v53  ;;  %7416 = vmatprep.subr.bf16.mxu0 %v14361_v42  ;;  %v14396_v53 = vld [vmem:[#allocation7 + $0x474] ss:$28 sps:$4 sm:$0xff]  }
 0x3e8   :  { %13313 = vmatprep.subr.bf16.mxu1 %v14362_v25  ;;  %v14397_v42 = vld [vmem:[#allocation7 + $0x9b8] ss:$28 sps:$4 sm:$0xff]   ;;  %v14394_v25 = vld [vmem:[#allocation7 + $0x470] ss:$28 sps:$4 sm:$0xff]  }
 0x3ea   :  { %7417 = vmatpush1.bf16.msra.mxu0 %v14359_v38  ;;  %v14401_v38 = vld [vmem:[#allocation7 + $0x4ac] ss:$28 sps:$4 sm:$0xff]  }
 0x3eb   :  { %13314 = vmatpush3.bf16.msra.mxu1 %v14363_v18  ;;  %7418 = vmatprep.subr.bf16.mxu0 %v14366_v55  ;;  %v17882_v18 = vld [vmem:[#allocation49_spill] sm:$0xff]  ;;  %v17883_v55 = vld [vmem:[#allocation50_spill] sm:$0xff] }
 0x3ec   :  { %13315 = vmatprep.subr.bf16.mxu1 %v14367_v23  ;;  %v14399_v23 = vld [vmem:[#allocation7 + $0x4a8] ss:$28 sps:$4 sm:$0xff]  }
 0x3ed   :  { %7739 = vmatmul.mubr.bf16.gmra.mrb[60].mxu1 %v17876_v40 }
 0x3ee   :  { %7419 = vmatpush1.bf16.msra.mxu0 %v14364_v30  ;;  %7779 = vmatprep.mubr.bf16.mxu1 %v17877_v34  ;;  %v14403_v30 = vld [vmem:[#allocation7 + $0x830] ss:$28 sps:$4 sm:$0xff]  }
 0x3ef   :  { %13316 = vmatpush3.bf16.msra.mxu1 %v14368_v49  ;;  %7420 = vmatprep.subr.bf16.mxu0 %v14371_v11  ;;  %v14406_v49 = vld [vmem:[#allocation7 + $0x4e4] ss:$28 sps:$4 sm:$0xff]  }
 0x3f0   :  { %13317 = vmatprep.subr.bf16.mxu1 %v14372_v29  ;;  %v14407_v11 = vld [vmem:[#allocation7 + $0xa28] ss:$28 sps:$4 sm:$0xff]   ;;  %v14404_v29 = vld [vmem:[#allocation7 + $0x4e0] ss:$28 sps:$4 sm:$0xff]  }
 0x3f2   :  { %7421 = vmatpush1.bf16.msra.mxu0 %v14369_v22  ;;  %v14411_v22 = vld [vmem:[#allocation7 + $0x51c] ss:$28 sps:$4 sm:$0xff]  }
 0x3f3   :  { %13318 = vmatpush3.bf16.msra.mxu1 %v14373_v39  ;;  %7463 = vmatprep.subr.bf16.mxu0 %v14376_v35  ;;  %v17884_v39 = vld [vmem:[#allocation51_spill] sm:$0xff] }
 0x3f4   :  { %13343 = vmatprep.subr.bf16.mxu1 %v14377_v14  ;;  %v14409_v35 = vld [vmem:[#allocation7 + $0x518] ss:$28 sps:$4 sm:$0xff]   ;;  %v14413_v14 = vld [vmem:[#allocation7 + $0x8a0] ss:$28 sps:$4 sm:$0xff]  }
 0x3f5   :  { %7423 = vmatmul.mubr.bf16.vlgmr.msra.gmra.mrb[48].mxu0 %v17870_v1  ;;  %v14388_v1 = vld [vmem:[#allocation7 + $0x788] ss:$28 sps:$4 sm:$0xff]  }
 0x3f6   :  { %7780 = vmatmul.mubr.bf16.vlgmr.msra.gmra.mrb[64].mxu1 %v17878_v45  ;;  %7432 = vmatprep.mubr.bf16.mxu0 %v17871_v15  ;;  %v14392_v15 = vld [vmem:[#allocation7 + $0x980] ss:$28 sps:$4 sm:$0xff]  }
 0x3f7   :  { %7464 = vmatpush1.bf16.msra.mxu0 %v14374_v63  ;;  %7787 = vmatprep.mubr.bf16.mxu1 %v17879_v8  ;;  %v14416_v63 = vld [vmem:[#allocation7 + $0x554] ss:$28 sps:$4 sm:$0xff]  }
 0x3f8   :  { %13344 = vmatpush3.bf16.msra.mxu1 %v14378_v51  ;;  %7465 = vmatprep.subr.bf16.mxu0 %v14381_v7  ;;  %v14417_v51 = vld [vmem:[#allocation7 + $0xc58] ss:$28 sps:$4 sm:$0xff]   ;;  %v14414_v7 = vld [vmem:[#allocation7 + $0x550] ss:$28 sps:$4 sm:$0xff]  }
 0x3f9   :  { %13345 = vmatprep.subr.bf16.mxu1 %v14382_v37  ;;  %v14421_v37 = vld [vmem:[#allocation7 + $0x58c] ss:$28 sps:$4 sm:$0xff]  }
 0x3fb   :  { %7466 = vmatpush1.bf16.msra.mxu0 %v14379_v5  ;;  %v14422_v5 = vld [vmem:[#allocation7 + $0xc90] ss:$28 sps:$4 sm:$0xff]  }
 0x3fc   :  { %13346 = vmatpush3.bf16.msra.mxu1 %v14383_v9  ;;  %7467 = vmatprep.subr.bf16.mxu0 %v14386_v27  ;;  %v14423_v9 = vld [vmem:[#allocation7 + $0xad0] ss:$28 sps:$4 sm:$0xff]   ;;  %v14426_v27 = vld [vmem:[#allocation7 + $0x5c4] ss:$28 sps:$4 sm:$0xff]  }
 0x3fd   :  { %7433 = vmatmul.mubr.bf16.gmra.mrb[52].mxu0 %v17872_v26  ;;  %13347 = vmatprep.subr.bf16.mxu1 %v14387_v17  ;;  %v14398_v26 = vld [vmem:[#allocation7 + $0x7f8] ss:$28 sps:$4 sm:$0xff]   ;;  %v14427_v17 = vld [vmem:[#allocation7 + $0xcc8] ss:$28 sps:$4 sm:$0xff]  }
 0x3fe   :  { %7788 = vmatmul.mubr.bf16.gmra.mrb[68].mxu1 %v17880_v20  ;;  %7442 = vmatprep.mubr.bf16.mxu0 %v17873_v59  ;;  %v14402_v59 = vld [vmem:[#allocation7 + $0x9f0] ss:$28 sps:$4 sm:$0xff]  }
 0x3ff   :  { %7468 = vmatpush1.bf16.msra.mxu0 %v14384_v28  ;;  %7795 = vmatprep.mubr.bf16.mxu1 %v17881_v60  ;;  %v14424_v28 = vld [vmem:[#allocation7 + $0x5c0] ss:$28 sps:$4 sm:$0xff]  }
 0x400   :  { %13348 = vmatpush3.bf16.msra.mxu1 %v14388_v1  ;;  %7469 = vmatprep.subr.bf16.mxu0 %v14391_v43  ;;  %v14428_v1 = vld [vmem:[#allocation7 + $0xb08] ss:$28 sps:$4 sm:$0xff]   ;;  %v14431_v43 = vld [vmem:[#allocation7 + $0x5fc] ss:$28 sps:$4 sm:$0xff]  }
 0x401   :  { %13349 = vmatprep.subr.bf16.mxu1 %v14392_v15  ;;  %v14432_v15 = vld [vmem:[#allocation7 + $0xd00] ss:$28 sps:$4 sm:$0xff]  }
 0x403   :  { %7470 = vmatpush1.bf16.msra.mxu0 %v14389_v21  ;;  %v14429_v21 = vld [vmem:[#allocation7 + $0x5f8] ss:$28 sps:$4 sm:$0xff]  }
 0x404   :  { %13350 = vmatpush3.bf16.msra.mxu1 %v14393_v2  ;;  %7471 = vmatprep.subr.bf16.mxu0 %v14396_v53  ;;  %v14433_v2 = vld [vmem:[#allocation7 + $0xb40] ss:$28 sps:$4 sm:$0xff]   ;;  %v14436_v53 = vld [vmem:[#allocation7 + $0x634] ss:$28 sps:$4 sm:$0xff]  }
 0x405   :  { %7443 = vmatmul.mubr.bf16.gmra.mrb[56].mxu0 %v17874_v13  ;;  %13351 = vmatprep.subr.bf16.mxu1 %v14397_v42  ;;  %v14408_v13 = vld [vmem:[#allocation7 + $0x868] ss:$28 sps:$4 sm:$0xff]   ;;  %v14437_v42 = vld [vmem:[#allocation7 + $0xd38] ss:$28 sps:$4 sm:$0xff]  }
 0x406   :  { %7796 = vmatmul.mubr.bf16.gmra.mrb[72].mxu1 %v17882_v18  ;;  %7452 = vmatprep.mubr.bf16.mxu0 %v17875_v57  ;;  %v14412_v57 = vld [vmem:[#allocation7 + $0xa60] ss:$28 sps:$4 sm:$0xff]  }
 0x407   :  { %7472 = vmatpush1.bf16.msra.mxu0 %v14394_v25  ;;  %7803 = vmatprep.mubr.bf16.mxu1 %v17883_v55  ;;  %v14434_v25 = vld [vmem:[#allocation7 + $0x630] ss:$28 sps:$4 sm:$0xff]  }
 0x408   :  { %13352 = vmatpush3.bf16.msra.mxu1 %v14398_v26  ;;  %7473 = vmatprep.subr.bf16.mxu0 %v14401_v38  ;;  %v14438_v26 = vld [vmem:[#allocation7 + $0xb78] ss:$28 sps:$4 sm:$0xff]   ;;  %v14441_v38 = vld [vmem:[#allocation7 + $0x66c] ss:$28 sps:$4 sm:$0xff]  }
 0x409   :  { %13353 = vmatprep.subr.bf16.mxu1 %v14402_v59  ;;  %v14442_v59 = vld [vmem:[#allocation7 + $0xd70] ss:$28 sps:$4 sm:$0xff]  }
 0x40b   :  { %7474 = vmatpush1.bf16.msra.mxu0 %v14399_v23  ;;  %v14439_v23 = vld [vmem:[#allocation7 + $0x668] ss:$28 sps:$4 sm:$0xff]  }
 0x40c   :  { %13354 = vmatpush3.bf16.msra.mxu1 %v14403_v30  ;;  %7475 = vmatprep.subr.bf16.mxu0 %v14406_v49  ;;  %v14443_v30 = vld [vmem:[#allocation7 + $0xbb0] ss:$28 sps:$4 sm:$0xff]   ;;  %v14446_v49 = vld [vmem:[#allocation7 + $0x6a4] ss:$28 sps:$4 sm:$0xff]  }
 0x40d   :  { %7453 = vmatmul.mubr.bf16.gmra.mrb[60].mxu0 %v17876_v40  ;;  %13355 = vmatprep.subr.bf16.mxu1 %v14407_v11  ;;  %v14418_v40 = vld [vmem:[#allocation7 + $0xa98] ss:$28 sps:$4 sm:$0xff]   ;;  %v14447_v11 = vld [vmem:[#allocation7 + $0xda8] ss:$28 sps:$4 sm:$0xff]  }
 0x40e   :  { %7804 = vmatmul.mubr.bf16.gmra.mrb[76].mxu1 %v17884_v39  ;;  %7495 = vmatprep.mubr.bf16.mxu0 %v17877_v34  ;;  %v14419_v34 = vld [vmem:[#allocation7 + $0x588] ss:$28 sps:$4 sm:$0xff]  }
 0x40f   :  { %7476 = vmatpush1.bf16.msra.mxu0 %v14404_v29  ;;  %7844 = vmatprep.mubr.bf16.mxu1 %v16417_v48  ;;  %v14444_v29 = vld [vmem:[#allocation7 + $0x6a0] ss:$28 sps:$4 sm:$0xff]  }
 0x410   :  { %13356 = vmatpush3.bf16.msra.mxu1 %v14408_v13  ;;  %7477 = vmatprep.subr.bf16.mxu0 %v14411_v22  ;;  %v14448_v13 = vld [vmem:[#allocation7 + $0xbe8] ss:$28 sps:$4 sm:$0xff]   ;;  %v14451_v22 = vld [vmem:[#allocation7 + $0x6dc] ss:$28 sps:$4 sm:$0xff]  }
 0x411   :  { %13357 = vmatprep.subr.bf16.mxu1 %v14412_v57  ;;  %v14452_v57 = vld [vmem:[#allocation7 + $0xde0] ss:$28 sps:$4 sm:$0xff]  }
 0x413   :  { %7478 = vmatpush1.bf16.msra.mxu0 %v14409_v35  ;;  %v14449_v35 = vld [vmem:[#allocation7 + $0x6d8] ss:$28 sps:$4 sm:$0xff]  }
 0x414   :  { %13358 = vmatpush3.bf16.msra.mxu1 %v14413_v14  ;;  %7479 = vmatprep.subr.bf16.mxu0 %v14416_v63  ;;  %v14453_v14 = vld [vmem:[#allocation7 + $0xc20] ss:$28 sps:$4 sm:$0xff]   ;;  %v14456_v63 = vld [vmem:[#allocation7 + $0x714] ss:$28 sps:$4 sm:$0xff]  }
 0x415   :  { %13383 = vmatprep.subr.bf16.mxu1 %v14417_v51  ;;  %v14454_v51 = vld [vmem:[#allocation7 + $0x710] ss:$28 sps:$4 sm:$0xff]  }
 0x417   :  { %7845 = vmatmul.mubr.bf16.vlgmr.msra.gmra.mrb[80].mxu1 %v16419_v24  ;;  %7480 = vmatpush1.bf16.msra.mxu0 %v14414_v7  ;;  %v14459_v7 = vld [vmem:[#allocation7 + $0x74c] ss:$28 sps:$4 sm:$0xff]  }
 0x418   :  { %7852 = vmatprep.mubr.bf16.mxu1 %v16421_v50  ;;  %13384 = vmatpush3.bf16.msra.mxu1 %v14418_v40  ;;  %v14543_v40 = vld [vmem:[#allocation10 + $0x4] ss:$16 sps:$4 sm:$0xff]  }
 0x419   :  { %7481 = vmatprep.subr.bf16.mxu0 %v14421_v37  ;;  %13385 = vmatprep.subr.bf16.mxu1 %v14422_v5  ;;  %v14541_v37 = vld [vmem:[#allocation10] ss:$16 sps:$4 sm:$0xff]   ;;  %v14457_v5 = vld [vmem:[#allocation7 + $0x748] ss:$28 sps:$4 sm:$0xff]  }
 0x41b   :  { %7482 = vmatpush1.bf16.msra.mxu0 %v14419_v34  ;;  %v14462_v34 = vld [vmem:[#allocation7 + $0x784] ss:$28 sps:$4 sm:$0xff]  }
 0x41c   :  { %13386 = vmatpush3.bf16.msra.mxu1 %v14423_v9  ;;  %7483 = vmatprep.subr.bf16.mxu0 %v14426_v27  ;;  %v14549_v9 = vld [vmem:[#allocation10 + $0x24] ss:$16 sps:$4 sm:$0xff]   ;;  %v14547_v27 = vld [vmem:[#allocation10 + $0x20] ss:$16 sps:$4 sm:$0xff]  }
 0x41d   :  { %13387 = vmatprep.subr.bf16.mxu1 %v14427_v17  ;;  %v14460_v17 = vld [vmem:[#allocation7 + $0x780] ss:$28 sps:$4 sm:$0xff]  }
 0x41f   :  { %7853 = vmatmul.mubr.bf16.gmra.mrb[84].mxu1 %v16427_v47  ;;  %7484 = vmatpush1.bf16.msra.mxu0 %v14424_v28  ;;  %v14555_v28 = vld [vmem:[#allocation10 + $0x44] ss:$16 sps:$4 sm:$0xff]  }
 0x420   :  { %7860 = vmatprep.mubr.bf16.mxu1 %v16431_v10  ;;  %13388 = vmatpush3.bf16.msra.mxu1 %v14428_v1  ;;  %v14463_v1 = vld [vmem:[#allocation7 + $0x7b8] ss:$28 sps:$4 sm:$0xff]  }
 0x421   :  { %7485 = vmatprep.subr.bf16.mxu0 %v14431_v43  ;;  %13389 = vmatprep.subr.bf16.mxu1 %v14432_v15  ;;  %v14468_v43 = vld [vmem:[#allocation7 + $0x7f4] ss:$28 sps:$4 sm:$0xff]  }
 0x422   :  { %v14561_v15 = vld [vmem:[#allocation10 + $0x64] ss:$16 sps:$4 sm:$0xff]  }
 0x423   :  { %7486 = vmatpush1.bf16.msra.mxu0 %v14429_v21  ;;  %v14559_v21 = vld [vmem:[#allocation10 + $0x60] ss:$16 sps:$4 sm:$0xff]  }
 0x424   :  { %13390 = vmatpush3.bf16.msra.mxu1 %v14433_v2  ;;  %7487 = vmatprep.subr.bf16.mxu0 %v14436_v53  ;;  %v14466_v2 = vld [vmem:[#allocation7 + $0x7f0] ss:$28 sps:$4 sm:$0xff]  }
 0x425   :  { %13391 = vmatprep.subr.bf16.mxu1 %v14437_v42  ;;  %v14567_v53 = vld [vmem:[#allocation10 + $0x84] ss:$16 sps:$4 sm:$0xff]  }
 0x426   :  { %v14469_v42 = vld [vmem:[#allocation7 + $0x828] ss:$28 sps:$4 sm:$0xff]  }
 0x427   :  { %7861 = vmatmul.mubr.bf16.gmra.mrb[88].mxu1 %v16440_v0  ;;  %7488 = vmatpush1.bf16.msra.mxu0 %v14434_v25  ;;  %v14474_v25 = vld [vmem:[#allocation7 + $0x864] ss:$28 sps:$4 sm:$0xff]  }
 0x428   :  { %7868 = vmatprep.mubr.bf16.mxu1 %v16446_v3  ;;  %13392 = vmatpush3.bf16.msra.mxu1 %v14438_v26  ;;  %v14573_v26 = vld [vmem:[#allocation10 + $0xa4] ss:$16 sps:$4 sm:$0xff]  }
 0x429   :  { %7489 = vmatprep.subr.bf16.mxu0 %v14441_v38  ;;  %13393 = vmatprep.subr.bf16.mxu1 %v14442_v59  ;;  %v14571_v38 = vld [vmem:[#allocation10 + $0xa0] ss:$16 sps:$4 sm:$0xff]  }
 0x42a   :  { %v14472_v59 = vld [vmem:[#allocation7 + $0x860] ss:$28 sps:$4 sm:$0xff]  }
 0x42b   :  { %7490 = vmatpush1.bf16.msra.mxu0 %v14439_v23  ;;  %v14579_v23 = vld [vmem:[#allocation10 + $0xc4] ss:$16 sps:$4 sm:$0xff]  }
 0x42c   :  { %13394 = vmatpush3.bf16.msra.mxu1 %v14443_v30  ;;  %7491 = vmatprep.subr.bf16.mxu0 %v14446_v49  ;;  %v14475_v30 = vld [vmem:[#allocation7 + $0x898] ss:$28 sps:$4 sm:$0xff]  }
 0x42d   :  { %13395 = vmatprep.subr.bf16.mxu1 %v14447_v11  ;;  %v14480_v49 = vld [vmem:[#allocation7 + $0x8d4] ss:$28 sps:$4 sm:$0xff]  }
 0x42e   :  { %v14585_v11 = vld [vmem:[#allocation10 + $0xe4] ss:$16 sps:$4 sm:$0xff]  }
 0x42f   :  { %7869 = vmatmul.mubr.bf16.gmra.mrb[92].mxu1 %v16450_v31  ;;  %7492 = vmatpush1.bf16.msra.mxu0 %v14444_v29  ;;  %v14583_v29 = vld [vmem:[#allocation10 + $0xe0] ss:$16 sps:$4 sm:$0xff]  }
 0x430   :  { %13396 = vmatpush3.bf16.msra.mxu1 %v14448_v13  ;;  %7909 = vmatprep.mubr.bf16.mxu1 %v16454_v4  ;;  %v14478_v13 = vld [vmem:[#allocation7 + $0x8d0] ss:$28 sps:$4 sm:$0xff]  }
 0x431   :  { %7493 = vmatprep.subr.bf16.mxu0 %v14451_v22  ;;  %13397 = vmatprep.subr.bf16.mxu1 %v14452_v57  ;;  %v14483_v22 = vld [vmem:[#allocation7 + $0x90c] ss:$28 sps:$4 sm:$0xff]  }
 0x432   :  { %v14589_v57 = vld [vmem:[#allocation10 + $0x100] ss:$16 sps:$4 sm:$0xff]  }
 0x433   :  { %7494 = vmatpush1.bf16.msra.mxu0 %v14449_v35  ;;  %v14481_v35 = vld [vmem:[#allocation7 + $0x908] ss:$28 sps:$4 sm:$0xff]  }
 0x434   :  { %13398 = vmatpush3.bf16.msra.mxu1 %v14453_v14  ;;  %7536 = vmatprep.subr.bf16.mxu0 %v14456_v63  ;;  %v14597_v14 = vld [vmem:[#allocation10 + $0x124] ss:$16 sps:$4 sm:$0xff]   ;;  %v14595_v63 = vld [vmem:[#allocation10 + $0x120] ss:$16 sps:$4 sm:$0xff]  }
 0x435   :  { %9998 = vmatprep.subr.bf16.mxu1 %v14543_v40  ;;  %v14603_v40 = vld [vmem:[#allocation10 + $0x144] ss:$16 sps:$4 sm:$0xff]  }
 0x436   :  { %7496 = vmatmul.mubr.bf16.vlgmr.msra.gmra.mrb[48].mxu0 %v17878_v45  ;;  %v14465_v45 = vld [vmem:[#allocation7 + $0x7bc] ss:$28 sps:$4 sm:$0xff]  }
 0x437   :  { %7910 = vmatmul.mubr.bf16.vlgmr.msra.gmra.mrb[96].mxu1 %v16460_v46  ;;  %7505 = vmatprep.mubr.bf16.mxu0 %v17879_v8  ;;  %v14553_v8 = vld [vmem:[#allocation10 + $0x40] ss:$16 sps:$4 sm:$0xff]  }
 0x438   :  { %7537 = vmatpush1.bf16.msra.mxu0 %v14454_v51  ;;  %7917 = vmatprep.mubr.bf16.mxu1 %v16472_v33  ;;  %v14484_v51 = vld [vmem:[#allocation7 + $0x940] ss:$28 sps:$4 sm:$0xff]  }
 0x439   :  { %7538 = vmatprep.subr.bf16.mxu0 %v14459_v7  ;;  %9999 = vmatpush1.bf16.msra.mxu1 %v14541_v37  ;;  %v14489_v7 = vld [vmem:[#allocation7 + $0x97c] ss:$28 sps:$4 sm:$0xff]  }
 0x43a   :  { %10000 = vmatprep.subr.bf16.mxu1 %v14549_v9  ;;  %v14601_v37 = vld [vmem:[#allocation10 + $0x140] ss:$16 sps:$4 sm:$0xff]   ;;  %v14609_v9 = vld [vmem:[#allocation10 + $0x164] ss:$16 sps:$4 sm:$0xff]  }
 0x43c   :  { %7539 = vmatpush1.bf16.msra.mxu0 %v14457_v5  ;;  %v14487_v5 = vld [vmem:[#allocation7 + $0x978] ss:$28 sps:$4 sm:$0xff]  }
 0x43d   :  { %7540 = vmatprep.subr.bf16.mxu0 %v14462_v34  ;;  %10001 = vmatpush1.bf16.msra.mxu1 %v14547_v27  ;;  %v14492_v34 = vld [vmem:[#allocation7 + $0x9b4] ss:$28 sps:$4 sm:$0xff]  }
 0x43e   :  { %7506 = vmatmul.mubr.bf16.gmra.mrb[52].mxu0 %v17880_v20  ;;  %10002 = vmatprep.subr.bf16.mxu1 %v14555_v28  ;;  %v14471_v20 = vld [vmem:[#allocation7 + $0x82c] ss:$28 sps:$4 sm:$0xff]  }
 0x43f   :  { %7918 = vmatmul.mubr.bf16.gmra.mrb[100].mxu1 %v16478_v12  ;;  %7515 = vmatprep.mubr.bf16.mxu0 %v17881_v60  ;;  %v14565_v60 = vld [vmem:[#allocation10 + $0x80] ss:$16 sps:$4 sm:$0xff]  }
 0x440   :  { %7541 = vmatpush1.bf16.msra.mxu0 %v14460_v17  ;;  %7925 = vmatprep.mubr.bf16.mxu1 %v16482_v56  ;;  %v14607_v27 = vld [vmem:[#allocation10 + $0x160] ss:$16 sps:$4 sm:$0xff]   ;;  %v14615_v17 = vld [vmem:[#allocation10 + $0x184] ss:$16 sps:$4 sm:$0xff]  }
 0x441   :  { %7542 = vmatprep.subr.bf16.mxu0 %v14465_v45  ;;  %10003 = vmatpush1.bf16.msra.mxu1 %v14553_v8  ;;  %v14490_v45 = vld [vmem:[#allocation7 + $0x9b0] ss:$28 sps:$4 sm:$0xff]  }
 0x442   :  { %10004 = vmatprep.subr.bf16.mxu1 %v14561_v15  ;;  %v14495_v28 = vld [vmem:[#allocation7 + $0x9ec] ss:$28 sps:$4 sm:$0xff]   ;;  %v14498_v15 = vld [vmem:[#allocation7 + $0xa24] ss:$28 sps:$4 sm:$0xff]  }
 0x443   :  { %v14613_v8 = vld [vmem:[#allocation10 + $0x180] ss:$16 sps:$4 sm:$0xff]  }
 0x444   :  { %7543 = vmatpush1.bf16.msra.mxu0 %v14463_v1  ;;  %v14621_v1 = vld [vmem:[#allocation10 + $0x1a4] ss:$16 sps:$4 sm:$0xff]  }
 0x445   :  { %7544 = vmatprep.subr.bf16.mxu0 %v14468_v43  ;;  %10005 = vmatpush1.bf16.msra.mxu1 %v14559_v21  ;;  %v14493_v43 = vld [vmem:[#allocation7 + $0x9e8] ss:$28 sps:$4 sm:$0xff]   ;;  %v14619_v21 = vld [vmem:[#allocation10 + $0x1a0] ss:$16 sps:$4 sm:$0xff]  }
 0x446   :  { %7516 = vmatmul.mubr.bf16.gmra.mrb[56].mxu0 %v17882_v18  ;;  %10006 = vmatprep.subr.bf16.mxu1 %v14567_v53  ;;  %v14477_v18 = vld [vmem:[#allocation7 + $0x89c] ss:$28 sps:$4 sm:$0xff]  }
 0x447   :  { %7926 = vmatmul.mubr.bf16.gmra.mrb[104].mxu1 %v16486_v19  ;;  %7525 = vmatprep.mubr.bf16.mxu0 %v17883_v55  ;;  %v14577_v55 = vld [vmem:[#allocation10 + $0xc0] ss:$16 sps:$4 sm:$0xff]  }
 0x448   :  { %7545 = vmatpush1.bf16.msra.mxu0 %v14466_v2  ;;  %7933 = vmatprep.mubr.bf16.mxu1 %v16490_v36  ;;  %v14627_v2 = vld [vmem:[#allocation10 + $0x1c4] ss:$16 sps:$4 sm:$0xff]   ;;  %v14501_v53 = vld [vmem:[#allocation7 + $0xa5c] ss:$28 sps:$4 sm:$0xff]  }
 0x449   :  { %7546 = vmatprep.subr.bf16.mxu0 %v14471_v20  ;;  %10007 = vmatpush1.bf16.msra.mxu1 %v14565_v60  ;;  %v14496_v20 = vld [vmem:[#allocation7 + $0xa20] ss:$28 sps:$4 sm:$0xff]  }
 0x44a   :  { %10008 = vmatprep.subr.bf16.mxu1 %v14573_v26  ;;  %v14625_v60 = vld [vmem:[#allocation10 + $0x1c0] ss:$16 sps:$4 sm:$0xff]  }
 0x44b   :  { %v14504_v26 = vld [vmem:[#allocation7 + $0xa94] ss:$28 sps:$4 sm:$0xff]  }
 0x44c   :  { %7547 = vmatpush1.bf16.msra.mxu0 %v14469_v42  ;;  %v14633_v42 = vld [vmem:[#allocation10 + $0x1e4] ss:$16 sps:$4 sm:$0xff]  }
 0x44d   :  { %7548 = vmatprep.subr.bf16.mxu0 %v14474_v25  ;;  %10009 = vmatpush1.bf16.msra.mxu1 %v14571_v38  ;;  %v14499_v25 = vld [vmem:[#allocation7 + $0xa58] ss:$28 sps:$4 sm:$0xff]   ;;  %v14631_v38 = vld [vmem:[#allocation10 + $0x1e0] ss:$16 sps:$4 sm:$0xff]  }
 0x44e   :  { %7526 = vmatmul.mubr.bf16.gmra.mrb[60].mxu0 %v17884_v39  ;;  %10010 = vmatprep.subr.bf16.mxu1 %v14579_v23  ;;  %v14591_v39 = vld [vmem:[#allocation10 + $0x104] ss:$16 sps:$4 sm:$0xff]   ;;  %v14507_v23 = vld [vmem:[#allocation7 + $0xacc] ss:$28 sps:$4 sm:$0xff]  }
 0x44f   :  { %7934 = vmatmul.mubr.bf16.gmra.mrb[108].mxu1 %v16492_v52  ;;  %7568 = vmatprep.mubr.bf16.mxu0 %v16417_v48  ;;  %v14486_v48 = vld [vmem:[#allocation7 + $0x944] ss:$28 sps:$4 sm:$0xff]  }
 0x450   :  { %7549 = vmatpush1.bf16.msra.mxu0 %v14472_v59  ;;  %v14639_v59 = vld [vmem:[#allocation10 + $0x204] ss:$16 sps:$4 sm:$0xff]  }
 0x451   :  { %7550 = vmatprep.subr.bf16.mxu0 %v14477_v18  ;;  %10011 = vmatpush1.bf16.msra.mxu1 %v14577_v55  ;;  %v14502_v18 = vld [vmem:[#allocation7 + $0xa90] ss:$28 sps:$4 sm:$0xff]   ;;  %v14505_v55 = vld [vmem:[#allocation7 + $0xac8] ss:$28 sps:$4 sm:$0xff]  }
 0x452   :  { %10012 = vmatprep.subr.bf16.mxu1 %v14585_v11  ;;  %v14513_v11 = vld [vmem:[#allocation7 + $0xb3c] ss:$28 sps:$4 sm:$0xff]  }
 0x454   :  { %7551 = vmatpush1.bf16.msra.mxu0 %v14475_v30  ;;  %v14510_v30 = vld [vmem:[#allocation7 + $0xb04] ss:$28 sps:$4 sm:$0xff]  }
 0x455   :  { %7552 = vmatprep.subr.bf16.mxu0 %v14480_v49  ;;  %10013 = vmatpush1.bf16.msra.mxu1 %v14583_v29  ;;  %v14508_v49 = vld [vmem:[#allocation7 + $0xb00] ss:$28 sps:$4 sm:$0xff]   ;;  %v14511_v29 = vld [vmem:[#allocation7 + $0xb38] ss:$28 sps:$4 sm:$0xff]  }
 0x456   :  { %10014 = vmatprep.subr.bf16.mxu1 %v14591_v39 }
 0x458   :  { %7553 = vmatpush1.bf16.msra.mxu0 %v14478_v13  ;;  %v14516_v13 = vld [vmem:[#allocation7 + $0xb74] ss:$28 sps:$4 sm:$0xff]  }
 0x459   :  { %7554 = vmatprep.subr.bf16.mxu0 %v14483_v22  ;;  %10015 = vmatpush1.bf16.msra.mxu1 %v14589_v57  ;;  %v14517_v57 = vld [vmem:[#allocation7 + $0xba8] ss:$28 sps:$4 sm:$0xff]  }
 0x45a   :  { %10016 = vmatprep.subr.bf16.mxu1 %v14597_v14 }
 0x45c   :  { %7555 = vmatpush1.bf16.msra.mxu0 %v14481_v35 }
 0x45d   :  { %7556 = vmatprep.subr.bf16.mxu0 %v14486_v48  ;;  %10017 = vmatpush1.bf16.msra.mxu1 %v14595_v63 }
 0x45e   :  { %10018 = vmatprep.subr.bf16.mxu1 %v14603_v40 }
 0x460   :  { %7557 = vmatpush1.bf16.msra.mxu0 %v14484_v51  ;;  %v14522_v51 = vld [vmem:[#allocation7 + $0xbe4] ss:$28 sps:$4 sm:$0xff]  }
 0x461   :  { %7558 = vmatprep.subr.bf16.mxu0 %v14489_v7  ;;  %10019 = vmatpush1.bf16.msra.mxu1 %v14601_v37 }
 0x462   :  { %10020 = vmatprep.subr.bf16.mxu1 %v14609_v9 }
 0x464   :  { %7559 = vmatpush1.bf16.msra.mxu0 %v14487_v5 }
 0x465   :  { %7560 = vmatprep.subr.bf16.mxu0 %v14492_v34  ;;  %10021 = vmatpush1.bf16.msra.mxu1 %v14607_v27 }
 0x466   :  { %10022 = vmatprep.subr.bf16.mxu1 %v14615_v17 }
 0x468   :  { %7561 = vmatpush1.bf16.msra.mxu0 %v14490_v45 }
 0x469   :  { %7562 = vmatprep.subr.bf16.mxu0 %v14495_v28  ;;  %10023 = vmatpush1.bf16.msra.mxu1 %v14613_v8 }
 0x46a   :  { %10024 = vmatprep.subr.bf16.mxu1 %v14621_v1 }
 0x46c   :  { %7563 = vmatpush1.bf16.msra.mxu0 %v14493_v43  ;;  %v14520_v43 = vld [vmem:[#allocation7 + $0xbe0] ss:$28 sps:$4 sm:$0xff]  }
 0x46d   :  { %7564 = vmatprep.subr.bf16.mxu0 %v14498_v15  ;;  %10025 = vmatpush1.bf16.msra.mxu1 %v14619_v21 }
 0x46e   :  { %10026 = vmatprep.subr.bf16.mxu1 %v14627_v2  ;;  %v14525_v2 = vld [vmem:[#allocation7 + $0xc1c] ss:$28 sps:$4 sm:$0xff]  }
 0x470   :  { %7565 = vmatpush1.bf16.msra.mxu0 %v14496_v20 }
 0x471   :  { %7566 = vmatprep.subr.bf16.mxu0 %v14501_v53  ;;  %10027 = vmatpush1.bf16.msra.mxu1 %v14625_v60 }
 0x472   :  { %10028 = vmatprep.subr.bf16.mxu1 %v14633_v42 }
 0x474   :  { %7567 = vmatpush1.bf16.msra.mxu0 %v14499_v25 }
 0x475   :  { %7609 = vmatprep.subr.bf16.mxu0 %v14504_v26  ;;  %10029 = vmatpush1.bf16.msra.mxu1 %v14631_v38 }
 0x476   :  { %10071 = vmatprep.subr.bf16.mxu1 %v14639_v59  ;;  %v14523_v59 = vld [vmem:[#allocation7 + $0xc18] ss:$28 sps:$4 sm:$0xff]  }
 0x477   :  { %7569 = vmatmul.mubr.bf16.vlgmr.msra.gmra.mrb[48].mxu0 %v16419_v24  ;;  %v14514_v24 = vld [vmem:[#allocation7 + $0xb70] ss:$28 sps:$4 sm:$0xff]  }
 0x478   :  { %7578 = vmatprep.mubr.bf16.mxu0 %v16421_v50  ;;  %7610 = vmatpush1.bf16.msra.mxu0 %v14502_v18  ;;  %v14519_v50 = vld [vmem:[#allocation7 + $0xbac] ss:$28 sps:$4 sm:$0xff]  }
 0x479   :  { %7611 = vmatprep.subr.bf16.mxu0 %v14507_v23 }
 0x47c   :  { %7612 = vmatpush1.bf16.msra.mxu0 %v14505_v55 }
 0x47d   :  { %7613 = vmatprep.subr.bf16.mxu0 %v14510_v30 }
 0x47f   :  { %7579 = vmatmul.mubr.bf16.gmra.mrb[52].mxu0 %v16427_v47 }
 0x480   :  { %7588 = vmatprep.mubr.bf16.mxu0 %v16431_v10  ;;  %7614 = vmatpush1.bf16.msra.mxu0 %v14508_v49  ;;  %v14528_v49 = vld [vmem:[#allocation7 + $0xc54] ss:$28 sps:$4 sm:$0xff]  }
 0x481   :  { %7615 = vmatprep.subr.bf16.mxu0 %v14513_v11 }
 0x484   :  { %7616 = vmatpush1.bf16.msra.mxu0 %v14511_v29 }
 0x485   :  { %7617 = vmatprep.subr.bf16.mxu0 %v14516_v13 }
 0x487   :  { %7589 = vmatmul.mubr.bf16.gmra.mrb[56].mxu0 %v16440_v0  ;;  %v16570_v22 = vpop.f32.mrb[32].mxu0  ;;  %v16572_v39 = vpop.f32.mrb[32].mxu1 }
 0x488   :  { %17885 = vst [vmem:[#allocation52_spill] sm:$0xff] %v16572_v39  ;;  %7598 = vmatprep.mubr.bf16.mxu0 %v16446_v3  ;;  %7618 = vmatpush1.bf16.msra.mxu0 %v14514_v24  ;;  %v16575_v47 = vpop.f32.mrb[33].mxu0  ;;  %v16577_v10 = vpop.f32.mrb[33].mxu1  ;;  %v8035_v35 = vmul.f32 %v16570_v22, %v16570_v22  ;;  %v8037_v48 = vmul.f32 %v16572_v39, %v16572_v39 }
 0x489   :  { %17886 = vst [vmem:[#allocation54_spill] sm:$0xff] %v16577_v10  ;;  %v8036_v0 = vmul.f32 %v16575_v47, %v16575_v47  ;;  %v8038_v14 = vmul.f32 %v16577_v10, %v16577_v10  ;;  %7619 = vmatprep.subr.bf16.mxu0 %v14519_v50  ;;  %v16587_v3 = vpop.f32.mrb[34].mxu0  ;;  %v16589_v63 = vpop.f32.mrb[34].mxu1 }
 0x48a   :  { %17887 = vst [vmem:[#allocation56_spill] sm:$0xff] %v16589_v63  ;;  %v7944_v7 = vadd.f32 %v16587_v3, %v16570_v22  ;;  %v8042_v40 = vmul.f32 %v16587_v3, %v16587_v3  ;;  %v7970_v37 = vadd.f32 %v16589_v63, %v16572_v39  ;;  %v8044_v5 = vmul.f32 %v16589_v63, %v16589_v63  ;;  %v16599_v34 = vpop.f32.mrb[35].mxu0  ;;  %v16601_v9 = vpop.f32.mrb[35].mxu1 }
 0x48b   :  { %17888 = vst [vmem:[#allocation53_spill] sm:$0xff] %v16601_v9  ;;  %v7957_v27 = vadd.f32 %v16599_v34, %v16575_v47  ;;  %v8043_v17 = vmul.f32 %v16599_v34, %v16599_v34  ;;  %v7983_v45 = vadd.f32 %v16601_v9, %v16577_v10  ;;  %v8045_v28 = vmul.f32 %v16601_v9, %v16601_v9 }
 0x48c   :  { %v8091_v8 = vadd.f32 %v8042_v40, %v8035_v35  ;;  %v8117_v1 = vadd.f32 %v8044_v5, %v8037_v48  ;;  %7620 = vmatpush1.bf16.msra.mxu0 %v14517_v57  ;;  %v14526_v5 = vld [vmem:[#allocation7 + $0xc50] ss:$28 sps:$4 sm:$0xff]  }
 0x48d   :  { %v8104_v15 = vadd.f32 %v8043_v17, %v8036_v0  ;;  %v8130_v21 = vadd.f32 %v8045_v28, %v8038_v14  ;;  %7621 = vmatprep.subr.bf16.mxu0 %v14522_v51  ;;  %v14531_v28 = vld [vmem:[#allocation7 + $0xc8c] ss:$28 sps:$4 sm:$0xff]  }
 0x48f   :  { %7599 = vmatmul.mubr.bf16.gmra.mrb[60].mxu0 %v16450_v31  ;;  %v16612_v20 = vpop.f32.mrb[36].mxu0  ;;  %v16614_v53 = vpop.f32.mrb[36].mxu1 }
 0x490   :  { %17889 = vst [vmem:[#allocation55_spill] sm:$0xff] %v16614_v53  ;;  %7622 = vmatpush1.bf16.msra.mxu0 %v14520_v43  ;;  %7641 = vmatprep.mubr.bf16.mxu0 %v16454_v4  ;;  %v7945_v60 = vadd.f32 %v7944_v7, %v16612_v20  ;;  %v8049_v42 = vmul.f32 %v16612_v20, %v16612_v20  ;;  %v16621_v26 = vpop.f32.mrb[37].mxu0  ;;  %v16623_v38 = vpop.f32.mrb[37].mxu1 }
 0x491   :  { %v7971_v25 = vadd.f32 %v7970_v37, %v16614_v53  ;;  %17890 = vst [vmem:[#allocation58_spill] sm:$0xff] %v16623_v38  ;;  %v8051_v31 = vmul.f32 %v16614_v53, %v16614_v53  ;;  %v7958_v18 = vadd.f32 %v7957_v27, %v16621_v26  ;;  %v8050_v4 = vmul.f32 %v16621_v26, %v16621_v26  ;;  %v16631_v55 = vpop.f32.mrb[38].mxu0  ;;  %v16633_v30 = vpop.f32.mrb[38].mxu1 }
 0x492   :  { %v7984_v23 = vadd.f32 %v7983_v45, %v16623_v38  ;;  %7623 = vmatprep.subr.bf16.mxu0 %v14525_v2  ;;  %17891 = vst [vmem:[#allocation57_spill] sm:$0xff] %v16633_v30  ;;  %v8092_v11 = vadd.f32 %v8091_v8, %v8049_v42  ;;  %v8052_v29 = vmul.f32 %v16623_v38, %v16623_v38  ;;  %v16640_v50 = vpop.f32.mrb[39].mxu0  ;;  %v16642_v57 = vpop.f32.mrb[39].mxu1 }
 0x493   :  { %v7946_v13 = vadd.f32 %v7945_v60, %v16631_v55  ;;  %v8056_v24 = vmul.f32 %v16631_v55, %v16631_v55  ;;  %17892 = vst [vmem:[#allocation59_spill] sm:$0xff] %v16642_v57  ;;  %v8118_v35 = vadd.f32 %v8117_v1, %v8051_v31  ;;  %v8105_v48 = vadd.f32 %v8104_v15, %v8050_v4  ;;  %v14529_v31 = vld [vmem:[#allocation7 + $0xc88] ss:$28 sps:$4 sm:$0xff]  }
 0x494   :  { %v7972_v0 = vadd.f32 %v7971_v25, %v16633_v30  ;;  %v8058_v14 = vmul.f32 %v16633_v30, %v16633_v30  ;;  %v8131_v51 = vadd.f32 %v8130_v21, %v8052_v29  ;;  %7624 = vmatpush1.bf16.msra.mxu0 %v14523_v59  ;;  %v7959_v40 = vadd.f32 %v7958_v18, %v16640_v50 }
 0x495   :  { %v8093_v7 = vadd.f32 %v8092_v11, %v8056_v24  ;;  %v8057_v37 = vmul.f32 %v16640_v50, %v16640_v50  ;;  %v7985_v17 = vadd.f32 %v7984_v23, %v16642_v57  ;;  %v8059_v45 = vmul.f32 %v16642_v57, %v16642_v57  ;;  %7625 = vmatprep.subr.bf16.mxu0 %v14528_v49 }
 0x496   :  { %v8119_v27 = vadd.f32 %v8118_v35, %v8058_v14 }
 0x497   :  { %v8106_v8 = vadd.f32 %v8105_v48, %v8057_v37  ;;  %v8132_v1 = vadd.f32 %v8131_v51, %v8059_v45  ;;  %v16653_v43 = vpop.f32.mrb[40].mxu0  ;;  %v16655_v15 = vpop.f32.mrb[40].mxu1 }
 0x498   :  { %17893 = vst [vmem:[#allocation29_spill] sm:$0xff] %v16655_v15  ;;  %7626 = vmatpush1.bf16.msra.mxu0 %v14526_v5  ;;  %v7947_v21 = vadd.f32 %v7946_v13, %v16653_v43  ;;  %v8063_v2 = vmul.f32 %v16653_v43, %v16653_v43  ;;  %v7973_v60 = vadd.f32 %v7972_v0, %v16655_v15  ;;  %v16663_v25 = vpop.f32.mrb[41].mxu0  ;;  %v16665_v59 = vpop.f32.mrb[41].mxu1  ;;  %v14534_v13 = vld [vmem:[#allocation7 + $0xcc4] ss:$28 sps:$4 sm:$0xff]  }
 0x499   :  { %v8065_v42 = vmul.f32 %v16655_v15, %v16655_v15  ;;  %17894 = vst [vmem:[#allocation30_spill] sm:$0xff] %v16665_v59  ;;  %v7960_v18 = vadd.f32 %v7959_v40, %v16663_v25  ;;  %v8064_v4 = vmul.f32 %v16663_v25, %v16663_v25  ;;  %v7986_v23 = vadd.f32 %v7985_v17, %v16665_v59  ;;  %v16673_v11 = vpop.f32.mrb[42].mxu0  ;;  %v16675_v29 = vpop.f32.mrb[42].mxu1 }
 0x49a   :  { %v8066_v49 = vmul.f32 %v16665_v59, %v16665_v59  ;;  %7627 = vmatprep.subr.bf16.mxu0 %v14531_v28  ;;  %17895 = vst [vmem:[#allocation38_spill] sm:$0xff] %v16675_v29  ;;  %v8094_v24 = vadd.f32 %v8093_v7, %v8063_v2  ;;  %v7948_v48 = vadd.f32 %v7947_v21, %v16673_v11  ;;  %v16680_v14 = vpop.f32.mrb[43].mxu0  ;;  %v16682_v51 = vpop.f32.mrb[43].mxu1  ;;  %v14532_v21 = vld [vmem:[#allocation7 + $0xcc0] ss:$28 sps:$4 sm:$0xff]  }
 0x49b   :  { %v8120_v35 = vadd.f32 %v8119_v27, %v8065_v42  ;;  %v8070_v0 = vmul.f32 %v16673_v11, %v16673_v11  ;;  %17896 = vst [vmem:[#allocation39_spill] sm:$0xff] %v16682_v51  ;;  %v8107_v40 = vadd.f32 %v8106_v8, %v8064_v4  ;;  %v7974_v5 = vadd.f32 %v7973_v60, %v16675_v29 }
 0x49c   :  { %v8133_v37 = vadd.f32 %v8132_v1, %v8066_v49  ;;  %v8072_v17 = vmul.f32 %v16675_v29, %v16675_v29  ;;  %7628 = vmatpush1.bf16.msra.mxu0 %v14529_v31  ;;  %v7961_v7 = vadd.f32 %v7960_v18, %v16680_v14  ;;  %v8071_v27 = vmul.f32 %v16680_v14, %v16680_v14  ;;  %v14537_v1 = vld [vmem:[#allocation7 + $0xcfc] ss:$28 sps:$4 sm:$0xff]  }
 0x49d   :  { %v8095_v45 = vadd.f32 %v8094_v24, %v8070_v0  ;;  %v7987_v28 = vadd.f32 %v7986_v23, %v16682_v51  ;;  %v8073_v8 = vmul.f32 %v16682_v51, %v16682_v51  ;;  %7629 = vmatprep.subr.bf16.mxu0 %v14534_v13  ;;  %v14535_v0 = vld [vmem:[#allocation7 + $0xcf8] ss:$28 sps:$4 sm:$0xff]  }
 0x49e   :  { %v8121_v2 = vadd.f32 %v8120_v35, %v8072_v17  ;;  %v8108_v60 = vadd.f32 %v8107_v40, %v8071_v27 }
 0x49f   :  { %v8134_v42 = vadd.f32 %v8133_v37, %v8073_v8  ;;  %v16693_v4 = vpop.f32.mrb[44].mxu0  ;;  %v16695_v49 = vpop.f32.mrb[44].mxu1 }
 0x4a0   :  { %17897 = vst [vmem:[#allocation40_spill] sm:$0xff] %v16693_v4  ;;  %17898 = vst [vmem:[#allocation41_spill] sm:$0xff] %v16695_v49  ;;  %7630 = vmatpush1.bf16.msra.mxu0 %v14532_v21  ;;  %v7949_v31 = vadd.f32 %v7948_v48, %v16693_v4  ;;  %v8077_v18 = vmul.f32 %v16693_v4, %v16693_v4  ;;  %v7975_v23 = vadd.f32 %v7974_v5, %v16695_v49  ;;  %v16703_v35 = vpop.f32.mrb[45].mxu0  ;;  %v16705_v13 = vpop.f32.mrb[45].mxu1  ;;  %v14540_v21 = vld [vmem:[#allocation7 + $0xd34] ss:$28 sps:$4 sm:$0xff]  }
 0x4a1   :  { %v8079_v24 = vmul.f32 %v16695_v49, %v16695_v49  ;;  %17899 = vst [vmem:[#allocation42_spill] sm:$0xff] %v16705_v13  ;;  %v7962_v40 = vadd.f32 %v7961_v7, %v16703_v35  ;;  %v8078_v37 = vmul.f32 %v16703_v35, %v16703_v35  ;;  %v7988_v48 = vadd.f32 %v7987_v28, %v16705_v13  ;;  %v16713_v5 = vpop.f32.mrb[46].mxu0  ;;  %v16715_v27 = vpop.f32.mrb[46].mxu1 }
 0x4a2   :  { %v8080_v17 = vmul.f32 %v16705_v13, %v16705_v13  ;;  %7631 = vmatprep.subr.bf16.mxu0 %v14537_v1  ;;  %17900 = vst [vmem:[#allocation43_spill] sm:$0xff] %v16713_v5  ;;  %17901 = vst [vmem:[#allocation44_spill] sm:$0xff] %v16715_v27  ;;  %v8096_v8 = vadd.f32 %v8095_v45, %v8077_v18  ;;  %v7950_v29 = vadd.f32 %v7949_v31, %v16713_v5  ;;  %v16720_v15 = vpop.f32.mrb[47].mxu0  ;;  %v16722_v51 = vpop.f32.mrb[47].mxu1  ;;  %v14538_v31 = vld [vmem:[#allocation7 + $0xd30] ss:$28 sps:$4 sm:$0xff]  }
 0x4a3   :  { %v8122_v49 = vadd.f32 %v8121_v2, %v8079_v24  ;;  %v8084_v7 = vmul.f32 %v16713_v5, %v16713_v5  ;;  %v8109_v28 = vadd.f32 %v8108_v60, %v8078_v37  ;;  %v7976_v1 = vadd.f32 %v7975_v23, %v16715_v27 }
 0x4a4   :  { %v8135_v59 = vadd.f32 %v8134_v42, %v8080_v17  ;;  %v8086_v13 = vmul.f32 %v16715_v27, %v16715_v27  ;;  %v7951_v41 = vrot.slane %v7950_v29, 4  ;;  %7632 = vmatpush1.bf16.msra.mxu0 %v14535_v0  ;;  %v7963_v45 = vadd.f32 %v7962_v40, %v16720_v15  ;;  %v14546_v42 = vld [vmem:[#allocation7 + $0xd6c] ss:$28 sps:$4 sm:$0xff]  }
 0x4a5   :  { %v8097_v61 = vadd.f32 %v8096_v8, %v8084_v7  ;;  %v8085_v2 = vmul.f32 %v16720_v15, %v16720_v15  ;;  %v7977_v18 = vrot.slane %v7976_v1, 4  ;;  %v7989_v6 = vadd.f32 %v7988_v48, %v16722_v51  ;;  %7633 = vmatprep.subr.bf16.mxu0 %v14540_v21 }
 0x4a6   :  { %v8123_v24 = vadd.f32 %v8122_v49, %v8086_v13  ;;  %v8087_v60 = vmul.f32 %v16722_v51, %v16722_v51  ;;  %v7952_v23 = vadd.f32 %v7951_v41, %v7950_v29  ;;  %v7964_v17 = vrot.slane %v7963_v45, 4  ;;  %v14544_v13 = vld [vmem:[#allocation7 + $0xd68] ss:$28 sps:$4 sm:$0xff]  }
 0x4a7   :  { %v8098_v37 = vrot.slane %v8097_v61, 4  ;;  %v8110_v8 = vadd.f32 %v8109_v28, %v8085_v2  ;;  %v7978_v0 = vadd.f32 %v7977_v18, %v7976_v1  ;;  %v7990_v40 = vrot.slane %v7989_v6, 4  ;;  %v14552_v29 = vld [vmem:[#allocation7 + $0xda4] ss:$28 sps:$4 sm:$0xff]  }
 0x4a8   :  { %v8124_v7 = vrot.slane %v8123_v24, 4  ;;  %v8136_v27 = vadd.f32 %v8135_v59, %v8087_v60  ;;  %v7953_v58 = vrot.slane %v7952_v23, 2  ;;  %v7965_v53 = vadd.f32 %v7964_v17, %v7963_v45  ;;  %7634 = vmatpush1.bf16.msra.mxu0 %v14538_v31  ;;  %v16733_v49 = vpop.f32.mrb[48].mxu1 }
 0x4a9   :  { %v8099_v30 = vadd.f32 %v8098_v37, %v8097_v61  ;;  %v8111_v57 = vrot.slane %v8110_v8, 4  ;;  %v7979_v48 = vrot.slane %v7978_v0, 2  ;;  %v7991_v21 = vadd.f32 %v7990_v40, %v7989_v6  ;;  %7635 = vmatprep.subr.bf16.mxu0 %v14546_v42  ;;  %v13280_v41 = vpop.f32.mrb[49].mxu1  ;;  %v14550_v6 = vld [vmem:[#allocation7 + $0xda0] ss:$28 sps:$4 sm:$0xff]  }
 0x4aa   :  { %v8125_v38 = vadd.f32 %v8124_v7, %v8123_v24  ;;  %v8137_v63 = vrot.slane %v8136_v27, 4  ;;  %v7954_v28 = vadd.f32 %v7953_v58, %v7952_v23  ;;  %v7966_v2 = vrot.slane %v7965_v53, 2  ;;  %v13282_v59 = vpop.f32.mrb[50].mxu1  ;;  %v14558_v58 = vld [vmem:[#allocation7 + $0xddc] ss:$28 sps:$4 sm:$0xff]  }
 0x4ab   :  { %v8100_v1 = vrot.slane %v8099_v30, 2  ;;  %v8112_v18 = vadd.f32 %v8111_v57, %v8110_v8  ;;  %v7980_v60 = vadd.f32 %v7979_v48, %v7978_v0  ;;  %v7992_v45 = vrot.slane %v7991_v21, 2  ;;  %v13283_v31 = vpop.f32.mrb[51].mxu1 }
 0x4ac   :  { %v8126_v61 = vrot.slane %v8125_v38, 2  ;;  %v8138_v37 = vadd.f32 %v8137_v63, %v8136_v27  ;;  %v7955_v17 = vrot.slane %v7954_v28, 1  ;;  %v7967_v9 = vadd.f32 %v7966_v2, %v7965_v53  ;;  %7636 = vmatpush1.bf16.msra.mxu0 %v14544_v13 }
 0x4ad   :  { %v8101_v39 = vadd.f32 %v8100_v1, %v8099_v30  ;;  %v8113_v10 = vrot.slane %v8112_v18, 2  ;;  %v7981_v24 = vrot.slane %v7980_v60, 1  ;;  %v7993_v7 = vadd.f32 %v7992_v45, %v7991_v21  ;;  %7637 = vmatprep.subr.bf16.mxu0 %v14552_v29 }
 0x4ae   :  { %v8127_v42 = vadd.f32 %v8126_v61, %v8125_v38  ;;  %v8139_v40 = vrot.slane %v8138_v37, 2  ;;  %v7956_v23 = vadd.f32 %v7955_v17, %v7954_v28  ;;  %v7968_v8 = vrot.slane %v7967_v9, 1  ;;  %v14556_v38 = vld [vmem:[#allocation7 + $0xdd8] ss:$28 sps:$4 sm:$0xff]  }
 0x4af   :  { %v8102_v57 = vrot.slane %v8101_v39, 1  ;;  %v8114_v0 = vadd.f32 %v8113_v10, %v8112_v18  ;;  %v7982_v48 = vadd.f32 %v7981_v24, %v7980_v60  ;;  %v7994_v63 = vrot.slane %v7993_v7, 1  ;;  %v14564_v10 = vld [vmem:[#allocation10 + $0xc] ss:$16 sps:$4 sm:$0xff]  }
 0x4b0   :  { %v8128_v5 = vrot.slane %v8127_v42, 1  ;;  %v8140_v27 = vadd.f32 %v8139_v40, %v8138_v37  ;;  %v16735_v30 = vmul.f32 0.015625, %v7956_v23  ;;  %v7969_v53 = vadd.f32 %v7968_v8, %v7967_v9  ;;  %7638 = vmatpush1.bf16.msra.mxu0 %v14550_v6  ;;  %v13285_v1 = vpop.f32.mrb[52].mxu1 }
 0x4b1   :  { %v8103_v4 = vadd.f32 %v8102_v57, %v8101_v39  ;;  %v8115_v13 = vrot.slane %v8114_v0, 1  ;;  %v16737_v2 = vmul.f32 0.015625, %v7982_v48  ;;  %v7995_v29 = vadd.f32 %v7994_v63, %v7993_v7  ;;  %7639 = vmatprep.subr.bf16.mxu0 %v14558_v58  ;;  %v13286_v61 = vpop.f32.mrb[53].mxu1  ;;  %v14562_v58 = vld [vmem:[#allocation10 + $0x8] ss:$16 sps:$4 sm:$0xff]  }
 0x4b2   :  { %v8129_v21 = vadd.f32 %v8128_v5, %v8127_v42  ;;  %v8141_v28 = vrot.slane %v8140_v27, 1  ;;  %v8196_v60 = vmul.f32 %v16735_v30, %v16735_v30  ;;  %v16741_v45 = vmul.f32 0.015625, %v7969_v53  ;;  %v13288_v9 = vpop.f32.mrb[54].mxu1  ;;  %v14570_v48 = vld [vmem:[#allocation10 + $0x2c] ss:$16 sps:$4 sm:$0xff]  }
 0x4b3   :  { %v8189_v18 = vmul.f32 0.015625, %v8103_v4  ;;  %v8116_v39 = vadd.f32 %v8115_v13, %v8114_v0  ;;  %v8198_v17 = vmul.f32 %v16737_v2, %v16737_v2  ;;  %v16745_v6 = vmul.f32 0.015625, %v7995_v29  ;;  %v13289_v24 = vpop.f32.mrb[55].mxu1 }
 0x4b4   :  { %v8191_v37 = vmul.f32 0.015625, %v8129_v21  ;;  %v8142_v5 = vadd.f32 %v8141_v28, %v8140_v27  ;;  %v8197_v4 = vmul.f32 %v16741_v45, %v16741_v45  ;;  %v16750_v40 = vadd.f32 %v13280_v41, %v16733_v49  ;;  %7640 = vmatpush1.bf16.msra.mxu0 %v14556_v38 }
 0x4b5   :  { %v8203_v42 = vsub.f32 %v8189_v18, %v8196_v60  ;;  %v8190_v7 = vmul.f32 0.015625, %v8116_v39  ;;  %v8199_v8 = vmul.f32 %v16745_v6, %v16745_v6  ;;  %v16754_v0 = vadd.f32 %v13283_v31, %v13282_v59  ;;  %10290 = vmatprep.subr.bf16.mxu0 %v14564_v10  ;;  %v14568_v59 = vld [vmem:[#allocation10 + $0x28] ss:$16 sps:$4 sm:$0xff]   ;;  %v14576_v18 = vld [vmem:[#allocation10 + $0x4c] ss:$16 sps:$4 sm:$0xff]  }
 0x4b6   :  { %v8205_v23 = vsub.f32 %v8191_v37, %v8198_v17  ;;  %v8192_v57 = vmul.f32 0.015625, %v8142_v5  ;;  %v16756_v53 = vadd.f32 %v13286_v61, %v13285_v1  ;;  %v16758_v13 = vadd.f32 %v13289_v24, %v13288_v9  ;;  %v14582_v37 = vld [vmem:[#allocation10 + $0x6c] ss:$16 sps:$4 sm:$0xff]   ;;  %v14580_v5 = vld [vmem:[#allocation10 + $0x68] ss:$16 sps:$4 sm:$0xff]  }
 0x4b7   :  { %v8210_v63 = vmax.f32 %v8203_v42, 0.0  ;;  %v8204_v27 = vsub.f32 %v8190_v7, %v8197_v4  ;;  %7642 = vmatmul.mubr.bf16.vlgmr.msra.gmra.mrb[48].mxu0 %v16460_v46  ;;  %v14588_v42 = vld [vmem:[#allocation10 + $0x8c] ss:$16 sps:$4 sm:$0xff]  }
 0x4b8   :  { %v8212_v21 = vmax.f32 %v8205_v23, 0.0  ;;  %v8206_v49 = vsub.f32 %v8192_v57, %v8199_v8  ;;  %7651 = vmatprep.mubr.bf16.mxu0 %v16472_v33  ;;  %10291 = vmatpush1.bf16.msra.mxu0 %v14562_v58  ;;  %v13291_v29 = vpop.f32.mrb[56].mxu1  ;;  %v14574_v33 = vld [vmem:[#allocation10 + $0x48] ss:$16 sps:$4 sm:$0xff]  }
 0x4b9   :  { %v8217_v41 = vadd.f32 1e-05, %v8210_v63  ;;  %v8211_v38 = vmax.f32 %v8204_v27, 0.0  ;;  %v13292_v10 = vpop.f32.mrb[57].mxu1  ;;  %10292 = vmatprep.subr.bf16.mxu0 %v14570_v48  ;;  %v14586_v8 = vld [vmem:[#allocation10 + $0x88] ss:$16 sps:$4 sm:$0xff]  }
 0x4ba   :  { %v8219_v31 = vadd.f32 1e-05, %v8212_v21  ;;  %v8213_v28 = vmax.f32 %v8206_v49, 0.0  ;;  %v16762_v61 = vadd.f32 %v13292_v10, %v13291_v29  ;;  %v13294_v60 = vpop.f32.mrb[58].mxu1  ;;  %v14592_v49 = vld [vmem:[#allocation10 + $0xa8] ss:$16 sps:$4 sm:$0xff]  }
 0x4bb   :  { %15022 = vrsqrt.f32 %v8217_v41  ;;  %v8218_v1 = vadd.f32 1e-05, %v8211_v38  ;;  %v13295_v46 = vpop.f32.mrb[59].mxu1  ;;  %v14600_v29 = vld [vmem:[#allocation10 + $0xcc] ss:$16 sps:$4 sm:$0xff]  }
 0x4bc   :  { %15024 = vrsqrt.f32 %v8219_v31  ;;  %v8220_v39 = vadd.f32 1e-05, %v8213_v28  ;;  %10293 = vmatpush1.bf16.msra.mxu0 %v14568_v59  ;;  %v16764_v9 = vadd.f32 %v13295_v46, %v13294_v60  ;;  %v16776_v28 = vld [vmem:[#allocation9] sm:$0xff]  ;;  %v14606_v46 = vld [vmem:[#allocation10 + $0xec] ss:$16 sps:$4 sm:$0xff]  }
 0x4bd   :  { %15026 = vrsqrt.f32 %v8218_v1  ;;  %10294 = vmatprep.subr.bf16.mxu0 %v14576_v18  ;;  %v14598_v60 = vld [vmem:[#allocation10 + $0xc8] ss:$16 sps:$4 sm:$0xff]  }
 0x4be   :  { %15028 = vrsqrt.f32 %v8220_v39 }
 0x4bf   :  { %7652 = vmatmul.mubr.bf16.gmra.mrb[52].mxu0 %v16478_v12  ;;  %v14594_v12 = vld [vmem:[#allocation10 + $0xac] ss:$16 sps:$4 sm:$0xff]  }
 0x4c0   :  { %7661 = vmatprep.mubr.bf16.mxu0 %v16482_v56  ;;  %10295 = vmatpush1.bf16.msra.mxu0 %v14574_v33  ;;  %v13297_v17 = vpop.f32.mrb[60].mxu1 }
 0x4c1   :  { %v13298_v24 = vpop.f32.mrb[61].mxu1  ;;  %10296 = vmatprep.subr.bf16.mxu0 %v14582_v37 }
 0x4c2   :  { %v16768_v7 = vadd.f32 %v13298_v24, %v13297_v17  ;;  %v13300_v4 = vpop.f32.mrb[62].mxu1 }
 0x4c3   :  { %v13301_v58 = vpop.f32.mrb[63].mxu1 }
 0x4c4   :  { %10297 = vmatpush1.bf16.msra.mxu0 %v14580_v5  ;;  %v16770_v57 = vadd.f32 %v13301_v58, %v13300_v4  ;;  %v14612_v58 = vld [vmem:[#allocation10 + $0x10c] ss:$16 sps:$4 sm:$0xff]  }
 0x4c5   :  { %v15023_v23 = vpop.eup %15022  ;;  %10298 = vmatprep.subr.bf16.mxu0 %v14588_v42 }
 0x4c6   :  { %v15025_v48 = vpop.eup %15024 }
 0x4c7   :  { %v15027_v63 = vpop.eup %15026  ;;  %7662 = vmatmul.mubr.bf16.gmra.mrb[56].mxu0 %v16486_v19 }
 0x4c8   :  { %v15029_v56 = vpop.eup %15028  ;;  %v8238_v27 = vcombine.low %v15023_v23, %v15027_v63  ;;  %7671 = vmatprep.mubr.bf16.mxu0 %v16490_v36  ;;  %10299 = vmatpush1.bf16.msra.mxu0 %v14586_v8 }
 0x4c9   :  { %v8239_v21 = vcombine.low %v15025_v48, %v15029_v56  ;;  %v13319_v38 = vpop.f32.mrb[64].mxu1  ;;  %10300 = vmatprep.subr.bf16.mxu0 %v14594_v12 }
 0x4ca   :  { %v8246_v41 = vrot.slane %v8238_v27, %v15935_v44  ;;  %v13320_v31 = vpop.f32.mrb[65].mxu1 }
 0x4cb   :  { %v8253_v59 = vrot.slane %v8239_v21, %v15935_v44  ;;  %v13321_v10 = vadd.f32 %v13320_v31, %v13319_v38  ;;  %v13322_v18 = vpop.f32.mrb[66].mxu1 }
 0x4cc   :  { %10301 = vmatpush1.bf16.msra.mxu0 %v14592_v49  ;;  %v13323_v19 = vpop.f32.mrb[67].mxu1 }
 0x4cd   :  { %v8254_v1 = vcombine.low %v8246_v41, %v8253_v59  ;;  %v16779_v36 = vadd.f32 %v13321_v10, %v16750_v40  ;;  %v13324_v39 = vadd.f32 %v13323_v19, %v13322_v18  ;;  %10302 = vmatprep.subr.bf16.mxu0 %v14600_v29  ;;  %v14604_v40 = vld [vmem:[#allocation10 + $0xe8] ss:$16 sps:$4 sm:$0xff]   ;;  %v14618_v29 = vld [vmem:[#allocation10 + $0x12c] ss:$16 sps:$4 sm:$0xff]  }
 0x4cf   :  { %v8273_v33 = vmul.f32 %v8254_v1, %v16776_v28  ;;  %v16783_v37 = vadd.f32 %v13324_v39, %v16754_v0  ;;  %7672 = vmatmul.mubr.bf16.gmra.mrb[60].mxu0 %v16492_v52 }
 0x4d0   :  { %10303 = vmatpush1.bf16.msra.mxu0 %v14598_v60 }
 0x4d1   :  { %v8280_v17 = vrot.slane %v8273_v33, %v15927_v32  ;;  %v8284_v5 = vrot.slane %v8273_v33, %v15929_v62  ;;  %v8288_v24 = vrot.slane %v8273_v33, %v15931_v54  ;;  %v8292_v42 = vrot.slane %v8273_v33, %v15933_v16  ;;  %v13325_v4 = vpop.f32.mrb[68].mxu1  ;;  %10304 = vmatprep.subr.bf16.mxu0 %v14606_v46  ;;  %v14616_v46 = vld [vmem:[#allocation10 + $0x128] ss:$16 sps:$4 sm:$0xff]   ;;  %v14624_v33 = vld [vmem:[#allocation10 + $0x14c] ss:$16 sps:$4 sm:$0xff]  }
 0x4d2   :  { %v13326_v48 = vpop.f32.mrb[69].mxu1 }
 0x4d3   :  { %v8312_v23 = vmul.f32 %v8280_v17, %v16735_v30  ;;  %v8313_v0 = vmul.f32 %v8284_v5, %v16741_v45  ;;  %v8314_v8 = vmul.f32 %v8288_v24, %v16737_v2  ;;  %v8315_v52 = vmul.f32 %v8292_v42, %v16745_v6  ;;  %v13328_v27 = vpop.f32.mrb[70].mxu1  ;;  %v14610_v2 = vld [vmem:[#allocation10 + $0x108] ss:$16 sps:$4 sm:$0xff]  }
 0x4d4   :  { %v8368_v12 = vrot.slane %v8280_v17, %v15927_v32  ;;  %v8372_v63 = vrot.slane %v8284_v5, %v15927_v32  ;;  %v16797_v56 = vrot.slane %v8292_v42, %v15927_v32  ;;  %v16800_v41 = vrot.slane %v8288_v24, %v15927_v32  ;;  %10305 = vmatpush1.bf16.msra.mxu0 %v14604_v40  ;;  %v13329_v45 = vpop.f32.mrb[71].mxu1  ;;  %v17902_v24 = vld [vmem:[#allocation40_spill] sm:$0xff]  ;;  %v17903_v40 = vld [vmem:[#allocation43_spill] sm:$0xff] }
 0x4d5   :  { %v8326_v21 = vcombine.low %v8312_v23, %v8313_v0  ;;  %v8327_v49 = vcombine.low %v8314_v8, %v8315_v52  ;;  %v13327_v30 = vadd.f32 %v13326_v48, %v13325_v4  ;;  %v13330_v38 = vadd.f32 %v13329_v45, %v13328_v27  ;;  %10306 = vmatprep.subr.bf16.mxu0 %v14612_v58  ;;  %v17904_v58 = vld [vmem:[#allocation54_spill] sm:$0xff]  ;;  %v17905_v23 = vld [vmem:[#allocation53_spill] sm:$0xff]  ;;  %v17906_v0 = vld [vmem:[#allocation52_spill] sm:$0xff] }
 0x4d6   :  { %v16804_v6 = vmul.f32 %v16797_v56, %v16722_v51  ;;  %v16807_v59 = vmul.f32 %v8372_v63, %v16575_v47  ;;  %v16810_v31 = vmul.f32 %v8372_v63, %v16599_v34  ;;  %v16818_v19 = vmul.f32 %v8368_v12, %v16570_v22  ;;  %v14622_v48 = vld [vmem:[#allocation10 + $0x148] ss:$16 sps:$4 sm:$0xff]  }
 0x4d7   :  { %v8334_v10 = vrot.slane %v8326_v21, %v15935_v44  ;;  %v8341_v18 = vrot.slane %v8327_v49, %v15935_v44  ;;  %v16815_v1 = vadd.f32 %v13327_v30, %v16756_v53  ;;  %v16821_v51 = vadd.f32 %v13330_v38, %v16758_v13  ;;  %v17908_v27 = vld [vmem:[#allocation58_spill] sm:$0xff]  ;;  %v17909_v49 = vld [vmem:[#allocation59_spill] sm:$0xff] }
 0x4d8   :  { %v16824_v60 = vmul.f32 %v8368_v12, %v16587_v3  ;;  %v16827_v47 = vmul.f32 %v8372_v63, %v16621_v26  ;;  %v16830_v34 = vmul.f32 %v8372_v63, %v16640_v50  ;;  %10307 = vmatpush1.bf16.msra.mxu0 %v14610_v2  ;;  %v16833_v53 = vmul.f32 %v8368_v12, %v16612_v20  ;;  %v17910_v38 = vld [vmem:[#allocation55_spill] sm:$0xff] }
 0x4d9   :  { %v8342_v39 = vcombine.low %v8334_v10, %v8341_v18  ;;  %v16836_v22 = vmul.f32 %v8368_v12, %v16631_v55  ;;  %v16839_v13 = vmul.f32 %v8372_v63, %v16663_v25  ;;  %v13331_v3 = vpop.f32.mrb[72].mxu1  ;;  %10308 = vmatprep.subr.bf16.mxu0 %v14618_v29  ;;  %v16842_v26 = vmul.f32 %v8372_v63, %v16680_v14  ;;  %v17911_v10 = vld [vmem:[#allocation57_spill] sm:$0xff] }
 0x4da   :  { %v16845_v50 = vmul.f32 %v8368_v12, %v16653_v43  ;;  %v16848_v17 = vmul.f32 %v8368_v12, %v16673_v11  ;;  %v16851_v20 = vmul.f32 %v8372_v63, %v16703_v35  ;;  %v13332_v5 = vpop.f32.mrb[73].mxu1  ;;  %v16854_v25 = vmul.f32 %v8372_v63, %v16720_v15 }
 0x4db   :  { %v8359_v55 = vrot.slane %v8342_v39, 7  ;;  %v16857_v42 = vmul.f32 %v8368_v12, %v17902_v24  ;;  %v16860_v14 = vmul.f32 %v8368_v12, %v17903_v40  ;;  %v13333_v4 = vadd.f32 %v13332_v5, %v13331_v3  ;;  %v13334_v43 = vpop.f32.mrb[74].mxu1  ;;  %v17907_v12 = vld [vmem:[#allocation56_spill] sm:$0xff]  ;;  %v17912_v39 = vld [vmem:[#allocation34_spill] sm:$0xff]  ;;  %v17913_v3 = vld [vmem:[#allocation35_spill] sm:$0xff] }
 0x4dc   :  { %v16864_v11 = vmul.f32 %v16797_v56, %v17904_v58  ;;  %v16868_v35 = vmul.f32 %v16797_v56, %v17905_v23  ;;  %v16872_v15 = vmul.f32 %v16800_v41, %v17906_v0  ;;  %10309 = vmatpush1.bf16.msra.mxu0 %v14616_v46  ;;  %v13335_v52 = vpop.f32.mrb[75].mxu1  ;;  %v16877_v63 = vmul.f32 %v16800_v41, %v17907_v12  ;;  %v17914_v5 = vld [vmem:[#allocation36_spill] sm:$0xff]  ;;  %v17915_v40 = vld [vmem:[#allocation37_spill] sm:$0xff]  ;;  %v17917_v58 = vld [vmem:[#allocation39_spill] sm:$0xff] }
 0x4dd   :  { %v8363_v8 = vsub.f32 %v16776_v28, %v8359_v55  ;;  %v16881_v21 = vmul.f32 %v16797_v56, %v17908_v27  ;;  %v16885_v30 = vmul.f32 %v16797_v56, %v17909_v49  ;;  %v16888_v45 = vadd.f32 %v13333_v4, %v16762_v61  ;;  %10310 = vmatprep.subr.bf16.mxu0 %v14624_v33  ;;  %v14630_v28 = vld [vmem:[#allocation10 + $0x16c] ss:$16 sps:$4 sm:$0xff]   ;;  %v17918_v0 = vld [vmem:[#allocation29_spill] sm:$0xff]  ;;  %v14628_v49 = vld [vmem:[#allocation10 + $0x168] ss:$16 sps:$4 sm:$0xff]  }
 0x4de   :  { %v13336_v2 = vadd.f32 %v13335_v52, %v13334_v43  ;;  %v16892_v29 = vmul.f32 %v16800_v41, %v17910_v38  ;;  %v16896_v18 = vmul.f32 %v16800_v41, %v17911_v10  ;;  %v17916_v33 = vld [vmem:[#allocation30_spill] sm:$0xff]  ;;  %v16911_v23 = vmul.f32 %v16797_v56, %v17917_v58 }
 0x4df   :  { %v8454_v46 = vrot.slane %v8363_v8, %v17912_v39  ;;  %v8458_v55 = vrot.slane %v8363_v8, %v17913_v3  ;;  %v8462_v24 = vrot.slane %v8363_v8, %v17914_v5  ;;  %v8466_v61 = vrot.slane %v8363_v8, %v17915_v40  ;;  %v14636_v38 = vld [vmem:[#allocation10 + $0x18c] ss:$16 sps:$4 sm:$0xff]   ;;  %v14634_v5 = vld [vmem:[#allocation10 + $0x188] ss:$16 sps:$4 sm:$0xff]  }
 0x4e0   :  { %v16903_v4 = vadd.f32 %v13336_v2, %v16764_v9  ;;  %v16907_v43 = vmul.f32 %v16797_v56, %v17916_v33  ;;  %v16915_v52 = vmul.f32 %v16800_v41, %v17918_v0  ;;  %10311 = vmatpush1.bf16.msra.mxu0 %v14622_v48  ;;  %v17919_v10 = vld [vmem:[#allocation38_spill] sm:$0xff]  ;;  %v17922_v0 = vld [vmem:[#allocation44_spill] sm:$0xff] }
 0x4e1   :  { %v16918_v12 = vrot.slane %v8454_v46, %v17912_v39  ;;  %v8493_v8 = vrot.slane %v8458_v55, %v17912_v39  ;;  %v16922_v9 = vrot.slane %v8462_v24, %v17912_v39  ;;  %v16925_v27 = vrot.slane %v8466_v61, %v17912_v39  ;;  %v13337_v2 = vpop.f32.mrb[76].mxu1  ;;  %10312 = vmatprep.subr.bf16.mxu0 %v14630_v28  ;;  %v17920_v58 = vld [vmem:[#allocation42_spill] sm:$0xff]  ;;  %v17921_v55 = vld [vmem:[#allocation41_spill] sm:$0xff] }
 0x4e2   :  { %v16929_v33 = vmul.f32 %v16800_v41, %v17919_v10  ;;  %v16933_v46 = vmul.f32 %v16797_v56, %v17920_v58  ;;  %v16937_v24 = vmul.f32 %v16800_v41, %v17921_v55  ;;  %v16941_v61 = vmul.f32 %v16800_v41, %v17922_v0  ;;  %v13338_v28 = vpop.f32.mrb[77].mxu1 }
 0x4e3   :  { %v16945_v48 = vadd.f32 %v16925_v27, %v16804_v6  ;;  %v8515_v10 = vadd.f32 %v8493_v8, %v16807_v59  ;;  %v8522_v40 = vadd.f32 %v8493_v8, %v16810_v31  ;;  %v8514_v56 = vadd.f32 %v16918_v12, %v16818_v19  ;;  %v13340_v16 = vpop.f32.mrb[78].mxu1 }
 0x4e4   :  { %v13339_v58 = vadd.f32 %v13338_v28, %v13337_v2  ;;  %v8521_v55 = vadd.f32 %v16918_v12, %v16824_v60  ;;  %v8529_v41 = vadd.f32 %v8493_v8, %v16827_v47  ;;  %v8536_v0 = vadd.f32 %v8493_v8, %v16830_v34  ;;  %10313 = vmatpush1.bf16.msra.mxu0 %v14628_v49  ;;  %v13341_v6 = vpop.f32.mrb[79].mxu1  ;;  %v14637_v47 = vld [vmem:[#allocation10 + $0x200] ss:$16 sps:$4 sm:$0xff]  }
 0x4e5   :  { %v8571_v3 = vmax.f32 %v8515_v10, 0.0  ;;  %v8578_v39 = vmax.f32 %v8522_v40, 0.0  ;;  %v8570_v59 = vmax.f32 %v8514_v56, 0.0  ;;  %v8528_v31 = vadd.f32 %v16918_v12, %v16833_v53  ;;  %10314 = vmatprep.subr.bf16.mxu0 %v14636_v38  ;;  %v14642_v53 = vld [vmem:[#allocation10 + $0x1ac] ss:$16 sps:$4 sm:$0xff]  }
 0x4e6   :  { %v16958_v19 = vadd.f32 %v13339_v58, %v16768_v7  ;;  %v13342_v2 = vadd.f32 %v13341_v6, %v13340_v16  ;;  %v8577_v28 = vmax.f32 %v8521_v55, 0.0  ;;  %v8585_v60 = vmax.f32 %v8529_v41, 0.0  ;;  %v14645_v56 = vld [vmem:[#allocation10 + $0x224] ss:$16 sps:$4 sm:$0xff]   ;;  %v14648_v58 = vld [vmem:[#allocation10 + $0x1cc] ss:$16 sps:$4 sm:$0xff]  }
 0x4e7   :  { %v8627_v54 = vpack.c.bf16 %v8578_v39, %v8571_v3  ;;  %v8592_v62 = vmax.f32 %v8536_v0, 0.0  ;;  %v8535_v34 = vadd.f32 %v16918_v12, %v16836_v22  ;;  %v8584_v49 = vmax.f32 %v8528_v31, 0.0  ;;  %v14640_v3 = vld [vmem:[#allocation10 + $0x1a8] ss:$16 sps:$4 sm:$0xff]   ;;  %v14643_v41 = vld [vmem:[#allocation10 + $0x220] ss:$16 sps:$4 sm:$0xff]  }
 0x4e8   :  { %v16963_v40 = vadd.f32 %v13342_v2, %v16770_v57  ;;  %v16965_v10 = vpack.c.bf16 %v8577_v28, %v8570_v59  ;;  %v8543_v7 = vadd.f32 %v8493_v8, %v16839_v13  ;;  %v8550_v16 = vadd.f32 %v8493_v8, %v16842_v26  ;;  %10315 = vmatpush1.bf16.msra.mxu0 %v14634_v5  ;;  %v14651_v59 = vld [vmem:[#allocation10 + $0x244] ss:$16 sps:$4 sm:$0xff]  }
 0x4e9   :  { %10030 = vmatprep.mubr.bf16.mxu1 %v8627_v54  ;;  %v16969_v39 = vpack.c.bf16 %v8592_v62, %v8585_v60  ;;  %v8591_v38 = vmax.f32 %v8535_v34, 0.0  ;;  %v8542_v22 = vadd.f32 %v16918_v12, %v16845_v50  ;;  %v8549_v57 = vadd.f32 %v16918_v12, %v16848_v17  ;;  %10322 = vmatprep.mubr.bf16.mxu0 %v8627_v54  ;;  %v14646_v60 = vld [vmem:[#allocation10 + $0x1c8] ss:$16 sps:$4 sm:$0xff]  }
 0x4ea   :  { %10031 = vmatmul.mubr.bf16.vlgmr.msra.gmra.mrb[112].mxu1 %v16965_v10  ;;  %v8599_v55 = vmax.f32 %v8543_v7, 0.0  ;;  %v8606_v13 = vmax.f32 %v8550_v16, 0.0  ;;  %v8557_v26 = vadd.f32 %v8493_v8, %v16851_v20  ;;  %v8564_v5 = vadd.f32 %v8493_v8, %v16854_v25  ;;  %v13359_v62 = vpop.f32.mrb[80].mxu1  ;;  %10316 = vmatprep.subr.bf16.mxu0 %v14642_v53  ;;  %v14654_v53 = vld [vmem:[#allocation10 + $0x1ec] ss:$16 sps:$4 sm:$0xff]  }
 0x4eb   :  { %10072 = vmatpush1.bf16.msra.mxu1 %v14637_v47  ;;  %10040 = vmatprep.mubr.bf16.mxu1 %v16969_v39  ;;  %v16979_v0 = vpack.c.bf16 %v8591_v38, %v8584_v49  ;;  %v8598_v50 = vmax.f32 %v8542_v22, 0.0  ;;  %v8605_v6 = vmax.f32 %v8549_v57, 0.0  ;;  %v8556_v54 = vadd.f32 %v16918_v12, %v16857_v42  ;;  %v13360_v17 = vpop.f32.mrb[81].mxu1  ;;  %v14649_v38 = vld [vmem:[#allocation10 + $0x240] ss:$16 sps:$4 sm:$0xff]  }
 0x4ec   :  { %10073 = vmatprep.subr.bf16.mxu1 %v14645_v56  ;;  %v16983_v31 = vpack.c.bf16 %v8606_v13, %v8599_v55  ;;  %v8613_v20 = vmax.f32 %v8557_v26, 0.0  ;;  %v8620_v25 = vmax.f32 %v8564_v5, 0.0  ;;  %v8563_v8 = vadd.f32 %v16918_v12, %v16860_v14  ;;  %v13362_v28 = vpop.f32.mrb[82].mxu1  ;;  %10317 = vmatpush1.bf16.msra.mxu0 %v14640_v3  ;;  %v14657_v57 = vld [vmem:[#allocation10 + $0x264] ss:$16 sps:$4 sm:$0xff]  }
 0x4ed   :  { %v13361_v2 = vadd.f32 %v13360_v17, %v13359_v62  ;;  %v16987_v47 = vpack.c.bf16 %v8605_v6, %v8598_v50  ;;  %v8612_v34 = vmax.f32 %v8556_v54, 0.0  ;;  %v8517_v42 = vadd.f32 %v16925_v27, %v16864_v11  ;;  %v13363_v49 = vpop.f32.mrb[83].mxu1  ;;  %10318 = vmatprep.subr.bf16.mxu0 %v14648_v58  ;;  %v14660_v62 = vld [vmem:[#allocation10 + $0x20c] ss:$16 sps:$4 sm:$0xff]  }
 0x4ee   :  { %v16991_v56 = vpack.c.bf16 %v8620_v25, %v8613_v20  ;;  %v8619_v7 = vmax.f32 %v8563_v8, 0.0  ;;  %v8524_v16 = vadd.f32 %v16925_v27, %v16868_v35  ;;  %v8516_v14 = vadd.f32 %v16922_v9, %v16872_v15  ;;  %v14663_v25 = vld [vmem:[#allocation10 + $0x284] ss:$16 sps:$4 sm:$0xff]  }
 0x4ef   :  { %v16998_v12 = vadd.f32 %v13361_v2, %v16779_v36  ;;  %v13364_v3 = vadd.f32 %v13363_v49, %v13362_v28  ;;  %10074 = vmatpush1.bf16.msra.mxu1 %v14643_v41  ;;  %v8573_v22 = vmax.f32 %v8517_v42, 0.0  ;;  %v8523_v11 = vadd.f32 %v16922_v9, %v16877_v63  ;;  %v14652_v36 = vld [vmem:[#allocation10 + $0x1e8] ss:$16 sps:$4 sm:$0xff]  }
 0x4f0   :  { %10075 = vmatprep.subr.bf16.mxu1 %v14651_v59  ;;  %v17002_v58 = vpack.c.bf16 %v8619_v7, %v8612_v34  ;;  %v8580_v55 = vmax.f32 %v8524_v16, 0.0  ;;  %v8572_v13 = vmax.f32 %v8516_v14, 0.0  ;;  %v8531_v35 = vadd.f32 %v16925_v27, %v16881_v21  ;;  %10319 = vmatpush1.bf16.msra.mxu0 %v14646_v60  ;;  %v14658_v34 = vld [vmem:[#allocation10 + $0x208] ss:$16 sps:$4 sm:$0xff]   ;;  %v14666_v7 = vld [vmem:[#allocation10 + $0x22c] ss:$16 sps:$4 sm:$0xff]  }
 0x4f1   :  { %v17007_v15 = vadd.f32 %v13364_v3, %v16783_v37  ;;  %v8579_v26 = vmax.f32 %v8523_v11, 0.0  ;;  %v8538_v5 = vadd.f32 %v16925_v27, %v16885_v30  ;;  %v8530_v63 = vadd.f32 %v16922_v9, %v16892_v29  ;;  %10320 = vmatprep.subr.bf16.mxu0 %v14654_v53  ;;  %v14655_v30 = vld [vmem:[#allocation10 + $0x260] ss:$16 sps:$4 sm:$0xff]  }
 0x4f2   :  { %10041 = vmatmul.mubr.bf16.gmra.mrb[116].mxu1 %v16979_v0  ;;  %v17014_v41 = vpack.c.bf16 %v8580_v55, %v8573_v22  ;;  %v8587_v50 = vmax.f32 %v8531_v35, 0.0  ;;  %v8537_v37 = vadd.f32 %v16922_v9, %v16896_v18  ;;  %v8545_v21 = vadd.f32 %v16925_v27, %v16907_v43  ;;  %v13365_v6 = vpop.f32.mrb[84].mxu1  ;;  %v14661_v22 = vld [vmem:[#allocation10 + $0x280] ss:$16 sps:$4 sm:$0xff]  }
 0x4f3   :  { %10076 = vmatpush1.bf16.msra.mxu1 %v14649_v38  ;;  %10050 = vmatprep.mubr.bf16.mxu1 %v16983_v31  ;;  %v17021_v54 = vpack.c.bf16 %v8579_v26, %v8572_v13  ;;  %v8594_v29 = vmax.f32 %v8538_v5, 0.0  ;;  %v8586_v17 = vmax.f32 %v8530_v63, 0.0  ;;  %v8552_v59 = vadd.f32 %v16925_v27, %v16911_v23  ;;  %v13366_v20 = vpop.f32.mrb[85].mxu1  ;;  %v14664_v13 = vld [vmem:[#allocation10 + $0x228] ss:$16 sps:$4 sm:$0xff]  }
 0x4f4   :  { %10077 = vmatprep.subr.bf16.mxu1 %v14657_v57  ;;  %v8593_v8 = vmax.f32 %v8537_v37, 0.0  ;;  %v8601_v18 = vmax.f32 %v8545_v21, 0.0  ;;  %v8544_v43 = vadd.f32 %v16922_v9, %v16915_v52  ;;  %v8551_v2 = vadd.f32 %v16922_v9, %v16929_v33  ;;  %v13368_v60 = vpop.f32.mrb[86].mxu1  ;;  %10321 = vmatpush1.bf16.msra.mxu0 %v14652_v36  ;;  %v14678_v37 = vld [vmem:[#allocation10 + $0x26c] ss:$16 sps:$4 sm:$0xff]  }
 0x4f5   :  { %v13367_v28 = vadd.f32 %v13366_v20, %v13365_v6  ;;  %v17029_v42 = vpack.c.bf16 %v8594_v29, %v8587_v50  ;;  %v8608_v49 = vmax.f32 %v8552_v59, 0.0  ;;  %v8559_v23 = vadd.f32 %v16925_v27, %v16933_v46  ;;  %v13369_v53 = vpop.f32.mrb[87].mxu1  ;;  %10363 = vmatprep.subr.bf16.mxu0 %v14660_v62  ;;  %v14669_v27 = vld [vmem:[#allocation10 + $0x2a4] ss:$16 sps:$4 sm:$0xff]   ;;  %v14670_v62 = vld [vmem:[#allocation10 + $0x248] ss:$16 sps:$4 sm:$0xff]  }
 0x4f6   :  { %v17033_v16 = vpack.c.bf16 %v8593_v8, %v8586_v17  ;;  %v8600_v14 = vmax.f32 %v8544_v43, 0.0  ;;  %v8607_v52 = vmax.f32 %v8551_v2, 0.0  ;;  %v8622_v3 = vmax.f32 %v16945_v48, 0.0  ;;  %v14681_v29 = vld [vmem:[#allocation10 + $0x2e4] ss:$16 sps:$4 sm:$0xff]  }
 0x4f7   :  { %v17037_v33 = vadd.f32 %v13367_v28, %v16815_v1  ;;  %v13370_v38 = vadd.f32 %v13369_v53, %v13368_v60  ;;  %10078 = vmatpush1.bf16.msra.mxu1 %v14655_v30  ;;  %v17039_v11 = vpack.c.bf16 %v8608_v49, %v8601_v18  ;;  %v8615_v57 = vmax.f32 %v8559_v23, 0.0  ;;  %10323 = vmatmul.mubr.bf16.vlgmr.msra.gmra.mrb[64].mxu0 %v16965_v10  ;;  %v14672_v10 = vld [vmem:[#allocation10 + $0x24c] ss:$16 sps:$4 sm:$0xff]   ;;  %v14673_v30 = vld [vmem:[#allocation10 + $0x2c0] ss:$16 sps:$4 sm:$0xff]  }
 0x4f8   :  { %10079 = vmatprep.subr.bf16.mxu1 %v14663_v25  ;;  %v17042_v46 = vpack.c.bf16 %v8607_v52, %v8600_v14  ;;  %v8558_v55 = vadd.f32 %v16922_v9, %v16937_v24  ;;  %v8565_v48 = vadd.f32 %v16922_v9, %v16941_v61  ;;  %10332 = vmatprep.mubr.bf16.mxu0 %v16969_v39  ;;  %v14667_v9 = vld [vmem:[#allocation10 + $0x2a0] ss:$16 sps:$4 sm:$0xff]   ;;  %v14676_v59 = vld [vmem:[#allocation10 + $0x268] ss:$16 sps:$4 sm:$0xff]   ;;  %v14684_v20 = vld [vmem:[#allocation10 + $0x28c] ss:$16 sps:$4 sm:$0xff]  }
 0x4f9   :  { %v17049_v1 = vadd.f32 %v13370_v38, %v16821_v51  ;;  %10364 = vmatpush1.bf16.msra.mxu0 %v14658_v34  ;;  %v17052_v35 = vpack.c.bf16 %v8622_v3, %v8615_v57  ;;  %v14675_v51 = vld [vmem:[#allocation10 + $0x2c4] ss:$16 sps:$4 sm:$0xff]   ;;  %v14679_v25 = vld [vmem:[#allocation10 + $0x2e0] ss:$16 sps:$4 sm:$0xff]   ;;  %v14688_v53 = vld [vmem:[#allocation10 + $0x2a8] ss:$16 sps:$4 sm:$0xff]  }
 0x4fa   :  { %10051 = vmatmul.mubr.bf16.gmra.mrb[120].mxu1 %v16987_v47  ;;  %10365 = vmatprep.subr.bf16.mxu0 %v14666_v7  ;;  %v8614_v36 = vmax.f32 %v8558_v55, 0.0  ;;  %v8621_v26 = vmax.f32 %v8565_v48, 0.0  ;;  %v13371_v5 = vpop.f32.mrb[88].mxu1  ;;  %v14685_v34 = vld [vmem:[#allocation10 + $0x300] ss:$16 sps:$4 sm:$0xff]  }
 0x4fb   :  { %10080 = vmatpush1.bf16.msra.mxu1 %v14661_v22  ;;  %10060 = vmatprep.mubr.bf16.mxu1 %v16991_v56  ;;  %v13372_v24 = vpop.f32.mrb[89].mxu1  ;;  %v14693_v49 = vld [vmem:[#allocation10 + $0x324] ss:$16 sps:$4 sm:$0xff]   ;;  %v14696_v7 = vld [vmem:[#allocation10 + $0x2cc] ss:$16 sps:$4 sm:$0xff]  }
 0x4fc   :  { %10081 = vmatprep.subr.bf16.mxu1 %v14669_v27  ;;  %v17056_v61 = vpack.c.bf16 %v8621_v26, %v8614_v36  ;;  %v13373_v39 = vadd.f32 %v13372_v24, %v13371_v5  ;;  %v13374_v63 = vpop.f32.mrb[90].mxu1  ;;  %v14699_v3 = vld [vmem:[#allocation10 + $0x344] ss:$16 sps:$4 sm:$0xff]   ;;  %v14697_v55 = vld [vmem:[#allocation10 + $0x340] ss:$16 sps:$4 sm:$0xff]  }
 0x4fd   :  { %10366 = vmatpush1.bf16.msra.mxu0 %v14664_v13  ;;  %v13375_v50 = vpop.f32.mrb[91].mxu1  ;;  %v14705_v48 = vld [vmem:[#allocation10 + $0x364] ss:$16 sps:$4 sm:$0xff]   ;;  %v14708_v36 = vld [vmem:[#allocation10 + $0x30c] ss:$16 sps:$4 sm:$0xff]  }
 0x4fe   :  { %10367 = vmatprep.subr.bf16.mxu0 %v14672_v10  ;;  %v17059_v21 = vadd.f32 %v13373_v39, %v16888_v45  ;;  %v13376_v6 = vadd.f32 %v13375_v50, %v13374_v63  ;;  %v14700_v10 = vld [vmem:[#allocation10 + $0x2e8] ss:$16 sps:$4 sm:$0xff]   ;;  %v14717_v50 = vld [vmem:[#allocation10 + $0x3a4] ss:$16 sps:$4 sm:$0xff]  }
 0x4ff   :  { %10082 = vmatpush1.bf16.msra.mxu1 %v14667_v9  ;;  %10333 = vmatmul.mubr.bf16.gmra.mrb[68].mxu0 %v16979_v0  ;;  %v14687_v0 = vld [vmem:[#allocation10 + $0x304] ss:$16 sps:$4 sm:$0xff]  }
 0x500   :  { %10083 = vmatprep.subr.bf16.mxu1 %v14675_v51  ;;  %v17063_v17 = vadd.f32 %v13376_v6, %v16903_v4  ;;  %10342 = vmatprep.mubr.bf16.mxu0 %v16983_v31  ;;  %v14682_v4 = vld [vmem:[#allocation10 + $0x288] ss:$16 sps:$4 sm:$0xff]   ;;  %v14690_v31 = vld [vmem:[#allocation10 + $0x2ac] ss:$16 sps:$4 sm:$0xff]   ;;  %v14711_v9 = vld [vmem:[#allocation10 + $0x384] ss:$16 sps:$4 sm:$0xff]  }
 0x501   :  { %10368 = vmatpush1.bf16.msra.mxu0 %v14670_v62  ;;  %v14709_v62 = vld [vmem:[#allocation10 + $0x380] ss:$16 sps:$4 sm:$0xff]   ;;  %v14712_v6 = vld [vmem:[#allocation10 + $0x328] ss:$16 sps:$4 sm:$0xff]  }
 0x502   :  { %10061 = vmatmul.mubr.bf16.gmra.mrb[124].mxu1 %v17002_v58  ;;  %10369 = vmatprep.subr.bf16.mxu0 %v14678_v37  ;;  %v13377_v45 = vpop.f32.mrb[92].mxu1 }
 0x503   :  { %10084 = vmatpush1.bf16.msra.mxu1 %v14673_v30  ;;  %10103 = vmatprep.mubr.bf16.mxu1 %v17014_v41  ;;  %v13378_v8 = vpop.f32.mrb[93].mxu1  ;;  %v14720_v30 = vld [vmem:[#allocation10 + $0x34c] ss:$16 sps:$4 sm:$0xff]  }
 0x504   :  { %10085 = vmatprep.subr.bf16.mxu1 %v14681_v29  ;;  %v13379_v18 = vadd.f32 %v13378_v8, %v13377_v45  ;;  %v13380_v43 = vpop.f32.mrb[94].mxu1  ;;  %v14723_v45 = vld [vmem:[#allocation10 + $0x3c4] ss:$16 sps:$4 sm:$0xff]   ;;  %v14718_v8 = vld [vmem:[#allocation10 + $0x348] ss:$16 sps:$4 sm:$0xff]  }
 0x505   :  { %10370 = vmatpush1.bf16.msra.mxu0 %v14676_v59  ;;  %v13381_v2 = vpop.f32.mrb[95].mxu1  ;;  %v14715_v59 = vld [vmem:[#allocation10 + $0x3a0] ss:$16 sps:$4 sm:$0xff]  }
 0x506   :  { %10371 = vmatprep.subr.bf16.mxu0 %v14684_v20  ;;  %v17069_v28 = vadd.f32 %v13379_v18, %v16958_v19  ;;  %v13382_v60 = vadd.f32 %v13381_v2, %v13380_v43  ;;  %v14691_v19 = vld [vmem:[#allocation10 + $0x320] ss:$16 sps:$4 sm:$0xff]   ;;  %v14726_v18 = vld [vmem:[#allocation10 + $0x36c] ss:$16 sps:$4 sm:$0xff]   ;;  %v14729_v2 = vld [vmem:[#allocation10 + $0x3e4] ss:$16 sps:$4 sm:$0xff]  }
 0x507   :  { %10086 = vmatpush1.bf16.msra.mxu1 %v14679_v25  ;;  %10343 = vmatmul.mubr.bf16.gmra.mrb[72].mxu0 %v16987_v47  ;;  %v14694_v47 = vld [vmem:[#allocation10 + $0x2c8] ss:$16 sps:$4 sm:$0xff]  }
 0x508   :  { %10087 = vmatprep.subr.bf16.mxu1 %v14687_v0  ;;  %v17073_v23 = vadd.f32 %v13382_v60, %v16963_v40  ;;  %10352 = vmatprep.mubr.bf16.mxu0 %v16991_v56  ;;  %v14702_v40 = vld [vmem:[#allocation10 + $0x2ec] ss:$16 sps:$4 sm:$0xff]   ;;  %v14724_v60 = vld [vmem:[#allocation10 + $0x368] ss:$16 sps:$4 sm:$0xff]  }
 0x509   :  { %10372 = vmatpush1.bf16.msra.mxu0 %v14682_v4  ;;  %v14721_v4 = vld [vmem:[#allocation10 + $0x3c0] ss:$16 sps:$4 sm:$0xff]  }
 0x50a   :  { %10373 = vmatprep.subr.bf16.mxu0 %v14690_v31  ;;  %v13399_v14 = vpop.f32.mrb[96].mxu1 }
 0x50b   :  { %10088 = vmatpush1.bf16.msra.mxu1 %v14685_v34  ;;  %v13400_v52 = vpop.f32.mrb[97].mxu1  ;;  %v14732_v34 = vld [vmem:[#allocation10 + $0x38c] ss:$16 sps:$4 sm:$0xff]  }
 0x50c   :  { %10089 = vmatprep.subr.bf16.mxu1 %v14693_v49  ;;  %v13401_v38 = vadd.f32 %v13400_v52, %v13399_v14  ;;  %v13402_v22 = vpop.f32.mrb[98].mxu1 }
 0x50d   :  { %10374 = vmatpush1.bf16.msra.mxu0 %v14688_v53  ;;  %v13403_v57 = vpop.f32.mrb[99].mxu1  ;;  %v14727_v53 = vld [vmem:[#allocation10 + $0x3e0] ss:$16 sps:$4 sm:$0xff]  }
 0x50e   :  { %10375 = vmatprep.subr.bf16.mxu0 %v14696_v7  ;;  %v17077_v27 = vadd.f32 %v13401_v38, %v16998_v12  ;;  %v13404_v56 = vadd.f32 %v13403_v57, %v13402_v22  ;;  %v14703_v12 = vld [vmem:[#allocation10 + $0x360] ss:$16 sps:$4 sm:$0xff]   ;;  %v14738_v57 = vld [vmem:[#allocation10 + $0x3cc] ss:$16 sps:$4 sm:$0xff]  }
 0x50f   :  { %10090 = vmatpush1.bf16.msra.mxu1 %v14691_v19  ;;  %10353 = vmatmul.mubr.bf16.gmra.mrb[76].mxu0 %v17002_v58  ;;  %v14706_v58 = vld [vmem:[#allocation10 + $0x308] ss:$16 sps:$4 sm:$0xff]  }
 0x510   :  { %10091 = vmatprep.subr.bf16.mxu1 %v14699_v3  ;;  %v17081_v13 = vadd.f32 %v13404_v56, %v17007_v15  ;;  %10395 = vmatprep.mubr.bf16.mxu0 %v17014_v41  ;;  %v14714_v15 = vld [vmem:[#allocation10 + $0x32c] ss:$16 sps:$4 sm:$0xff]   ;;  %v14730_v19 = vld [vmem:[#allocation10 + $0x388] ss:$16 sps:$4 sm:$0xff]  }
 0x511   :  { %10376 = vmatpush1.bf16.msra.mxu0 %v14694_v47  ;;  %v14735_v3 = vld [vmem:[#allocation10 + $0x3ac] ss:$16 sps:$4 sm:$0xff]   ;;  %v14733_v47 = vld [vmem:[#allocation10 + $0x3a8] ss:$16 sps:$4 sm:$0xff]  }
 0x512   :  { %10377 = vmatprep.subr.bf16.mxu0 %v14702_v40  ;;  %v13405_v26 = vpop.f32.mrb[100].mxu1  ;;  %v14736_v40 = vld [vmem:[#allocation10 + $0x3c8] ss:$16 sps:$4 sm:$0xff]   ;;  %v14741_v56 = vld [vmem:[#allocation10 + $0x3ec] ss:$16 sps:$4 sm:$0xff]  }
 0x513   :  { %10092 = vmatpush1.bf16.msra.mxu1 %v14697_v55  ;;  %v13406_v5 = vpop.f32.mrb[101].mxu1  ;;  %v14747_v55 = vld [vmem:[#allocation10 + $0x40c] ss:$16 sps:$4 sm:$0xff]  }
 0x514   :  { %10093 = vmatprep.subr.bf16.mxu1 %v14705_v48  ;;  %v13407_v24 = vadd.f32 %v13406_v5, %v13405_v26  ;;  %v13408_v51 = vpop.f32.mrb[102].mxu1  ;;  %v14742_v48 = vld [vmem:[#allocation10 + $0x400] ss:$16 sps:$4 sm:$0xff]   ;;  %v14751_v26 = vld [vmem:[#allocation10 + $0x428] ss:$16 sps:$4 sm:$0xff]  }
 0x515   :  { %10378 = vmatpush1.bf16.msra.mxu0 %v14700_v10  ;;  %v13409_v39 = vpop.f32.mrb[103].mxu1  ;;  %v14745_v10 = vld [vmem:[#allocation10 + $0x408] ss:$16 sps:$4 sm:$0xff]   ;;  %v14759_v5 = vld [vmem:[#allocation10 + $0x44c] ss:$16 sps:$4 sm:$0xff]  }
 0x516   :  { %10379 = vmatprep.subr.bf16.mxu0 %v14708_v36  ;;  %v17085_v63 = vadd.f32 %v13407_v24, %v17037_v33  ;;  %v13410_v41 = vadd.f32 %v13409_v39, %v13408_v51  ;;  %v14750_v36 = vld [vmem:[#allocation10 + $0x424] ss:$16 sps:$4 sm:$0xff]   ;;  %v14757_v24 = vld [vmem:[#allocation10 + $0x448] ss:$16 sps:$4 sm:$0xff]   ;;  %v14760_v51 = vld [vmem:[#allocation10 + $0x460] ss:$16 sps:$4 sm:$0xff]  }
 0x517   :  { %10094 = vmatpush1.bf16.msra.mxu1 %v14703_v12  ;;  %v14756_v12 = vld [vmem:[#allocation10 + $0x444] ss:$16 sps:$4 sm:$0xff]  }
 0x518   :  { %10095 = vmatprep.subr.bf16.mxu1 %v14711_v9  ;;  %v17088_v37 = vadd.f32 %v13410_v41, %v17049_v1  ;;  %v14754_v9 = vld [vmem:[#allocation10 + $0x440] ss:$16 sps:$4 sm:$0xff]   ;;  %v14768_v39 = vld [vmem:[#allocation10 + $0x484] ss:$16 sps:$4 sm:$0xff]  }
 0x519   :  { %10380 = vmatpush1.bf16.msra.mxu0 %v14706_v58  ;;  %v14763_v58 = vld [vmem:[#allocation10 + $0x468] ss:$16 sps:$4 sm:$0xff]   ;;  %v14766_v41 = vld [vmem:[#allocation10 + $0x480] ss:$16 sps:$4 sm:$0xff]  }
 0x51a   :  { %10381 = vmatprep.subr.bf16.mxu0 %v14714_v15  ;;  %v13411_v29 = vpop.f32.mrb[104].mxu1  ;;  %v14771_v15 = vld [vmem:[#allocation10 + $0x48c] ss:$16 sps:$4 sm:$0xff]  }
 0x51b   :  { %10096 = vmatpush1.bf16.msra.mxu1 %v14709_v62  ;;  %v13412_v20 = vpop.f32.mrb[105].mxu1  ;;  %v14769_v62 = vld [vmem:[#allocation10 + $0x488] ss:$16 sps:$4 sm:$0xff]  }
 0x51c   :  { %10097 = vmatprep.subr.bf16.mxu1 %v14717_v50  ;;  %v13413_v33 = vadd.f32 %v13412_v20, %v13411_v29  ;;  %v13414_v25 = vpop.f32.mrb[106].mxu1  ;;  %v14772_v50 = vld [vmem:[#allocation10 + $0x4a0] ss:$16 sps:$4 sm:$0xff]   ;;  %v14783_v29 = vld [vmem:[#allocation10 + $0x4cc] ss:$16 sps:$4 sm:$0xff]  }
 0x51d   :  { %10382 = vmatpush1.bf16.msra.mxu0 %v14712_v6  ;;  %v13415_v0 = vpop.f32.mrb[107].mxu1  ;;  %v14775_v6 = vld [vmem:[#allocation10 + $0x4a8] ss:$16 sps:$4 sm:$0xff]  }
 0x51e   :  { %10383 = vmatprep.subr.bf16.mxu0 %v14720_v30  ;;  %v17091_v1 = vadd.f32 %v13413_v33, %v17059_v21  ;;  %v13416_v43 = vadd.f32 %v13415_v0, %v13414_v25  ;;  %v14780_v30 = vld [vmem:[#allocation10 + $0x4c4] ss:$16 sps:$4 sm:$0xff]   ;;  %v14781_v20 = vld [vmem:[#allocation10 + $0x4c8] ss:$16 sps:$4 sm:$0xff]   ;;  %v14784_v33 = vld [vmem:[#allocation10 + $0x4e0] ss:$16 sps:$4 sm:$0xff]  }
 0x51f   :  { %10098 = vmatpush1.bf16.msra.mxu1 %v14715_v59  ;;  %v14778_v59 = vld [vmem:[#allocation10 + $0x4c0] ss:$16 sps:$4 sm:$0xff]   ;;  %v14787_v25 = vld [vmem:[#allocation10 + $0x4e8] ss:$16 sps:$4 sm:$0xff]   ;;  %v14795_v0 = vld [vmem:[#allocation10 + $0x50c] ss:$16 sps:$4 sm:$0xff]  }
 0x520   :  { %10099 = vmatprep.subr.bf16.mxu1 %v14723_v45  ;;  %v17094_v31 = vadd.f32 %v13416_v43, %v17063_v17  ;;  %v14786_v45 = vld [vmem:[#allocation10 + $0x4e4] ss:$16 sps:$4 sm:$0xff]   ;;  %v14793_v43 = vld [vmem:[#allocation10 + $0x508] ss:$16 sps:$4 sm:$0xff]  }
 0x521   :  { %10384 = vmatpush1.bf16.msra.mxu0 %v14718_v8  ;;  %v14792_v8 = vld [vmem:[#allocation10 + $0x504] ss:$16 sps:$4 sm:$0xff]  }
 0x522   :  { %10385 = vmatprep.subr.bf16.mxu0 %v14726_v18  ;;  %v13417_v49 = vpop.f32.mrb[108].mxu1  ;;  %v14790_v18 = vld [vmem:[#allocation10 + $0x500] ss:$16 sps:$4 sm:$0xff]  }
 0x523   :  { %10100 = vmatpush1.bf16.msra.mxu1 %v14721_v4  ;;  %v13418_v7 = vpop.f32.mrb[109].mxu1  ;;  %v14798_v4 = vld [vmem:[#allocation10 + $0x524] ss:$16 sps:$4 sm:$0xff]  }
 0x524   :  { %10101 = vmatprep.subr.bf16.mxu1 %v14729_v2  ;;  %v13419_v14 = vadd.f32 %v13418_v7, %v13417_v49  ;;  %v13420_v21 = vpop.f32.mrb[110].mxu1  ;;  %v14801_v2 = vld [vmem:[#allocation10 + $0x52c] ss:$16 sps:$4 sm:$0xff]   ;;  %v14802_v49 = vld [vmem:[#allocation10 + $0x540] ss:$16 sps:$4 sm:$0xff]  }
 0x525   :  { %10386 = vmatpush1.bf16.msra.mxu0 %v14724_v60  ;;  %v13421_v52 = vpop.f32.mrb[111].mxu1  ;;  %v14796_v60 = vld [vmem:[#allocation10 + $0x520] ss:$16 sps:$4 sm:$0xff]   ;;  %v14805_v7 = vld [vmem:[#allocation10 + $0x548] ss:$16 sps:$4 sm:$0xff]  }
 0x526   :  { %10387 = vmatprep.subr.bf16.mxu0 %v14732_v34  ;;  %v17097_v38 = vadd.f32 %v13419_v14, %v17069_v28  ;;  %v13422_v17 = vadd.f32 %v13421_v52, %v13420_v21  ;;  %v14739_v28 = vld [vmem:[#allocation10 + $0x3e8] ss:$16 sps:$4 sm:$0xff]   ;;  %v14807_v14 = vld [vmem:[#allocation10 + $0x54c] ss:$16 sps:$4 sm:$0xff]   ;;  %v14810_v21 = vld [vmem:[#allocation10 + $0x564] ss:$16 sps:$4 sm:$0xff]  }
 0x527   :  { %10102 = vmatpush1.bf16.msra.mxu1 %v14727_v53  ;;  %v14799_v34 = vld [vmem:[#allocation10 + $0x528] ss:$16 sps:$4 sm:$0xff]   ;;  %v14804_v53 = vld [vmem:[#allocation10 + $0x544] ss:$16 sps:$4 sm:$0xff]   ;;  %v14808_v52 = vld [vmem:[#allocation10 + $0x560] ss:$16 sps:$4 sm:$0xff]  }
 0x528   :  { %v17100_v22 = vadd.f32 %v13422_v17, %v17073_v23  ;;  %v14744_v23 = vld [vmem:[#allocation10 + $0x404] ss:$16 sps:$4 sm:$0xff]  }
 0x529   :  { %10388 = vmatpush1.bf16.msra.mxu0 %v14730_v19  ;;  %10144 = vmatprep.subr.bf16.mxu1 %v14744_v23  ;;  %v14813_v19 = vld [vmem:[#allocation10 + $0x56c] ss:$16 sps:$4 sm:$0xff]   ;;  %v14816_v17 = vld [vmem:[#allocation10 + $0x584] ss:$16 sps:$4 sm:$0xff]   ;;  %v14820_v23 = vld [vmem:[#allocation10 + $0x5a0] ss:$16 sps:$4 sm:$0xff]  }
 0x52a   :  { %10104 = vmatmul.mubr.bf16.vlgmr.msra.gmra.mrb[112].mxu1 %v17021_v54  ;;  %10389 = vmatprep.subr.bf16.mxu0 %v14735_v3  ;;  %v14811_v3 = vld [vmem:[#allocation10 + $0x568] ss:$16 sps:$4 sm:$0xff]  }
 0x52b   :  { %10113 = vmatprep.mubr.bf16.mxu1 %v17029_v42  ;;  %10145 = vmatpush1.bf16.msra.mxu1 %v14742_v48  ;;  %v14828_v48 = vld [vmem:[#allocation10 + $0x5c4] ss:$16 sps:$4 sm:$0xff]  }
 0x52c   :  { %10146 = vmatprep.subr.bf16.mxu1 %v14750_v36  ;;  %v14826_v36 = vld [vmem:[#allocation10 + $0x5c0] ss:$16 sps:$4 sm:$0xff]  }
 0x52d   :  { %10390 = vmatpush1.bf16.msra.mxu0 %v14733_v47  ;;  %v14819_v47 = vld [vmem:[#allocation10 + $0x58c] ss:$16 sps:$4 sm:$0xff]  }
 0x52e   :  { %10391 = vmatprep.subr.bf16.mxu0 %v14738_v57  ;;  %v14814_v57 = vld [vmem:[#allocation10 + $0x580] ss:$16 sps:$4 sm:$0xff]  }
 0x531   :  { %10392 = vmatpush1.bf16.msra.mxu0 %v14736_v40  ;;  %v14817_v40 = vld [vmem:[#allocation10 + $0x588] ss:$16 sps:$4 sm:$0xff]  }
 0x532   :  { %10114 = vmatmul.mubr.bf16.gmra.mrb[116].mxu1 %v17033_v16  ;;  %10393 = vmatprep.subr.bf16.mxu0 %v14741_v56  ;;  %v14822_v56 = vld [vmem:[#allocation10 + $0x5a4] ss:$16 sps:$4 sm:$0xff]  }
 0x533   :  { %10123 = vmatprep.mubr.bf16.mxu1 %v17039_v11 }
 0x535   :  { %10394 = vmatpush1.bf16.msra.mxu0 %v14739_v28  ;;  %v14825_v28 = vld [vmem:[#allocation10 + $0x5ac] ss:$16 sps:$4 sm:$0xff]  }
 0x536   :  { %10436 = vmatprep.subr.bf16.mxu0 %v14747_v55  ;;  %v14823_v55 = vld [vmem:[#allocation10 + $0x5a8] ss:$16 sps:$4 sm:$0xff]  }
 0x538   :  { %10396 = vmatmul.mubr.bf16.vlgmr.msra.gmra.mrb[64].mxu0 %v17021_v54  ;;  %v14753_v54 = vld [vmem:[#allocation10 + $0x42c] ss:$16 sps:$4 sm:$0xff]  }
 0x539   :  { %10405 = vmatprep.mubr.bf16.mxu0 %v17029_v42  ;;  %10437 = vmatpush1.bf16.msra.mxu0 %v14745_v10  ;;  %v14748_v42 = vld [vmem:[#allocation10 + $0x420] ss:$16 sps:$4 sm:$0xff]   ;;  %v14831_v10 = vld [vmem:[#allocation10 + $0x5cc] ss:$16 sps:$4 sm:$0xff]  }
 0x53a   :  { %10124 = vmatmul.mubr.bf16.gmra.mrb[120].mxu1 %v17042_v46  ;;  %10438 = vmatprep.subr.bf16.mxu0 %v14753_v54  ;;  %v14829_v54 = vld [vmem:[#allocation10 + $0x5c8] ss:$16 sps:$4 sm:$0xff]  }
 0x53b   :  { %10133 = vmatprep.mubr.bf16.mxu1 %v17052_v35  ;;  %10147 = vmatpush1.bf16.msra.mxu1 %v14748_v42  ;;  %v14834_v42 = vld [vmem:[#allocation10 + $0x5e4] ss:$16 sps:$4 sm:$0xff]  }
 0x53c   :  { %10148 = vmatprep.subr.bf16.mxu1 %v14756_v12  ;;  %v14832_v12 = vld [vmem:[#allocation10 + $0x5e0] ss:$16 sps:$4 sm:$0xff]  }
 0x53d   :  { %10439 = vmatpush1.bf16.msra.mxu0 %v14751_v26  ;;  %v14837_v26 = vld [vmem:[#allocation10 + $0x5ec] ss:$16 sps:$4 sm:$0xff]  }
 0x53e   :  { %10440 = vmatprep.subr.bf16.mxu0 %v14759_v5  ;;  %v14835_v5 = vld [vmem:[#allocation10 + $0x5e8] ss:$16 sps:$4 sm:$0xff]  }
 0x53f   :  { %10149 = vmatpush1.bf16.msra.mxu1 %v14754_v9  ;;  %v14840_v9 = vld [vmem:[#allocation10 + $0x604] ss:$16 sps:$4 sm:$0xff]  }
 0x540   :  { %10406 = vmatmul.mubr.bf16.gmra.mrb[68].mxu0 %v17033_v16  ;;  %v14762_v16 = vld [vmem:[#allocation10 + $0x464] ss:$16 sps:$4 sm:$0xff]  }
 0x541   :  { %10415 = vmatprep.mubr.bf16.mxu0 %v17039_v11  ;;  %10441 = vmatpush1.bf16.msra.mxu0 %v14757_v24  ;;  %v14765_v11 = vld [vmem:[#allocation10 + $0x46c] ss:$16 sps:$4 sm:$0xff]  }
 0x542   :  { %10134 = vmatmul.mubr.bf16.gmra.mrb[124].mxu1 %v17056_v61  ;;  %10150 = vmatprep.subr.bf16.mxu1 %v14762_v16  ;;  %v14843_v24 = vld [vmem:[#allocation10 + $0x60c] ss:$16 sps:$4 sm:$0xff]   ;;  %v8022_v16 = vadd.f32 %v17081_v13, %v17077_v27 }
 0x543   :  { %10442 = vmatprep.subr.bf16.mxu0 %v14765_v11  ;;  %10151 = vmatpush1.bf16.msra.mxu1 %v14760_v51  ;;  %v8048_v11 = vmul.f32 %v17081_v13, %v17081_v13  ;;  %v8041_v51 = vmul.f32 %v17077_v27, %v17077_v27 }
 0x544   :  { %10152 = vmatprep.subr.bf16.mxu1 %v14768_v39  ;;  %v8055_v39 = vmul.f32 %v17085_v63, %v17085_v63 }
 0x545   :  { %10443 = vmatpush1.bf16.msra.mxu0 %v14763_v58  ;;  %v8023_v58 = vadd.f32 %v8022_v16, %v17085_v63 }
 0x546   :  { %10444 = vmatprep.subr.bf16.mxu0 %v14771_v15  ;;  %v8169_v15 = vadd.f32 %v8048_v11, %v8041_v51 }
 0x547   :  { %10153 = vmatpush1.bf16.msra.mxu1 %v14766_v41 }
 0x548   :  { %10416 = vmatmul.mubr.bf16.gmra.mrb[72].mxu0 %v17042_v46  ;;  %v14774_v46 = vld [vmem:[#allocation10 + $0x4a4] ss:$16 sps:$4 sm:$0xff]   ;;  %v8170_v41 = vadd.f32 %v8169_v15, %v8055_v39 }
 0x549   :  { %10425 = vmatprep.mubr.bf16.mxu0 %v17052_v35  ;;  %10445 = vmatpush1.bf16.msra.mxu0 %v14769_v62  ;;  %v14777_v35 = vld [vmem:[#allocation10 + $0x4ac] ss:$16 sps:$4 sm:$0xff]   ;;  %v8024_v62 = vadd.f32 %v8023_v58, %v17088_v37 }
 0x54a   :  { %10154 = vmatprep.subr.bf16.mxu1 %v14774_v46  ;;  %10446 = vmatprep.subr.bf16.mxu0 %v14777_v35  ;;  %v8062_v46 = vmul.f32 %v17088_v37, %v17088_v37 }
 0x54b   :  { %10155 = vmatpush1.bf16.msra.mxu1 %v14772_v50  ;;  %v8025_v35 = vadd.f32 %v8024_v62, %v17091_v1  ;;  %v8069_v50 = vmul.f32 %v17091_v1, %v17091_v1 }
 0x54c   :  { %10156 = vmatprep.subr.bf16.mxu1 %v14780_v30 }
 0x54d   :  { %10447 = vmatpush1.bf16.msra.mxu0 %v14775_v6  ;;  %v8171_v6 = vadd.f32 %v8170_v41, %v8062_v46 }
 0x54e   :  { %10448 = vmatprep.subr.bf16.mxu0 %v14783_v29  ;;  %v8026_v29 = vadd.f32 %v8025_v35, %v17094_v31 }
 0x54f   :  { %10157 = vmatpush1.bf16.msra.mxu1 %v14778_v59  ;;  %v8172_v30 = vadd.f32 %v8171_v6, %v8069_v50  ;;  %v8076_v59 = vmul.f32 %v17094_v31, %v17094_v31 }
 0x550   :  { %10426 = vmatmul.mubr.bf16.gmra.mrb[76].mxu0 %v17056_v61  ;;  %v14789_v61 = vld [vmem:[#allocation10 + $0x4ec] ss:$16 sps:$4 sm:$0xff]   ;;  %10158 = vmatprep.subr.bf16.mxu1 %v14786_v45  ;;  %v8083_v45 = vmul.f32 %v17097_v38, %v17097_v38 }
 0x551   :  { %10449 = vmatpush1.bf16.msra.mxu0 %v14781_v20  ;;  %v8027_v20 = vadd.f32 %v8026_v29, %v17097_v38 }
 0x552   :  { %10450 = vmatprep.subr.bf16.mxu0 %v14789_v61  ;;  %v8173_v61 = vadd.f32 %v8172_v30, %v8076_v59 }
 0x553   :  { %10159 = vmatpush1.bf16.msra.mxu1 %v14784_v33 }
 0x554   :  { %10160 = vmatprep.subr.bf16.mxu1 %v14792_v8  ;;  %v8174_v8 = vadd.f32 %v8173_v61, %v8083_v45 }
 0x555   :  { %10451 = vmatpush1.bf16.msra.mxu0 %v14787_v25 }
 0x556   :  { %10452 = vmatprep.subr.bf16.mxu0 %v14795_v0  ;;  %v8028_v0 = vadd.f32 %v8027_v20, %v17100_v22 }
 0x557   :  { %10161 = vmatpush1.bf16.msra.mxu1 %v14790_v18  ;;  %v8090_v18 = vmul.f32 %v17100_v22, %v17100_v22 }
 0x558   :  { %10162 = vmatprep.subr.bf16.mxu1 %v14798_v4 }
 0x559   :  { %10453 = vmatpush1.bf16.msra.mxu0 %v14793_v43 }
 0x55a   :  { %10454 = vmatprep.subr.bf16.mxu0 %v14801_v2 }
 0x55b   :  { %10163 = vmatpush1.bf16.msra.mxu1 %v14796_v60 }
 0x55c   :  { %10164 = vmatprep.subr.bf16.mxu1 %v14804_v53 }
 0x55d   :  { %10455 = vmatpush1.bf16.msra.mxu0 %v14799_v34 }
 0x55e   :  { %10456 = vmatprep.subr.bf16.mxu0 %v14807_v14 }
 0x55f   :  { %10165 = vmatpush1.bf16.msra.mxu1 %v14802_v49 }
 0x560   :  { %10166 = vmatprep.subr.bf16.mxu1 %v14810_v21  ;;  %v8029_v21 = vrot.slane %v8028_v0, 4 }
 0x561   :  { %10457 = vmatpush1.bf16.msra.mxu0 %v14805_v7 }
 0x562   :  { %10458 = vmatprep.subr.bf16.mxu0 %v14813_v19  ;;  %v8175_v19 = vadd.f32 %v8174_v8, %v8090_v18 }
 0x563   :  { %10167 = vmatpush1.bf16.msra.mxu1 %v14808_v52 }
 0x564   :  { %10168 = vmatprep.subr.bf16.mxu1 %v14816_v17 }
 0x565   :  { %10459 = vmatpush1.bf16.msra.mxu0 %v14811_v3 }
 0x566   :  { %10460 = vmatprep.subr.bf16.mxu0 %v14819_v47 }
 0x567   :  { %10169 = vmatpush1.bf16.msra.mxu1 %v14814_v57 }
 0x568   :  { %10170 = vmatprep.subr.bf16.mxu1 %v14822_v56  ;;  %v8176_v56 = vrot.slane %v8175_v19, 4 }
 0x569   :  { %10461 = vmatpush1.bf16.msra.mxu0 %v14817_v40  ;;  %v8030_v40 = vadd.f32 %v8029_v21, %v8028_v0 }
 0x56a   :  { %10462 = vmatprep.subr.bf16.mxu0 %v14825_v28 }
 0x56b   :  { %10171 = vmatpush1.bf16.msra.mxu1 %v14820_v23 }
 0x56c   :  { %10172 = vmatprep.subr.bf16.mxu1 %v14828_v48 }
 0x56d   :  { %10463 = vmatpush1.bf16.msra.mxu0 %v14823_v55 }
 0x56e   :  { %10464 = vmatprep.subr.bf16.mxu0 %v14831_v10 }
 0x56f   :  { %10173 = vmatpush1.bf16.msra.mxu1 %v14826_v36 }
 0x570   :  { %10174 = vmatprep.subr.bf16.mxu1 %v14834_v42 }
 0x571   :  { %10465 = vmatpush1.bf16.msra.mxu0 %v14829_v54 }
 0x572   :  { %10466 = vmatprep.subr.bf16.mxu0 %v14837_v26 }
 0x573   :  { %10175 = vmatpush1.bf16.msra.mxu1 %v14832_v12 }
 0x574   :  { %10217 = vmatprep.subr.bf16.mxu1 %v14840_v9  ;;  %v8031_v9 = vrot.slane %v8030_v40, 2 }
 0x575   :  { %10467 = vmatpush1.bf16.msra.mxu0 %v14835_v5 }
 0x576   :  { %10509 = vmatprep.subr.bf16.mxu0 %v14843_v24  ;;  %v8177_v24 = vadd.f32 %v8176_v56, %v8175_v19  ;;  %v8032_v15 = vadd.f32 %v8031_v9, %v8030_v40 }
 0x578   :  { %v8178_v41 = vrot.slane %v8177_v24, 2  ;;  %v8033_v8 = vrot.slane %v8032_v15, 1 }
 0x57a   :  { %v8179_v0 = vadd.f32 %v8178_v41, %v8177_v24 }
 0x58a   :  { %v17137_v33 = vpop.f32.mrb[48].mxu0 }
 0x58b   :  { %v17139_v25 = vpop.f32.mrb[49].mxu0  ;;  %v8039_v4 = vmul.f32 %v17137_v33, %v17137_v33 }
 0x58c   :  { %v17144_v43 = vpop.f32.mrb[50].mxu0  ;;  %v8040_v49 = vmul.f32 %v17139_v25, %v17139_v25 }
 0x58d   :  { %v7996_v2 = vadd.f32 %v17144_v43, %v17137_v33  ;;  %v8046_v60 = vmul.f32 %v17144_v43, %v17144_v43  ;;  %v17152_v34 = vpop.f32.mrb[51].mxu0 }
 0x58e   :  { %v8009_v53 = vadd.f32 %v17152_v34, %v17139_v25  ;;  %v8047_v7 = vmul.f32 %v17152_v34, %v17152_v34 }
 0x58f   :  { %v8143_v14 = vadd.f32 %v8046_v60, %v8039_v4 }
 0x590   :  { %v8156_v52 = vadd.f32 %v8047_v7, %v8040_v49  ;;  %v8180_v7 = vrot.slane %v8179_v0, 1 }
 0x592   :  { %v17160_v3 = vpop.f32.mrb[52].mxu0 }
 0x593   :  { %v7997_v17 = vadd.f32 %v7996_v2, %v17160_v3  ;;  %v8053_v47 = vmul.f32 %v17160_v3, %v17160_v3  ;;  %v17165_v57 = vpop.f32.mrb[53].mxu0 }
 0x594   :  { %v8010_v28 = vadd.f32 %v8009_v53, %v17165_v57  ;;  %v8054_v23 = vmul.f32 %v17165_v57, %v17165_v57  ;;  %v17170_v55 = vpop.f32.mrb[54].mxu0  ;;  %v8034_v53 = vadd.f32 %v8033_v8, %v8032_v15 }
 0x595   :  { %v8144_v48 = vadd.f32 %v8143_v14, %v8053_v47  ;;  %v7998_v10 = vadd.f32 %v7997_v17, %v17170_v55  ;;  %v8060_v36 = vmul.f32 %v17170_v55, %v17170_v55  ;;  %v17175_v54 = vpop.f32.mrb[55].mxu0 }
 0x596   :  { %v8157_v42 = vadd.f32 %v8156_v52, %v8054_v23  ;;  %v8011_v26 = vadd.f32 %v8010_v28, %v17175_v54  ;;  %v8061_v12 = vmul.f32 %v17175_v54, %v17175_v54 }
 0x597   :  { %v8145_v5 = vadd.f32 %v8144_v48, %v8060_v36  ;;  %v8181_v36 = vadd.f32 %v8180_v7, %v8179_v0 }
 0x598   :  { %v8158_v16 = vadd.f32 %v8157_v42, %v8061_v12  ;;  %v8188_v42 = vmul.f32 0.015625, %v8034_v53 }
 0x599   :  { %v8195_v15 = vmul.f32 0.015625, %v8181_v36 }
 0x59a   :  { %v17180_v11 = vpop.f32.mrb[56].mxu0  ;;  %v8202_v41 = vmul.f32 %v8188_v42, %v8188_v42 }
 0x59b   :  { %v7999_v51 = vadd.f32 %v7998_v10, %v17180_v11  ;;  %v8067_v58 = vmul.f32 %v17180_v11, %v17180_v11  ;;  %v17185_v39 = vpop.f32.mrb[57].mxu0 }
 0x59c   :  { %v8012_v62 = vadd.f32 %v8011_v26, %v17185_v39  ;;  %v8068_v46 = vmul.f32 %v17185_v39, %v17185_v39  ;;  %v17190_v35 = vpop.f32.mrb[58].mxu0 }
 0x59d   :  { %v8146_v50 = vadd.f32 %v8145_v5, %v8067_v58  ;;  %v8000_v6 = vadd.f32 %v7999_v51, %v17190_v35  ;;  %v8074_v30 = vmul.f32 %v17190_v35, %v17190_v35  ;;  %v17195_v29 = vpop.f32.mrb[59].mxu0 }
 0x59e   :  { %v8159_v59 = vadd.f32 %v8158_v16, %v8068_v46  ;;  %v8013_v20 = vadd.f32 %v8012_v62, %v17195_v29  ;;  %v8075_v45 = vmul.f32 %v17195_v29, %v17195_v29 }
 0x59f   :  { %v8147_v61 = vadd.f32 %v8146_v50, %v8074_v30 }
 0x5a0   :  { %v8160_v18 = vadd.f32 %v8159_v59, %v8075_v45 }
 0x5a2   :  { %v17200_v4 = vpop.f32.mrb[60].mxu0 }
 0x5a3   :  { %v8001_v2 = vadd.f32 %v8000_v6, %v17200_v4  ;;  %v8081_v60 = vmul.f32 %v17200_v4, %v17200_v4  ;;  %v17205_v49 = vpop.f32.mrb[61].mxu0 }
 0x5a4   :  { %v8014_v14 = vadd.f32 %v8013_v20, %v17205_v49  ;;  %v8082_v21 = vmul.f32 %v17205_v49, %v17205_v49  ;;  %v17210_v19 = vpop.f32.mrb[62].mxu0 }
 0x5a5   :  { %v8148_v52 = vadd.f32 %v8147_v61, %v8081_v60  ;;  %v8002_v17 = vadd.f32 %v8001_v2, %v17210_v19  ;;  %v8088_v47 = vmul.f32 %v17210_v19, %v17210_v19  ;;  %v17215_v40 = vpop.f32.mrb[63].mxu0  ;;  %v8209_v61 = vsub.f32 %v8195_v15, %v8202_v41 }
 0x5a6   :  { %v8161_v56 = vadd.f32 %v8160_v18, %v8082_v21  ;;  %v8015_v28 = vadd.f32 %v8014_v14, %v17215_v40  ;;  %v8089_v23 = vmul.f32 %v17215_v40, %v17215_v40 }
 0x5a7   :  { %v8003_v48 = vrot.slane %v8002_v17, 4  ;;  %v8149_v10 = vadd.f32 %v8148_v52, %v8088_v47  ;;  %v8216_v21 = vmax.f32 %v8209_v61, 0.0 }
 0x5a8   :  { %v8016_v26 = vrot.slane %v8015_v28, 4  ;;  %v8162_v12 = vadd.f32 %v8161_v56, %v8089_v23 }
 0x5a9   :  { %v8004_v5 = vadd.f32 %v8003_v48, %v8002_v17  ;;  %v8150_v9 = vrot.slane %v8149_v10, 4 }
 0x5aa   :  { %v8017_v24 = vadd.f32 %v8016_v26, %v8015_v28  ;;  %v8163_v16 = vrot.slane %v8162_v12, 4 }
 0x5ab   :  { %v8005_v51 = vrot.slane %v8004_v5, 2  ;;  %v8151_v58 = vadd.f32 %v8150_v9, %v8149_v10  ;;  %v8223_v10 = vadd.f32 1e-05, %v8216_v21 }
 0x5ac   :  { %v8018_v62 = vrot.slane %v8017_v24, 2  ;;  %v8164_v46 = vadd.f32 %v8163_v16, %v8162_v12 }
 0x5ad   :  { %v8006_v50 = vadd.f32 %v8005_v51, %v8004_v5  ;;  %v8152_v6 = vrot.slane %v8151_v58, 2  ;;  %15030 = vrsqrt.f32 %v8223_v10 }
 0x5ae   :  { %v8019_v30 = vadd.f32 %v8018_v62, %v8017_v24  ;;  %v8165_v59 = vrot.slane %v8164_v46, 2  ;;  %v7943_v62 = vld [vmem:[#allocation9 + $0x8] sm:$0x3f] }
 0x5af   :  { %v8007_v20 = vrot.slane %v8006_v50, 1  ;;  %v8153_v45 = vadd.f32 %v8152_v6, %v8151_v58 }
 0x5b0   :  { %v8020_v8 = vrot.slane %v8019_v30, 1  ;;  %v8166_v0 = vadd.f32 %v8165_v59, %v8164_v46 }
 0x5b1   :  { %v8008_v18 = vadd.f32 %v8007_v20, %v8006_v50  ;;  %v8154_v2 = vrot.slane %v8153_v45, 1  ;;  %v17924_v20 = vld [vmem:[#allocation32_spill] sm:$0xff] }
 0x5b2   :  { %v8021_v60 = vadd.f32 %v8020_v8, %v8019_v30  ;;  %v8167_v53 = vrot.slane %v8166_v0, 1  ;;  %v17923_v30 = vld [vmem:[#allocation31_spill] sm:$0xff] }
 0x5b3   :  { %v8155_v7 = vadd.f32 %v8154_v2, %v8153_v45  ;;  %v8186_v14 = vmul.f32 0.015625, %v8008_v18 }
 0x5b4   :  { %v8168_v52 = vadd.f32 %v8167_v53, %v8166_v0  ;;  %v8187_v17 = vmul.f32 0.015625, %v8021_v60 }
 0x5b5   :  { %v8193_v47 = vmul.f32 0.015625, %v8155_v7  ;;  %v8200_v56 = vmul.f32 %v8186_v14, %v8186_v14 }
 0x5b6   :  { %v8194_v28 = vmul.f32 0.015625, %v8168_v52  ;;  %v8201_v23 = vmul.f32 %v8187_v17, %v8187_v17 }
 0x5b7   :  { %v8207_v48 = vsub.f32 %v8193_v47, %v8200_v56  ;;  %v15031_v24 = vpop.eup %15030 }
 0x5b8   :  { %v8208_v36 = vsub.f32 %v8194_v28, %v8201_v23  ;;  %v8269_v41 = vrot.slane %v15031_v24, %v15935_v44 }
 0x5b9   :  { %v8214_v26 = vmax.f32 %v8207_v48, 0.0 }
 0x5ba   :  { %v8215_v12 = vmax.f32 %v8208_v36, 0.0  ;;  %v17925_v36 = vld [vmem:[#allocation34_spill] sm:$0xff] }
 0x5bb   :  { %v8221_v5 = vadd.f32 1e-05, %v8214_v26  ;;  %v17926_v26 = vld [vmem:[#allocation35_spill] sm:$0xff] }
 0x5bc   :  { %v8222_v9 = vadd.f32 1e-05, %v8215_v12  ;;  %v17927_v12 = vld [vmem:[#allocation36_spill] sm:$0xff] }
 0x5bd   :  { %15032 = vrsqrt.f32 %v8221_v5 }
 0x5be   :  { %15034 = vrsqrt.f32 %v8222_v9 }
 0x5c7   :  { %v15033_v16 = vpop.eup %15032 }
 0x5c8   :  { %v15035_v51 = vpop.eup %15034 }
 0x5c9   :  { %v8255_v58 = vcombine.low %v15033_v16, %v15035_v51 }
 0x5cb   :  { %v8262_v15 = vrot.slane %v8255_v58, %v15935_v44 }
 0x5cd   :  { %v8270_v46 = vcombine.low %v8262_v15, %v8269_v41 }
 0x5cf   :  { %v8274_v50 = vmul.f32 %v8270_v46, %v7943_v62 }
 0x5d1   :  { %v8296_v6 = vrot.slane %v8274_v50, %v15927_v32  ;;  %v8300_v59 = vrot.slane %v8274_v50, %v17923_v30  ;;  %v8304_v45 = vrot.slane %v8274_v50, %v17924_v20 }
 0x5d3   :  { %v8316_v61 = vmul.f32 %v8296_v6, %v8186_v14  ;;  %v8317_v8 = vmul.f32 %v8300_v59, %v8187_v17  ;;  %v8318_v0 = vmul.f32 %v8304_v45, %v8188_v42  ;;  %v8384_v18 = vrot.slane %v8296_v6, %v15927_v32 }
 0x5d4   :  { %v8388_v2 = vrot.slane %v8300_v59, %v15927_v32 }
 0x5d5   :  { %v8343_v60 = vcombine.low %v8316_v61, %v8317_v8  ;;  %v8357_v53 = vrot.slane %v8318_v0, %v15935_v44  ;;  %v8397_v7 = vmul.f32 %v8384_v18, %v17137_v33  ;;  %v8404_v21 = vmul.f32 %v8384_v18, %v17144_v43 }
 0x5d6   :  { %v8447_v52 = vmul.f32 %v8388_v2, %v17215_v40  ;;  %v8398_v47 = vmul.f32 %v8388_v2, %v17139_v25  ;;  %v8405_v56 = vmul.f32 %v8388_v2, %v17152_v34  ;;  %v8412_v14 = vmul.f32 %v8388_v2, %v17165_v57 }
 0x5d7   :  { %v8350_v42 = vrot.slane %v8343_v60, %v15935_v44  ;;  %v8419_v17 = vmul.f32 %v8388_v2, %v17175_v54  ;;  %v8411_v28 = vmul.f32 %v8384_v18, %v17160_v3  ;;  %v8418_v23 = vmul.f32 %v8384_v18, %v17170_v55 }
 0x5d8   :  { %v8426_v33 = vmul.f32 %v8388_v2, %v17185_v39  ;;  %v8433_v43 = vmul.f32 %v8388_v2, %v17195_v29  ;;  %v8425_v40 = vmul.f32 %v8384_v18, %v17180_v11  ;;  %v8432_v25 = vmul.f32 %v8384_v18, %v17190_v35 }
 0x5d9   :  { %v8358_v48 = vcombine.low %v8350_v42, %v8357_v53  ;;  %v8440_v34 = vmul.f32 %v8388_v2, %v17205_v49  ;;  %v8439_v57 = vmul.f32 %v8384_v18, %v17200_v4  ;;  %v17245_v10 = vmul.f32 %v8384_v18, %v17210_v19  ;;  %v14838_v18 = vld [vmem:[#allocation10 + $0x600] ss:$16 sps:$4 sm:$0xff]  }
 0x5da   :  { %v8392_v3 = vrot.slane %v8304_v45, %v15927_v32 }
 0x5db   :  { %v8360_v54 = vrot.slane %v8358_v48, 7 }
 0x5dc   :  { %v8399_v35 = vmul.f32 %v8392_v3, %v17077_v27  ;;  %v17253_v5 = vmul.f32 %v8392_v3, %v17081_v13  ;;  %v17256_v4 = vmul.f32 %v8392_v3, %v17085_v63  ;;  %v17261_v9 = vmul.f32 %v8392_v3, %v17088_v37 }
 0x5dd   :  { %v8364_v55 = vsub.f32 %v7943_v62, %v8360_v54  ;;  %v17264_v24 = vmul.f32 %v8392_v3, %v17091_v1  ;;  %v17270_v27 = vmul.f32 %v8392_v3, %v17094_v31  ;;  %v17273_v13 = vmul.f32 %v8392_v3, %v17097_v38 }
 0x5de   :  { %v17276_v63 = vmul.f32 %v8392_v3, %v17100_v22  ;;  %v14841_v22 = vld [vmem:[#allocation10 + $0x608] ss:$16 sps:$4 sm:$0xff]  }
 0x5df   :  { %v8470_v39 = vrot.slane %v8364_v55, %v17925_v36  ;;  %v8474_v29 = vrot.slane %v8364_v55, %v17926_v26  ;;  %v8478_v11 = vrot.slane %v8364_v55, %v17927_v12 }
 0x5e1   :  { %v8505_v49 = vrot.slane %v8470_v39, %v17925_v36  ;;  %v8509_v19 = vrot.slane %v8474_v29, %v17925_v36  ;;  %v17267_v16 = vrot.slane %v8478_v11, %v17925_v36  ;;  %v14852_v11 = vld [vmem:[#allocation10 + $0x644] ss:$16 sps:$4 sm:$0xff]  }
 0x5e3   :  { %v8568_v51 = vadd.f32 %v8509_v19, %v8447_v52  ;;  %v8519_v58 = vadd.f32 %v8509_v19, %v8398_v47  ;;  %v8526_v15 = vadd.f32 %v8509_v19, %v8405_v56  ;;  %v8518_v37 = vadd.f32 %v8505_v49, %v8397_v7  ;;  %v14846_v56 = vld [vmem:[#allocation10 + $0x624] ss:$16 sps:$4 sm:$0xff]  }
 0x5e4   :  { %v8525_v41 = vadd.f32 %v8505_v49, %v8404_v21  ;;  %v8533_v62 = vadd.f32 %v8509_v19, %v8412_v14  ;;  %v8540_v1 = vadd.f32 %v8509_v19, %v8419_v17  ;;  %v8532_v46 = vadd.f32 %v8505_v49, %v8411_v28  ;;  %v14849_v14 = vld [vmem:[#allocation10 + $0x62c] ss:$16 sps:$4 sm:$0xff]  }
 0x5e5   :  { %v8575_v50 = vmax.f32 %v8519_v58, 0.0  ;;  %v8582_v6 = vmax.f32 %v8526_v15, 0.0  ;;  %v8574_v59 = vmax.f32 %v8518_v37, 0.0  ;;  %v8539_v45 = vadd.f32 %v8505_v49, %v8418_v23 }
 0x5e6   :  { %v8581_v31 = vmax.f32 %v8525_v41, 0.0  ;;  %v8589_v61 = vmax.f32 %v8533_v62, 0.0  ;;  %v8596_v8 = vmax.f32 %v8540_v1, 0.0  ;;  %v8588_v38 = vmax.f32 %v8532_v46, 0.0 }
 0x5e7   :  { %v8631_v0 = vpack.c.bf16 %v8582_v6, %v8575_v50  ;;  %v8595_v2 = vmax.f32 %v8539_v45, 0.0  ;;  %v8547_v60 = vadd.f32 %v8509_v19, %v8426_v33  ;;  %v8554_v53 = vadd.f32 %v8509_v19, %v8433_v43  ;;  %v14844_v33 = vld [vmem:[#allocation10 + $0x620] ss:$16 sps:$4 sm:$0xff]   ;;  %v14847_v43 = vld [vmem:[#allocation10 + $0x628] ss:$16 sps:$4 sm:$0xff]  }
 0x5e8   :  { %v8630_v52 = vpack.c.bf16 %v8581_v31, %v8574_v59  ;;  %v8638_v7 = vpack.c.bf16 %v8596_v8, %v8589_v61  ;;  %v8546_v21 = vadd.f32 %v8505_v49, %v8425_v40  ;;  %v8553_v47 = vadd.f32 %v8505_v49, %v8432_v25  ;;  %v14858_v31 = vld [vmem:[#allocation10 + $0x664] ss:$16 sps:$4 sm:$0xff]  }
 0x5e9   :  { %10176 = vmatprep.mubr.bf16.mxu1 %v8631_v0  ;;  %10468 = vmatprep.mubr.bf16.mxu0 %v8631_v0  ;;  %v8637_v42 = vpack.c.bf16 %v8595_v2, %v8588_v38  ;;  %v8603_v17 = vmax.f32 %v8547_v60, 0.0  ;;  %v8610_v28 = vmax.f32 %v8554_v53, 0.0  ;;  %v8561_v23 = vadd.f32 %v8509_v19, %v8440_v34  ;;  %v14855_v34 = vld [vmem:[#allocation10 + $0x64c] ss:$16 sps:$4 sm:$0xff]   ;;  %v14862_v2 = vld [vmem:[#allocation10 + $0x680] ss:$16 sps:$4 sm:$0xff]  }
 0x5ea   :  { %10177 = vmatmul.mubr.bf16.vlgmr.msra.gmra.mrb[112].mxu1 %v8630_v52  ;;  %10469 = vmatmul.mubr.bf16.vlgmr.msra.gmra.mrb[64].mxu0 %v8630_v52  ;;  %v8602_v48 = vmax.f32 %v8546_v21, 0.0  ;;  %v8609_v54 = vmax.f32 %v8553_v47, 0.0  ;;  %v8624_v3 = vmax.f32 %v8568_v51, 0.0  ;;  %v8560_v55 = vadd.f32 %v8505_v49, %v8439_v57  ;;  %v14865_v60 = vld [vmem:[#allocation10 + $0x688] ss:$16 sps:$4 sm:$0xff]  }
 0x5eb   :  { %10218 = vmatpush1.bf16.msra.mxu1 %v14838_v18  ;;  %10510 = vmatpush1.bf16.msra.mxu0 %v14841_v22  ;;  %v8645_v40 = vpack.c.bf16 %v8610_v28, %v8603_v17  ;;  %v8617_v25 = vmax.f32 %v8561_v23, 0.0  ;;  %v8567_v39 = vadd.f32 %v8505_v49, %v17245_v10  ;;  %v8520_v29 = vadd.f32 %v17267_v16, %v8399_v35  ;;  %v14859_v18 = vld [vmem:[#allocation10 + $0x668] ss:$16 sps:$4 sm:$0xff]   ;;  %v14870_v53 = vld [vmem:[#allocation10 + $0x6a4] ss:$16 sps:$4 sm:$0xff]  }
 0x5ec   :  { %10186 = vmatprep.mubr.bf16.mxu1 %v8638_v7  ;;  %10478 = vmatprep.mubr.bf16.mxu0 %v8638_v7  ;;  %v8644_v19 = vpack.c.bf16 %v8609_v54, %v8602_v48  ;;  %v8616_v58 = vmax.f32 %v8560_v55, 0.0  ;;  %v8527_v51 = vadd.f32 %v17267_v16, %v17253_v5  ;;  %v8534_v57 = vadd.f32 %v17267_v16, %v17256_v4  ;;  %v14850_v5 = vld [vmem:[#allocation10 + $0x640] ss:$16 sps:$4 sm:$0xff]   ;;  %v14853_v4 = vld [vmem:[#allocation10 + $0x648] ss:$16 sps:$4 sm:$0xff]  }
 0x5ed   :  { %10219 = vmatprep.subr.bf16.mxu1 %v14846_v56  ;;  %10511 = vmatprep.subr.bf16.mxu0 %v14849_v14  ;;  %v8652_v15 = vpack.c.bf16 %v8624_v3, %v8617_v25  ;;  %v8623_v37 = vmax.f32 %v8567_v39, 0.0  ;;  %v8576_v41 = vmax.f32 %v8520_v29, 0.0  ;;  %v8541_v10 = vadd.f32 %v17267_v16, %v17261_v9  ;;  %v14873_v52 = vld [vmem:[#allocation10 + $0x6ac] ss:$16 sps:$4 sm:$0xff]   ;;  %v14868_v7 = vld [vmem:[#allocation10 + $0x6a0] ss:$16 sps:$4 sm:$0xff]  }
 0x5ee   :  { %v8583_v35 = vmax.f32 %v8527_v51, 0.0  ;;  %v8590_v49 = vmax.f32 %v8534_v57, 0.0  ;;  %v8548_v62 = vadd.f32 %v17267_v16, %v17264_v24  ;;  %v8555_v1 = vadd.f32 %v17267_v16, %v17270_v27  ;;  %v14861_v27 = vld [vmem:[#allocation10 + $0x66c] ss:$16 sps:$4 sm:$0xff]   ;;  %v14871_v21 = vld [vmem:[#allocation10 + $0x6a8] ss:$16 sps:$4 sm:$0xff]  }
 0x5ef   :  { %10220 = vmatpush1.bf16.msra.mxu1 %v14844_v33  ;;  %10512 = vmatpush1.bf16.msra.mxu0 %v14847_v43  ;;  %v8651_v46 = vpack.c.bf16 %v8623_v37, %v8616_v58  ;;  %v8597_v50 = vmax.f32 %v8541_v10, 0.0  ;;  %v8562_v6 = vadd.f32 %v17267_v16, %v17273_v13  ;;  %v8569_v9 = vadd.f32 %v17267_v16, %v17276_v63  ;;  %v14856_v13 = vld [vmem:[#allocation10 + $0x660] ss:$16 sps:$4 sm:$0xff]   ;;  %v14864_v16 = vld [vmem:[#allocation10 + $0x684] ss:$16 sps:$4 sm:$0xff]  }
 0x5f0   :  { %10221 = vmatprep.subr.bf16.mxu1 %v14852_v11  ;;  %10513 = vmatprep.subr.bf16.mxu0 %v14855_v34  ;;  %v17294_v59 = vpack.c.bf16 %v8583_v35, %v8576_v41  ;;  %v8604_v24 = vmax.f32 %v8548_v62, 0.0  ;;  %v8611_v45 = vmax.f32 %v8555_v1, 0.0  ;;  %v14867_v63 = vld [vmem:[#allocation10 + $0x68c] ss:$16 sps:$4 sm:$0xff]   ;;  %v14876_v47 = vld [vmem:[#allocation10 + $0x6c4] ss:$16 sps:$4 sm:$0xff]  }
 0x5f1   :  { %v8639_v61 = vpack.c.bf16 %v8597_v50, %v8590_v49  ;;  %v8618_v8 = vmax.f32 %v8562_v6, 0.0  ;;  %v8625_v38 = vmax.f32 %v8569_v9, 0.0  ;;  %v14879_v56 = vld [vmem:[#allocation10 + $0x6cc] ss:$16 sps:$4 sm:$0xff]   ;;  %v14874_v14 = vld [vmem:[#allocation10 + $0x6c0] ss:$16 sps:$4 sm:$0xff]  }
 0x5f2   :  { %10187 = vmatmul.mubr.bf16.gmra.mrb[116].mxu1 %v8637_v42  ;;  %10479 = vmatmul.mubr.bf16.gmra.mrb[68].mxu0 %v8637_v42  ;;  %v8646_v0 = vpack.c.bf16 %v8611_v45, %v8604_v24  ;;  %v14877_v42 = vld [vmem:[#allocation10 + $0x6c8] ss:$16 sps:$4 sm:$0xff]   ;;  %v14882_v17 = vld [vmem:[#allocation10 + $0x6e4] ss:$16 sps:$4 sm:$0xff]   ;;  %v14885_v28 = vld [vmem:[#allocation10 + $0x6ec] ss:$16 sps:$4 sm:$0xff]  }
 0x5f3   :  { %10222 = vmatpush1.bf16.msra.mxu1 %v14850_v5  ;;  %10514 = vmatpush1.bf16.msra.mxu0 %v14853_v4  ;;  %v8653_v22 = vpack.c.bf16 %v8625_v38, %v8618_v8  ;;  %v14880_v23 = vld [vmem:[#allocation10 + $0x6e0] ss:$16 sps:$4 sm:$0xff]   ;;  %v14883_v48 = vld [vmem:[#allocation10 + $0x6e8] ss:$16 sps:$4 sm:$0xff]   ;;  %v15376_v54 = vmov 0  }
 0x5f4   :  { %10196 = vmatprep.mubr.bf16.mxu1 %v8645_v40  ;;  %10488 = vmatprep.mubr.bf16.mxu0 %v8645_v40  ;;  %v14888_v3 = vld [vmem:[#allocation13 + $0x4] ss:$8 sps:$4 sm:$0xff]   ;;  %v14886_v55 = vld [vmem:[#allocation13] ss:$8 sps:$4 sm:$0xff]   ;;  %v14891_v33 = vld [vmem:[#allocation13 + $0x14] ss:$8 sps:$4 sm:$0xff]  }
 0x5f5   :  { %10223 = vmatprep.subr.bf16.mxu1 %v14858_v31  ;;  %10515 = vmatprep.subr.bf16.mxu0 %v14861_v27  ;;  %v14889_v43 = vld [vmem:[#allocation13 + $0x10] ss:$8 sps:$4 sm:$0xff]   ;;  %v14894_v40 = vld [vmem:[#allocation13 + $0x24] ss:$8 sps:$4 sm:$0xff]   ;;  %v14892_v25 = vld [vmem:[#allocation13 + $0x20] ss:$8 sps:$4 sm:$0xff]  }
 0x5f6   :  { %v14897_v39 = vld [vmem:[#allocation13 + $0x34] ss:$8 sps:$4 sm:$0xff]   ;;  %v14895_v29 = vld [vmem:[#allocation13 + $0x30] ss:$8 sps:$4 sm:$0xff]   ;;  %v14900_v11 = vld [vmem:[#allocation13 + $0x44] ss:$8 sps:$4 sm:$0xff]  }
 0x5f7   :  { %10224 = vmatpush1.bf16.msra.mxu1 %v14856_v13  ;;  %10516 = vmatpush1.bf16.msra.mxu0 %v14859_v18  ;;  %v14898_v34 = vld [vmem:[#allocation13 + $0x40] ss:$8 sps:$4 sm:$0xff]   ;;  %v14901_v58 = vld [vmem:[#allocation13 + $0x50] ss:$8 sps:$4 sm:$0xff]   ;;  %v14906_v51 = vld [vmem:[#allocation13 + $0x64] ss:$8 sps:$4 sm:$0xff]  }
 0x5f8   :  { %10225 = vmatprep.subr.bf16.mxu1 %v14864_v16  ;;  %10517 = vmatprep.subr.bf16.mxu0 %v14867_v63  ;;  %v14904_v57 = vld [vmem:[#allocation13 + $0x60] ss:$8 sps:$4 sm:$0xff]   ;;  %v14907_v37 = vld [vmem:[#allocation13 + $0x70] ss:$8 sps:$4 sm:$0xff]   ;;  %v14912_v41 = vld [vmem:[#allocation13 + $0x84] ss:$8 sps:$4 sm:$0xff]  }
 0x5f9   :  { %v14910_v10 = vld [vmem:[#allocation13 + $0x80] ss:$8 sps:$4 sm:$0xff]   ;;  %v14915_v35 = vld [vmem:[#allocation13 + $0x94] ss:$8 sps:$4 sm:$0xff]   ;;  %v14913_v49 = vld [vmem:[#allocation13 + $0x90] ss:$8 sps:$4 sm:$0xff]  }
 0x5fa   :  { %10197 = vmatmul.mubr.bf16.gmra.mrb[120].mxu1 %v8644_v19  ;;  %10489 = vmatmul.mubr.bf16.gmra.mrb[72].mxu0 %v8644_v19  ;;  %v14903_v19 = vld [vmem:[#allocation13 + $0x54] ss:$8 sps:$4 sm:$0xff]   ;;  %v14918_v62 = vld [vmem:[#allocation13 + $0xa4] ss:$8 sps:$4 sm:$0xff]   ;;  %v14916_v1 = vld [vmem:[#allocation13 + $0xa0] ss:$8 sps:$4 sm:$0xff]  }
 0x5fb   :  { %10226 = vmatpush1.bf16.msra.mxu1 %v14862_v2  ;;  %10518 = vmatpush1.bf16.msra.mxu0 %v14865_v60  ;;  %v14921_v5 = vld [vmem:[#allocation13 + $0xb4] ss:$8 sps:$4 sm:$0xff]   ;;  %v14919_v4 = vld [vmem:[#allocation13 + $0xb0] ss:$8 sps:$4 sm:$0xff]   ;;  %v14922_v50 = vld [vmem:[#allocation13 + $0xc0] ss:$8 sps:$4 sm:$0xff]  }
 0x5fc   :  { %10206 = vmatprep.mubr.bf16.mxu1 %v8652_v15  ;;  %10498 = vmatprep.mubr.bf16.mxu0 %v8652_v15  ;;  %v14909_v15 = vld [vmem:[#allocation13 + $0x74] ss:$8 sps:$4 sm:$0xff]   ;;  %v14925_v9 = vld [vmem:[#allocation13 + $0xd0] ss:$8 sps:$4 sm:$0xff]   ;;  %v14928_v24 = vld [vmem:[#allocation13 + $0xe0] ss:$8 sps:$4 sm:$0xff]  }
 0x5fd   :  { %10227 = vmatprep.subr.bf16.mxu1 %v14870_v53  ;;  %10519 = vmatprep.subr.bf16.mxu0 %v14873_v52  ;;  %v14927_v6 = vld [vmem:[#allocation13 + $0xd4] ss:$8 sps:$4 sm:$0xff]   ;;  %v14931_v31 = vld [vmem:[#allocation13 + $0xf0] ss:$8 sps:$4 sm:$0xff]   ;;  %v14936_v27 = vld [vmem:[#allocation13 + $0x104] ss:$8 sps:$4 sm:$0xff]  }
 0x5fe   :  { %v14933_v45 = vld [vmem:[#allocation13 + $0xf4] ss:$8 sps:$4 sm:$0xff]  }
 0x5ff   :  { %10228 = vmatpush1.bf16.msra.mxu1 %v14868_v7  ;;  %10520 = vmatpush1.bf16.msra.mxu0 %v14871_v21 }
 0x600   :  { %10229 = vmatprep.subr.bf16.mxu1 %v14876_v47  ;;  %10521 = vmatprep.subr.bf16.mxu0 %v14879_v56 }
 0x602   :  { %10207 = vmatmul.mubr.bf16.gmra.mrb[124].mxu1 %v8651_v46  ;;  %10499 = vmatmul.mubr.bf16.gmra.mrb[76].mxu0 %v8651_v46  ;;  %v14924_v46 = vld [vmem:[#allocation13 + $0xc4] ss:$8 sps:$4 sm:$0xff]  }
 0x603   :  { %10230 = vmatpush1.bf16.msra.mxu1 %v14874_v14  ;;  %10522 = vmatpush1.bf16.msra.mxu0 %v14877_v42 }
 0x604   :  { %10231 = vmatprep.subr.bf16.mxu1 %v14882_v17  ;;  %10523 = vmatprep.subr.bf16.mxu0 %v14885_v28 }
 0x605   :  { %10249 = vmatprep.mubr.bf16.mxu1 %v15376_v54  ;;  %10541 = vmatprep.mubr.bf16.mxu0 %v15376_v54 }
 0x607   :  { %10232 = vmatpush1.bf16.msra.mxu1 %v14880_v23  ;;  %10524 = vmatpush1.bf16.msra.mxu0 %v14883_v48 }
 0x608   :  { %11368 = vmatprep.subr.bf16.mxu1 %v14888_v3 }
 0x60a   :  { %10250 = vmatmul.mubr.bf16.vlgmr.msra.gmra.mrb[112].mxu1 %v17294_v59  ;;  %10542 = vmatmul.mubr.bf16.vlgmr.msra.gmra.mrb[64].mxu0 %v17294_v59  ;;  %v14930_v59 = vld [vmem:[#allocation13 + $0xe4] ss:$8 sps:$4 sm:$0xff]  }
 0x60b   :  { %10259 = vmatprep.mubr.bf16.mxu1 %v15376_v54  ;;  %10551 = vmatprep.mubr.bf16.mxu0 %v15376_v54 }
 0x60c   :  { %11369 = vmatpush1.bf16.msra.mxu1 %v14886_v55 }
 0x60d   :  { %11370 = vmatprep.subr.bf16.mxu1 %v14891_v33 }
 0x610   :  { %11371 = vmatpush1.bf16.msra.mxu1 %v14889_v43 }
 0x611   :  { %11372 = vmatprep.subr.bf16.mxu1 %v14894_v40 }
 0x612   :  { %10260 = vmatmul.mubr.bf16.gmra.mrb[116].mxu1 %v8639_v61  ;;  %10552 = vmatmul.mubr.bf16.gmra.mrb[68].mxu0 %v8639_v61 }
 0x613   :  { %10269 = vmatprep.mubr.bf16.mxu1 %v15376_v54  ;;  %10561 = vmatprep.mubr.bf16.mxu0 %v15376_v54 }
 0x614   :  { %11373 = vmatpush1.bf16.msra.mxu1 %v14892_v25 }
 0x615   :  { %11374 = vmatprep.subr.bf16.mxu1 %v14897_v39 }
 0x618   :  { %11375 = vmatpush1.bf16.msra.mxu1 %v14895_v29 }
 0x619   :  { %11376 = vmatprep.subr.bf16.mxu1 %v14900_v11 }
 0x61a   :  { %10270 = vmatmul.mubr.bf16.gmra.mrb[120].mxu1 %v8646_v0  ;;  %10562 = vmatmul.mubr.bf16.gmra.mrb[72].mxu0 %v8646_v0 }
 0x61b   :  { %10279 = vmatprep.mubr.bf16.mxu1 %v15376_v54  ;;  %10571 = vmatprep.mubr.bf16.mxu0 %v15376_v54 }
 0x61c   :  { %11377 = vmatpush1.bf16.msra.mxu1 %v14898_v34 }
 0x61d   :  { %11378 = vmatprep.subr.bf16.mxu1 %v14903_v19 }
 0x620   :  { %11379 = vmatpush1.bf16.msra.mxu1 %v14901_v58 }
 0x621   :  { %11380 = vmatprep.subr.bf16.mxu1 %v14906_v51 }
 0x622   :  { %10280 = vmatmul.mubr.bf16.gmra.mrb[124].mxu1 %v8653_v22  ;;  %10572 = vmatmul.mubr.bf16.gmra.mrb[76].mxu0 %v8653_v22 }
 0x624   :  { %11381 = vmatpush1.bf16.msra.mxu1 %v14904_v57 }
 0x625   :  { %11382 = vmatprep.subr.bf16.mxu1 %v14909_v15 }
 0x628   :  { %11383 = vmatpush1.bf16.msra.mxu1 %v14907_v37 }
 0x629   :  { %11384 = vmatprep.subr.bf16.mxu1 %v14912_v41 }
 0x62c   :  { %11385 = vmatpush1.bf16.msra.mxu1 %v14910_v10 }
 0x62d   :  { %11386 = vmatprep.subr.bf16.mxu1 %v14915_v35 }
 0x630   :  { %11387 = vmatpush1.bf16.msra.mxu1 %v14913_v49 }
 0x631   :  { %11388 = vmatprep.subr.bf16.mxu1 %v14918_v62 }
 0x634   :  { %11389 = vmatpush1.bf16.msra.mxu1 %v14916_v1 }
 0x635   :  { %11390 = vmatprep.subr.bf16.mxu1 %v14921_v5 }
 0x638   :  { %11391 = vmatpush1.bf16.msra.mxu1 %v14919_v4 }
 0x639   :  { %11392 = vmatprep.subr.bf16.mxu1 %v14924_v46 }
 0x63c   :  { %11393 = vmatpush1.bf16.msra.mxu1 %v14922_v50 }
 0x63d   :  { %11394 = vmatprep.subr.bf16.mxu1 %v14927_v6 }
 0x640   :  { %11395 = vmatpush1.bf16.msra.mxu1 %v14925_v9 }
 0x641   :  { %11396 = vmatprep.subr.bf16.mxu1 %v14930_v59 }
 0x644   :  { %11397 = vmatpush1.bf16.msra.mxu1 %v14928_v24 }
 0x645   :  { %11398 = vmatprep.subr.bf16.mxu1 %v14933_v45 }
 0x648   :  { %11399 = vmatpush1.bf16.msra.mxu1 %v14931_v31 }
 0x649   :  { %11441 = vmatprep.subr.bf16.mxu1 %v14936_v27 }
 0x6dd   :  { %v17298_v61 = vpop.f32.mrb[112].mxu1  ;;  %v17300_v8 = vpop.f32.mrb[64].mxu0 }
 0x6de   :  { %v17302_v38 = vpop.f32.mrb[113].mxu1  ;;  %v17304_v0 = vpop.f32.mrb[65].mxu0  ;;  %v10635_v13 = vmul.f32 %v17298_v61, %v17298_v61  ;;  %v10637_v18 = vmul.f32 %v17300_v8, %v17300_v8 }
 0x6df   :  { %v10636_v22 = vmul.f32 %v17302_v38, %v17302_v38  ;;  %v10638_v16 = vmul.f32 %v17304_v0, %v17304_v0  ;;  %v17314_v63 = vpop.f32.mrb[114].mxu1  ;;  %v17316_v2 = vpop.f32.mrb[66].mxu0 }
 0x6e0   :  { %v10583_v60 = vadd.f32 %v17314_v63, %v17298_v61  ;;  %v10639_v53 = vmul.f32 %v17314_v63, %v17314_v63  ;;  %v10609_v52 = vadd.f32 %v17316_v2, %v17300_v8  ;;  %v10641_v7 = vmul.f32 %v17316_v2, %v17316_v2  ;;  %v17326_v21 = vpop.f32.mrb[115].mxu1  ;;  %v17328_v47 = vpop.f32.mrb[67].mxu0 }
 0x6e1   :  { %v10596_v56 = vadd.f32 %v17326_v21, %v17302_v38  ;;  %v10640_v14 = vmul.f32 %v17326_v21, %v17326_v21  ;;  %v10622_v42 = vadd.f32 %v17328_v47, %v17304_v0  ;;  %v10642_v17 = vmul.f32 %v17328_v47, %v17328_v47 }
 0x6e2   :  { %v10667_v28 = vadd.f32 %v10639_v53, %v10635_v13  ;;  %v10693_v23 = vadd.f32 %v10641_v7, %v10637_v18 }
 0x6e3   :  { %v10680_v48 = vadd.f32 %v10640_v14, %v10636_v22  ;;  %v10706_v54 = vadd.f32 %v10642_v17, %v10638_v16 }
 0x6e5   :  { %v17338_v3 = vpop.f32.mrb[116].mxu1  ;;  %v17340_v55 = vpop.f32.mrb[68].mxu0 }
 0x6e6   :  { %v10584_v33 = vadd.f32 %v10583_v60, %v17338_v3  ;;  %v10643_v43 = vmul.f32 %v17338_v3, %v17338_v3  ;;  %v10610_v40 = vadd.f32 %v10609_v52, %v17340_v55  ;;  %v10645_v25 = vmul.f32 %v17340_v55, %v17340_v55  ;;  %v17348_v39 = vpop.f32.mrb[117].mxu1  ;;  %v17350_v29 = vpop.f32.mrb[69].mxu0 }
 0x6e7   :  { %v10597_v11 = vadd.f32 %v10596_v56, %v17348_v39  ;;  %v10644_v34 = vmul.f32 %v17348_v39, %v17348_v39  ;;  %v10623_v19 = vadd.f32 %v10622_v42, %v17350_v29  ;;  %v10646_v58 = vmul.f32 %v17350_v29, %v17350_v29  ;;  %v17358_v51 = vpop.f32.mrb[118].mxu1  ;;  %v17360_v57 = vpop.f32.mrb[70].mxu0 }
 0x6e8   :  { %v10668_v15 = vadd.f32 %v10667_v28, %v10643_v43  ;;  %v10694_v37 = vadd.f32 %v10693_v23, %v10645_v25  ;;  %v10585_v41 = vadd.f32 %v10584_v33, %v17358_v51  ;;  %v10647_v10 = vmul.f32 %v17358_v51, %v17358_v51  ;;  %v17365_v35 = vpop.f32.mrb[119].mxu1  ;;  %v17367_v49 = vpop.f32.mrb[71].mxu0 }
 0x6e9   :  { %v10681_v62 = vadd.f32 %v10680_v48, %v10644_v34  ;;  %v10707_v1 = vadd.f32 %v10706_v54, %v10646_v58  ;;  %v10611_v5 = vadd.f32 %v10610_v40, %v17360_v57  ;;  %v10649_v4 = vmul.f32 %v17360_v57, %v17360_v57 }
 0x6ea   :  { %v10669_v46 = vadd.f32 %v10668_v15, %v10647_v10  ;;  %v10598_v50 = vadd.f32 %v10597_v11, %v17365_v35  ;;  %v10648_v6 = vmul.f32 %v17365_v35, %v17365_v35  ;;  %v10624_v9 = vadd.f32 %v10623_v19, %v17367_v49 }
 0x6eb   :  { %v10695_v59 = vadd.f32 %v10694_v37, %v10649_v4  ;;  %v10650_v24 = vmul.f32 %v17367_v49, %v17367_v49 }
 0x6ec   :  { %v10682_v45 = vadd.f32 %v10681_v62, %v10648_v6 }
 0x6ed   :  { %v10708_v31 = vadd.f32 %v10707_v1, %v10650_v24  ;;  %v17378_v27 = vpop.f32.mrb[120].mxu1  ;;  %v17380_v13 = vpop.f32.mrb[72].mxu0 }
 0x6ee   :  { %17928 = vst [vmem:[#allocation45_spill] sm:$0xff] %v17380_v13  ;;  %v10586_v18 = vadd.f32 %v10585_v41, %v17378_v27  ;;  %v10651_v22 = vmul.f32 %v17378_v27, %v17378_v27  ;;  %v10612_v16 = vadd.f32 %v10611_v5, %v17380_v13  ;;  %v10653_v60 = vmul.f32 %v17380_v13, %v17380_v13  ;;  %v17388_v53 = vpop.f32.mrb[121].mxu1  ;;  %v17390_v52 = vpop.f32.mrb[73].mxu0 }
 0x6ef   :  { %v10599_v7 = vadd.f32 %v10598_v50, %v17388_v53  ;;  %v10652_v56 = vmul.f32 %v17388_v53, %v17388_v53  ;;  %v10625_v14 = vadd.f32 %v10624_v9, %v17390_v52  ;;  %v10654_v42 = vmul.f32 %v17390_v52, %v17390_v52  ;;  %v17398_v17 = vpop.f32.mrb[122].mxu1  ;;  %v17400_v28 = vpop.f32.mrb[74].mxu0 }
 0x6f0   :  { %17929 = vst [vmem:[#allocation46_spill] sm:$0xff] %v17400_v28  ;;  %v10670_v23 = vadd.f32 %v10669_v46, %v10651_v22  ;;  %v10696_v48 = vadd.f32 %v10695_v59, %v10653_v60  ;;  %v10587_v54 = vadd.f32 %v10586_v18, %v17398_v17  ;;  %v10655_v33 = vmul.f32 %v17398_v17, %v17398_v17  ;;  %v17405_v43 = vpop.f32.mrb[123].mxu1  ;;  %v17407_v40 = vpop.f32.mrb[75].mxu0 }
 0x6f1   :  { %v10683_v25 = vadd.f32 %v10682_v45, %v10652_v56  ;;  %v10709_v11 = vadd.f32 %v10708_v31, %v10654_v42  ;;  %v10613_v34 = vadd.f32 %v10612_v16, %v17400_v28  ;;  %v10657_v19 = vmul.f32 %v17400_v28, %v17400_v28 }
 0x6f2   :  { %v10671_v58 = vadd.f32 %v10670_v23, %v10655_v33  ;;  %v10600_v15 = vadd.f32 %v10599_v7, %v17405_v43  ;;  %v10656_v37 = vmul.f32 %v17405_v43, %v17405_v43  ;;  %v10626_v41 = vadd.f32 %v10625_v14, %v17407_v40 }
 0x6f3   :  { %v10697_v10 = vadd.f32 %v10696_v48, %v10657_v19  ;;  %v10658_v62 = vmul.f32 %v17407_v40, %v17407_v40 }
 0x6f4   :  { %v10684_v1 = vadd.f32 %v10683_v25, %v10656_v37 }
 0x6f5   :  { %v10710_v5 = vadd.f32 %v10709_v11, %v10658_v62  ;;  %v17418_v4 = vpop.f32.mrb[124].mxu1  ;;  %v17420_v46 = vpop.f32.mrb[76].mxu0 }
 0x6f6   :  { %17930 = vst [vmem:[#allocation47_spill] sm:$0xff] %v17420_v46  ;;  %v10588_v50 = vadd.f32 %v10587_v54, %v17418_v4  ;;  %v10659_v6 = vmul.f32 %v17418_v4, %v17418_v4  ;;  %v10614_v9 = vadd.f32 %v10613_v34, %v17420_v46  ;;  %v10661_v59 = vmul.f32 %v17420_v46, %v17420_v46  ;;  %v17428_v24 = vpop.f32.mrb[125].mxu1  ;;  %v17430_v45 = vpop.f32.mrb[77].mxu0 }
 0x6f7   :  { %17931 = vst [vmem:[#allocation48_spill] sm:$0xff] %v17430_v45  ;;  %v10601_v31 = vadd.f32 %v10600_v15, %v17428_v24  ;;  %v10660_v18 = vmul.f32 %v17428_v24, %v17428_v24  ;;  %v10627_v22 = vadd.f32 %v10626_v41, %v17430_v45  ;;  %v10662_v16 = vmul.f32 %v17430_v45, %v17430_v45  ;;  %v17438_v60 = vpop.f32.mrb[126].mxu1  ;;  %v17440_v7 = vpop.f32.mrb[78].mxu0 }
 0x6f8   :  { %17932 = vst [vmem:[#allocation49_spill] sm:$0xff] %v17440_v7  ;;  %v10672_v56 = vadd.f32 %v10671_v58, %v10659_v6  ;;  %v10698_v14 = vadd.f32 %v10697_v10, %v10661_v59  ;;  %v10589_v42 = vadd.f32 %v10588_v50, %v17438_v60  ;;  %v10663_v23 = vmul.f32 %v17438_v60, %v17438_v60  ;;  %v17445_v48 = vpop.f32.mrb[127].mxu1  ;;  %v17447_v54 = vpop.f32.mrb[79].mxu0 }
 0x6f9   :  { %v10685_v33 = vadd.f32 %v10684_v1, %v10660_v18  ;;  %v10711_v25 = vadd.f32 %v10710_v5, %v10662_v16  ;;  %v10615_v11 = vadd.f32 %v10614_v9, %v17440_v7  ;;  %v10665_v34 = vmul.f32 %v17440_v7, %v17440_v7 }
 0x6fa   :  { %v10590_v19 = vrot.slane %v10589_v42, 4  ;;  %v10673_v15 = vadd.f32 %v10672_v56, %v10663_v23  ;;  %v10602_v58 = vadd.f32 %v10601_v31, %v17445_v48  ;;  %v10664_v37 = vmul.f32 %v17445_v48, %v17445_v48 }
 0x6fb   :  { %v10616_v41 = vrot.slane %v10615_v11, 4  ;;  %v10699_v10 = vadd.f32 %v10698_v14, %v10665_v34  ;;  %v10628_v62 = vadd.f32 %v10627_v22, %v17447_v54  ;;  %v10666_v1 = vmul.f32 %v17447_v54, %v17447_v54 }
 0x6fc   :  { %v10591_v5 = vadd.f32 %v10590_v19, %v10589_v42  ;;  %v10674_v50 = vrot.slane %v10673_v15, 4  ;;  %v10603_v6 = vrot.slane %v10602_v58, 4  ;;  %v10686_v9 = vadd.f32 %v10685_v33, %v10664_v37 }
 0x6fd   :  { %v10617_v59 = vadd.f32 %v10616_v41, %v10615_v11  ;;  %v10700_v18 = vrot.slane %v10699_v10, 4  ;;  %v10629_v16 = vrot.slane %v10628_v62, 4  ;;  %v10712_v56 = vadd.f32 %v10711_v25, %v10666_v1 }
 0x6fe   :  { %v10592_v23 = vrot.slane %v10591_v5, 2  ;;  %v10675_v31 = vadd.f32 %v10674_v50, %v10673_v15  ;;  %v10604_v7 = vadd.f32 %v10603_v6, %v10602_v58  ;;  %v10687_v12 = vrot.slane %v10686_v9, 4 }
 0x6ff   :  { %v10618_v26 = vrot.slane %v10617_v59, 2  ;;  %v10701_v36 = vadd.f32 %v10700_v18, %v10699_v10  ;;  %v10630_v14 = vadd.f32 %v10629_v16, %v10628_v62  ;;  %v10713_v34 = vrot.slane %v10712_v56, 4 }
 0x700   :  { %v10593_v22 = vadd.f32 %v10592_v23, %v10591_v5  ;;  %v10676_v46 = vrot.slane %v10675_v31, 2  ;;  %v10605_v45 = vrot.slane %v10604_v7, 2  ;;  %v10688_v28 = vadd.f32 %v10687_v12, %v10686_v9 }
 0x701   :  { %v10619_v42 = vadd.f32 %v10618_v26, %v10617_v59  ;;  %v10702_v19 = vrot.slane %v10701_v36, 2  ;;  %v10631_v13 = vrot.slane %v10630_v14, 2  ;;  %v10714_v33 = vadd.f32 %v10713_v34, %v10712_v56 }
 0x702   :  { %v10594_v11 = vrot.slane %v10593_v22, 1  ;;  %v10677_v37 = vadd.f32 %v10676_v46, %v10675_v31  ;;  %v10606_v41 = vadd.f32 %v10605_v45, %v10604_v7  ;;  %v10689_v25 = vrot.slane %v10688_v28, 2 }
 0x703   :  { %v10620_v1 = vrot.slane %v10619_v42, 1  ;;  %v10703_v15 = vadd.f32 %v10702_v19, %v10701_v36  ;;  %v10632_v58 = vadd.f32 %v10631_v13, %v10630_v14  ;;  %v10715_v50 = vrot.slane %v10714_v33, 2 }
 0x704   :  { %v10595_v6 = vadd.f32 %v10594_v11, %v10593_v22  ;;  %v10678_v10 = vrot.slane %v10677_v37, 1  ;;  %v10607_v62 = vrot.slane %v10606_v41, 1  ;;  %v10690_v18 = vadd.f32 %v10689_v25, %v10688_v28 }
 0x705   :  { %v10621_v5 = vadd.f32 %v10620_v1, %v10619_v42  ;;  %v10704_v16 = vrot.slane %v10703_v15, 1  ;;  %v10633_v23 = vrot.slane %v10632_v58, 1  ;;  %v10716_v12 = vadd.f32 %v10715_v50, %v10714_v33 }
 0x706   :  { %v10679_v26 = vadd.f32 %v10678_v10, %v10677_v37  ;;  %v10719_v9 = vmul.f32 0.015625, %v10595_v6  ;;  %v10608_v59 = vadd.f32 %v10607_v62, %v10606_v41  ;;  %v10691_v56 = vrot.slane %v10690_v18, 1 }
 0x707   :  { %v10705_v34 = vadd.f32 %v10704_v16, %v10703_v15  ;;  %v10721_v46 = vmul.f32 0.015625, %v10621_v5  ;;  %v10634_v45 = vadd.f32 %v10633_v23, %v10632_v58  ;;  %v10717_v7 = vrot.slane %v10716_v12, 1 }
 0x708   :  { %v10723_v31 = vmul.f32 0.015625, %v10679_v26  ;;  %v10727_v36 = vmul.f32 %v10719_v9, %v10719_v9  ;;  %v10692_v13 = vadd.f32 %v10691_v56, %v10690_v18  ;;  %v10720_v14 = vmul.f32 0.015625, %v10608_v59 }
 0x709   :  { %v10725_v22 = vmul.f32 0.015625, %v10705_v34  ;;  %v10729_v19 = vmul.f32 %v10721_v46, %v10721_v46  ;;  %v10718_v11 = vadd.f32 %v10717_v7, %v10716_v12  ;;  %v10722_v28 = vmul.f32 0.015625, %v10634_v45 }
 0x70a   :  { %v10731_v42 = vsub.f32 %v10723_v31, %v10727_v36  ;;  %v10724_v25 = vmul.f32 0.015625, %v10692_v13  ;;  %v10728_v1 = vmul.f32 %v10720_v14, %v10720_v14  ;;  %v10582_v36 = vld [vmem:[#allocation12] sm:$0xff] }
 0x70b   :  { %v10733_v33 = vsub.f32 %v10725_v22, %v10729_v19  ;;  %v10726_v37 = vmul.f32 0.015625, %v10718_v11  ;;  %v10730_v50 = vmul.f32 %v10722_v28, %v10722_v28 }
 0x70c   :  { %v10735_v41 = vmax.f32 %v10731_v42, 0.0  ;;  %v10732_v6 = vsub.f32 %v10724_v25, %v10728_v1  ;;  %v17933_v25 = vld [vmem:[#allocation33_spill] sm:$0xff] }
 0x70d   :  { %v10737_v15 = vmax.f32 %v10733_v33, 0.0  ;;  %v10734_v10 = vsub.f32 %v10726_v37, %v10730_v50 }
 0x70e   :  { %v10739_v58 = vadd.f32 1e-05, %v10735_v41  ;;  %v10736_v62 = vmax.f32 %v10732_v6, 0.0 }
 0x70f   :  { %v10741_v5 = vadd.f32 1e-05, %v10737_v15  ;;  %v10738_v16 = vmax.f32 %v10734_v10, 0.0 }
 0x710   :  { %15036 = vrsqrt.f32 %v10739_v58  ;;  %v10740_v18 = vadd.f32 1e-05, %v10736_v62 }
 0x711   :  { %15038 = vrsqrt.f32 %v10741_v5  ;;  %v10742_v23 = vadd.f32 1e-05, %v10738_v16 }
 0x712   :  { %15040 = vrsqrt.f32 %v10740_v18 }
 0x713   :  { %15042 = vrsqrt.f32 %v10742_v23 }
 0x71a   :  { %v15037_v12 = vpop.eup %15036 }
 0x71b   :  { %v15039_v26 = vpop.eup %15038 }
 0x71c   :  { %v15041_v59 = vpop.eup %15040 }
 0x71d   :  { %v15043_v56 = vpop.eup %15042  ;;  %v10751_v34 = vcombine.low %v15037_v12, %v15041_v59 }
 0x71e   :  { %v10752_v45 = vcombine.low %v15039_v26, %v15043_v56 }
 0x71f   :  { %v10759_v7 = vrot.slane %v10751_v34, %v15935_v44 }
 0x720   :  { %v10766_v31 = vrot.slane %v10752_v45, %v15935_v44 }
 0x722   :  { %v10767_v13 = vcombine.low %v10759_v7, %v10766_v31 }
 0x724   :  { %v10769_v22 = vmul.f32 %v10767_v13, %v10582_v36  ;;  %v17939_v13 = vld [vmem:[#allocation35_spill] sm:$0xff] }
 0x726   :  { %v10774_v19 = vrot.slane %v10769_v22, %v15927_v32  ;;  %v10778_v11 = vrot.slane %v10769_v22, %v17923_v30  ;;  %v10782_v42 = vrot.slane %v10769_v22, %v17924_v20  ;;  %v10786_v1 = vrot.slane %v10769_v22, %v17933_v25  ;;  %v17940_v22 = vld [vmem:[#allocation36_spill] sm:$0xff] }
 0x728   :  { %v10791_v33 = vmul.f32 %v10774_v19, %v10719_v9  ;;  %v10792_v37 = vmul.f32 %v10778_v11, %v10720_v14  ;;  %v10793_v50 = vmul.f32 %v10782_v42, %v10721_v46  ;;  %v10794_v41 = vmul.f32 %v10786_v1, %v10722_v28 }
 0x729   :  { %v10822_v6 = vrot.slane %v10774_v19, %v15927_v32  ;;  %v10826_v15 = vrot.slane %v10778_v11, %v15927_v32  ;;  %v10834_v10 = vrot.slane %v10786_v1, %v15927_v32  ;;  %v10830_v5 = vrot.slane %v10782_v42, %v15927_v32  ;;  %v17942_v42 = vld [vmem:[#allocation49_spill] sm:$0xff] }
 0x72a   :  { %v10799_v58 = vcombine.low %v10791_v33, %v10792_v37  ;;  %v10800_v62 = vcombine.low %v10793_v50, %v10794_v41 }
 0x72b   :  { %v10866_v16 = vmul.f32 %v10834_v10, %v17447_v54  ;;  %v10836_v20 = vmul.f32 %v10826_v15, %v17302_v38  ;;  %v10840_v18 = vmul.f32 %v10826_v15, %v17326_v21  ;;  %v10835_v9 = vmul.f32 %v10822_v6, %v17298_v61 }
 0x72c   :  { %v10807_v46 = vrot.slane %v10799_v58, %v15935_v44  ;;  %v10814_v14 = vrot.slane %v10800_v62, %v15935_v44  ;;  %v10839_v28 = vmul.f32 %v10822_v6, %v17314_v63  ;;  %v10844_v23 = vmul.f32 %v10826_v15, %v17348_v39 }
 0x72d   :  { %v10848_v12 = vmul.f32 %v10826_v15, %v17365_v35  ;;  %v10843_v26 = vmul.f32 %v10822_v6, %v17338_v3  ;;  %v10847_v54 = vmul.f32 %v10822_v6, %v17358_v51  ;;  %v10852_v38 = vmul.f32 %v10826_v15, %v17388_v53 }
 0x72e   :  { %v10815_v59 = vcombine.low %v10807_v46, %v10814_v14  ;;  %v10856_v21 = vmul.f32 %v10826_v15, %v17405_v43  ;;  %v10851_v61 = vmul.f32 %v10822_v6, %v17378_v27  ;;  %v10855_v56 = vmul.f32 %v10822_v6, %v17398_v17 }
 0x72f   :  { %v10860_v34 = vmul.f32 %v10826_v15, %v17428_v24  ;;  %v10864_v63 = vmul.f32 %v10826_v15, %v17445_v48  ;;  %v10859_v39 = vmul.f32 %v10822_v6, %v17418_v4  ;;  %v17487_v35 = vmul.f32 %v10822_v6, %v17438_v60 }
 0x730   :  { %v10816_v3 = vrot.slane %v10815_v59, 7  ;;  %v17490_v51 = vmul.f32 %v10834_v10, %v17304_v0  ;;  %v17493_v53 = vmul.f32 %v10834_v10, %v17328_v47  ;;  %v17496_v27 = vmul.f32 %v10830_v5, %v17300_v8 }
 0x731   :  { %v17499_v17 = vmul.f32 %v10830_v5, %v17316_v2  ;;  %v17502_v43 = vmul.f32 %v10834_v10, %v17350_v29  ;;  %v17505_v4 = vmul.f32 %v10834_v10, %v17367_v49  ;;  %v17508_v24 = vmul.f32 %v10830_v5, %v17340_v55  ;;  %v17934_v2 = vld [vmem:[#allocation45_spill] sm:$0xff]  ;;  %v17935_v29 = vld [vmem:[#allocation46_spill] sm:$0xff]  ;;  %v17936_v49 = vld [vmem:[#allocation48_spill] sm:$0xff] }
 0x732   :  { %v10818_v0 = vsub.f32 %v10582_v36, %v10816_v3  ;;  %v17511_v60 = vmul.f32 %v10830_v5, %v17360_v57  ;;  %v17514_v47 = vmul.f32 %v10834_v10, %v17390_v52  ;;  %v17517_v8 = vmul.f32 %v10834_v10, %v17407_v40  ;;  %v17937_v55 = vld [vmem:[#allocation47_spill] sm:$0xff]  ;;  %v17938_v57 = vld [vmem:[#allocation34_spill] sm:$0xff]  ;;  %v17941_v40 = vld [vmem:[#allocation37_spill] sm:$0xff] }
 0x733   :  { %v17520_v48 = vmul.f32 %v10830_v5, %v17934_v2  ;;  %v17523_v45 = vmul.f32 %v10830_v5, %v17935_v29  ;;  %v17526_v7 = vmul.f32 %v10834_v10, %v17936_v49  ;;  %v17529_v31 = vmul.f32 %v10830_v5, %v17937_v55 }
 0x734   :  { %v10871_v36 = vrot.slane %v10818_v0, %v17938_v57  ;;  %v10875_v52 = vrot.slane %v10818_v0, %v17939_v13  ;;  %v10879_v19 = vrot.slane %v10818_v0, %v17940_v22  ;;  %v10883_v11 = vrot.slane %v10818_v0, %v17941_v40 }
 0x735   :  { %v17536_v25 = vmul.f32 %v10830_v5, %v17942_v42 }
 0x736   :  { %v10891_v1 = vrot.slane %v10871_v36, %v17938_v57  ;;  %v10895_v33 = vrot.slane %v10875_v52, %v17938_v57  ;;  %v17541_v37 = vrot.slane %v10883_v11, %v17938_v57  ;;  %v17544_v50 = vrot.slane %v10879_v19, %v17938_v57  ;;  %v14934_v52 = vld [vmem:[#allocation13 + $0x100] ss:$8 sps:$4 sm:$0xff]  }
 0x738   :  { %v17547_v41 = vadd.f32 %v17541_v37, %v10866_v16  ;;  %v10905_v6 = vadd.f32 %v10895_v33, %v10836_v20  ;;  %v10909_v15 = vadd.f32 %v10895_v33, %v10840_v18  ;;  %v10904_v10 = vadd.f32 %v10891_v1, %v10835_v9  ;;  %v14939_v9 = vld [vmem:[#allocation13 + $0x114] ss:$8 sps:$4 sm:$0xff]  }
 0x739   :  { %v10908_v58 = vadd.f32 %v10891_v1, %v10839_v28  ;;  %v10913_v62 = vadd.f32 %v10895_v33, %v10844_v23  ;;  %v10917_v5 = vadd.f32 %v10895_v33, %v10848_v12  ;;  %v10912_v46 = vadd.f32 %v10891_v1, %v10843_v26 }
 0x73a   :  { %v10937_v14 = vmax.f32 %v10905_v6, 0.0  ;;  %v10941_v59 = vmax.f32 %v10909_v15, 0.0  ;;  %v10936_v3 = vmax.f32 %v10904_v10, 0.0  ;;  %v10916_v0 = vadd.f32 %v10891_v1, %v10847_v54  ;;  %v14937_v10 = vld [vmem:[#allocation13 + $0x110] ss:$8 sps:$4 sm:$0xff]  }
 0x73b   :  { %v10940_v2 = vmax.f32 %v10908_v58, 0.0  ;;  %v10945_v29 = vmax.f32 %v10913_v62, 0.0  ;;  %v10949_v49 = vmax.f32 %v10917_v5, 0.0  ;;  %v10944_v55 = vmax.f32 %v10912_v46, 0.0 }
 0x73c   :  { %v10969_v36 = vpack.c.bf16 %v10941_v59, %v10937_v14  ;;  %v10948_v22 = vmax.f32 %v10916_v0, 0.0  ;;  %v10921_v16 = vadd.f32 %v10895_v33, %v10852_v38  ;;  %v10925_v19 = vadd.f32 %v10895_v33, %v10856_v21 }
 0x73d   :  { %v10968_v20 = vpack.c.bf16 %v10940_v2, %v10936_v3  ;;  %v10973_v18 = vpack.c.bf16 %v10949_v49, %v10945_v29  ;;  %v10920_v28 = vadd.f32 %v10891_v1, %v10851_v61  ;;  %v10924_v23 = vadd.f32 %v10891_v1, %v10855_v56  ;;  %v14942_v56 = vld [vmem:[#allocation13 + $0x124] ss:$8 sps:$4 sm:$0xff]   ;;  %v14940_v3 = vld [vmem:[#allocation13 + $0x120] ss:$8 sps:$4 sm:$0xff]  }
 0x73e   :  { %11400 = vmatprep.mubr.bf16.mxu1 %v10969_v36  ;;  %v10972_v12 = vpack.c.bf16 %v10948_v22, %v10944_v55  ;;  %v10953_v26 = vmax.f32 %v10921_v16, 0.0  ;;  %v10957_v40 = vmax.f32 %v10925_v19, 0.0  ;;  %v10929_v11 = vadd.f32 %v10895_v33, %v10860_v34 }
 0x73f   :  { %11401 = vmatmul.mubr.bf16.vlgmr.msra.gmra.mrb[128].mxu1 %v10968_v20  ;;  %v10952_v54 = vmax.f32 %v10920_v28, 0.0  ;;  %v10956_v42 = vmax.f32 %v10924_v23, 0.0  ;;  %v10933_v6 = vadd.f32 %v10895_v33, %v10864_v63  ;;  %v10928_v15 = vadd.f32 %v10891_v1, %v10859_v39  ;;  %v14948_v28 = vld [vmem:[#allocation13 + $0x144] ss:$8 sps:$4 sm:$0xff]  }
 0x740   :  { %11442 = vmatpush1.bf16.msra.mxu1 %v14934_v52  ;;  %11410 = vmatprep.mubr.bf16.mxu1 %v10973_v18  ;;  %v10977_v38 = vpack.c.bf16 %v10957_v40, %v10953_v26  ;;  %v10961_v21 = vmax.f32 %v10929_v11, 0.0  ;;  %v10932_v58 = vadd.f32 %v10891_v1, %v17487_v35  ;;  %v10907_v61 = vadd.f32 %v17541_v37, %v17490_v51 }
 0x741   :  { %11443 = vmatprep.subr.bf16.mxu1 %v14939_v9  ;;  %v10976_v62 = vpack.c.bf16 %v10956_v42, %v10952_v54  ;;  %v10965_v5 = vmax.f32 %v10933_v6, 0.0  ;;  %v10960_v34 = vmax.f32 %v10928_v15, 0.0  ;;  %v10911_v46 = vadd.f32 %v17541_v37, %v17493_v53  ;;  %v14951_v6 = vld [vmem:[#allocation13 + $0x154] ss:$8 sps:$4 sm:$0xff]  }
 0x742   :  { %v10964_v63 = vmax.f32 %v10932_v58, 0.0  ;;  %v10939_v39 = vmax.f32 %v10907_v61, 0.0  ;;  %v10906_v33 = vadd.f32 %v17544_v50, %v17496_v27  ;;  %v10910_v14 = vadd.f32 %v17544_v50, %v17499_v17  ;;  %v14945_v27 = vld [vmem:[#allocation13 + $0x134] ss:$8 sps:$4 sm:$0xff]   ;;  %v14958_v58 = vld [vmem:[#allocation13 + $0x180] ss:$8 sps:$4 sm:$0xff]  }
 0x743   :  { %v10981_v35 = vpack.c.bf16 %v10965_v5, %v10961_v21  ;;  %v10943_v1 = vmax.f32 %v10911_v46, 0.0  ;;  %v10915_v51 = vadd.f32 %v17541_v37, %v17502_v43  ;;  %v10919_v59 = vadd.f32 %v17541_v37, %v17505_v4  ;;  %v14957_v21 = vld [vmem:[#allocation13 + $0x174] ss:$8 sps:$4 sm:$0xff]   ;;  %v14964_v5 = vld [vmem:[#allocation13 + $0x1a0] ss:$8 sps:$4 sm:$0xff]  }
 0x744   :  { %11444 = vmatpush1.bf16.msra.mxu1 %v14937_v10  ;;  %v10980_v0 = vpack.c.bf16 %v10964_v63, %v10960_v34  ;;  %v10938_v53 = vmax.f32 %v10906_v33, 0.0  ;;  %v10942_v2 = vmax.f32 %v10910_v14, 0.0  ;;  %v10914_v29 = vadd.f32 %v17544_v50, %v17508_v24  ;;  %v14949_v10 = vld [vmem:[#allocation13 + $0x150] ss:$8 sps:$4 sm:$0xff]   ;;  %v14963_v61 = vld [vmem:[#allocation13 + $0x194] ss:$8 sps:$4 sm:$0xff]  }
 0x745   :  { %11445 = vmatprep.subr.bf16.mxu1 %v14942_v56  ;;  %v10971_v49 = vpack.c.bf16 %v10943_v1, %v10939_v39  ;;  %v10947_v17 = vmax.f32 %v10915_v51, 0.0  ;;  %v10951_v55 = vmax.f32 %v10919_v59, 0.0  ;;  %v10918_v36 = vadd.f32 %v17544_v50, %v17511_v60  ;;  %v14943_v60 = vld [vmem:[#allocation13 + $0x130] ss:$8 sps:$4 sm:$0xff]   ;;  %v14969_v34 = vld [vmem:[#allocation13 + $0x1b4] ss:$8 sps:$4 sm:$0xff]  }
 0x746   :  { %v17566_v43 = vpack.c.bf16 %v10942_v2, %v10938_v53  ;;  %v10946_v52 = vmax.f32 %v10914_v29, 0.0  ;;  %v10923_v4 = vadd.f32 %v17541_v37, %v17514_v47  ;;  %v10927_v22 = vadd.f32 %v17541_v37, %v17517_v8  ;;  %v14961_v56 = vld [vmem:[#allocation13 + $0x190] ss:$8 sps:$4 sm:$0xff]   ;;  %v14972_v63 = vld [vmem:[#allocation13 + $0x1c4] ss:$8 sps:$4 sm:$0xff]  }
 0x747   :  { %11411 = vmatmul.mubr.bf16.gmra.mrb[132].mxu1 %v10972_v12  ;;  %v17572_v16 = vpack.c.bf16 %v10951_v55, %v10947_v17  ;;  %v10950_v24 = vmax.f32 %v10918_v36, 0.0  ;;  %v10922_v19 = vadd.f32 %v17544_v50, %v17520_v48  ;;  %v10926_v20 = vadd.f32 %v17544_v50, %v17523_v45  ;;  %v14967_v46 = vld [vmem:[#allocation13 + $0x1b0] ss:$8 sps:$4 sm:$0xff]   ;;  %v14970_v39 = vld [vmem:[#allocation13 + $0x1c0] ss:$8 sps:$4 sm:$0xff]  }
 0x748   :  { %11446 = vmatpush1.bf16.msra.mxu1 %v14940_v3  ;;  %11420 = vmatprep.mubr.bf16.mxu1 %v10977_v38  ;;  %v10955_v18 = vmax.f32 %v10923_v4, 0.0  ;;  %v10959_v9 = vmax.f32 %v10927_v22, 0.0  ;;  %v10931_v47 = vadd.f32 %v17541_v37, %v17526_v7  ;;  %v10967_v8 = vmax.f32 %v17547_v41, 0.0  ;;  %v14946_v7 = vld [vmem:[#allocation13 + $0x140] ss:$8 sps:$4 sm:$0xff]   ;;  %v14984_v53 = vld [vmem:[#allocation16 + $0x48] sm:$0xff]  }
 0x749   :  { %11447 = vmatprep.subr.bf16.mxu1 %v14945_v27  ;;  %v17581_v23 = vpack.c.bf16 %v10950_v24, %v10946_v52  ;;  %v10954_v12 = vmax.f32 %v10922_v19, 0.0  ;;  %v10958_v26 = vmax.f32 %v10926_v20, 0.0  ;;  %v10930_v48 = vadd.f32 %v17544_v50, %v17529_v31  ;;  %v14954_v31 = vld [vmem:[#allocation13 + $0x164] ss:$8 sps:$4 sm:$0xff]   ;;  %v14952_v38 = vld [vmem:[#allocation13 + $0x160] ss:$8 sps:$4 sm:$0xff]  }
 0x74a   :  { %v10979_v45 = vpack.c.bf16 %v10959_v9, %v10955_v18  ;;  %v10963_v40 = vmax.f32 %v10931_v47, 0.0  ;;  %v10934_v11 = vadd.f32 %v17544_v50, %v17536_v25  ;;  %v14955_v25 = vld [vmem:[#allocation13 + $0x170] ss:$8 sps:$4 sm:$0xff]   ;;  %v14960_v50 = vld [vmem:[#allocation13 + $0x184] ss:$8 sps:$4 sm:$0xff]   ;;  %v14989_v17 = vld [vmem:[#allocation16 + $0x18] sm:$0xff]  }
 0x74b   :  { %v10978_v54 = vpack.c.bf16 %v10958_v26, %v10954_v12  ;;  %v10962_v42 = vmax.f32 %v10930_v48, 0.0  ;;  %v14975_v33 = vld [vmem:[#allocation13 + $0x1d4] ss:$8 sps:$4 sm:$0xff]   ;;  %v14973_v14 = vld [vmem:[#allocation13 + $0x1d0] ss:$8 sps:$4 sm:$0xff]   ;;  %v14982_v3 = vld [vmem:[#allocation16 + $0x40] sm:$0xff]  }
 0x74c   :  { %11448 = vmatpush1.bf16.msra.mxu1 %v14943_v60  ;;  %v10983_v37 = vpack.c.bf16 %v10967_v8, %v10963_v40  ;;  %v10966_v41 = vmax.f32 %v10934_v11, 0.0  ;;  %v14976_v1 = vld [vmem:[#allocation13 + $0x1e0] ss:$8 sps:$4 sm:$0xff]   ;;  %v14981_v51 = vld [vmem:[#allocation13 + $0x1f4] ss:$8 sps:$4 sm:$0xff]   ;;  %13423 = vmatprep.subr.bf16.mxu0 %v14982_v3  ;;  %v14985_v2 = vld [vmem:[#allocation16 + $0x8] sm:$0xff]  }
 0x74d   :  { %11449 = vmatprep.subr.bf16.mxu1 %v14948_v28  ;;  %v14979_v59 = vld [vmem:[#allocation13 + $0x1f0] ss:$8 sps:$4 sm:$0xff]   ;;  %v14990_v55 = vld [vmem:[#allocation16 + $0x60] sm:$0xff]   ;;  %v14997_v24 = vld [vmem:[#allocation16 + $0x38] sm:$0xff]  }
 0x74e   :  { %v10982_v15 = vpack.c.bf16 %v10966_v41, %v10962_v42  ;;  %v14986_v29 = vld [vmem:[#allocation16 + $0x50] sm:$0xff]   ;;  %v14991_v36 = vld [vmem:[#allocation16 + $0x20] sm:$0xff]   ;;  %v14993_v52 = vld [vmem:[#allocation16 + $0x28] sm:$0xff]  }
 0x74f   :  { %11421 = vmatmul.mubr.bf16.gmra.mrb[136].mxu1 %v10976_v62  ;;  %v14966_v62 = vld [vmem:[#allocation13 + $0x1a4] ss:$8 sps:$4 sm:$0xff]   ;;  %v14987_v27 = vld [vmem:[#allocation16 + $0x10] sm:$0xff]  }
 0x750   :  { %11450 = vmatpush1.bf16.msra.mxu1 %v14946_v7  ;;  %11430 = vmatprep.mubr.bf16.mxu1 %v10981_v35  ;;  %v14978_v35 = vld [vmem:[#allocation13 + $0x1e4] ss:$8 sps:$4 sm:$0xff]   ;;  %v14994_v4 = vld [vmem:[#allocation16 + $0x70] sm:$0xff]  }
 0x751   :  { %11451 = vmatprep.subr.bf16.mxu1 %v14951_v6  ;;  %v14995_v22 = vld [vmem:[#allocation16 + $0x30] sm:$0xff]  }
 0x754   :  { %11452 = vmatpush1.bf16.msra.mxu1 %v14949_v10 }
 0x755   :  { %11453 = vmatprep.subr.bf16.mxu1 %v14954_v31 }
 0x757   :  { %11431 = vmatmul.mubr.bf16.gmra.mrb[140].mxu1 %v10980_v0  ;;  %v14983_v0 = vld [vmem:[#allocation16] sm:$0xff]  }
 0x758   :  { %11454 = vmatpush1.bf16.msra.mxu1 %v14952_v38  ;;  %11473 = vmatprep.mubr.bf16.mxu1 %v10971_v49  ;;  %v14988_v49 = vld [vmem:[#allocation16 + $0x58] sm:$0xff]  }
 0x759   :  { %11455 = vmatprep.subr.bf16.mxu1 %v14957_v21  ;;  %13424 = vmatpush3.bf16.msra.mxu0 %v14983_v0 }
 0x75a   :  { %13425 = vmatprep.subr.bf16.mxu0 %v14984_v53 }
 0x75c   :  { %11456 = vmatpush1.bf16.msra.mxu1 %v14955_v25 }
 0x75d   :  { %11457 = vmatprep.subr.bf16.mxu1 %v14960_v50  ;;  %13426 = vmatpush3.bf16.msra.mxu0 %v14985_v2 }
 0x75e   :  { %13427 = vmatprep.subr.bf16.mxu0 %v14986_v29 }
 0x760   :  { %11458 = vmatpush1.bf16.msra.mxu1 %v14958_v58 }
 0x761   :  { %11459 = vmatprep.subr.bf16.mxu1 %v14963_v61  ;;  %13428 = vmatpush3.bf16.msra.mxu0 %v14987_v27 }
 0x762   :  { %13429 = vmatprep.subr.bf16.mxu0 %v14988_v49 }
 0x764   :  { %11460 = vmatpush1.bf16.msra.mxu1 %v14961_v56 }
 0x765   :  { %11461 = vmatprep.subr.bf16.mxu1 %v14966_v62  ;;  %13430 = vmatpush3.bf16.msra.mxu0 %v14989_v17 }
 0x766   :  { %13431 = vmatprep.subr.bf16.mxu0 %v14990_v55 }
 0x768   :  { %11462 = vmatpush1.bf16.msra.mxu1 %v14964_v5 }
 0x769   :  { %11463 = vmatprep.subr.bf16.mxu1 %v14969_v34  ;;  %13432 = vmatpush3.bf16.msra.mxu0 %v14991_v36 }
 0x76c   :  { %11464 = vmatpush1.bf16.msra.mxu1 %v14967_v46 }
 0x76d   :  { %11465 = vmatprep.subr.bf16.mxu1 %v14972_v63 }
 0x770   :  { %11466 = vmatpush1.bf16.msra.mxu1 %v14970_v39 }
 0x771   :  { %11467 = vmatprep.subr.bf16.mxu1 %v14975_v33 }
 0x774   :  { %11468 = vmatpush1.bf16.msra.mxu1 %v14973_v14 }
 0x775   :  { %11469 = vmatprep.subr.bf16.mxu1 %v14978_v35 }
 0x778   :  { %11470 = vmatpush1.bf16.msra.mxu1 %v14976_v1 }
 0x779   :  { %11471 = vmatprep.subr.bf16.mxu1 %v14981_v51 }
 0x77c   :  { %11472 = vmatpush1.bf16.msra.mxu1 %v14979_v59 }
 0x77f   :  { %11474 = vmatmul.mubr.bf16.vlgmr.msra.gmra.mrb[128].mxu1 %v17566_v43  ;;  %v14992_v43 = vld [vmem:[#allocation16 + $0x68] sm:$0xff]  }
 0x780   :  { %11483 = vmatprep.mubr.bf16.mxu1 %v17572_v16  ;;  %13433 = vmatprep.subr.bf16.mxu0 %v14992_v43  ;;  %v14996_v16 = vld [vmem:[#allocation16 + $0x78] sm:$0xff]  }
 0x781   :  { %13434 = vmatpush3.bf16.msra.mxu0 %v14993_v52 }
 0x782   :  { %13435 = vmatprep.subr.bf16.mxu0 %v14994_v4 }
 0x785   :  { %13436 = vmatpush3.bf16.msra.mxu0 %v14995_v22 }
 0x786   :  { %13437 = vmatprep.subr.bf16.mxu0 %v14996_v16 }
 0x787   :  { %11484 = vmatmul.mubr.bf16.gmra.mrb[132].mxu1 %v17581_v23 }
 0x788   :  { %11493 = vmatprep.mubr.bf16.mxu1 %v10979_v45 }
 0x789   :  { %13438 = vmatpush3.bf16.msra.mxu0 %v14997_v24 }
 0x78f   :  { %11494 = vmatmul.mubr.bf16.gmra.mrb[136].mxu1 %v10978_v54 }
 0x790   :  { %11503 = vmatprep.mubr.bf16.mxu1 %v10983_v37 }
 0x797   :  { %11504 = vmatmul.mubr.bf16.gmra.mrb[140].mxu1 %v10982_v15 }
 0x852   :  { %v17590_v19 = vpop.f32.mrb[128].mxu1 }
 0x853   :  { %v17592_v20 = vpop.f32.mrb[129].mxu1  ;;  %v11541_v18 = vmul.f32 %v17590_v19, %v17590_v19 }
 0x854   :  { %v17594_v60 = vpop.f32.mrb[130].mxu1  ;;  %v11542_v28 = vmul.f32 %v17592_v20, %v17592_v20 }
 0x855   :  { %v11515_v9 = vadd.f32 %v17594_v60, %v17590_v19  ;;  %v11543_v47 = vmul.f32 %v17594_v60, %v17594_v60  ;;  %v17602_v8 = vpop.f32.mrb[131].mxu1 }
 0x856   :  { %v11528_v23 = vadd.f32 %v17602_v8, %v17592_v20  ;;  %v11544_v12 = vmul.f32 %v17602_v8, %v17602_v8 }
 0x857   :  { %v11557_v26 = vadd.f32 %v11543_v47, %v11541_v18 }
 0x858   :  { %v11570_v48 = vadd.f32 %v11544_v12, %v11542_v28 }
 0x85a   :  { %v17610_v45 = vpop.f32.mrb[132].mxu1 }
 0x85b   :  { %v11516_v40 = vadd.f32 %v11515_v9, %v17610_v45  ;;  %v11545_v11 = vmul.f32 %v17610_v45, %v17610_v45  ;;  %v17615_v54 = vpop.f32.mrb[133].mxu1 }
 0x85c   :  { %v11529_v42 = vadd.f32 %v11528_v23, %v17615_v54  ;;  %v11546_v7 = vmul.f32 %v17615_v54, %v17615_v54  ;;  %v17620_v37 = vpop.f32.mrb[134].mxu1 }
 0x85d   :  { %v11558_v41 = vadd.f32 %v11557_v26, %v11545_v11  ;;  %v11517_v6 = vadd.f32 %v11516_v40, %v17620_v37  ;;  %v11547_v15 = vmul.f32 %v17620_v37, %v17620_v37  ;;  %v17625_v10 = vpop.f32.mrb[135].mxu1 }
 0x85e   :  { %v11571_v31 = vadd.f32 %v11570_v48, %v11546_v7  ;;  %v11530_v38 = vadd.f32 %v11529_v42, %v17625_v10  ;;  %v11548_v21 = vmul.f32 %v17625_v10, %v17625_v10 }
 0x85f   :  { %v11559_v25 = vadd.f32 %v11558_v41, %v11547_v15 }
 0x860   :  { %v11572_v50 = vadd.f32 %v11571_v31, %v11548_v21 }
 0x862   :  { %v17630_v58 = vpop.f32.mrb[136].mxu1 }
 0x863   :  { %v11518_v61 = vadd.f32 %v11517_v6, %v17630_v58  ;;  %v11549_v56 = vmul.f32 %v17630_v58, %v17630_v58  ;;  %v17635_v62 = vpop.f32.mrb[137].mxu1 }
 0x864   :  { %v11531_v5 = vadd.f32 %v11530_v38, %v17635_v62  ;;  %v11550_v34 = vmul.f32 %v17635_v62, %v17635_v62  ;;  %v17640_v46 = vpop.f32.mrb[138].mxu1 }
 0x865   :  { %v11560_v63 = vadd.f32 %v11559_v25, %v11549_v56  ;;  %v11519_v39 = vadd.f32 %v11518_v61, %v17640_v46  ;;  %v11551_v33 = vmul.f32 %v17640_v46, %v17640_v46  ;;  %v17645_v14 = vpop.f32.mrb[139].mxu1 }
 0x866   :  { %v11573_v35 = vadd.f32 %v11572_v50, %v11550_v34  ;;  %v11532_v1 = vadd.f32 %v11531_v5, %v17645_v14  ;;  %v11552_v51 = vmul.f32 %v17645_v14, %v17645_v14 }
 0x867   :  { %v11561_v59 = vadd.f32 %v11560_v63, %v11551_v33 }
 0x868   :  { %v11574_v3 = vadd.f32 %v11573_v35, %v11552_v51 }
 0x86a   :  { %v17650_v0 = vpop.f32.mrb[140].mxu1 }
 0x86b   :  { %v11520_v53 = vadd.f32 %v11519_v39, %v17650_v0  ;;  %v11553_v2 = vmul.f32 %v17650_v0, %v17650_v0  ;;  %v17655_v29 = vpop.f32.mrb[141].mxu1 }
 0x86c   :  { %v11533_v27 = vadd.f32 %v11532_v1, %v17655_v29  ;;  %v11554_v49 = vmul.f32 %v17655_v29, %v17655_v29  ;;  %v17660_v17 = vpop.f32.mrb[142].mxu1 }
 0x86d   :  { %v11562_v55 = vadd.f32 %v11561_v59, %v11553_v2  ;;  %v11521_v36 = vadd.f32 %v11520_v53, %v17660_v17  ;;  %v11555_v43 = vmul.f32 %v17660_v17, %v17660_v17  ;;  %v11511_v52 = vpop.f32.mrb[143].mxu1 }
 0x86e   :  { %v11575_v4 = vadd.f32 %v11574_v3, %v11554_v49  ;;  %v11534_v22 = vadd.f32 %v11533_v27, %v11511_v52  ;;  %v11556_v16 = vmul.f32 %v11511_v52, %v11511_v52 }
 0x86f   :  { %v11522_v24 = vrot.slane %v11521_v36, 4  ;;  %v11563_v18 = vadd.f32 %v11562_v55, %v11555_v43 }
 0x870   :  { %v11535_v9 = vrot.slane %v11534_v22, 4  ;;  %v11576_v47 = vadd.f32 %v11575_v4, %v11556_v16 }
 0x871   :  { %v11523_v28 = vadd.f32 %v11522_v24, %v11521_v36  ;;  %v11564_v23 = vrot.slane %v11563_v18, 4 }
 0x872   :  { %v11536_v12 = vadd.f32 %v11535_v9, %v11534_v22  ;;  %v11577_v26 = vrot.slane %v11576_v47, 4  ;;  %v11514_v22 = vld [vmem:[#allocation15] sm:$0xf] }
 0x873   :  { %v11524_v48 = vrot.slane %v11523_v28, 2  ;;  %v11565_v40 = vadd.f32 %v11564_v23, %v11563_v18 }
 0x874   :  { %v11537_v11 = vrot.slane %v11536_v12, 2  ;;  %v11578_v42 = vadd.f32 %v11577_v26, %v11576_v47 }
 0x875   :  { %v11525_v7 = vadd.f32 %v11524_v48, %v11523_v28  ;;  %v11566_v41 = vrot.slane %v11565_v40, 2 }
 0x876   :  { %v11538_v6 = vadd.f32 %v11537_v11, %v11536_v12  ;;  %v11579_v15 = vrot.slane %v11578_v42, 2 }
 0x877   :  { %v11526_v31 = vrot.slane %v11525_v7, 1  ;;  %v11567_v38 = vadd.f32 %v11566_v41, %v11565_v40 }
 0x878   :  { %v11539_v21 = vrot.slane %v11538_v6, 1  ;;  %v11580_v25 = vadd.f32 %v11579_v15, %v11578_v42 }
 0x879   :  { %v11527_v50 = vadd.f32 %v11526_v31, %v11525_v7  ;;  %v11568_v61 = vrot.slane %v11567_v38, 1 }
 0x87a   :  { %v11540_v56 = vadd.f32 %v11539_v21, %v11538_v6  ;;  %v11581_v5 = vrot.slane %v11580_v25, 1 }
 0x87b   :  { %v11569_v34 = vadd.f32 %v11568_v61, %v11567_v38  ;;  %v11583_v63 = vmul.f32 0.015625, %v11527_v50 }
 0x87c   :  { %v11582_v39 = vadd.f32 %v11581_v5, %v11580_v25  ;;  %v11584_v33 = vmul.f32 0.015625, %v11540_v56 }
 0x87d   :  { %v11585_v35 = vmul.f32 0.015625, %v11569_v34  ;;  %v11587_v1 = vmul.f32 %v11583_v63, %v11583_v63 }
 0x87e   :  { %v11586_v51 = vmul.f32 0.015625, %v11582_v39  ;;  %v11588_v59 = vmul.f32 %v11584_v33, %v11584_v33 }
 0x87f   :  { %v11589_v3 = vsub.f32 %v11585_v35, %v11587_v1 }
 0x880   :  { %v11590_v53 = vsub.f32 %v11586_v51, %v11588_v59 }
 0x881   :  { %v11591_v2 = vmax.f32 %v11589_v3, 0.0 }
 0x882   :  { %v11592_v27 = vmax.f32 %v11590_v53, 0.0 }
 0x883   :  { %v11593_v49 = vadd.f32 1e-05, %v11591_v2 }
 0x884   :  { %v11594_v55 = vadd.f32 1e-05, %v11592_v27 }
 0x885   :  { %15044 = vrsqrt.f32 %v11593_v49 }
 0x886   :  { %15046 = vrsqrt.f32 %v11594_v55 }
 0x88f   :  { %v15045_v36 = vpop.eup %15044 }
 0x890   :  { %v15047_v43 = vpop.eup %15046 }
 0x891   :  { %v11599_v4 = vcombine.low %v15045_v36, %v15047_v43 }
 0x893   :  { %v11606_v16 = vrot.slane %v11599_v4, %v15935_v44 }
 0x895   :  { %v11608_v24 = vmul.f32 %v11606_v16, %v11514_v22 }
 0x897   :  { %v11613_v18 = vrot.slane %v11608_v24, %v15927_v32  ;;  %v11617_v9 = vrot.slane %v11608_v24, %v17923_v30 }
 0x899   :  { %v11620_v47 = vmul.f32 %v11613_v18, %v11583_v63  ;;  %v11621_v28 = vmul.f32 %v11617_v9, %v11584_v33  ;;  %v11638_v23 = vrot.slane %v11613_v18, %v15927_v32  ;;  %v11642_v12 = vrot.slane %v11617_v9, %v15927_v32 }
 0x89b   :  { %v11624_v26 = vcombine.low %v11620_v47, %v11621_v28  ;;  %v11658_v48 = vmul.f32 %v11642_v12, %v11511_v52  ;;  %v11644_v40 = vmul.f32 %v11642_v12, %v17592_v20  ;;  %v11646_v11 = vmul.f32 %v11642_v12, %v17602_v8 }
 0x89c   :  { %v11643_v42 = vmul.f32 %v11638_v23, %v17590_v19  ;;  %v11645_v7 = vmul.f32 %v11638_v23, %v17594_v60  ;;  %v11648_v41 = vmul.f32 %v11642_v12, %v17615_v54  ;;  %v11650_v30 = vmul.f32 %v11642_v12, %v17625_v10 }
 0x89d   :  { %v11631_v6 = vrot.slane %v11624_v26, %v15935_v44  ;;  %v11647_v15 = vmul.f32 %v11638_v23, %v17610_v45  ;;  %v11649_v31 = vmul.f32 %v11638_v23, %v17620_v37  ;;  %v11652_v52 = vmul.f32 %v11642_v12, %v17635_v62 }
 0x89e   :  { %v11654_v20 = vmul.f32 %v11642_v12, %v17645_v14  ;;  %v11651_v8 = vmul.f32 %v11638_v23, %v17630_v58  ;;  %v11653_v19 = vmul.f32 %v11638_v23, %v17640_v46  ;;  %v11656_v60 = vmul.f32 %v11642_v12, %v17655_v29 }
 0x89f   :  { %v11632_v38 = vrot.slane %v11631_v6, 7  ;;  %v11655_v54 = vmul.f32 %v11638_v23, %v17650_v0  ;;  %v11657_v10 = vmul.f32 %v11638_v23, %v17660_v17  ;;  %v15004_v6 = vld [vmem:[#allocation19 + $0x30] sm:$0xff]  }
 0x8a1   :  { %v11634_v44 = vsub.f32 %v11514_v22, %v11632_v38 }
 0x8a3   :  { %v11663_v45 = vrot.slane %v11634_v44, %v17938_v57  ;;  %v11667_v37 = vrot.slane %v11634_v44, %v17939_v13 }
 0x8a5   :  { %v11673_v62 = vrot.slane %v11663_v45, %v17938_v57  ;;  %v11677_v14 = vrot.slane %v11667_v37, %v17938_v57 }
 0x8a7   :  { %v11693_v21 = vadd.f32 %v11677_v14, %v11658_v48  ;;  %v11679_v58 = vadd.f32 %v11677_v14, %v11644_v40  ;;  %v11681_v25 = vadd.f32 %v11677_v14, %v11646_v11  ;;  %v11678_v46 = vadd.f32 %v11673_v62, %v11643_v42  ;;  %v14998_v40 = vld [vmem:[#allocation19] sm:$0xff]   ;;  %v14999_v11 = vld [vmem:[#allocation19 + $0x8] sm:$0xff]   ;;  %v15000_v42 = vld [vmem:[#allocation19 + $0x10] sm:$0xff]  }
 0x8a8   :  { %v11680_v50 = vadd.f32 %v11673_v62, %v11645_v7  ;;  %v11683_v29 = vadd.f32 %v11677_v14, %v11648_v41  ;;  %v11685_v61 = vadd.f32 %v11677_v14, %v11650_v30  ;;  %v11682_v56 = vadd.f32 %v11673_v62, %v11647_v15  ;;  %13475 = vmatprep.subr.bf16.mxu1 %v14998_v40  ;;  %v15001_v7 = vld [vmem:[#allocation19 + $0x18] sm:$0xff]   ;;  %v15002_v41 = vld [vmem:[#allocation19 + $0x20] sm:$0xff]   ;;  %v15003_v30 = vld [vmem:[#allocation19 + $0x28] sm:$0xff]  }
 0x8a9   :  { %v11695_v0 = vmax.f32 %v11679_v58, 0.0  ;;  %v11697_v5 = vmax.f32 %v11681_v25, 0.0  ;;  %v11694_v17 = vmax.f32 %v11678_v46, 0.0  ;;  %v11684_v34 = vadd.f32 %v11673_v62, %v11649_v31  ;;  %13476 = vmatpush3.bf16.msra.mxu1 %v14998_v40  ;;  %v15005_v15 = vld [vmem:[#allocation19 + $0x38] sm:$0xff]  }
 0x8aa   :  { %v11696_v63 = vmax.f32 %v11680_v50, 0.0  ;;  %v11699_v39 = vmax.f32 %v11683_v29, 0.0  ;;  %v11701_v33 = vmax.f32 %v11685_v61, 0.0  ;;  %v11698_v13 = vmax.f32 %v11682_v56, 0.0  ;;  %13477 = vmatprep.subr.bf16.mxu1 %v14999_v11 }
 0x8ab   :  { %v11711_v35 = vpack.c.bf16 %v11697_v5, %v11695_v0  ;;  %v11700_v1 = vmax.f32 %v11684_v34, 0.0  ;;  %v11687_v51 = vadd.f32 %v11677_v14, %v11652_v52  ;;  %v11689_v59 = vadd.f32 %v11677_v14, %v11654_v20 }
 0x8ac   :  { %v11710_v3 = vpack.c.bf16 %v11696_v63, %v11694_v17  ;;  %v11713_v53 = vpack.c.bf16 %v11701_v33, %v11699_v39  ;;  %v11686_v2 = vadd.f32 %v11673_v62, %v11651_v8  ;;  %v11688_v27 = vadd.f32 %v11673_v62, %v11653_v19 }
 0x8ad   :  { %11878 = vmatprep.mubr.bf16.mxu0 %v11711_v35  ;;  %v11712_v49 = vpack.c.bf16 %v11700_v1, %v11698_v13  ;;  %v11703_v55 = vmax.f32 %v11687_v51, 0.0  ;;  %v11705_v36 = vmax.f32 %v11689_v59, 0.0  ;;  %v11691_v43 = vadd.f32 %v11677_v14, %v11656_v60  ;;  %13478 = vmatpush3.bf16.msra.mxu1 %v14999_v11 }
 0x8ae   :  { %11879 = vmatmul.mubr.bf16.vlgmr.msra.gmra.mrb[80].mxu0 %v11710_v3  ;;  %v11702_v4 = vmax.f32 %v11686_v2, 0.0  ;;  %v11704_v22 = vmax.f32 %v11688_v27, 0.0  ;;  %v11709_v16 = vmax.f32 %v11693_v21, 0.0  ;;  %v11690_v24 = vadd.f32 %v11673_v62, %v11655_v54  ;;  %13479 = vmatprep.subr.bf16.mxu1 %v15000_v42 }
 0x8af   :  { %11886 = vmatprep.mubr.bf16.mxu0 %v11713_v53  ;;  %v11715_v18 = vpack.c.bf16 %v11705_v36, %v11703_v55  ;;  %v11707_v9 = vmax.f32 %v11691_v43, 0.0  ;;  %v11692_v47 = vadd.f32 %v11673_v62, %v11657_v10 }
 0x8b0   :  { %v11714_v28 = vpack.c.bf16 %v11704_v22, %v11702_v4  ;;  %v11706_v23 = vmax.f32 %v11690_v24, 0.0 }
 0x8b1   :  { %v11717_v12 = vpack.c.bf16 %v11709_v16, %v11707_v9  ;;  %v11708_v26 = vmax.f32 %v11692_v47, 0.0  ;;  %13480 = vmatpush3.bf16.msra.mxu1 %v15000_v42 }
 0x8b2   :  { %13481 = vmatprep.subr.bf16.mxu1 %v15001_v7 }
 0x8b3   :  { %v11716_v48 = vpack.c.bf16 %v11708_v26, %v11706_v23 }
 0x8b5   :  { %13482 = vmatpush3.bf16.msra.mxu1 %v15001_v7 }
 0x8b6   :  { %11887 = vmatmul.mubr.bf16.gmra.mrb[84].mxu0 %v11712_v49  ;;  %13483 = vmatprep.subr.bf16.mxu1 %v15002_v41 }
 0x8b7   :  { %11894 = vmatprep.mubr.bf16.mxu0 %v11715_v18 }
 0x8b9   :  { %13484 = vmatpush3.bf16.msra.mxu1 %v15002_v41 }
 0x8ba   :  { %13485 = vmatprep.subr.bf16.mxu1 %v15003_v30 }
 0x8bd   :  { %13486 = vmatpush3.bf16.msra.mxu1 %v15003_v30 }
 0x8be   :  { %11895 = vmatmul.mubr.bf16.gmra.mrb[88].mxu0 %v11714_v28  ;;  %13487 = vmatprep.subr.bf16.mxu1 %v15004_v6 }
 0x8bf   :  { %11902 = vmatprep.mubr.bf16.mxu0 %v11717_v12 }
 0x8c1   :  { %13488 = vmatpush3.bf16.msra.mxu1 %v15004_v6 }
 0x8c2   :  { %13489 = vmatprep.subr.bf16.mxu1 %v15005_v15 }
 0x8c5   :  { %13490 = vmatpush3.bf16.msra.mxu1 %v15005_v15 }
 0x8c6   :  { %11903 = vmatmul.mubr.bf16.gmra.mrb[92].mxu0 %v11716_v48 }
 0x981   :  { %v13439_v31 = vpop.f32.mrb[80].mxu0 }
 0x982   :  { %v13440_v52 = vpop.f32.mrb[81].mxu0 }
 0x983   :  { %v17690_v20 = vadd.f32 %v13440_v52, %v13439_v31  ;;  %v13442_v8 = vpop.f32.mrb[82].mxu0 }
 0x984   :  { %v13443_v19 = vpop.f32.mrb[83].mxu0 }
 0x985   :  { %v17692_v60 = vadd.f32 %v13443_v19, %v13442_v8  ;;  %v11925_v38 = vmul.f32 %v17690_v20, %v17690_v20  ;;  %v11911_v8 = vld [vmem:[#allocation18] sm:$0x3] }
 0x987   :  { %v11912_v54 = vadd.f32 %v17692_v60, %v17690_v20  ;;  %v11926_v10 = vmul.f32 %v17692_v60, %v17692_v60 }
 0x989   :  { %v11933_v44 = vadd.f32 %v11926_v10, %v11925_v38  ;;  %v13445_v45 = vpop.f32.mrb[84].mxu0 }
 0x98a   :  { %v13446_v37 = vpop.f32.mrb[85].mxu0 }
 0x98b   :  { %v13447_v62 = vadd.f32 %v13446_v37, %v13445_v45  ;;  %v13448_v14 = vpop.f32.mrb[86].mxu0 }
 0x98c   :  { %v13449_v21 = vpop.f32.mrb[87].mxu0 }
 0x98d   :  { %v11913_v58 = vadd.f32 %v13447_v62, %v11912_v54  ;;  %v11927_v25 = vmul.f32 %v13447_v62, %v13447_v62  ;;  %v13450_v46 = vadd.f32 %v13449_v21, %v13448_v14 }
 0x98f   :  { %v11934_v50 = vadd.f32 %v11933_v44, %v11927_v25  ;;  %v11914_v29 = vadd.f32 %v13450_v46, %v11913_v58  ;;  %v11928_v61 = vmul.f32 %v13450_v46, %v13450_v46 }
 0x991   :  { %v11935_v56 = vadd.f32 %v11934_v50, %v11928_v61  ;;  %v13451_v0 = vpop.f32.mrb[88].mxu0 }
 0x992   :  { %v13452_v5 = vpop.f32.mrb[89].mxu0 }
 0x993   :  { %v13453_v17 = vadd.f32 %v13452_v5, %v13451_v0  ;;  %v13454_v34 = vpop.f32.mrb[90].mxu0 }
 0x994   :  { %v13455_v63 = vpop.f32.mrb[91].mxu0 }
 0x995   :  { %v11915_v39 = vadd.f32 %v13453_v17, %v11914_v29  ;;  %v11929_v33 = vmul.f32 %v13453_v17, %v13453_v17  ;;  %v13456_v13 = vadd.f32 %v13455_v63, %v13454_v34 }
 0x997   :  { %v11936_v35 = vadd.f32 %v11935_v56, %v11929_v33  ;;  %v11916_v1 = vadd.f32 %v13456_v13, %v11915_v39  ;;  %v11930_v51 = vmul.f32 %v13456_v13, %v13456_v13 }
 0x999   :  { %v11937_v59 = vadd.f32 %v11936_v35, %v11930_v51  ;;  %v13457_v3 = vpop.f32.mrb[92].mxu0 }
 0x99a   :  { %v13458_v53 = vpop.f32.mrb[93].mxu0 }
 0x99b   :  { %v13459_v2 = vadd.f32 %v13458_v53, %v13457_v3  ;;  %v13460_v27 = vpop.f32.mrb[94].mxu0 }
 0x99c   :  { %v13461_v49 = vpop.f32.mrb[95].mxu0 }
 0x99d   :  { %v11917_v55 = vadd.f32 %v13459_v2, %v11916_v1  ;;  %v11931_v36 = vmul.f32 %v13459_v2, %v13459_v2  ;;  %v13462_v43 = vadd.f32 %v13461_v49, %v13460_v27 }
 0x99f   :  { %v11938_v4 = vadd.f32 %v11937_v59, %v11931_v36  ;;  %v11918_v22 = vadd.f32 %v13462_v43, %v11917_v55  ;;  %v11932_v16 = vmul.f32 %v13462_v43, %v13462_v43 }
 0x9a1   :  { %v11919_v24 = vrot.slane %v11918_v22, 4  ;;  %v11939_v18 = vadd.f32 %v11938_v4, %v11932_v16 }
 0x9a3   :  { %v11920_v9 = vadd.f32 %v11919_v24, %v11918_v22  ;;  %v11940_v47 = vrot.slane %v11939_v18, 4 }
 0x9a5   :  { %v11921_v28 = vrot.slane %v11920_v9, 2  ;;  %v11941_v23 = vadd.f32 %v11940_v47, %v11939_v18 }
 0x9a7   :  { %v11922_v12 = vadd.f32 %v11921_v28, %v11920_v9  ;;  %v11942_v26 = vrot.slane %v11941_v23, 2 }
 0x9a9   :  { %v11923_v48 = vrot.slane %v11922_v12, 1  ;;  %v11943_v40 = vadd.f32 %v11942_v26, %v11941_v23 }
 0x9ab   :  { %v11924_v11 = vadd.f32 %v11923_v48, %v11922_v12  ;;  %v11944_v42 = vrot.slane %v11943_v40, 1 }
 0x9ad   :  { %v11945_v7 = vadd.f32 %v11944_v42, %v11943_v40  ;;  %v11946_v41 = vmul.f32 0.015625, %v11924_v11 }
 0x9af   :  { %v11947_v30 = vmul.f32 0.015625, %v11945_v7  ;;  %v11948_v6 = vmul.f32 %v11946_v41, %v11946_v41 }
 0x9b1   :  { %v11949_v15 = vsub.f32 %v11947_v30, %v11948_v6 }
 0x9b3   :  { %v11950_v31 = vmax.f32 %v11949_v15, 0.0 }
 0x9b5   :  { %v11951_v52 = vadd.f32 1e-05, %v11950_v31 }
 0x9b7   :  { %15048 = vrsqrt.f32 %v11951_v52 }
 0x9c1   :  { %v15049_v19 = vpop.eup %15048 }
 0x9c2   :  { %v11953_v38 = vmul.f32 %v15049_v19, %v11911_v8 }
 0x9c4   :  { %v11954_v54 = vmul.f32 %v11953_v38, %v11946_v41  ;;  %v11962_v10 = vrot.slane %v11953_v38, %v15927_v32 }
 0x9c6   :  { %v11956_v44 = vrot.slane %v11954_v54, 7  ;;  %v11970_v45 = vmul.f32 %v13462_v43, %v11962_v10  ;;  %v11963_v37 = vmul.f32 %v17690_v20, %v11962_v10  ;;  %v11964_v14 = vmul.f32 %v17692_v60, %v11962_v10 }
 0x9c7   :  { %v11965_v21 = vmul.f32 %v13447_v62, %v11962_v10  ;;  %v11966_v58 = vmul.f32 %v13450_v46, %v11962_v10  ;;  %v11967_v25 = vmul.f32 %v13453_v17, %v11962_v10  ;;  %v11968_v50 = vmul.f32 %v13456_v13, %v11962_v10 }
 0x9c8   :  { %v11958_v29 = vsub.f32 %v11911_v8, %v11956_v44  ;;  %v11969_v61 = vmul.f32 %v13459_v2, %v11962_v10  ;;  %v13254_v2 = vld [vmem:[#allocation21] ss:$0 sm:$0xff] }
 0x9ca   :  { %v11974_v56 = vrot.slane %v11958_v29, %v17938_v57 }
 0x9cc   :  { %v11975_v0 = vadd.f32 %v11974_v56, %v11963_v37  ;;  %v11976_v5 = vadd.f32 %v11974_v56, %v11964_v14  ;;  %v11977_v34 = vadd.f32 %v11974_v56, %v11965_v21  ;;  %v11978_v63 = vadd.f32 %v11974_v56, %v11966_v58 }
 0x9cd   :  { %v11979_v39 = vadd.f32 %v11974_v56, %v11967_v25  ;;  %v11980_v32 = vadd.f32 %v11974_v56, %v11968_v50  ;;  %v11981_v33 = vadd.f32 %v11974_v56, %v11969_v61  ;;  %v11982_v35 = vadd.f32 %v11974_v56, %v11970_v45 }
 0x9ce   :  { %v11983_v1 = vmax.f32 %v11975_v0, 0.0  ;;  %v11984_v20 = vmax.f32 %v11976_v5, 0.0  ;;  %v11985_v51 = vmax.f32 %v11977_v34, 0.0  ;;  %v11986_v60 = vmax.f32 %v11978_v63, 0.0 }
 0x9cf   :  { %v11987_v62 = vmax.f32 %v11979_v39, 0.0  ;;  %v11988_v46 = vmax.f32 %v11980_v32, 0.0  ;;  %v11989_v17 = vmax.f32 %v11981_v33, 0.0  ;;  %v11990_v13 = vmax.f32 %v11982_v35, 0.0 }
 0x9d0   :  { %v11991_v59 = vpack.c.bf16 %v11984_v20, %v11983_v1  ;;  %v11992_v3 = vpack.c.bf16 %v11986_v60, %v11985_v51 }
 0x9d1   :  { %v11993_v53 = vpack.c.bf16 %v11988_v46, %v11987_v62  ;;  %v11994_v57 = vpack.c.bf16 %v11990_v13, %v11989_v17 }
 0x9d2   :  { %13491 = vmatprep.mubr.bf16.mxu1 %v11991_v59 }
 0x9d3   :  { %13492 = vmatmul.mubr.bf16.vlgmr.msra.gmra.mrb[144].mxu1 %v11992_v3 }
 0x9d4   :  { %13495 = vmatprep.mubr.bf16.mxu1 %v11993_v53 }
 0x9db   :  { %13496 = vmatmul.mubr.bf16.gmra.mrb[148].mxu1 %v11994_v57 }
 0xaa6   :  { %v13493_v27 = vpop.f32.mrb[144].mxu1 }
 0xaa7   :  { %v12109_v49 = vadd.f32 %v13493_v27, %v13254_v2  ;;  %v12100_v55 = vpop.f32.mrb[145].mxu1 }
 0xaa8   :  { %v12101_v36 = vadd.f32 %v13254_v2, %v12100_v55  ;;  %v13494_v43 = vpop.f32.mrb[146].mxu1 }
 0xaa9   :  { %12133 = vst [vmem:[%s17741_s13 + $0x10] sm:$0xff] %v12109_v49  ;;  %v12112_v4 = vadd.f32 %v13494_v43, %v13254_v2  ;;  %v12103_v22 = vpop.f32.mrb[147].mxu1 }
 0xaaa   :  { %12131 = vst [vmem:[%s17741_s13] sm:$0xff] %v12101_v36  ;;  %v12104_v16 = vadd.f32 %v13254_v2, %v12103_v22 }
 0xaab   :  { %12134 = vst [vmem:[%s17741_s13 + $0x18] sm:$0xff] %v12112_v4 }
 0xaac   :  { %12132 = vst [vmem:[%s17741_s13 + $0x8] sm:$0xff] %v12104_v16 }
 0xaae   :  { %v13497_v24 = vpop.f32.mrb[148].mxu1 }
 0xaaf   :  { %v12125_v18 = vadd.f32 %v13497_v24, %v13254_v2  ;;  %v12116_v9 = vpop.f32.mrb[149].mxu1 }
 0xab0   :  { %v12117_v47 = vadd.f32 %v13254_v2, %v12116_v9  ;;  %v13498_v28 = vpop.f32.mrb[150].mxu1 }
 0xab1   :  { %12137 = vst [vmem:[%s17741_s13 + $0x30] sm:$0xff] %v12125_v18  ;;  %v12128_v23 = vadd.f32 %v13498_v28, %v13254_v2  ;;  %v12119_v12 = vpop.f32.mrb[151].mxu1 }
 0xab2   :  { %12135 = vst [vmem:[%s17741_s13 + $0x20] sm:$0xff] %v12117_v47  ;;  %v12120_v26 = vadd.f32 %v13254_v2, %v12119_v12 }
 0xab3   :  { %12138 = vst [vmem:[%s17741_s13 + $0x38] sm:$0xff] %v12128_v23 }
 0xab4   :  { %12136 = vst [vmem:[%s17741_s13 + $0x28] sm:$0xff] %v12120_v26 }
 0xab5   :  { %12143 = vsyncpa [#allocation3], 1 }
 0xab6   :  { %12144 = vsyncpa [#allocation5], 1 }
 0xab7   :  { %12145 = vsyncpa [#allocation8], 1 }
 0xab8   :  { %12146 = vsyncpa [#allocation11], 1 }
 0xab9   :  { %12147 = vsyncpa [#allocation14], 1 }
 0xaba   :  { %12148 = vsyncpa [#allocation17], 1 }
 0xabb   :  { %12149 = vsyncpa [#allocation20], 1 }

</bundles_post_ra>
